<compile_context>
chip_gen: v5e
topology: v5e:2x2
jax: 0.10.0
libtpu: 0.0.40
codegen_flags: <defaults>
</compile_context>

<pallas_src>
import jax
import jax.numpy as jnp
from jax.experimental import pallas as pl
from jax.experimental.pallas import tpu as pltpu


# -----------------------------------------------------------------------------
# Fused kernel: one grid step == one image, everything resident in VMEM.
# -----------------------------------------------------------------------------
def _shallow_cell_kernel(alpha_ref,                      # (1,) SMEM, PReLU slope
                         x_ref,                          # (1, H, W, Cin)
                         w1_ref, w2_ref, w3_ref,         # (9Cin,C),(9C,C),(9C,C)
                         wdu1_ref, wdu2_ref,             # (C, C//r), (C//r, C)
                         o_ref,                          # (1, H, W, C)
                         xp, pbuf, cols):                # VMEM scratch
    _, H, W, Cin = x_ref.shape
    C = o_ref.shape[-1]
    HW = H * W

    def conv3x3(pad_ref, w_ref, cin):
        # Build im2col in VMEM scratch: column block t = dy*3+dx holds tap (dy,dx).
        for dy in range(3):
            for dx in range(3):
                t = dy * 3 + dx
                cols[:, t * cin:(t + 1) * cin] = (
                    pad_ref[dy:dy + H, dx:dx + W, :cin].reshape(HW, cin))
        # Single large-K matmul on the MXU, f32 accumulation.
        return jnp.dot(cols[:, :9 * cin], w_ref[...],
                       preferred_element_type=jnp.float32)

    # ---- shallow conv: conv(3 -> C); zero-padding fused into the kernel -----
    xp[...] = jnp.zeros_like(xp)
    xp[1:H + 1, 1:W + 1, :] = x_ref[0].astype(jnp.float32)
    feat0 = conv3x3(xp, w1_ref, Cin)                     # (HW, C)

    # ---- CAB body: conv -> PReLU -> conv (shared padded buffer) -------------
    pbuf[...] = jnp.zeros_like(pbuf)                     # zero border once/image
    pbuf[1:H + 1, 1:W + 1, :] = feat0.reshape(H, W, C)
    r = conv3x3(pbuf, w2_ref, C)                         # (HW, C)
    a = alpha_ref[0]
    r = jnp.maximum(r, 0.0) + a * jnp.minimum(r, 0.0)    # PReLU

    # Interior is fully overwritten; zero border from above is still valid.
    pbuf[1:H + 1, 1:W + 1, :] = r.reshape(H, W, C)
    r = conv3x3(pbuf, w3_ref, C)                         # (HW, C)

    # ---- CALayer: GAP -> 1x1 -> ReLU -> 1x1 -> sigmoid, gate + residual -----
    y = jnp.sum(r, axis=0, keepdims=True) * (1.0 / HW)   # (1, C)
    z = jnp.maximum(jnp.dot(y, wdu1_ref[...],
                            preferred_element_type=jnp.float32), 0.0)
    z = jax.nn.sigmoid(jnp.dot(z, wdu2_ref[...],
                               preferred_element_type=jnp.float32))
    out2d = r * z + feat0                                # (HW, C)
    o_ref[0] = out2d.reshape(H, W, C).astype(o_ref.dtype)


# -----------------------------------------------------------------------------
# Wrapper: single pallas_call for the whole module (NCHW in, NCHW out).
# -----------------------------------------------------------------------------
def shallow_cell_forward(x_nchw, params):
    N, Cin, H, W = x_nchw.shape
    C = params["w_shallow"].shape[-1]
    Cr = params["w_du1"].shape[-1]
    HW = H * W

    x = jnp.transpose(x_nchw, (0, 2, 3, 1))              # tiny NCHW -> NHWC
    w1 = params["w_shallow"].reshape(9 * Cin, C)
    w2 = params["w_body1"].reshape(9 * C, C)
    w3 = params["w_body2"].reshape(9 * C, C)
    alpha = jnp.asarray(params["prelu_alpha"], jnp.float32).reshape(1)

    grid_spec = pltpu.PrefetchScalarGridSpec(
        num_scalar_prefetch=1,                           # alpha -> SMEM
        grid=(N,),
        in_specs=[
            pl.BlockSpec((1, H, W, Cin), lambda b, a: (b, 0, 0, 0)),
            pl.BlockSpec((9 * Cin, C), lambda b, a: (0, 0)),
            pl.BlockSpec((9 * C, C), lambda b, a: (0, 0)),
            pl.BlockSpec((9 * C, C), lambda b, a: (0, 0)),
            pl.BlockSpec((C, Cr), lambda b, a: (0, 0)),
            pl.BlockSpec((Cr, C), lambda b, a: (0, 0)),
        ],
        out_specs=pl.BlockSpec((1, H, W, C), lambda b, a: (b, 0, 0, 0)),
        scratch_shapes=[
            pltpu.VMEM((H + 2, W + 2, Cin), jnp.float32),   # padded input
            pltpu.VMEM((H + 2, W + 2, C), jnp.float32),     # shared padded body buf
            pltpu.VMEM((HW, 9 * C), jnp.float32),           # im2col buffer
        ],
    )

    flops = N * (2 * HW * 9 * Cin * C          # shallow conv
                 + 2 * 2 * HW * 9 * C * C      # two body convs
                 + 2 * (C * Cr + Cr * C)       # conv_du 1x1s
                 + 4 * HW * C)                 # gate + residual
    bytes_accessed = 4 * (N * HW * Cin + N * HW * C          # x, out
                          + 9 * Cin * C + 2 * 9 * C * C      # conv weights
                          + 2 * C * Cr)                      # conv_du weights

    out_nhwc = pl.pallas_call(
        _shallow_cell_kernel,
        out_shape=jax.ShapeDtypeStruct((N, H, W, C), x_nchw.dtype),
        grid_spec=grid_spec,
        compiler_params=pltpu.CompilerParams(
            dimension_semantics=("parallel",)),          # v7x: 2 TCs split batch
        cost_estimate=pl.CostEstimate(flops=flops,
                                      transcendentals=N * C,
                                      bytes_accessed=bytes_accessed),
    )(alpha, x, w1, w2, w3, params["w_du1"], params["w_du2"])
    return jnp.transpose(out_nhwc, (0, 3, 1, 2))         # NHWC -> NCHW


# -----------------------------------------------------------------------------
# pure-JAX reference (for verification)
# -----------------------------------------------------------------------------
def _ref_forward(x_nchw, params):
    x = jnp.transpose(x_nchw, (0, 2, 3, 1))

    def conv(inp, w):
        return jax.lax.conv_general_dilated(
            inp, w, (1, 1), "SAME",
            dimension_numbers=("NHWC", "HWIO", "NHWC"),
            precision=jax.lax.Precision.HIGHEST)

    a = params["prelu_alpha"]
    feat0 = conv(x, params["w_shallow"])
    r = conv(feat0, params["w_body1"])
    r = jnp.where(r >= 0, r, a * r)
    r = conv(r, params["w_body2"])
    y = jnp.mean(r, axis=(1, 2))                         # (N, C)
    z1 = jnp.maximum(y @ params["w_du1"], 0.0)
    z2 = jax.nn.sigmoid(z1 @ params["w_du2"])
    out = r * z2[:, None, None, :] + feat0
    return jnp.transpose(out, (0, 3, 1, 2))


if __name__ == "__main__":
    N, Cin, H, W = 2, 3, 16, 16          # shallow_cell's first conv expects 3 channels
    n_feats, reduction = 32, 4

    key = jax.random.PRNGKey(0)
    kx, k1, k2, k3, k4, k5 = jax.random.split(key, 6)

    x = jax.random.normal(kx, (N, Cin, H, W), jnp.float32)   # PyTorch-style NCHW

    params = {
        # conv(3, n_feats, 3, bias=False) -- HWIO
        "w_shallow": 0.10 * jax.random.normal(k1, (3, 3, Cin, n_feats), jnp.float32),
        # CAB body: conv(n_feats, n_feats, 3) -> PReLU -> conv(n_feats, n_feats, 3)
        "w_body1": 0.05 * jax.random.normal(k2, (3, 3, n_feats, n_feats), jnp.float32),
        "w_body2": 0.05 * jax.random.normal(k3, (3, 3, n_feats, n_feats), jnp.float32),
        # CALayer conv_du 1x1 convs, stored as (Cin, Cout) matmul matrices
        "w_du1": 0.10 * jax.random.normal(k4, (n_feats, n_feats // reduction), jnp.float32),
        "w_du2": 0.10 * jax.random.normal(k5, (n_feats // reduction, n_feats), jnp.float32),
        # nn.PReLU() default single-parameter init
        "prelu_alpha": 0.25,
    }

    fwd = jax.jit(shallow_cell_forward)
    out = jax.block_until_ready(fwd(x, params))

    ref = jax.block_until_ready(_ref_forward(x, params))
    assert out.shape == (N, n_feats, H, W), out.shape
    assert jnp.allclose(out, ref, atol=2e-3, rtol=2e-3), float(jnp.max(jnp.abs(out - ref)))

    print("KERNEL_OK")
</pallas_src>

<mosaic_0001>
module attributes {stable_mosaic.version = 11 : i64} {
  func.func @_shallow_cell_kernel(%arg0: i32, %arg1: memref<1xf32, #tpu.memory_space<smem>>, %arg2: memref<1x16x16x3xf32, #tpu.memory_space<vmem>>, %arg3: memref<27x32xf32, #tpu.memory_space<vmem>>, %arg4: memref<288x32xf32, #tpu.memory_space<vmem>>, %arg5: memref<288x32xf32, #tpu.memory_space<vmem>>, %arg6: memref<32x8xf32, #tpu.memory_space<vmem>>, %arg7: memref<8x32xf32, #tpu.memory_space<vmem>>, %arg8: memref<1x16x16x32xf32, #tpu.memory_space<vmem>>, %arg9: memref<18x18x3xf32, #tpu.memory_space<vmem>>, %arg10: memref<18x18x32xf32, #tpu.memory_space<vmem>>, %arg11: memref<256x288xf32, #tpu.memory_space<vmem>>) attributes {dimension_semantics = [#tpu.dimension_semantics<parallel>], iteration_bounds = array<i64: 2>, scalar_prefetch = 1 : i64, scratch_operands = 3 : i64, tpu.core_type = #tpu.core_type<tc>, window_params = [{transform_indices = @transform_0, window_bounds = array<i64: 1, 16, 16, 3>}, {pipeline_mode = #tpu.pipeline_mode<synchronous>, transform_indices = @transform_1, window_bounds = array<i64: 27, 32>}, {pipeline_mode = #tpu.pipeline_mode<synchronous>, transform_indices = @transform_2, window_bounds = array<i64: 288, 32>}, {pipeline_mode = #tpu.pipeline_mode<synchronous>, transform_indices = @transform_3, window_bounds = array<i64: 288, 32>}, {pipeline_mode = #tpu.pipeline_mode<synchronous>, transform_indices = @transform_4, window_bounds = array<i64: 32, 8>}, {pipeline_mode = #tpu.pipeline_mode<synchronous>, transform_indices = @transform_5, window_bounds = array<i64: 8, 32>}, {transform_indices = @transform_6, window_bounds = array<i64: 1, 16, 16, 32>}]} {
    %cst = arith.constant 0.000000e+00 : f32
    %0 = vector.broadcast %cst : f32 to vector<18x18x3xf32>
    %c0 = arith.constant 0 : index
    %c0_0 = arith.constant 0 : index
    %c0_1 = arith.constant 0 : index
    %1 = vector.load %arg9[%c0, %c0_0, %c0_1] : memref<18x18x3xf32, #tpu.memory_space<vmem>>, vector<18x18x3xf32>
    tpu.vector_store %arg9[%c0, %c0_0, %c0_1], %0 {strides = array<i32>} : memref<18x18x3xf32, #tpu.memory_space<vmem>>, vector<18x18x3xf32>,
    %c0_2 = arith.constant 0 : index
    %c0_3 = arith.constant 0 : index
    %c0_4 = arith.constant 0 : index
    %c0_5 = arith.constant 0 : index
    %2 = vector.load %arg2[%c0_2, %c0_3, %c0_4, %c0_5] : memref<1x16x16x3xf32, #tpu.memory_space<vmem>>, vector<1x16x16x3xf32>
    %3 = vector.shape_cast %2 : vector<1x16x16x3xf32> to vector<16x16x3xf32>
    %c1 = arith.constant 1 : index
    %c1_6 = arith.constant 1 : index
    %c0_7 = arith.constant 0 : index
    %4 = vector.load %arg9[%c1, %c1_6, %c0_7] : memref<18x18x3xf32, #tpu.memory_space<vmem>>, vector<16x16x3xf32>
    tpu.vector_store %arg9[%c1, %c1_6, %c0_7], %3 {strides = array<i32>} : memref<18x18x3xf32, #tpu.memory_space<vmem>>, vector<16x16x3xf32>,
    %c0_8 = arith.constant 0 : index
    %c0_9 = arith.constant 0 : index
    %c0_10 = arith.constant 0 : index
    %5 = vector.load %arg9[%c0_8, %c0_9, %c0_10] : memref<18x18x3xf32, #tpu.memory_space<vmem>>, vector<16x16x3xf32>
    %6 = vector.shape_cast %5 : vector<16x16x3xf32> to vector<256x3xf32>
    %c0_11 = arith.constant 0 : index
    %c0_12 = arith.constant 0 : index
    %7 = vector.load %arg11[%c0_11, %c0_12] : memref<256x288xf32, #tpu.memory_space<vmem>>, vector<256x3xf32>
    tpu.vector_store %arg11[%c0_11, %c0_12], %6 {strides = array<i32>} : memref<256x288xf32, #tpu.memory_space<vmem>>, vector<256x3xf32>,
    %c0_13 = arith.constant 0 : index
    %c1_14 = arith.constant 1 : index
    %c0_15 = arith.constant 0 : index
    %8 = vector.load %arg9[%c0_13, %c1_14, %c0_15] : memref<18x18x3xf32, #tpu.memory_space<vmem>>, vector<16x16x3xf32>
    %9 = vector.shape_cast %8 : vector<16x16x3xf32> to vector<256x3xf32>
    %c0_16 = arith.constant 0 : index
    %c3 = arith.constant 3 : index
    %10 = vector.load %arg11[%c0_16, %c3] : memref<256x288xf32, #tpu.memory_space<vmem>>, vector<256x3xf32>
    tpu.vector_store %arg11[%c0_16, %c3], %9 {strides = array<i32>} : memref<256x288xf32, #tpu.memory_space<vmem>>, vector<256x3xf32>,
    %c0_17 = arith.constant 0 : index
    %c2 = arith.constant 2 : index
    %c0_18 = arith.constant 0 : index
    %11 = vector.load %arg9[%c0_17, %c2, %c0_18] : memref<18x18x3xf32, #tpu.memory_space<vmem>>, vector<16x16x3xf32>
    %12 = vector.shape_cast %11 : vector<16x16x3xf32> to vector<256x3xf32>
    %c0_19 = arith.constant 0 : index
    %c6 = arith.constant 6 : index
    %13 = vector.load %arg11[%c0_19, %c6] : memref<256x288xf32, #tpu.memory_space<vmem>>, vector<256x3xf32>
    tpu.vector_store %arg11[%c0_19, %c6], %12 {strides = array<i32>} : memref<256x288xf32, #tpu.memory_space<vmem>>, vector<256x3xf32>,
    %c1_20 = arith.constant 1 : index
    %c0_21 = arith.constant 0 : index
    %c0_22 = arith.constant 0 : index
    %14 = vector.load %arg9[%c1_20, %c0_21, %c0_22] : memref<18x18x3xf32, #tpu.memory_space<vmem>>, vector<16x16x3xf32>
    %15 = vector.shape_cast %14 : vector<16x16x3xf32> to vector<256x3xf32>
    %c0_23 = arith.constant 0 : index
    %c9 = arith.constant 9 : index
    %16 = vector.load %arg11[%c0_23, %c9] : memref<256x288xf32, #tpu.memory_space<vmem>>, vector<256x3xf32>
    tpu.vector_store %arg11[%c0_23, %c9], %15 {strides = array<i32>} : memref<256x288xf32, #tpu.memory_space<vmem>>, vector<256x3xf32>,
    %c1_24 = arith.constant 1 : index
    %c1_25 = arith.constant 1 : index
    %c0_26 = arith.constant 0 : index
    %17 = vector.load %arg9[%c1_24, %c1_25, %c0_26] : memref<18x18x3xf32, #tpu.memory_space<vmem>>, vector<16x16x3xf32>
    %18 = vector.shape_cast %17 : vector<16x16x3xf32> to vector<256x3xf32>
    %c0_27 = arith.constant 0 : index
    %c12 = arith.constant 12 : index
    %19 = vector.load %arg11[%c0_27, %c12] : memref<256x288xf32, #tpu.memory_space<vmem>>, vector<256x3xf32>
    tpu.vector_store %arg11[%c0_27, %c12], %18 {strides = array<i32>} : memref<256x288xf32, #tpu.memory_space<vmem>>, vector<256x3xf32>,
    %c1_28 = arith.constant 1 : index
    %c2_29 = arith.constant 2 : index
    %c0_30 = arith.constant 0 : index
    %20 = vector.load %arg9[%c1_28, %c2_29, %c0_30] : memref<18x18x3xf32, #tpu.memory_space<vmem>>, vector<16x16x3xf32>
    %21 = vector.shape_cast %20 : vector<16x16x3xf32> to vector<256x3xf32>
    %c0_31 = arith.constant 0 : index
    %c15 = arith.constant 15 : index
    %22 = vector.load %arg11[%c0_31, %c15] : memref<256x288xf32, #tpu.memory_space<vmem>>, vector<256x3xf32>
    tpu.vector_store %arg11[%c0_31, %c15], %21 {strides = array<i32>} : memref<256x288xf32, #tpu.memory_space<vmem>>, vector<256x3xf32>,
    %c2_32 = arith.constant 2 : index
    %c0_33 = arith.constant 0 : index
    %c0_34 = arith.constant 0 : index
    %23 = vector.load %arg9[%c2_32, %c0_33, %c0_34] : memref<18x18x3xf32, #tpu.memory_space<vmem>>, vector<16x16x3xf32>
    %24 = vector.shape_cast %23 : vector<16x16x3xf32> to vector<256x3xf32>
    %c0_35 = arith.constant 0 : index
    %c18 = arith.constant 18 : index
    %25 = vector.load %arg11[%c0_35, %c18] : memref<256x288xf32, #tpu.memory_space<vmem>>, vector<256x3xf32>
    tpu.vector_store %arg11[%c0_35, %c18], %24 {strides = array<i32>} : memref<256x288xf32, #tpu.memory_space<vmem>>, vector<256x3xf32>,
    %c2_36 = arith.constant 2 : index
    %c1_37 = arith.constant 1 : index
    %c0_38 = arith.constant 0 : index
    %26 = vector.load %arg9[%c2_36, %c1_37, %c0_38] : memref<18x18x3xf32, #tpu.memory_space<vmem>>, vector<16x16x3xf32>
    %27 = vector.shape_cast %26 : vector<16x16x3xf32> to vector<256x3xf32>
    %c0_39 = arith.constant 0 : index
    %c21 = arith.constant 21 : index
    %28 = vector.load %arg11[%c0_39, %c21] : memref<256x288xf32, #tpu.memory_space<vmem>>, vector<256x3xf32>
    tpu.vector_store %arg11[%c0_39, %c21], %27 {strides = array<i32>} : memref<256x288xf32, #tpu.memory_space<vmem>>, vector<256x3xf32>,
    %c2_40 = arith.constant 2 : index
    %c2_41 = arith.constant 2 : index
    %c0_42 = arith.constant 0 : index
    %29 = vector.load %arg9[%c2_40, %c2_41, %c0_42] : memref<18x18x3xf32, #tpu.memory_space<vmem>>, vector<16x16x3xf32>
    %30 = vector.shape_cast %29 : vector<16x16x3xf32> to vector<256x3xf32>
    %c0_43 = arith.constant 0 : index
    %c24 = arith.constant 24 : index
    %31 = vector.load %arg11[%c0_43, %c24] : memref<256x288xf32, #tpu.memory_space<vmem>>, vector<256x3xf32>
    tpu.vector_store %arg11[%c0_43, %c24], %30 {strides = array<i32>} : memref<256x288xf32, #tpu.memory_space<vmem>>, vector<256x3xf32>,
    %c0_44 = arith.constant 0 : index
    %c0_45 = arith.constant 0 : index
    %32 = vector.load %arg11[%c0_44, %c0_45] : memref<256x288xf32, #tpu.memory_space<vmem>>, vector<256x27xf32>
    %c0_46 = arith.constant 0 : index
    %c0_47 = arith.constant 0 : index
    %33 = vector.load %arg3[%c0_46, %c0_47] : memref<27x32xf32, #tpu.memory_space<vmem>>, vector<27x32xf32>
    %cst_48 = arith.constant dense<0.000000e+00> : vector<256x32xf32>
    %34 = tpu.matmul %32, %33, %cst_48 {dimension_numbers = #tpu.dot_dimension_numbers<[1], [0], [0], [1], [0, 0, 1, 1], [], []>} : vector<256x27xf32>, vector<27x32xf32>, vector<256x32xf32> -> vector<256x32xf32>
    %cst_49 = arith.constant 0.000000e+00 : f32
    %35 = vector.broadcast %cst_49 : f32 to vector<18x18x32xf32>
    %c0_50 = arith.constant 0 : index
    %c0_51 = arith.constant 0 : index
    %c0_52 = arith.constant 0 : index
    %36 = vector.load %arg10[%c0_50, %c0_51, %c0_52] : memref<18x18x32xf32, #tpu.memory_space<vmem>>, vector<18x18x32xf32>
    tpu.vector_store %arg10[%c0_50, %c0_51, %c0_52], %35 {strides = array<i32>} : memref<18x18x32xf32, #tpu.memory_space<vmem>>, vector<18x18x32xf32>,
    %37 = vector.shape_cast %34 : vector<256x32xf32> to vector<16x16x32xf32>
    %c1_53 = arith.constant 1 : index
    %c1_54 = arith.constant 1 : index
    %c0_55 = arith.constant 0 : index
    %38 = vector.load %arg10[%c1_53, %c1_54, %c0_55] : memref<18x18x32xf32, #tpu.memory_space<vmem>>, vector<16x16x32xf32>
    tpu.vector_store %arg10[%c1_53, %c1_54, %c0_55], %37 {strides = array<i32>} : memref<18x18x32xf32, #tpu.memory_space<vmem>>, vector<16x16x32xf32>,
    %c0_56 = arith.constant 0 : index
    %c0_57 = arith.constant 0 : index
    %c0_58 = arith.constant 0 : index
    %39 = vector.load %arg10[%c0_56, %c0_57, %c0_58] : memref<18x18x32xf32, #tpu.memory_space<vmem>>, vector<16x16x32xf32>
    %40 = vector.shape_cast %39 : vector<16x16x32xf32> to vector<256x32xf32>
    %c0_59 = arith.constant 0 : index
    %c0_60 = arith.constant 0 : index
    %41 = vector.load %arg11[%c0_59, %c0_60] : memref<256x288xf32, #tpu.memory_space<vmem>>, vector<256x32xf32>
    tpu.vector_store %arg11[%c0_59, %c0_60], %40 {strides = array<i32>} : memref<256x288xf32, #tpu.memory_space<vmem>>, vector<256x32xf32>,
    %c0_61 = arith.constant 0 : index
    %c1_62 = arith.constant 1 : index
    %c0_63 = arith.constant 0 : index
    %42 = vector.load %arg10[%c0_61, %c1_62, %c0_63] : memref<18x18x32xf32, #tpu.memory_space<vmem>>, vector<16x16x32xf32>
    %43 = vector.shape_cast %42 : vector<16x16x32xf32> to vector<256x32xf32>
    %c0_64 = arith.constant 0 : index
    %c32 = arith.constant 32 : index
    %44 = vector.load %arg11[%c0_64, %c32] : memref<256x288xf32, #tpu.memory_space<vmem>>, vector<256x32xf32>
    tpu.vector_store %arg11[%c0_64, %c32], %43 {strides = array<i32>} : memref<256x288xf32, #tpu.memory_space<vmem>>, vector<256x32xf32>,
    %c0_65 = arith.constant 0 : index
    %c2_66 = arith.constant 2 : index
    %c0_67 = arith.constant 0 : index
    %45 = vector.load %arg10[%c0_65, %c2_66, %c0_67] : memref<18x18x32xf32, #tpu.memory_space<vmem>>, vector<16x16x32xf32>
    %46 = vector.shape_cast %45 : vector<16x16x32xf32> to vector<256x32xf32>
    %c0_68 = arith.constant 0 : index
    %c64 = arith.constant 64 : index
    %47 = vector.load %arg11[%c0_68, %c64] : memref<256x288xf32, #tpu.memory_space<vmem>>, vector<256x32xf32>
    tpu.vector_store %arg11[%c0_68, %c64], %46 {strides = array<i32>} : memref<256x288xf32, #tpu.memory_space<vmem>>, vector<256x32xf32>,
    %c1_69 = arith.constant 1 : index
    %c0_70 = arith.constant 0 : index
    %c0_71 = arith.constant 0 : index
    %48 = vector.load %arg10[%c1_69, %c0_70, %c0_71] : memref<18x18x32xf32, #tpu.memory_space<vmem>>, vector<16x16x32xf32>
    %49 = vector.shape_cast %48 : vector<16x16x32xf32> to vector<256x32xf32>
    %c0_72 = arith.constant 0 : index
    %c96 = arith.constant 96 : index
    %50 = vector.load %arg11[%c0_72, %c96] : memref<256x288xf32, #tpu.memory_space<vmem>>, vector<256x32xf32>
    tpu.vector_store %arg11[%c0_72, %c96], %49 {strides = array<i32>} : memref<256x288xf32, #tpu.memory_space<vmem>>, vector<256x32xf32>,
    %c1_73 = arith.constant 1 : index
    %c1_74 = arith.constant 1 : index
    %c0_75 = arith.constant 0 : index
    %51 = vector.load %arg10[%c1_73, %c1_74, %c0_75] : memref<18x18x32xf32, #tpu.memory_space<vmem>>, vector<16x16x32xf32>
    %52 = vector.shape_cast %51 : vector<16x16x32xf32> to vector<256x32xf32>
    %c0_76 = arith.constant 0 : index
    %c128 = arith.constant 128 : index
    %53 = vector.load %arg11[%c0_76, %c128] : memref<256x288xf32, #tpu.memory_space<vmem>>, vector<256x32xf32>
    tpu.vector_store %arg11[%c0_76, %c128], %52 {strides = array<i32>} : memref<256x288xf32, #tpu.memory_space<vmem>>, vector<256x32xf32>,
    %c1_77 = arith.constant 1 : index
    %c2_78 = arith.constant 2 : index
    %c0_79 = arith.constant 0 : index
    %54 = vector.load %arg10[%c1_77, %c2_78, %c0_79] : memref<18x18x32xf32, #tpu.memory_space<vmem>>, vector<16x16x32xf32>
    %55 = vector.shape_cast %54 : vector<16x16x32xf32> to vector<256x32xf32>
    %c0_80 = arith.constant 0 : index
    %c160 = arith.constant 160 : index
    %56 = vector.load %arg11[%c0_80, %c160] : memref<256x288xf32, #tpu.memory_space<vmem>>, vector<256x32xf32>
    tpu.vector_store %arg11[%c0_80, %c160], %55 {strides = array<i32>} : memref<256x288xf32, #tpu.memory_space<vmem>>, vector<256x32xf32>,
    %c2_81 = arith.constant 2 : index
    %c0_82 = arith.constant 0 : index
    %c0_83 = arith.constant 0 : index
    %57 = vector.load %arg10[%c2_81, %c0_82, %c0_83] : memref<18x18x32xf32, #tpu.memory_space<vmem>>, vector<16x16x32xf32>
    %58 = vector.shape_cast %57 : vector<16x16x32xf32> to vector<256x32xf32>
    %c0_84 = arith.constant 0 : index
    %c192 = arith.constant 192 : index
    %59 = vector.load %arg11[%c0_84, %c192] : memref<256x288xf32, #tpu.memory_space<vmem>>, vector<256x32xf32>
    tpu.vector_store %arg11[%c0_84, %c192], %58 {strides = array<i32>} : memref<256x288xf32, #tpu.memory_space<vmem>>, vector<256x32xf32>,
    %c2_85 = arith.constant 2 : index
    %c1_86 = arith.constant 1 : index
    %c0_87 = arith.constant 0 : index
    %60 = vector.load %arg10[%c2_85, %c1_86, %c0_87] : memref<18x18x32xf32, #tpu.memory_space<vmem>>, vector<16x16x32xf32>
    %61 = vector.shape_cast %60 : vector<16x16x32xf32> to vector<256x32xf32>
    %c0_88 = arith.constant 0 : index
    %c224 = arith.constant 224 : index
    %62 = vector.load %arg11[%c0_88, %c224] : memref<256x288xf32, #tpu.memory_space<vmem>>, vector<256x32xf32>
    tpu.vector_store %arg11[%c0_88, %c224], %61 {strides = array<i32>} : memref<256x288xf32, #tpu.memory_space<vmem>>, vector<256x32xf32>,
    %c2_89 = arith.constant 2 : index
    %c2_90 = arith.constant 2 : index
    %c0_91 = arith.constant 0 : index
    %63 = vector.load %arg10[%c2_89, %c2_90, %c0_91] : memref<18x18x32xf32, #tpu.memory_space<vmem>>, vector<16x16x32xf32>
    %64 = vector.shape_cast %63 : vector<16x16x32xf32> to vector<256x32xf32>
    %c0_92 = arith.constant 0 : index
    %c256 = arith.constant 256 : index
    %65 = vector.load %arg11[%c0_92, %c256] : memref<256x288xf32, #tpu.memory_space<vmem>>, vector<256x32xf32>
    tpu.vector_store %arg11[%c0_92, %c256], %64 {strides = array<i32>} : memref<256x288xf32, #tpu.memory_space<vmem>>, vector<256x32xf32>,
    %c0_93 = arith.constant 0 : index
    %c0_94 = arith.constant 0 : index
    %66 = vector.load %arg11[%c0_93, %c0_94] : memref<256x288xf32, #tpu.memory_space<vmem>>, vector<256x288xf32>
    %c0_95 = arith.constant 0 : index
    %c0_96 = arith.constant 0 : index
    %67 = vector.load %arg4[%c0_95, %c0_96] : memref<288x32xf32, #tpu.memory_space<vmem>>, vector<288x32xf32>
    %cst_97 = arith.constant dense<0.000000e+00> : vector<256x32xf32>
    %68 = tpu.matmul %66, %67, %cst_97 {dimension_numbers = #tpu.dot_dimension_numbers<[1], [0], [0], [1], [0, 0, 1, 1], [], []>} : vector<256x288xf32>, vector<288x32xf32>, vector<256x32xf32> -> vector<256x32xf32>
    %c0_98 = arith.constant 0 : index
    %69 = memref.load %arg1[%c0_98] : memref<1xf32, #tpu.memory_space<smem>>
    %cst_99 = arith.constant 0.000000e+00 : f32
    %70 = vector.broadcast %cst_99 : f32 to vector<256x32xf32>
    %71 = arith.maximumf %68, %70 : vector<256x32xf32>
    %cst_100 = arith.constant 0.000000e+00 : f32
    %72 = vector.broadcast %cst_100 : f32 to vector<256x32xf32>
    %73 = arith.minimumf %68, %72 : vector<256x32xf32>
    %74 = vector.broadcast %69 : f32 to vector<256x32xf32>
    %75 = arith.mulf %74, %73 : vector<256x32xf32>
    %76 = arith.addf %71, %75 : vector<256x32xf32>
    %77 = vector.shape_cast %76 : vector<256x32xf32> to vector<16x16x32xf32>
    %c1_101 = arith.constant 1 : index
    %c1_102 = arith.constant 1 : index
    %c0_103 = arith.constant 0 : index
    %78 = vector.load %arg10[%c1_101, %c1_102, %c0_103] : memref<18x18x32xf32, #tpu.memory_space<vmem>>, vector<16x16x32xf32>
    tpu.vector_store %arg10[%c1_101, %c1_102, %c0_103], %77 {strides = array<i32>} : memref<18x18x32xf32, #tpu.memory_space<vmem>>, vector<16x16x32xf32>,
    %c0_104 = arith.constant 0 : index
    %c0_105 = arith.constant 0 : index
    %c0_106 = arith.constant 0 : index
    %79 = vector.load %arg10[%c0_104, %c0_105, %c0_106] : memref<18x18x32xf32, #tpu.memory_space<vmem>>, vector<16x16x32xf32>
    %80 = vector.shape_cast %79 : vector<16x16x32xf32> to vector<256x32xf32>
    %c0_107 = arith.constant 0 : index
    %c0_108 = arith.constant 0 : index
    %81 = vector.load %arg11[%c0_107, %c0_108] : memref<256x288xf32, #tpu.memory_space<vmem>>, vector<256x32xf32>
    tpu.vector_store %arg11[%c0_107, %c0_108], %80 {strides = array<i32>} : memref<256x288xf32, #tpu.memory_space<vmem>>, vector<256x32xf32>,
    %c0_109 = arith.constant 0 : index
    %c1_110 = arith.constant 1 : index
    %c0_111 = arith.constant 0 : index
    %82 = vector.load %arg10[%c0_109, %c1_110, %c0_111] : memref<18x18x32xf32, #tpu.memory_space<vmem>>, vector<16x16x32xf32>
    %83 = vector.shape_cast %82 : vector<16x16x32xf32> to vector<256x32xf32>
    %c0_112 = arith.constant 0 : index
    %c32_113 = arith.constant 32 : index
    %84 = vector.load %arg11[%c0_112, %c32_113] : memref<256x288xf32, #tpu.memory_space<vmem>>, vector<256x32xf32>
    tpu.vector_store %arg11[%c0_112, %c32_113], %83 {strides = array<i32>} : memref<256x288xf32, #tpu.memory_space<vmem>>, vector<256x32xf32>,
    %c0_114 = arith.constant 0 : index
    %c2_115 = arith.constant 2 : index
    %c0_116 = arith.constant 0 : index
    %85 = vector.load %arg10[%c0_114, %c2_115, %c0_116] : memref<18x18x32xf32, #tpu.memory_space<vmem>>, vector<16x16x32xf32>
    %86 = vector.shape_cast %85 : vector<16x16x32xf32> to vector<256x32xf32>
    %c0_117 = arith.constant 0 : index
    %c64_118 = arith.constant 64 : index
    %87 = vector.load %arg11[%c0_117, %c64_118] : memref<256x288xf32, #tpu.memory_space<vmem>>, vector<256x32xf32>
    tpu.vector_store %arg11[%c0_117, %c64_118], %86 {strides = array<i32>} : memref<256x288xf32, #tpu.memory_space<vmem>>, vector<256x32xf32>,
    %c1_119 = arith.constant 1 : index
    %c0_120 = arith.constant 0 : index
    %c0_121 = arith.constant 0 : index
    %88 = vector.load %arg10[%c1_119, %c0_120, %c0_121] : memref<18x18x32xf32, #tpu.memory_space<vmem>>, vector<16x16x32xf32>
    %89 = vector.shape_cast %88 : vector<16x16x32xf32> to vector<256x32xf32>
    %c0_122 = arith.constant 0 : index
    %c96_123 = arith.constant 96 : index
    %90 = vector.load %arg11[%c0_122, %c96_123] : memref<256x288xf32, #tpu.memory_space<vmem>>, vector<256x32xf32>
    tpu.vector_store %arg11[%c0_122, %c96_123], %89 {strides = array<i32>} : memref<256x288xf32, #tpu.memory_space<vmem>>, vector<256x32xf32>,
    %c1_124 = arith.constant 1 : index
    %c1_125 = arith.constant 1 : index
    %c0_126 = arith.constant 0 : index
    %91 = vector.load %arg10[%c1_124, %c1_125, %c0_126] : memref<18x18x32xf32, #tpu.memory_space<vmem>>, vector<16x16x32xf32>
    %92 = vector.shape_cast %91 : vector<16x16x32xf32> to vector<256x32xf32>
    %c0_127 = arith.constant 0 : index
    %c128_128 = arith.constant 128 : index
    %93 = vector.load %arg11[%c0_127, %c128_128] : memref<256x288xf32, #tpu.memory_space<vmem>>, vector<256x32xf32>
    tpu.vector_store %arg11[%c0_127, %c128_128], %92 {strides = array<i32>} : memref<256x288xf32, #tpu.memory_space<vmem>>, vector<256x32xf32>,
    %c1_129 = arith.constant 1 : index
    %c2_130 = arith.constant 2 : index
    %c0_131 = arith.constant 0 : index
    %94 = vector.load %arg10[%c1_129, %c2_130, %c0_131] : memref<18x18x32xf32, #tpu.memory_space<vmem>>, vector<16x16x32xf32>
    %95 = vector.shape_cast %94 : vector<16x16x32xf32> to vector<256x32xf32>
    %c0_132 = arith.constant 0 : index
    %c160_133 = arith.constant 160 : index
    %96 = vector.load %arg11[%c0_132, %c160_133] : memref<256x288xf32, #tpu.memory_space<vmem>>, vector<256x32xf32>
    tpu.vector_store %arg11[%c0_132, %c160_133], %95 {strides = array<i32>} : memref<256x288xf32, #tpu.memory_space<vmem>>, vector<256x32xf32>,
    %c2_134 = arith.constant 2 : index
    %c0_135 = arith.constant 0 : index
    %c0_136 = arith.constant 0 : index
    %97 = vector.load %arg10[%c2_134, %c0_135, %c0_136] : memref<18x18x32xf32, #tpu.memory_space<vmem>>, vector<16x16x32xf32>
    %98 = vector.shape_cast %97 : vector<16x16x32xf32> to vector<256x32xf32>
    %c0_137 = arith.constant 0 : index
    %c192_138 = arith.constant 192 : index
    %99 = vector.load %arg11[%c0_137, %c192_138] : memref<256x288xf32, #tpu.memory_space<vmem>>, vector<256x32xf32>
    tpu.vector_store %arg11[%c0_137, %c192_138], %98 {strides = array<i32>} : memref<256x288xf32, #tpu.memory_space<vmem>>, vector<256x32xf32>,
    %c2_139 = arith.constant 2 : index
    %c1_140 = arith.constant 1 : index
    %c0_141 = arith.constant 0 : index
    %100 = vector.load %arg10[%c2_139, %c1_140, %c0_141] : memref<18x18x32xf32, #tpu.memory_space<vmem>>, vector<16x16x32xf32>
    %101 = vector.shape_cast %100 : vector<16x16x32xf32> to vector<256x32xf32>
    %c0_142 = arith.constant 0 : index
    %c224_143 = arith.constant 224 : index
    %102 = vector.load %arg11[%c0_142, %c224_143] : memref<256x288xf32, #tpu.memory_space<vmem>>, vector<256x32xf32>
    tpu.vector_store %arg11[%c0_142, %c224_143], %101 {strides = array<i32>} : memref<256x288xf32, #tpu.memory_space<vmem>>, vector<256x32xf32>,
    %c2_144 = arith.constant 2 : index
    %c2_145 = arith.constant 2 : index
    %c0_146 = arith.constant 0 : index
    %103 = vector.load %arg10[%c2_144, %c2_145, %c0_146] : memref<18x18x32xf32, #tpu.memory_space<vmem>>, vector<16x16x32xf32>
    %104 = vector.shape_cast %103 : vector<16x16x32xf32> to vector<256x32xf32>
    %c0_147 = arith.constant 0 : index
    %c256_148 = arith.constant 256 : index
    %105 = vector.load %arg11[%c0_147, %c256_148] : memref<256x288xf32, #tpu.memory_space<vmem>>, vector<256x32xf32>
    tpu.vector_store %arg11[%c0_147, %c256_148], %104 {strides = array<i32>} : memref<256x288xf32, #tpu.memory_space<vmem>>, vector<256x32xf32>,
    %c0_149 = arith.constant 0 : index
    %c0_150 = arith.constant 0 : index
    %106 = vector.load %arg11[%c0_149, %c0_150] : memref<256x288xf32, #tpu.memory_space<vmem>>, vector<256x288xf32>
    %c0_151 = arith.constant 0 : index
    %c0_152 = arith.constant 0 : index
    %107 = vector.load %arg5[%c0_151, %c0_152] : memref<288x32xf32, #tpu.memory_space<vmem>>, vector<288x32xf32>
    %cst_153 = arith.constant dense<0.000000e+00> : vector<256x32xf32>
    %108 = tpu.matmul %106, %107, %cst_153 {dimension_numbers = #tpu.dot_dimension_numbers<[1], [0], [0], [1], [0, 0, 1, 1], [], []>} : vector<256x288xf32>, vector<288x32xf32>, vector<256x32xf32> -> vector<256x32xf32>
    %cst_154 = arith.constant dense<0.000000e+00> : vector<32xf32>
    %109 = vector.multi_reduction <add>, %108, %cst_154 [0] : vector<256x32xf32> to vector<32xf32>
    %110 = vector.shape_cast %109 : vector<32xf32> to vector<1x32xf32>
    %cst_155 = arith.constant 3.906250e-03 : f32
    %111 = vector.broadcast %cst_155 : f32 to vector<1x32xf32>
    %112 = arith.mulf %110, %111 : vector<1x32xf32>
    %c0_156 = arith.constant 0 : index
    %c0_157 = arith.constant 0 : index
    %113 = vector.load %arg6[%c0_156, %c0_157] : memref<32x8xf32, #tpu.memory_space<vmem>>, vector<32x8xf32>
    %cst_158 = arith.constant dense<0.000000e+00> : vector<1x8xf32>
    %114 = tpu.matmul %112, %113, %cst_158 {dimension_numbers = #tpu.dot_dimension_numbers<[1], [0], [0], [1], [0, 0, 1, 1], [], []>} : vector<1x32xf32>, vector<32x8xf32>, vector<1x8xf32> -> vector<1x8xf32>
    %cst_159 = arith.constant 0.000000e+00 : f32
    %115 = vector.broadcast %cst_159 : f32 to vector<1x8xf32>
    %116 = arith.maximumf %114, %115 : vector<1x8xf32>
    %c0_160 = arith.constant 0 : index
    %c0_161 = arith.constant 0 : index
    %117 = vector.load %arg7[%c0_160, %c0_161] : memref<8x32xf32, #tpu.memory_space<vmem>>, vector<8x32xf32>
    %cst_162 = arith.constant dense<0.000000e+00> : vector<1x32xf32>
    %118 = tpu.matmul %116, %117, %cst_162 {dimension_numbers = #tpu.dot_dimension_numbers<[1], [0], [0], [1], [0, 0, 1, 1], [], []>} : vector<1x8xf32>, vector<8x32xf32>, vector<1x32xf32> -> vector<1x32xf32>
    %119 = arith.negf %118 : vector<1x32xf32>
    %120 = math.exp %119 : vector<1x32xf32>
    %cst_163 = arith.constant 1.000000e+00 : f32
    %121 = vector.broadcast %cst_163 : f32 to vector<1x32xf32>
    %122 = arith.addf %121, %120 : vector<1x32xf32>
    %123 = arith.divf %121, %122 : vector<1x32xf32>
    %124 = vector.broadcast %123 : vector<1x32xf32> to vector<256x32xf32>
    %125 = arith.mulf %108, %124 : vector<256x32xf32>
    %126 = arith.addf %125, %34 : vector<256x32xf32>
    %127 = vector.shape_cast %126 : vector<256x32xf32> to vector<16x16x32xf32>
    %c0_164 = arith.constant 0 : index
    %c0_165 = arith.constant 0 : index
    %c0_166 = arith.constant 0 : index
    %c0_167 = arith.constant 0 : index
    %128 = vector.load %arg8[%c0_164, %c0_165, %c0_166, %c0_167] : memref<1x16x16x32xf32, #tpu.memory_space<vmem>>, vector<1x16x16x32xf32>
    %129 = vector.shape_cast %128 : vector<1x16x16x32xf32> to vector<16x16x32xf32>
    %130 = vector.shape_cast %127 : vector<16x16x32xf32> to vector<1x16x16x32xf32>
    tpu.vector_store %arg8[%c0_164, %c0_165, %c0_166, %c0_167], %130 {strides = array<i32>} : memref<1x16x16x32xf32, #tpu.memory_space<vmem>>, vector<1x16x16x32xf32>,
    return
  }
  func.func @transform_0(%arg0: i32, %arg1: memref<1xf32, #tpu.memory_space<smem>>) -> (i32, i32, i32, i32) {
    %c0_i32 = arith.constant 0 : i32
    %c0_i32_0 = arith.constant 0 : i32
    %c0_i32_1 = arith.constant 0 : i32
    %c0_i32_2 = arith.constant 0 : i32
    return %arg0, %c0_i32, %c0_i32_0, %c0_i32_1 : i32, i32, i32, i32
  }
  func.func @transform_1(%arg0: i32, %arg1: memref<1xf32, #tpu.memory_space<smem>>) -> (i32, i32) {
    %c0_i32 = arith.constant 0 : i32
    %c0_i32_0 = arith.constant 0 : i32
    %c0_i32_1 = arith.constant 0 : i32
    return %c0_i32, %c0_i32_0 : i32, i32
  }
  func.func @transform_2(%arg0: i32, %arg1: memref<1xf32, #tpu.memory_space<smem>>) -> (i32, i32) {
    %c0_i32 = arith.constant 0 : i32
    %c0_i32_0 = arith.constant 0 : i32
    %c0_i32_1 = arith.constant 0 : i32
    return %c0_i32, %c0_i32_0 : i32, i32
  }
  func.func @transform_3(%arg0: i32, %arg1: memref<1xf32, #tpu.memory_space<smem>>) -> (i32, i32) {
    %c0_i32 = arith.constant 0 : i32
    %c0_i32_0 = arith.constant 0 : i32
    %c0_i32_1 = arith.constant 0 : i32
    return %c0_i32, %c0_i32_0 : i32, i32
  }
  func.func @transform_4(%arg0: i32, %arg1: memref<1xf32, #tpu.memory_space<smem>>) -> (i32, i32) {
    %c0_i32 = arith.constant 0 : i32
    %c0_i32_0 = arith.constant 0 : i32
    %c0_i32_1 = arith.constant 0 : i32
    return %c0_i32, %c0_i32_0 : i32, i32
  }
  func.func @transform_5(%arg0: i32, %arg1: memref<1xf32, #tpu.memory_space<smem>>) -> (i32, i32) {
    %c0_i32 = arith.constant 0 : i32
    %c0_i32_0 = arith.constant 0 : i32
    %c0_i32_1 = arith.constant 0 : i32
    return %c0_i32, %c0_i32_0 : i32, i32
  }
  func.func @transform_6(%arg0: i32, %arg1: memref<1xf32, #tpu.memory_space<smem>>) -> (i32, i32, i32, i32) {
    %c0_i32 = arith.constant 0 : i32
    %c0_i32_0 = arith.constant 0 : i32
    %c0_i32_1 = arith.constant 0 : i32
    %c0_i32_2 = arith.constant 0 : i32
    return %arg0, %c0_i32, %c0_i32_0, %c0_i32_1 : i32, i32, i32, i32
  }
}

</mosaic_0001>

<bundles_post_ra>
// kernel: shallow_cell_forward.1
= control target key start
LH: loop header
LB: loop body
LE: loop exit
PB: predicated region body
PF: predicated region fallthrough
CT: control target
= control target key end

     0   :  { %s11092_s0 = inlined_call_operand.<no memory space> [shape: f32[1], index: 0, kind: input, shape index: {}]   ;;  %s11093_s1 = inlined_call_operand.vmem [shape: f32[2,16,16,3], index: 1, kind: input, shape index: {}]   ;;  %s11094_s2 = inlined_call_operand.vmem [shape: f32[27,32], index: 2, kind: input, shape index: {}]   ;;  %s11095_s3 = inlined_call_operand.vmem [shape: f32[288,32], index: 3, kind: input, shape index: {}]   ;;  %s11096_s4 = inlined_call_operand.vmem [shape: f32[288,32], index: 4, kind: input, shape index: {}]   ;;  %s11097_s5 = inlined_call_operand.vmem [shape: f32[32,8], index: 5, kind: input, shape index: {}]   ;;  %s11098_s6 = inlined_call_operand.vmem [shape: f32[8,32], index: 6, kind: input, shape index: {}]   ;;  %s11099_s7 = inlined_call_operand.hbm [shape: f32[2,16,16,32], index: 7, kind: output, shape index: {}]  }
   0x1   :  { %12 = sst [smem:[#allocation6]] %s11092_s0 }
   0x2   :  { %13 = vsyncpa [#allocation8], 0 }
   0x3   :  { %15 = vsyncpa [#allocation8 + $0x1], 0  ;;  %s6946_s26 = smov 0   ;;  %s6948_s27 = smov 0  }
   0x4   :  { %s6950_s28 = smov 0   ;;  %s6952_s29 = smov 0  }
   0x5 LB: > { %s6967_s0 = sadd.s32 4294967295, %s6887_s29   ;;  %s6626_s30 = sadd.s32 4294967294, %s6887_s29   ;;  %s6887_s29 = sphi %s6952_s29, %s11323_s29   ;;  %s6883_s28 = sphi %s6950_s28, %s11322_s28   ;;  %s6879_s27 = sphi %s6948_s27, %s11321_s27   ;;  %s6875_s26 = sphi %s6946_s26, %s11320_s26  }
   0x6   : > { %s6971_s8 = sadd.s32 1, %s6887_s29   ;;  %s159_s9 = sadd.s32 1, %s6883_s28 }
   0x7   : > { %s156_s10 = ssub.s32 %s6887_s29, %s6971_s8  ;;  %p169_p0 = scmp.ne.s32.totalorder %s6883_s28, %s6879_s27 }
   0x8   : > { %p157_p1 = scmp.eq.s32.totalorder %s156_s10, 0  ;;  %p170_p2 = scmp.eq.s32.totalorder %s6967_s0, 1 }
   0x9   : > { %p175_p3 = scmp.ne.s32.totalorder %s6879_s27, %s6875_s26  ;;  %p176_p4 = scmp.eq.s32.totalorder %s6626_s30, 1 }
   0xa   : > { %s6982_s11 = scalar_select %p157_p1, %s6883_s28, %s159_s9  }
   0xb   : > { %p6984_p5 = por %p170_p2, %p169_p0  ;;  %p6988_p6 = por %p176_p4, %p175_p3 }
   0xc   : > { %p6629_p7 = scmp.ge.s32.totalorder %s6887_s29, 1  ;;  %p217_p8 = scmp.lt.s32.totalorder %s6887_s29, 3 }
   0xe   : > { %p218_p9 = pnand %p6629_p7, %p217_p8 }
  0x10   : > { %221 = sbr.rel (%p218_p9) target bundleno = 2677 (0xa75), region = 44 }
  0x15   : > { %vm252_vm0 = vcmask 23552   ;;  %v6889_v0 = vmov 0.0   ;;  %s6890_s14 = smov 3   ;;  %p247_p10 = scmp.lt.s32.totalorder %s6967_s0, 1  ;;  %vm255_vm1 = vcmask 17408   ;;  %vm597_vm2 = vcmask 48152  }
  0x16   : > { %253 = vst.msk [vmem:[#allocation2] sm:$0xff] %vm252_vm0, %v6889_v0  ;;  %s6891_s20 = smov 6   ;;  %s6892_s21 = smov 9   ;;  %vm790_vm3 = vcmask 72752   ;;  %vm983_vm4 = vcmask 97352   ;;  %vm2115_vm5 = vcmask 1042432  }
  0x17   : > { %254 = vst.msk [vmem:[#allocation2 + $0x8] sm:$0xff] %vm252_vm0, %v6889_v0  ;;  %s248_s15 = scalar_select %p247_p10, %s6967_s0, 1  ;;  %vm1176_vm6 = vcmask 121952   ;;  %vm1369_vm7 = vcmask 146552   ;;  %vm1563_vm8 = vcmask 171152   ;;  %vm1756_vm9 = vcmask 195752  }
  0x18   : > { %257 = vst.msk [vmem:[#allocation2 + $0x18] sm:$0xff] %vm252_vm0, %v6889_v0  ;;  %s6893_s22 = smov 12   ;;  %s6894_s23 = smov 18   ;;  %vm1949_vm10 = vcmask 220352   ;;  %vm2018_vm11 = vcmask 220160   ;;  %vm2232_vm12 = vcmask 261120  }
  0x19   : > { %258 = vst.msk [vmem:[#allocation2 + $0x20] sm:$0xff] %vm252_vm0, %v6889_v0  ;;  %s6738_s16 = sshll.u32 %s248_s15, 8  ;;  %s6895_s24 = smov 21   ;;  %vm2235_vm13 = vcmask 254976   ;;  %vm2545_vm14 = vcmask 523520   ;;  %vm2738_vm15 = vcmask 785920  }
  0x1a   : > { %260 = vst.msk [vmem:[#allocation2 + $0x30] sm:$0xff] %vm252_vm0, %v6889_v0  ;;  %s7062_s19 = scalar_lea.vmem %s11093_s1, %s6738_s16  ;;  %s6896_s25 = smov 15  }
  0x1b   : > { %261 = vst.msk [vmem:[#allocation2 + $0x38] sm:$0xff] %vm252_vm0, %v6889_v0  ;;  %v308_v2 = vld [vmem:[%s7062_s19] sm:$0xff]  ;;  %v309_v5 = vld [vmem:[%s7062_s19 + $0x8] sm:$0xff]  ;;  %v315_v8 = vld [vmem:[%s7062_s19 + $0x38] sm:$0xff]  ;;  %s6897_s30 = smov 24   ;;  %s244_s16 = sand.u32 1, %s6879_s27  }
  0x1c   : > { %263 = vst.msk [vmem:[#allocation2 + $0x48] sm:$0xff] %vm252_vm0, %v6889_v0  ;;  %v312_v6 = vld [vmem:[%s7062_s19 + $0x20] sm:$0xff]  ;;  %v313_v7 = vld [vmem:[%s7062_s19 + $0x28] sm:$0xff]  ;;  %v310_v10 = vld [vmem:[%s7062_s19 + $0x10] sm:$0xff]  ;;  %s6630_s17 = sshll.u32 %s244_s16, 8 }
  0x1d   : > { %264 = vst.msk [vmem:[#allocation2 + $0x50] sm:$0xff] %vm252_vm0, %v6889_v0  ;;  %v316_v9 = vld [vmem:[%s7062_s19 + $0x40] sm:$0xff]  ;;  %v318_v11 = vld [vmem:[%s7062_s19 + $0x50] sm:$0xff]  ;;  %v319_v12 = vld [vmem:[%s7062_s19 + $0x58] sm:$0xff]  ;;  %s10919_s18 = scalar_lea.vmem [#allocation7], %s6630_s17 }
  0x1e   : > { %v437_v1 = vld [vmem:[#allocation2 + $0x1] sm:$0xff]  ;;  %266 = vst.msk [vmem:[#allocation2 + $0x60] sm:$0xff] %vm252_vm0, %v6889_v0  ;;  %v311_v13 = vld [vmem:[%s7062_s19 + $0x18] sm:$0xff]  ;;  %v322_v16 = vld [vmem:[%s7062_s19 + $0x70] sm:$0xff] }
  0x1f   : > { %501 = vrot.lane.b32.xlu0 %v437_v1, %s6890_s14  ;;  %267 = vst.msk [vmem:[#allocation2 + $0x68] sm:$0xff] %vm252_vm0, %v6889_v0  ;;  %v321_v14 = vld [vmem:[%s7062_s19 + $0x68] sm:$0xff]  ;;  %v314_v18 = vld [vmem:[%s7062_s19 + $0x30] sm:$0xff]  ;;  %v324_v19 = vld [vmem:[%s7062_s19 + $0x80] sm:$0xff] }
  0x20   : > { %269 = vst.msk [vmem:[#allocation2 + $0x78] sm:$0xff] %vm252_vm0, %v6889_v0  ;;  %v325_v20 = vld [vmem:[%s7062_s19 + $0x88] sm:$0xff]  ;;  %v327_v23 = vld [vmem:[%s7062_s19 + $0x98] sm:$0xff]  ;;  %v328_v26 = vld [vmem:[%s7062_s19 + $0xa0] sm:$0xff] }
  0x21   : > { %270 = vst.msk [vmem:[#allocation2 + $0x80] sm:$0xff] %vm252_vm0, %v6889_v0  ;;  %v317_v21 = vld [vmem:[%s7062_s19 + $0x48] sm:$0xff]  ;;  %v320_v27 = vld [vmem:[%s7062_s19 + $0x60] sm:$0xff]  ;;  %v330_v28 = vld [vmem:[%s7062_s19 + $0xb0] sm:$0xff] }
  0x22   : > { %272 = vst.msk [vmem:[#allocation2 + $0x90] sm:$0xff] %vm252_vm0, %v6889_v0  ;;  %v331_v32 = vld [vmem:[%s7062_s19 + $0xb8] sm:$0xff]  ;;  %v333_v34 = vld [vmem:[%s7062_s19 + $0xc8] sm:$0xff]  ;;  %v334_v38 = vld [vmem:[%s7062_s19 + $0xd0] sm:$0xff] }
  0x23   : > { %273 = vst.msk [vmem:[#allocation2 + $0x98] sm:$0xff] %vm252_vm0, %v6889_v0  ;;  %v323_v33 = vld [vmem:[%s7062_s19 + $0x78] sm:$0xff]  ;;  %v326_v39 = vld [vmem:[%s7062_s19 + $0x90] sm:$0xff]  ;;  %v336_v40 = vld [vmem:[%s7062_s19 + $0xe0] sm:$0xff] }
  0x24   : > { %275 = vst.msk [vmem:[#allocation2 + $0xa8] sm:$0xff] %vm252_vm0, %v6889_v0  ;;  %v337_v44 = vld [vmem:[%s7062_s19 + $0xe8] sm:$0xff]  ;;  %v332_v49 = vld [vmem:[%s7062_s19 + $0xc0] sm:$0xff]  ;;  %v335_v53 = vld [vmem:[%s7062_s19 + $0xd8] sm:$0xff] }
  0x25   : > { %276 = vst.msk [vmem:[#allocation2 + $0xb0] sm:$0xff] %vm252_vm0, %v6889_v0  ;;  %v329_v45 = vld [vmem:[%s7062_s19 + $0xa8] sm:$0xff]  ;;  %v373_v61 = vld [vmem:[#allocation2] sm:$0xff] }
  0x26   : > { %278 = vst.msk [vmem:[#allocation2 + $0xc0] sm:$0xff] %vm252_vm0, %v6889_v0 }
  0x27   : > { %279 = vst.msk [vmem:[#allocation2 + $0xc8] sm:$0xff] %vm252_vm0, %v6889_v0 }
  0x28   : > { %281 = vst.msk [vmem:[#allocation2 + $0xd8] sm:$0xff] %vm252_vm0, %v6889_v0 }
  0x29   : > { %282 = vst.msk [vmem:[#allocation2 + $0xe0] sm:$0xff] %vm252_vm0, %v6889_v0 }
  0x2a   : > { %284 = vst.msk [vmem:[#allocation2 + $0xf0] sm:$0xff] %vm252_vm0, %v6889_v0 }
  0x2b   : > { %285 = vst.msk [vmem:[#allocation2 + $0xf8] sm:$0xff] %vm252_vm0, %v6889_v0 }
  0x2c   : > { %287 = vst.msk [vmem:[#allocation2 + $0x108] sm:$0xff] %vm252_vm0, %v6889_v0 }
  0x2d   : > { %288 = vst.msk [vmem:[#allocation2 + $0x110] sm:$0xff] %vm252_vm0, %v6889_v0 }
  0x2e   : > { %290 = vst.msk [vmem:[#allocation2 + $0x120] sm:$0xff] %vm252_vm0, %v6889_v0 }
  0x2f   : > { %291 = vst.msk [vmem:[#allocation2 + $0x128] sm:$0xff] %vm252_vm0, %v6889_v0 }
  0x30   : > { %293 = vst.msk [vmem:[#allocation2 + $0x138] sm:$0xff] %vm252_vm0, %v6889_v0 }
  0x31   : > { %294 = vst.msk [vmem:[#allocation2 + $0x140] sm:$0xff] %vm252_vm0, %v6889_v0 }
  0x32   : > { %296 = vst.msk [vmem:[#allocation2 + $0x150] sm:$0xff] %vm252_vm0, %v6889_v0 }
  0x33   : > { %297 = vst.msk [vmem:[#allocation2 + $0x158] sm:$0xff] %vm252_vm0, %v6889_v0 }
  0x34   : > { %299 = vst.msk [vmem:[#allocation2 + $0x168] sm:$0xff] %vm252_vm0, %v6889_v0 }
  0x35   : > { %300 = vst.msk [vmem:[#allocation2 + $0x170] sm:$0xff] %vm252_vm0, %v6889_v0 }
  0x36   : > { %302 = vst.msk [vmem:[#allocation2 + $0x180] sm:$0xff] %vm252_vm0, %v6889_v0 }
  0x37   : > { %303 = vst.msk [vmem:[#allocation2 + $0x188] sm:$0xff] %vm252_vm0, %v6889_v0 }
  0x38   : > { %305 = vst.msk [vmem:[#allocation2 + $0x198] sm:$0xff] %vm252_vm0, %v6889_v0 }
  0x39   : > { %306 = vst.msk [vmem:[#allocation2 + $0x1a0] sm:$0xff] %vm252_vm0, %v6889_v0 }
  0x3a   : > { %341 = vst.msk [vmem:[#allocation2 + $0x19] sm:$0xff] %vm252_vm0, %v308_v2 }
  0x3b   : > { %256 = vst.msk [vmem:[#allocation2 + $0x10] sm:$0x3] %vm255_vm1, %v6889_v0 }
  0x3c   : > { %259 = vst.msk [vmem:[#allocation2 + $0x28] sm:$0x3] %vm255_vm1, %v6889_v0 }
  0x3d   : > { %262 = vst.msk [vmem:[#allocation2 + $0x40] sm:$0x3] %vm255_vm1, %v6889_v0 }
  0x3e   : > { %265 = vst.msk [vmem:[#allocation2 + $0x58] sm:$0x3] %vm255_vm1, %v6889_v0 }
  0x3f   : > { %268 = vst.msk [vmem:[#allocation2 + $0x70] sm:$0x3] %vm255_vm1, %v6889_v0 }
  0x40   : > { %271 = vst.msk [vmem:[#allocation2 + $0x88] sm:$0x3] %vm255_vm1, %v6889_v0 }
  0x41   : > { %v7088_v3 = vld [vmem:[#allocation2 + $0x19] sm:$0xff]  ;;  %274 = vst.msk [vmem:[#allocation2 + $0xa0] sm:$0x3] %vm255_vm1, %v6889_v0 }
  0x42   : > { %505 = vrot.lane.b32.xlu1 %v7088_v3, %s6890_s14  ;;  %v438_v4 = vld [vmem:[#allocation2 + $0x9] sm:$0xff]  ;;  %277 = vst.msk [vmem:[#allocation2 + $0xb8] sm:$0x3] %vm255_vm1, %v6889_v0  ;;  %v7233_v2 = vld [vmem:[#allocation2 + $0x18] sm:$0xff] }
  0x43   : > { %503 = vrot.lane.b32.xlu0 %v438_v4, %s6890_s14  ;;  %280 = vst.msk [vmem:[#allocation2 + $0xd0] sm:$0x3] %vm255_vm1, %v6889_v0  ;;  %v631_v1 = vld [vmem:[#allocation2 + $0xa] sm:$0xff] }
  0x44   : > { %283 = vst.msk [vmem:[#allocation2 + $0xe8] sm:$0x3] %vm255_vm1, %v6889_v0 }
  0x45   : > { %286 = vst.msk [vmem:[#allocation2 + $0x100] sm:$0x3] %vm255_vm1, %v6889_v0 }
  0x46   : > { %289 = vst.msk [vmem:[#allocation2 + $0x118] sm:$0x3] %vm255_vm1, %v6889_v0 }
  0x47   : > { %292 = vst.msk [vmem:[#allocation2 + $0x130] sm:$0x3] %vm255_vm1, %v6889_v0 }
  0x48   : > { %295 = vst.msk [vmem:[#allocation2 + $0x148] sm:$0x3] %vm255_vm1, %v6889_v0 }
  0x49   : > { %298 = vst.msk [vmem:[#allocation2 + $0x160] sm:$0x3] %vm255_vm1, %v6889_v0 }
  0x4a   : > { %301 = vst.msk [vmem:[#allocation2 + $0x178] sm:$0x3] %vm255_vm1, %v6889_v0 }
  0x4b   : > { %304 = vst.msk [vmem:[#allocation2 + $0x190] sm:$0x3] %vm255_vm1, %v6889_v0 }
  0x4c   : > { %307 = vst.msk [vmem:[#allocation2 + $0x1a8] sm:$0x3] %vm255_vm1, %v6889_v0  ;;  %vm6408_vm1 = vcmask 64512  }
  0x4d   : > { %342 = vst.msk [vmem:[#allocation2 + $0x21] sm:$0xff] %vm252_vm0, %v309_v5  ;;  %v374_v5 = vld [vmem:[#allocation2 + $0x8] sm:$0xff] }
  0x4e   : > { %345 = vst.msk [vmem:[#allocation2 + $0x49] sm:$0xff] %vm252_vm0, %v312_v6 }
  0x4f   : > { %346 = vst.msk [vmem:[#allocation2 + $0x51] sm:$0xff] %vm252_vm0, %v313_v7 }
  0x50   : > { %348 = vst.msk [vmem:[#allocation2 + $0x69] sm:$0xff] %vm252_vm0, %v315_v8 }
  0x51   : > { %349 = vst.msk [vmem:[#allocation2 + $0x79] sm:$0xff] %vm252_vm0, %v316_v9 }
  0x52   : > { %343 = vst.msk [vmem:[#allocation2 + $0x31] sm:$0xff] %vm252_vm0, %v310_v10  ;;  %v630_v10 = vld [vmem:[#allocation2 + $0x2] sm:$0xff] }
  0x53   : > { %351 = vst.msk [vmem:[#allocation2 + $0x91] sm:$0xff] %vm252_vm0, %v318_v11 }
  0x54   : > { %v7134_v15 = vld [vmem:[#allocation2 + $0x21] sm:$0xff]  ;;  %352 = vst.msk [vmem:[#allocation2 + $0x99] sm:$0xff] %vm252_vm0, %v319_v12 }
  0x55   : > { %507 = vrot.lane.b32.xlu1 %v7134_v15, %s6890_s14  ;;  %v7140_v17 = vld [vmem:[#allocation2 + $0x49] sm:$0xff]  ;;  %344 = vst.msk [vmem:[#allocation2 + $0x39] sm:$0xff] %vm252_vm0, %v311_v13  ;;  %v7242_v7 = vld [vmem:[#allocation2 + $0x1a] sm:$0xff] }
  0x56   : > { %513 = vrot.lane.b32.xlu0 %v7140_v17, %s6890_s14  ;;  %354 = vst.msk [vmem:[#allocation2 + $0xb1] sm:$0xff] %vm252_vm0, %v321_v14  ;;  %v7156_v24 = vld [vmem:[#allocation2 + $0x51] sm:$0xff]  ;;  %v7251_v9 = vld [vmem:[#allocation2 + $0x20] sm:$0xff]  ;;  %v7259_v12 = vld [vmem:[#allocation2 + $0x48] sm:$0xff] }
  0x57   : > { %355 = vst.msk [vmem:[#allocation2 + $0xc1] sm:$0xff] %vm252_vm0, %v322_v16  ;;  %v7161_v25 = vld [vmem:[#allocation2 + $0x69] sm:$0xff]  ;;  %v7266_v14 = vld [vmem:[#allocation2 + $0x52] sm:$0xff] }
  0x58   : > { %347 = vst.msk [vmem:[#allocation2 + $0x61] sm:$0xff] %vm252_vm0, %v314_v18  ;;  %v7177_v30 = vld [vmem:[#allocation2 + $0x79] sm:$0xff]  ;;  %v7272_v16 = vld [vmem:[#allocation2 + $0x50] sm:$0xff]  ;;  %v7274_v18 = vld [vmem:[#allocation2 + $0x22] sm:$0xff] }
  0x59   : > { %v7152_v22 = vld [vmem:[#allocation2 + $0x31] sm:$0xff]  ;;  %357 = vst.msk [vmem:[#allocation2 + $0xd9] sm:$0xff] %vm252_vm0, %v324_v19 }
  0x5a   : > { %509 = vrot.lane.b32.xlu2 %v7152_v22, %s6890_s14  ;;  %358 = vst.msk [vmem:[#allocation2 + $0xe1] sm:$0xff] %vm252_vm0, %v325_v20  ;;  %v449_v31 = vld [vmem:[#allocation2 + $0x91] sm:$0xff] }
  0x5b   : > { %350 = vst.msk [vmem:[#allocation2 + $0x81] sm:$0xff] %vm252_vm0, %v317_v21  ;;  %v450_v36 = vld [vmem:[#allocation2 + $0x99] sm:$0xff]  ;;  %v7235_v4 = vld [vmem:[#allocation2 + $0x30] sm:$0xff] }
  0x5c   : > { %360 = vst.msk [vmem:[#allocation2 + $0xf9] sm:$0xff] %vm252_vm0, %v327_v23  ;;  %v7174_v29 = vld [vmem:[#allocation2 + $0x39] sm:$0xff] }
  0x5d   : > { %515 = vrot.lane.b32.xlu1 %v7156_v24, %s6890_s14  ;;  %361 = vst.msk [vmem:[#allocation2 + $0x109] sm:$0xff] %vm252_vm0, %v328_v26  ;;  %v452_v37 = vld [vmem:[#allocation2 + $0xb1] sm:$0xff]  ;;  %v7263_v13 = vld [vmem:[#allocation2 + $0x3a] sm:$0xff] }
  0x5e   : > { %519 = vrot.lane.b32.xlu0 %v7161_v25, %s6890_s14  ;;  %353 = vst.msk [vmem:[#allocation2 + $0xa9] sm:$0xff] %vm252_vm0, %v320_v27  ;;  %v453_v42 = vld [vmem:[#allocation2 + $0xc1] sm:$0xff]  ;;  %v7245_v8 = vld [vmem:[#allocation2 + $0x32] sm:$0xff] }
  0x5f   : > { %363 = vst.msk [vmem:[#allocation2 + $0x121] sm:$0xff] %vm252_vm0, %v330_v28  ;;  %v7189_v35 = vld [vmem:[#allocation2 + $0x61] sm:$0xff]  ;;  %v7255_v11 = vld [vmem:[#allocation2 + $0x38] sm:$0xff] }
  0x60   : > { %364 = vst.msk [vmem:[#allocation2 + $0x129] sm:$0xff] %vm252_vm0, %v331_v32  ;;  %v455_v43 = vld [vmem:[#allocation2 + $0xd9] sm:$0xff]  ;;  %v7282_v20 = vld [vmem:[#allocation2 + $0x68] sm:$0xff] }
  0x61   : > { %356 = vst.msk [vmem:[#allocation2 + $0xc9] sm:$0xff] %vm252_vm0, %v323_v33  ;;  %v456_v47 = vld [vmem:[#allocation2 + $0xe1] sm:$0xff]  ;;  %v7301_v32 = vld [vmem:[#allocation2 + $0x4a] sm:$0xff] }
  0x62   : > { %511 = vrot.lane.b32.xlu2 %v7174_v29, %s6890_s14  ;;  %366 = vst.msk [vmem:[#allocation2 + $0x141] sm:$0xff] %vm252_vm0, %v333_v34  ;;  %v7201_v41 = vld [vmem:[#allocation2 + $0x81] sm:$0xff]  ;;  %v7307_v34 = vld [vmem:[#allocation2 + $0x90] sm:$0xff] }
  0x63   : > { %367 = vst.msk [vmem:[#allocation2 + $0x151] sm:$0xff] %vm252_vm0, %v334_v38  ;;  %v458_v48 = vld [vmem:[#allocation2 + $0xf9] sm:$0xff]  ;;  %v7286_v21 = vld [vmem:[#allocation2 + $0x62] sm:$0xff] }
  0x64   : > { %359 = vst.msk [vmem:[#allocation2 + $0xf1] sm:$0xff] %vm252_vm0, %v326_v39  ;;  %v459_v51 = vld [vmem:[#allocation2 + $0x109] sm:$0xff]  ;;  %v7278_v19 = vld [vmem:[#allocation2 + $0x60] sm:$0xff]  ;;  %v7324_v39 = vld [vmem:[#allocation2 + $0x98] sm:$0xff] }
  0x65   : > { %521 = vrot.lane.b32.xlu1 %v7177_v30, %s6890_s14  ;;  %369 = vst.msk [vmem:[#allocation2 + $0x169] sm:$0xff] %vm252_vm0, %v336_v40  ;;  %v451_v46 = vld [vmem:[#allocation2 + $0xa9] sm:$0xff]  ;;  %v7290_v23 = vld [vmem:[#allocation2 + $0x7a] sm:$0xff] }
  0x66   : > { %525 = vrot.lane.b32.xlu0 %v449_v31, %s6890_s14  ;;  %370 = vst.msk [vmem:[#allocation2 + $0x171] sm:$0xff] %vm252_vm0, %v337_v44  ;;  %v461_v52 = vld [vmem:[#allocation2 + $0x121] sm:$0xff]  ;;  %v7298_v31 = vld [vmem:[#allocation2 + $0x78] sm:$0xff]  ;;  %v7326_v40 = vld [vmem:[#allocation2 + $0x6a] sm:$0xff] }
  0x67   : > { %362 = vst.msk [vmem:[#allocation2 + $0x111] sm:$0xff] %vm252_vm0, %v329_v45  ;;  %v462_v55 = vld [vmem:[#allocation2 + $0x129] sm:$0xff]  ;;  %v7303_v33 = vld [vmem:[#allocation2 + $0x80] sm:$0xff] }
  0x68   : > { %365 = vst.msk [vmem:[#allocation2 + $0x139] sm:$0xff] %vm252_vm0, %v332_v49  ;;  %v454_v50 = vld [vmem:[#allocation2 + $0xc9] sm:$0xff]  ;;  %v7348_v49 = vld [vmem:[#allocation2 + $0x92] sm:$0xff] }
  0x69   : > { %368 = vst.msk [vmem:[#allocation2 + $0x159] sm:$0xff] %vm252_vm0, %v335_v53  ;;  %v464_v56 = vld [vmem:[#allocation2 + $0x141] sm:$0xff]  ;;  %v7338_v44 = vld [vmem:[#allocation2 + $0xaa] sm:$0xff] }
  0x6a   : > { %517 = vrot.lane.b32.xlu2 %v7189_v35, %s6890_s14  ;;  %v465_v58 = vld [vmem:[#allocation2 + $0x151] sm:$0xff]  ;;  %405 = vst.msk [vmem:[#allocation4] sm:$0xff] %vm252_vm0, %v373_v61  ;;  %v646_v45 = vld [vmem:[#allocation2 + $0xc2] sm:$0xff] }
  0x6b   : > { %v457_v54 = vld [vmem:[#allocation2 + $0xf1] sm:$0xff]  ;;  %407 = vst.msk [vmem:[#allocation4 + $0x30] sm:$0xff] %vm252_vm0, %v7233_v2 }
  0x6c   : > { %v467_v59 = vld [vmem:[#allocation2 + $0x169] sm:$0xff]  ;;  %409 = vst.msk [vmem:[#allocation4 + $0x60] sm:$0xff] %vm252_vm0, %v7235_v4  ;;  %v7376_v61 = vld [vmem:[#allocation2 + $0xf8] sm:$0xff] }
  0x6d   : > { %527 = vrot.lane.b32.xlu1 %v450_v36, %s6890_s14  ;;  %v468_v63 = vld [vmem:[#allocation2 + $0x171] sm:$0xff]  ;;  %406 = vst.msk [vmem:[#allocation4 + $0x18] sm:$0xff] %vm252_vm0, %v374_v5  ;;  %v7311_v36 = vld [vmem:[#allocation2 + $0x82] sm:$0xff] }
  0x6e   : > { %531 = vrot.lane.b32.xlu0 %v452_v37, %s6890_s14  ;;  %v460_v57 = vld [vmem:[#allocation2 + $0x111] sm:$0xff]  ;;  %408 = vst.msk [vmem:[#allocation4 + $0x48] sm:$0xff] %vm252_vm0, %v7251_v9  ;;  %v7317_v37 = vld [vmem:[#allocation2 + $0x9a] sm:$0xff]  ;;  %v7388_v5 = vld [vmem:[#allocation2 + $0x108] sm:$0xff] }
  0x6f   : > { %v463_v62 = vld [vmem:[#allocation2 + $0x139] sm:$0xff]  ;;  %410 = vst.msk [vmem:[#allocation4 + $0x78] sm:$0xff] %vm252_vm0, %v7255_v11  ;;  %v647_v53 = vld [vmem:[#allocation2 + $0xca] sm:$0xff] }
  0x70   : > { %v466_v6 = vld [vmem:[#allocation2 + $0x159] sm:$0xff]  ;;  %411 = vst.msk [vmem:[#allocation4 + $0x90] sm:$0xff] %vm252_vm0, %v7259_v12 }
  0x71   : > { %412 = vst.msk [vmem:[#allocation4 + $0xa8] sm:$0xff] %vm252_vm0, %v7272_v16 }
  0x72   : > { %523 = vrot.lane.b32.xlu2 %v7201_v41, %s6890_s14  ;;  %413 = vst.msk [vmem:[#allocation4 + $0xc0] sm:$0xff] %vm252_vm0, %v7278_v19 }
  0x73   : > { %414 = vst.msk [vmem:[#allocation4 + $0xd8] sm:$0xff] %vm252_vm0, %v7282_v20 }
  0x74   : > { %415 = vst.msk [vmem:[#allocation4 + $0xf0] sm:$0xff] %vm252_vm0, %v7298_v31 }
  0x75   : > { %533 = vrot.lane.b32.xlu1 %v453_v42, %s6890_s14  ;;  %416 = vst.msk [vmem:[#allocation4 + $0x108] sm:$0xff] %vm252_vm0, %v7303_v33  ;;  %v7330_v42 = vld [vmem:[#allocation2 + $0xa8] sm:$0xff] }
  0x76   : > { %537 = vrot.lane.b32.xlu0 %v455_v43, %s6890_s14  ;;  %417 = vst.msk [vmem:[#allocation4 + $0x120] sm:$0xff] %vm252_vm0, %v7307_v34  ;;  %v7334_v43 = vld [vmem:[#allocation2 + $0xb0] sm:$0xff] }
  0x77   : > { %418 = vst.msk [vmem:[#allocation4 + $0x138] sm:$0xff] %vm252_vm0, %v7324_v39 }
  0x78   : > { %419 = vst.msk [vmem:[#allocation4 + $0x150] sm:$0xff] %vm252_vm0, %v7330_v42 }
  0x79   : > { %420 = vst.msk [vmem:[#allocation4 + $0x168] sm:$0xff] %vm252_vm0, %v7334_v43 }
  0x7a   : > { %529 = vrot.lane.b32.xlu2 %v451_v46, %s6890_s14  ;;  %426 = vst.msk [vmem:[#allocation4 + $0x1f8] sm:$0xff] %vm252_vm0, %v7376_v61 }
  0x7b   : > { %427 = vst.msk [vmem:[#allocation4 + $0x210] sm:$0xff] %vm252_vm0, %v7388_v5 }
  0x7c   : > { %2237 = vst.msk [vmem:[#allocation3 + $0x18] sm:$0xff] %vm2232_vm12, %v6889_v0 }
  0x7d   : > { %539 = vrot.lane.b32.xlu1 %v456_v47, %s6890_s14  ;;  %v7346_v47 = vld [vmem:[#allocation2 + $0xc0] sm:$0xff]  ;;  %2238 = vst.msk [vmem:[#allocation3 + $0x20] sm:$0xff] %vm2232_vm12, %v6889_v0 }
  0x7e   : > { %543 = vrot.lane.b32.xlu0 %v458_v48, %s6890_s14  ;;  %421 = vst.msk [vmem:[#allocation4 + $0x180] sm:$0xff] %vm252_vm0, %v7346_v47 }
  0x7f   : > { %2233 = vst.msk [vmem:[#allocation3] sm:$0xff] %vm2232_vm12, %v6889_v0 }
  0x80   : > { %2234 = vst.msk [vmem:[#allocation3 + $0x8] sm:$0xff] %vm2232_vm12, %v6889_v0 }
  0x81   : > { %2240 = vst.msk [vmem:[#allocation3 + $0x30] sm:$0xff] %vm2232_vm12, %v6889_v0 }
  0x82   : > { %535 = vrot.lane.b32.xlu2 %v454_v50, %s6890_s14  ;;  %v7352_v50 = vld [vmem:[#allocation2 + $0xc8] sm:$0xff]  ;;  %2241 = vst.msk [vmem:[#allocation3 + $0x38] sm:$0xff] %vm2232_vm12, %v6889_v0 }
  0x83   : > { %422 = vst.msk [vmem:[#allocation4 + $0x198] sm:$0xff] %vm252_vm0, %v7352_v50 }
  0x84   : > { %2243 = vst.msk [vmem:[#allocation3 + $0x48] sm:$0xff] %vm2232_vm12, %v6889_v0 }
  0x85   : > { %545 = vrot.lane.b32.xlu1 %v459_v51, %s6890_s14  ;;  %2244 = vst.msk [vmem:[#allocation3 + $0x50] sm:$0xff] %vm2232_vm12, %v6889_v0 }
  0x86   : > { %549 = vrot.lane.b32.xlu0 %v461_v52, %s6890_s14  ;;  %v7355_v52 = vld [vmem:[#allocation2 + $0xd8] sm:$0xff]  ;;  %2246 = vst.msk [vmem:[#allocation3 + $0x60] sm:$0xff] %vm2232_vm12, %v6889_v0 }
  0x87   : > { %423 = vst.msk [vmem:[#allocation4 + $0x1b0] sm:$0xff] %vm252_vm0, %v7355_v52 }
  0x88   : > { %2247 = vst.msk [vmem:[#allocation3 + $0x68] sm:$0xff] %vm2232_vm12, %v6889_v0 }
  0x89   : > { %2249 = vst.msk [vmem:[#allocation3 + $0x78] sm:$0xff] %vm2232_vm12, %v6889_v0 }
  0x8a   : > { %541 = vrot.lane.b32.xlu2 %v457_v54, %s6890_s14  ;;  %v649_v54 = vld [vmem:[#allocation2 + $0xe2] sm:$0xff]  ;;  %2250 = vst.msk [vmem:[#allocation3 + $0x80] sm:$0xff] %vm2232_vm12, %v6889_v0 }
  0x8b   : > { %2252 = vst.msk [vmem:[#allocation3 + $0x90] sm:$0xff] %vm2232_vm12, %v6889_v0 }
  0x8c   : > { %2253 = vst.msk [vmem:[#allocation3 + $0x98] sm:$0xff] %vm2232_vm12, %v6889_v0 }
  0x8d   : > { %551 = vrot.lane.b32.xlu1 %v462_v55, %s6890_s14  ;;  %2255 = vst.msk [vmem:[#allocation3 + $0xa8] sm:$0xff] %vm2232_vm12, %v6889_v0 }
  0x8e   : > { %555 = vrot.lane.b32.xlu0 %v464_v56, %s6890_s14  ;;  %v7367_v56 = vld [vmem:[#allocation2 + $0xe0] sm:$0xff]  ;;  %2256 = vst.msk [vmem:[#allocation3 + $0xb0] sm:$0xff] %vm2232_vm12, %v6889_v0 }
  0x8f   : > { %424 = vst.msk [vmem:[#allocation4 + $0x1c8] sm:$0xff] %vm252_vm0, %v7367_v56 }
  0x90   : > { %2258 = vst.msk [vmem:[#allocation3 + $0xc0] sm:$0xff] %vm2232_vm12, %v6889_v0 }
  0x91   : > { %v502_v60 = vpop.permute.xlu0 %501  ;;  %2259 = vst.msk [vmem:[#allocation3 + $0xc8] sm:$0xff] %vm2232_vm12, %v6889_v0 }
  0x92   : > { %547 = vrot.lane.b32.xlu2 %v460_v57, %s6890_s14  ;;  %598 = vst.msk [vmem:[#allocation4] sm:$0xff] %vm597_vm2, %v502_v60 }
  0x93   : > { %2261 = vst.msk [vmem:[#allocation3 + $0xd8] sm:$0xff] %vm2232_vm12, %v6889_v0 }
  0x94   : > { %2262 = vst.msk [vmem:[#allocation3 + $0xe0] sm:$0xff] %vm2232_vm12, %v6889_v0 }
  0x95   : > { %557 = vrot.lane.b32.xlu1 %v465_v58, %s6890_s14  ;;  %v7369_v58 = vld [vmem:[#allocation2 + $0xb2] sm:$0xff]  ;;  %2264 = vst.msk [vmem:[#allocation3 + $0xf0] sm:$0xff] %vm2232_vm12, %v6889_v0 }
  0x96   : > { %561 = vrot.lane.b32.xlu0 %v467_v59, %s6890_s14  ;;  %v7373_v59 = vld [vmem:[#allocation2 + $0xf0] sm:$0xff]  ;;  %2265 = vst.msk [vmem:[#allocation3 + $0xf8] sm:$0xff] %vm2232_vm12, %v6889_v0 }
  0x97   : > { %425 = vst.msk [vmem:[#allocation4 + $0x1e0] sm:$0xff] %vm252_vm0, %v7373_v59 }
  0x98   : > { %2267 = vst.msk [vmem:[#allocation3 + $0x108] sm:$0xff] %vm2232_vm12, %v6889_v0 }
  0x99   : > { %2268 = vst.msk [vmem:[#allocation3 + $0x110] sm:$0xff] %vm2232_vm12, %v6889_v0 }
  0x9a   : > { %553 = vrot.lane.b32.xlu2 %v463_v62, %s6890_s14  ;;  %v650_v62 = vld [vmem:[#allocation2 + $0xf2] sm:$0xff]  ;;  %2270 = vst.msk [vmem:[#allocation3 + $0x120] sm:$0xff] %vm2232_vm12, %v6889_v0 }
  0x9b   : > { %2271 = vst.msk [vmem:[#allocation3 + $0x128] sm:$0xff] %vm2232_vm12, %v6889_v0 }
  0x9c   : > { %2273 = vst.msk [vmem:[#allocation3 + $0x138] sm:$0xff] %vm2232_vm12, %v6889_v0 }
  0x9d   : > { %563 = vrot.lane.b32.xlu1 %v468_v63, %s6890_s14  ;;  %v652_v63 = vld [vmem:[#allocation2 + $0x10a] sm:$0xff]  ;;  %2274 = vst.msk [vmem:[#allocation3 + $0x140] sm:$0xff] %vm2232_vm12, %v6889_v0 }
  0x9e   : > { %696 = vrot.lane.b32.xlu0 %v631_v1, %s6891_s20  ;;  %2276 = vst.msk [vmem:[#allocation3 + $0x150] sm:$0xff] %vm2232_vm12, %v6889_v0 }
  0x9f   : > { %2277 = vst.msk [vmem:[#allocation3 + $0x158] sm:$0xff] %vm2232_vm12, %v6889_v0 }
  0xa0   : > { %2279 = vst.msk [vmem:[#allocation3 + $0x168] sm:$0xff] %vm2232_vm12, %v6889_v0 }
  0xa1   : > { %2280 = vst.msk [vmem:[#allocation3 + $0x170] sm:$0xff] %vm2232_vm12, %v6889_v0 }
  0xa2   : > { %559 = vrot.lane.b32.xlu2 %v466_v6, %s6890_s14  ;;  %2282 = vst.msk [vmem:[#allocation3 + $0x180] sm:$0xff] %vm2232_vm12, %v6889_v0  ;;  %s6845_s14 = scalar_lea.hbm %s11099_s7, 512 }
  0xa3   : > { %2283 = vst.msk [vmem:[#allocation3 + $0x188] sm:$0xff] %vm2232_vm12, %v6889_v0 }
  0xa4   : > { %2285 = vst.msk [vmem:[#allocation3 + $0x198] sm:$0xff] %vm2232_vm12, %v6889_v0 }
  0xa5   : > { %698 = vrot.lane.b32.xlu1 %v7242_v7, %s6891_s20  ;;  %2286 = vst.msk [vmem:[#allocation3 + $0x1a0] sm:$0xff] %vm2232_vm12, %v6889_v0 }
  0xa6   : > { %702 = vrot.lane.b32.xlu0 %v7245_v8, %s6891_s20  ;;  %2239 = vst.msk [vmem:[#allocation3 + $0x28] sm:$0x3] %vm2235_vm13, %v6889_v0 }
  0xa7   : > { %2236 = vst.msk [vmem:[#allocation3 + $0x10] sm:$0x3] %vm2235_vm13, %v6889_v0 }
  0xa8   : > { %2242 = vst.msk [vmem:[#allocation3 + $0x40] sm:$0x3] %vm2235_vm13, %v6889_v0 }
  0xa9   : > { %2245 = vst.msk [vmem:[#allocation3 + $0x58] sm:$0x3] %vm2235_vm13, %v6889_v0 }
  0xaa   : > { %694 = vrot.lane.b32.xlu2 %v630_v10, %s6891_s20  ;;  %v7390_v10 = vld [vmem:[#allocation2 + $0xda] sm:$0xff]  ;;  %2248 = vst.msk [vmem:[#allocation3 + $0x70] sm:$0x3] %vm2235_vm13, %v6889_v0 }
  0xab   : > { %2251 = vst.msk [vmem:[#allocation3 + $0x88] sm:$0x3] %vm2235_vm13, %v6889_v0 }
  0xac   : > { %2254 = vst.msk [vmem:[#allocation3 + $0xa0] sm:$0x3] %vm2235_vm13, %v6889_v0 }
  0xad   : > { %704 = vrot.lane.b32.xlu1 %v7263_v13, %s6891_s20  ;;  %2257 = vst.msk [vmem:[#allocation3 + $0xb8] sm:$0x3] %vm2235_vm13, %v6889_v0 }
  0xae   : > { %708 = vrot.lane.b32.xlu0 %v7266_v14, %s6891_s20  ;;  %2260 = vst.msk [vmem:[#allocation3 + $0xd0] sm:$0x3] %vm2235_vm13, %v6889_v0 }
  0xaf   : > { %2263 = vst.msk [vmem:[#allocation3 + $0xe8] sm:$0x3] %vm2235_vm13, %v6889_v0 }
  0xb0   : > { %2266 = vst.msk [vmem:[#allocation3 + $0x100] sm:$0x3] %vm2235_vm13, %v6889_v0 }
  0xb1   : > { %2269 = vst.msk [vmem:[#allocation3 + $0x118] sm:$0x3] %vm2235_vm13, %v6889_v0 }
  0xb2   : > { %700 = vrot.lane.b32.xlu2 %v7274_v18, %s6891_s20  ;;  %2272 = vst.msk [vmem:[#allocation3 + $0x130] sm:$0x3] %vm2235_vm13, %v6889_v0 }
  0xb3   : > { %2275 = vst.msk [vmem:[#allocation3 + $0x148] sm:$0x3] %vm2235_vm13, %v6889_v0 }
  0xb4   : > { %v506_v26 = vpop.permute.xlu1 %505  ;;  %v510_v27 = vpop.permute.xlu2 %509  ;;  %2278 = vst.msk [vmem:[#allocation3 + $0x160] sm:$0x3] %vm2235_vm13, %v6889_v0 }
  0xb5   : > { %710 = vrot.lane.b32.xlu1 %v7286_v21, %s6891_s20  ;;  %600 = vst.msk [vmem:[#allocation4 + $0x30] sm:$0xff] %vm597_vm2, %v506_v26  ;;  %v504_v28 = vpop.permute.xlu0 %503  ;;  %v7394_v26 = vld [vmem:[#allocation2 + $0x110] sm:$0xff] }
  0xb6   : > { %714 = vrot.lane.b32.xlu0 %v7290_v23, %s6891_s20  ;;  %602 = vst.msk [vmem:[#allocation4 + $0x60] sm:$0xff] %vm597_vm2, %v510_v27 }
  0xb7   : > { %599 = vst.msk [vmem:[#allocation4 + $0x18] sm:$0xff] %vm597_vm2, %v504_v28  ;;  %v7397_v28 = vld [vmem:[#allocation2 + $0x120] sm:$0xff] }
  0xb8   : > { %428 = vst.msk [vmem:[#allocation4 + $0x228] sm:$0xff] %vm252_vm0, %v7394_v26 }
  0xb9   : > { %429 = vst.msk [vmem:[#allocation4 + $0x240] sm:$0xff] %vm252_vm0, %v7397_v28 }
  0xba   : > { %706 = vrot.lane.b32.xlu2 %v7301_v32, %s6891_s20  ;;  %2281 = vst.msk [vmem:[#allocation3 + $0x178] sm:$0x3] %vm2235_vm13, %v6889_v0 }
  0xbb   : > { %2284 = vst.msk [vmem:[#allocation3 + $0x190] sm:$0x3] %vm2235_vm13, %v6889_v0 }
  0xbc   : > { %v512_v38 = vpop.permute.xlu2 %511  ;;  %2287 = vst.msk [vmem:[#allocation3 + $0x1a8] sm:$0x3] %vm2235_vm13, %v6889_v0 }
  0xbd   : > { %716 = vrot.lane.b32.xlu1 %v7311_v36, %s6891_s20  ;;  %603 = vst.msk [vmem:[#allocation4 + $0x78] sm:$0xff] %vm597_vm2, %v512_v38  ;;  %v653_v38 = vld [vmem:[#allocation2 + $0x112] sm:$0xff] }
  0xbe   : > { %720 = vrot.lane.b32.xlu0 %v7317_v37, %s6891_s20 }
  0xc2   : > { %712 = vrot.lane.b32.xlu2 %v7326_v40, %s6891_s20 }
  0xc4   : > { %v518_v46 = vpop.permute.xlu2 %517 }
  0xc5   : > { %722 = vrot.lane.b32.xlu1 %v7338_v44, %s6891_s20  ;;  %606 = vst.msk [vmem:[#allocation4 + $0xc0] sm:$0xff] %vm597_vm2, %v518_v46 }
  0xc6   : > { %726 = vrot.lane.b32.xlu0 %v646_v45, %s6891_s20  ;;  %v655_v45 = vld [vmem:[#allocation2 + $0x12a] sm:$0xff] }
  0xc7   : > { %v508_v48 = vpop.permute.xlu1 %507 }
  0xc8   : > { %601 = vst.msk [vmem:[#allocation4 + $0x48] sm:$0xff] %vm597_vm2, %v508_v48  ;;  %v514_v51 = vpop.permute.xlu0 %513  ;;  %v7409_v48 = vld [vmem:[#allocation2 + $0x128] sm:$0xff] }
  0xc9   : > { %604 = vst.msk [vmem:[#allocation4 + $0x90] sm:$0xff] %vm597_vm2, %v514_v51 }
  0xca   : > { %718 = vrot.lane.b32.xlu2 %v7348_v49, %s6891_s20  ;;  %430 = vst.msk [vmem:[#allocation4 + $0x258] sm:$0xff] %vm252_vm0, %v7409_v48 }
  0xcc   : > { %v524_v55 = vpop.permute.xlu2 %523 }
  0xcd   : > { %728 = vrot.lane.b32.xlu1 %v647_v53, %s6891_s20  ;;  %609 = vst.msk [vmem:[#allocation4 + $0x108] sm:$0xff] %vm597_vm2, %v524_v55  ;;  %v651_v53 = vld [vmem:[#allocation2 + $0xfa] sm:$0xff] }
  0xce   : > { %732 = vrot.lane.b32.xlu0 %v649_v54, %s6891_s20  ;;  %v399_v54 = vld [vmem:[#allocation2 + $0x138] sm:$0xff] }
  0xcf   : > { %v516_v57 = vpop.permute.xlu1 %515  ;;  %431 = vst.msk [vmem:[#allocation4 + $0x270] sm:$0xff] %vm252_vm0, %v399_v54 }
  0xd0   : > { %605 = vst.msk [vmem:[#allocation4 + $0xa8] sm:$0xff] %vm597_vm2, %v516_v57  ;;  %v520_v60 = vpop.permute.xlu0 %519  ;;  %v400_v57 = vld [vmem:[#allocation2 + $0x140] sm:$0xff] }
  0xd1   : > { %607 = vst.msk [vmem:[#allocation4 + $0xd8] sm:$0xff] %vm597_vm2, %v520_v60  ;;  %v656_v60 = vld [vmem:[#allocation2 + $0x13a] sm:$0xff] }
  0xd2   : > { %724 = vrot.lane.b32.xlu2 %v7369_v58, %s6891_s20  ;;  %432 = vst.msk [vmem:[#allocation4 + $0x288] sm:$0xff] %vm252_vm0, %v400_v57 }
  0xd4   : > { %v530_v1 = vpop.permute.xlu2 %529 }
  0xd5   : > { %734 = vrot.lane.b32.xlu1 %v650_v62, %s6891_s20  ;;  %612 = vst.msk [vmem:[#allocation4 + $0x150] sm:$0xff] %vm597_vm2, %v530_v1  ;;  %v658_v62 = vld [vmem:[#allocation2 + $0x152] sm:$0xff] }
  0xd6   : > { %738 = vrot.lane.b32.xlu0 %v652_v63, %s6891_s20  ;;  %v401_v1 = vld [vmem:[#allocation2 + $0x150] sm:$0xff] }
  0xd7   : > { %v522_v6 = vpop.permute.xlu1 %521  ;;  %433 = vst.msk [vmem:[#allocation4 + $0x2a0] sm:$0xff] %vm252_vm0, %v401_v1 }
  0xd8   : > { %608 = vst.msk [vmem:[#allocation4 + $0xf0] sm:$0xff] %vm597_vm2, %v522_v6  ;;  %v526_v27 = vpop.permute.xlu0 %525 }
  0xd9   : > { %610 = vst.msk [vmem:[#allocation4 + $0x120] sm:$0xff] %vm597_vm2, %v526_v27  ;;  %v654_v27 = vld [vmem:[#allocation2 + $0x122] sm:$0xff] }
  0xda   : > { %730 = vrot.lane.b32.xlu2 %v7390_v10, %s6891_s20 }
  0xdc   : > { %v536_v46 = vpop.permute.xlu2 %535 }
  0xdd   : > { %740 = vrot.lane.b32.xlu1 %v653_v38, %s6891_s20  ;;  %615 = vst.msk [vmem:[#allocation4 + $0x198] sm:$0xff] %vm597_vm2, %v536_v46  ;;  %v402_v38 = vld [vmem:[#allocation2 + $0x158] sm:$0xff]  ;;  %v403_v46 = vld [vmem:[#allocation2 + $0x168] sm:$0xff] }
  0xde   : > { %744 = vrot.lane.b32.xlu0 %v655_v45, %s6891_s20  ;;  %434 = vst.msk [vmem:[#allocation4 + $0x2b8] sm:$0xff] %vm252_vm0, %v402_v38 }
  0xdf   : > { %v528_v51 = vpop.permute.xlu1 %527  ;;  %435 = vst.msk [vmem:[#allocation4 + $0x2d0] sm:$0xff] %vm252_vm0, %v403_v46 }
  0xe0   : > { %611 = vst.msk [vmem:[#allocation4 + $0x138] sm:$0xff] %vm597_vm2, %v528_v51  ;;  %v532_v55 = vpop.permute.xlu0 %531  ;;  %v659_v51 = vld [vmem:[#allocation2 + $0x15a] sm:$0xff] }
  0xe1   : > { %613 = vst.msk [vmem:[#allocation4 + $0x168] sm:$0xff] %vm597_vm2, %v532_v55  ;;  %v404_v55 = vld [vmem:[#allocation2 + $0x170] sm:$0xff] }
  0xe2   : > { %736 = vrot.lane.b32.xlu2 %v651_v53, %s6891_s20  ;;  %v661_v53 = vld [vmem:[#allocation2 + $0x172] sm:$0xff]  ;;  %436 = vst.msk [vmem:[#allocation4 + $0x2e8] sm:$0xff] %vm252_vm0, %v404_v55 }
  0xe4   : > { %v542_v63 = vpop.permute.xlu2 %541 }
  0xe5   : > { %746 = vrot.lane.b32.xlu1 %v656_v60, %s6891_s20  ;;  %618 = vst.msk [vmem:[#allocation4 + $0x1e0] sm:$0xff] %vm597_vm2, %v542_v63  ;;  %v657_v60 = vld [vmem:[#allocation2 + $0x142] sm:$0xff] }
  0xe6   : > { %750 = vrot.lane.b32.xlu0 %v658_v62, %s6891_s20 }
  0xe7   : > { %v534_v6 = vpop.permute.xlu1 %533 }
  0xe8   : > { %614 = vst.msk [vmem:[#allocation4 + $0x180] sm:$0xff] %vm597_vm2, %v534_v6  ;;  %v538_v45 = vpop.permute.xlu0 %537  ;;  %v660_v6 = vld [vmem:[#allocation2 + $0x16a] sm:$0xff] }
  0xe9   : > { %616 = vst.msk [vmem:[#allocation4 + $0x1b0] sm:$0xff] %vm597_vm2, %v538_v45 }
  0xea   : > { %742 = vrot.lane.b32.xlu2 %v654_v27, %s6891_s20 }
  0xec   : > { %v548_v54 = vpop.permute.xlu2 %547 }
  0xed   : > { %752 = vrot.lane.b32.xlu1 %v659_v51, %s6891_s20  ;;  %621 = vst.msk [vmem:[#allocation4 + $0x228] sm:$0xff] %vm597_vm2, %v548_v54 }
  0xee   : > { %756 = vrot.lane.b32.xlu0 %v661_v53, %s6891_s20 }
  0xef   : > { %v540_v57 = vpop.permute.xlu1 %539 }
  0xf0   : > { %617 = vst.msk [vmem:[#allocation4 + $0x1c8] sm:$0xff] %vm597_vm2, %v540_v57  ;;  %v544_v62 = vpop.permute.xlu0 %543 }
  0xf1   : > { %619 = vst.msk [vmem:[#allocation4 + $0x1f8] sm:$0xff] %vm597_vm2, %v544_v62 }
  0xf2   : > { %748 = vrot.lane.b32.xlu2 %v657_v60, %s6891_s20 }
  0xf4   : > { %v554_v63 = vpop.permute.xlu2 %553 }
  0xf5   : > { %887 = vrot.lane.b32.xlu1 %v7233_v2, %s6892_s21  ;;  %624 = vst.msk [vmem:[#allocation4 + $0x270] sm:$0xff] %vm597_vm2, %v554_v63 }
  0xf6   : > { %891 = vrot.lane.b32.xlu0 %v7235_v4, %s6892_s21 }
  0xf7   : > { %v546_v1 = vpop.permute.xlu1 %545 }
  0xf8   : > { %620 = vst.msk [vmem:[#allocation4 + $0x210] sm:$0xff] %vm597_vm2, %v546_v1  ;;  %v550_v27 = vpop.permute.xlu0 %549 }
  0xf9   : > { %622 = vst.msk [vmem:[#allocation4 + $0x240] sm:$0xff] %vm597_vm2, %v550_v27 }
  0xfa   : > { %754 = vrot.lane.b32.xlu2 %v660_v6, %s6891_s20  ;;  %s6739_s20 = sshll.u32 %s6967_s0, 8 }
  0xfc   : > { %v560_v38 = vpop.permute.xlu2 %559 }
  0xfd   : > { %893 = vrot.lane.b32.xlu1 %v7255_v11, %s6892_s21  ;;  %627 = vst.msk [vmem:[#allocation4 + $0x2b8] sm:$0xff] %vm597_vm2, %v560_v38 }
  0xfe   : > { %897 = vrot.lane.b32.xlu0 %v7272_v16, %s6892_s21 }
  0xff   : > { %v552_v2 = vpop.permute.xlu1 %551 }
 0x100   : > { %623 = vst.msk [vmem:[#allocation4 + $0x258] sm:$0xff] %vm597_vm2, %v552_v2  ;;  %v556_v45 = vpop.permute.xlu0 %555 }
 0x101   : > { %625 = vst.msk [vmem:[#allocation4 + $0x288] sm:$0xff] %vm597_vm2, %v556_v45 }
 0x102   : > { %889 = vrot.lane.b32.xlu2 %v7251_v9, %s6892_s21 }
 0x104   : > { %v695_v46 = vpop.permute.xlu2 %694 }
 0x105   : > { %899 = vrot.lane.b32.xlu1 %v7278_v19, %s6892_s21  ;;  %791 = vst.msk [vmem:[#allocation4] sm:$0xff] %vm790_vm3, %v695_v46 }
 0x106   : > { %903 = vrot.lane.b32.xlu0 %v7298_v31, %s6892_s21 }
 0x107   : > { %v558_v51 = vpop.permute.xlu1 %557 }
 0x108   : > { %626 = vst.msk [vmem:[#allocation4 + $0x2a0] sm:$0xff] %vm597_vm2, %v558_v51  ;;  %v562_v53 = vpop.permute.xlu0 %561 }
 0x109   : > { %628 = vst.msk [vmem:[#allocation4 + $0x2d0] sm:$0xff] %vm597_vm2, %v562_v53 }
 0x10a   : > { %895 = vrot.lane.b32.xlu2 %v7259_v12, %s6892_s21 }
 0x10c   : > { %v701_v9 = vpop.permute.xlu2 %700 }
 0x10d   : > { %905 = vrot.lane.b32.xlu1 %v7303_v33, %s6892_s21  ;;  %794 = vst.msk [vmem:[#allocation4 + $0x48] sm:$0xff] %vm790_vm3, %v701_v9 }
 0x10e   : > { %909 = vrot.lane.b32.xlu0 %v7324_v39, %s6892_s21 }
 0x10f   : > { %v564_v54 = vpop.permute.xlu1 %563 }
 0x110   : > { %629 = vst.msk [vmem:[#allocation4 + $0x2e8] sm:$0xff] %vm597_vm2, %v564_v54  ;;  %v697_v55 = vpop.permute.xlu0 %696 }
 0x111   : > { %792 = vst.msk [vmem:[#allocation4 + $0x18] sm:$0xff] %vm790_vm3, %v697_v55 }
 0x112   : > { %901 = vrot.lane.b32.xlu2 %v7282_v20, %s6892_s21 }
 0x114   : > { %v707_v57 = vpop.permute.xlu2 %706 }
 0x115   : > { %911 = vrot.lane.b32.xlu1 %v7330_v42, %s6892_s21  ;;  %797 = vst.msk [vmem:[#allocation4 + $0x90] sm:$0xff] %vm790_vm3, %v707_v57 }
 0x116   : > { %915 = vrot.lane.b32.xlu0 %v7346_v47, %s6892_s21 }
 0x117   : > { %v699_v60 = vpop.permute.xlu1 %698 }
 0x118   : > { %793 = vst.msk [vmem:[#allocation4 + $0x30] sm:$0xff] %vm790_vm3, %v699_v60  ;;  %v703_v62 = vpop.permute.xlu0 %702 }
 0x119   : > { %795 = vst.msk [vmem:[#allocation4 + $0x60] sm:$0xff] %vm790_vm3, %v703_v62 }
 0x11a   : > { %907 = vrot.lane.b32.xlu2 %v7307_v34, %s6892_s21 }
 0x11c   : > { %v713_v63 = vpop.permute.xlu2 %712 }
 0x11d   : > { %917 = vrot.lane.b32.xlu1 %v7352_v50, %s6892_s21  ;;  %800 = vst.msk [vmem:[#allocation4 + $0xd8] sm:$0xff] %vm790_vm3, %v713_v63 }
 0x11e   : > { %921 = vrot.lane.b32.xlu0 %v7367_v56, %s6892_s21 }
 0x11f   : > { %v705_v1 = vpop.permute.xlu1 %704 }
 0x120   : > { %796 = vst.msk [vmem:[#allocation4 + $0x78] sm:$0xff] %vm790_vm3, %v705_v1  ;;  %v709_v6 = vpop.permute.xlu0 %708 }
 0x121   : > { %798 = vst.msk [vmem:[#allocation4 + $0xa8] sm:$0xff] %vm790_vm3, %v709_v6 }
 0x122   : > { %913 = vrot.lane.b32.xlu2 %v7334_v43, %s6892_s21 }
 0x124   : > { %v719_v27 = vpop.permute.xlu2 %718 }
 0x125   : > { %923 = vrot.lane.b32.xlu1 %v7373_v59, %s6892_s21  ;;  %803 = vst.msk [vmem:[#allocation4 + $0x120] sm:$0xff] %vm790_vm3, %v719_v27 }
 0x126   : > { %927 = vrot.lane.b32.xlu0 %v7388_v5, %s6892_s21 }
 0x127   : > { %v711_v38 = vpop.permute.xlu1 %710 }
 0x128   : > { %799 = vst.msk [vmem:[#allocation4 + $0xc0] sm:$0xff] %vm790_vm3, %v711_v38  ;;  %v715_v2 = vpop.permute.xlu0 %714 }
 0x129   : > { %801 = vst.msk [vmem:[#allocation4 + $0xf0] sm:$0xff] %vm790_vm3, %v715_v2 }
 0x12a   : > { %919 = vrot.lane.b32.xlu2 %v7355_v52, %s6892_s21 }
 0x12c   : > { %v725_v45 = vpop.permute.xlu2 %724 }
 0x12d   : > { %929 = vrot.lane.b32.xlu1 %v7394_v26, %s6892_s21  ;;  %806 = vst.msk [vmem:[#allocation4 + $0x168] sm:$0xff] %vm790_vm3, %v725_v45  ;;  %v2015_v45 = vld [vmem:[%s11094_s2 + $0x8] sm:$0xff] }
 0x12e   : > { %933 = vrot.lane.b32.xlu0 %v7409_v48, %s6892_s21 }
 0x12f   : > { %v717_v59 = vpop.permute.xlu1 %716 }
 0x130   : > { %802 = vst.msk [vmem:[#allocation4 + $0x108] sm:$0xff] %vm790_vm3, %v717_v59  ;;  %v721_v5 = vpop.permute.xlu0 %720  ;;  %v2014_v59 = vld [vmem:[%s11094_s2] sm:$0xff] }
 0x131   : > { %804 = vst.msk [vmem:[#allocation4 + $0x138] sm:$0xff] %vm790_vm3, %v721_v5 }
 0x132   : > { %925 = vrot.lane.b32.xlu2 %v7376_v61, %s6892_s21 }
 0x134   : > { %v731_v46 = vpop.permute.xlu2 %730 }
 0x135   : > { %1080 = vrot.lane.b32.xlu1 %v7088_v3, %s6893_s22  ;;  %809 = vst.msk [vmem:[#allocation4 + $0x1b0] sm:$0xff] %vm790_vm3, %v731_v46 }
 0x136   : > { %1467 = vrot.lane.b32.xlu0 %v7235_v4, %s6894_s23 }
 0x137   : > { %v723_v26 = vpop.permute.xlu1 %722 }
 0x138   : > { %805 = vst.msk [vmem:[#allocation4 + $0x150] sm:$0xff] %vm790_vm3, %v723_v26  ;;  %v727_v48 = vpop.permute.xlu0 %726 }
 0x139   : > { %807 = vst.msk [vmem:[#allocation4 + $0x180] sm:$0xff] %vm790_vm3, %v727_v48 }
 0x13a   : > { %931 = vrot.lane.b32.xlu2 %v7397_v28, %s6892_s21 }
 0x13c   : > { %v737_v51 = vpop.permute.xlu2 %736 }
 0x13d   : > { %1660 = vrot.lane.b32.xlu1 %v7152_v22, %s6895_s24  ;;  %812 = vst.msk [vmem:[#allocation4 + $0x1f8] sm:$0xff] %vm790_vm3, %v737_v51 }
 0x13e   : > { %1082 = vrot.lane.b32.xlu0 %v7134_v15, %s6893_s22 }
 0x13f   : > { %v729_v3 = vpop.permute.xlu1 %728 }
 0x140   : > { %808 = vst.msk [vmem:[#allocation4 + $0x198] sm:$0xff] %vm790_vm3, %v729_v3  ;;  %v733_v4 = vpop.permute.xlu0 %732 }
 0x141   : > { %810 = vst.msk [vmem:[#allocation4 + $0x1c8] sm:$0xff] %vm790_vm3, %v733_v4 }
 0x142   : > { %1273 = vrot.lane.b32.xlu2 %v7242_v7, %s6896_s25 }
 0x144   : > { %v743_v28 = vpop.permute.xlu2 %742 }
 0x145   : > { %1275 = vrot.lane.b32.xlu1 %v7274_v18, %s6896_s25  ;;  %815 = vst.msk [vmem:[#allocation4 + $0x240] sm:$0xff] %vm790_vm3, %v743_v28  ;;  %v1026_v28 = vld [vmem:[#allocation2 + $0x91] sm:$0xff] }
 0x146   : > { %1662 = vrot.lane.b32.xlu0 %v7174_v29, %s6895_s24 }
 0x147   : > { %v735_v15 = vpop.permute.xlu1 %734 }
 0x148   : > { %811 = vst.msk [vmem:[#allocation4 + $0x1e0] sm:$0xff] %vm790_vm3, %v735_v15  ;;  %v739_v53 = vpop.permute.xlu0 %738  ;;  %v1605_v15 = vld [vmem:[#allocation2 + $0x99] sm:$0xff] }
 0x149   : > { %813 = vst.msk [vmem:[#allocation4 + $0x210] sm:$0xff] %vm790_vm3, %v739_v53 }
 0x14a   : > { %1853 = vrot.lane.b32.xlu2 %v7245_v8, %s6897_s30 }
 0x14c   : > { %v749_v7 = vpop.permute.xlu2 %748 }
 0x14d   : > { %1855 = vrot.lane.b32.xlu1 %v7263_v13, %s6897_s30  ;;  %818 = vst.msk [vmem:[#allocation4 + $0x288] sm:$0xff] %vm790_vm3, %v749_v7 }
 0x14e   : > { %1277 = vrot.lane.b32.xlu0 %v7245_v8, %s6896_s25 }
 0x14f   : > { %v741_v18 = vpop.permute.xlu1 %740 }
 0x150   : > { %814 = vst.msk [vmem:[#allocation4 + $0x228] sm:$0xff] %vm790_vm3, %v741_v18  ;;  %v745_v9 = vpop.permute.xlu0 %744 }
 0x151   : > { %816 = vst.msk [vmem:[#allocation4 + $0x258] sm:$0xff] %vm790_vm3, %v745_v9  ;;  %v1606_v9 = vld [vmem:[#allocation2 + $0xa9] sm:$0xff] }
 0x152   : > { %1469 = vrot.lane.b32.xlu2 %v7255_v11, %s6894_s23 }
 0x154   : > { %v755_v54 = vpop.permute.xlu2 %754 }
 0x155   : > { %1471 = vrot.lane.b32.xlu1 %v7259_v12, %s6894_s23  ;;  %821 = vst.msk [vmem:[#allocation4 + $0x2d0] sm:$0xff] %vm790_vm3, %v755_v54 }
 0x156   : > { %1857 = vrot.lane.b32.xlu0 %v7301_v32, %s6897_s30 }
 0x157   : > { %v747_v55 = vpop.permute.xlu1 %746 }
 0x158   : > { %817 = vst.msk [vmem:[#allocation4 + $0x270] sm:$0xff] %vm790_vm3, %v747_v55  ;;  %v751_v8 = vpop.permute.xlu0 %750 }
 0x159   : > { %819 = vst.msk [vmem:[#allocation4 + $0x2a0] sm:$0xff] %vm790_vm3, %v751_v8 }
 0x15a   : > { %1084 = vrot.lane.b32.xlu2 %v7152_v22, %s6893_s22 }
 0x15c   : > { %v890_v11 = vpop.permute.xlu2 %889 }
 0x15d   : > { %1086 = vrot.lane.b32.xlu1 %v7174_v29, %s6893_s22  ;;  %985 = vst.msk [vmem:[#allocation4 + $0x18] sm:$0xff] %vm983_vm4, %v890_v11 }
 0x15e   : > { %1473 = vrot.lane.b32.xlu0 %v7272_v16, %s6894_s23 }
 0x15f   : > { %v753_v12 = vpop.permute.xlu1 %752 }
 0x160   : > { %820 = vst.msk [vmem:[#allocation4 + $0x2b8] sm:$0xff] %vm790_vm3, %v753_v12  ;;  %v757_v57 = vpop.permute.xlu0 %756 }
 0x161   : > { %822 = vst.msk [vmem:[#allocation4 + $0x2e8] sm:$0xff] %vm790_vm3, %v757_v57 }
 0x162   : > { %1664 = vrot.lane.b32.xlu2 %v7140_v17, %s6895_s24 }
 0x164   : > { %v896_v22 = vpop.permute.xlu2 %895 }
 0x165   : > { %1666 = vrot.lane.b32.xlu1 %v7156_v24, %s6895_s24  ;;  %988 = vst.msk [vmem:[#allocation4 + $0x60] sm:$0xff] %vm983_vm4, %v896_v22 }
 0x166   : > { %1088 = vrot.lane.b32.xlu0 %v7140_v17, %s6893_s22 }
 0x167   : > { %v888_v29 = vpop.permute.xlu1 %887 }
 0x168   : > { %984 = vst.msk [vmem:[#allocation4] sm:$0xff] %vm983_vm4, %v888_v29  ;;  %v892_v16 = vpop.permute.xlu0 %891 }
 0x169   : > { %986 = vst.msk [vmem:[#allocation4 + $0x30] sm:$0xff] %vm983_vm4, %v892_v16  ;;  %v1029_v16 = vld [vmem:[#allocation2 + $0xb1] sm:$0xff] }
 0x16a   : > { %1279 = vrot.lane.b32.xlu2 %v7263_v13, %s6896_s25 }
 0x16c   : > { %v902_v60 = vpop.permute.xlu2 %901 }
 0x16d   : > { %1281 = vrot.lane.b32.xlu1 %v7301_v32, %s6896_s25  ;;  %991 = vst.msk [vmem:[#allocation4 + $0xa8] sm:$0xff] %vm983_vm4, %v902_v60  ;;  %v1608_v60 = vld [vmem:[#allocation2 + $0xc1] sm:$0xff] }
 0x16e   : > { %1668 = vrot.lane.b32.xlu0 %v7189_v35, %s6895_s24 }
 0x16f   : > { %v894_v62 = vpop.permute.xlu1 %893 }
 0x170   : > { %987 = vst.msk [vmem:[#allocation4 + $0x48] sm:$0xff] %vm983_vm4, %v894_v62  ;;  %v898_v17 = vpop.permute.xlu0 %897 }
 0x171   : > { %989 = vst.msk [vmem:[#allocation4 + $0x78] sm:$0xff] %vm983_vm4, %v898_v17  ;;  %v1221_v17 = vld [vmem:[#allocation2 + $0xaa] sm:$0xff] }
 0x172   : > { %1859 = vrot.lane.b32.xlu2 %v7266_v14, %s6897_s30 }
 0x174   : > { %v908_v63 = vpop.permute.xlu2 %907 }
 0x175   : > { %1861 = vrot.lane.b32.xlu1 %v7286_v21, %s6897_s30  ;;  %994 = vst.msk [vmem:[#allocation4 + $0xf0] sm:$0xff] %vm983_vm4, %v908_v63 }
 0x176   : > { %1283 = vrot.lane.b32.xlu0 %v7266_v14, %s6896_s25 }
 0x177   : > { %v900_v13 = vpop.permute.xlu1 %899 }
 0x178   : > { %990 = vst.msk [vmem:[#allocation4 + $0x90] sm:$0xff] %vm983_vm4, %v900_v13  ;;  %v904_v32 = vpop.permute.xlu0 %903 }
 0x179   : > { %992 = vst.msk [vmem:[#allocation4 + $0xc0] sm:$0xff] %vm983_vm4, %v904_v32  ;;  %v1609_v32 = vld [vmem:[#allocation2 + $0xc9] sm:$0xff] }
 0x17a   : > { %1475 = vrot.lane.b32.xlu2 %v7278_v19, %s6894_s23 }
 0x17c   : > { %v914_v1 = vpop.permute.xlu2 %913 }
 0x17d   : > { %1477 = vrot.lane.b32.xlu1 %v7282_v20, %s6894_s23  ;;  %997 = vst.msk [vmem:[#allocation4 + $0x138] sm:$0xff] %vm983_vm4, %v914_v1  ;;  %v1601_v20 = vld [vmem:[#allocation2 + $0x69] sm:$0xff] }
 0x17e   : > { %1863 = vrot.lane.b32.xlu0 %v7326_v40, %s6897_s30 }
 0x17f   : > { %v906_v6 = vpop.permute.xlu1 %905 }
 0x180   : > { %993 = vst.msk [vmem:[#allocation4 + $0xd8] sm:$0xff] %vm983_vm4, %v906_v6  ;;  %v910_v14 = vpop.permute.xlu0 %909 }
 0x181   : > { %995 = vst.msk [vmem:[#allocation4 + $0x108] sm:$0xff] %vm983_vm4, %v910_v14 }
 0x182   : > { %1090 = vrot.lane.b32.xlu2 %v7156_v24, %s6893_s22 }
 0x184   : > { %v920_v27 = vpop.permute.xlu2 %919 }
 0x185   : > { %1092 = vrot.lane.b32.xlu1 %v7189_v35, %s6893_s22  ;;  %1000 = vst.msk [vmem:[#allocation4 + $0x180] sm:$0xff] %vm983_vm4, %v920_v27  ;;  %v1223_v27 = vld [vmem:[#allocation2 + $0xc2] sm:$0xff] }
 0x186   : > { %1479 = vrot.lane.b32.xlu0 %v7298_v31, %s6894_s23  ;;  %v2017_v31 = vld [vmem:[%s11094_s2 + $0x18] sm:$0x7] }
 0x187   : > { %v912_v19 = vpop.permute.xlu1 %911  ;;  %6633 = vmatpush.msk.msra.mxu0 %vm2115_vm5, %v2017_v31  ;;  %6740 = vmatpush.msk.msra.mxu2 %vm2115_vm5, %v2017_v31 }
 0x188   : > { %996 = vst.msk [vmem:[#allocation4 + $0x120] sm:$0xff] %vm983_vm4, %v912_v19  ;;  %v916_v38 = vpop.permute.xlu0 %915  ;;  %v1802_v19 = vld [vmem:[#allocation2 + $0xca] sm:$0xff] }
 0x189   : > { %998 = vst.msk [vmem:[#allocation4 + $0x150] sm:$0xff] %vm983_vm4, %v916_v38 }
 0x18a   : > { %1670 = vrot.lane.b32.xlu2 %v1601_v20, %s6895_s24 }
 0x18c   : > { %v926_v2 = vpop.permute.xlu2 %925 }
 0x18d   : > { %1672 = vrot.lane.b32.xlu1 %v7177_v30, %s6895_s24  ;;  %1003 = vst.msk [vmem:[#allocation4 + $0x1c8] sm:$0xff] %vm983_vm4, %v926_v2  ;;  %v2016_v30 = vld [vmem:[%s11094_s2 + $0x10] sm:$0xff] }
 0x18e   : > { %1094 = vrot.lane.b32.xlu0 %v7161_v25, %s6893_s22  ;;  %2132 = vmatpush.msra.mxu0 %v2016_v30 }
 0x18f   : > { %v918_v24 = vpop.permute.xlu1 %917  ;;  %6741 = vmatpush.msra.mxu2 %v2016_v30 }
 0x190   : > { %999 = vst.msk [vmem:[#allocation4 + $0x168] sm:$0xff] %vm983_vm4, %v918_v24  ;;  %v922_v35 = vpop.permute.xlu0 %921  ;;  %2133 = vmatpush.msra.mxu0 %v2015_v45 }
 0x191   : > { %1001 = vst.msk [vmem:[#allocation4 + $0x198] sm:$0xff] %vm983_vm4, %v922_v35  ;;  %6742 = vmatpush.msra.mxu2 %v2015_v45  ;;  %v1032_v45 = vld [vmem:[#allocation2 + $0xd9] sm:$0xff] }
 0x192   : > { %1285 = vrot.lane.b32.xlu2 %v7286_v21, %s6896_s25  ;;  %2134 = vmatpush.msra.mxu0 %v2014_v59 }
 0x193   : > { %6743 = vmatpush.msra.mxu2 %v2014_v59 }
 0x194   : > { %v932_v25 = vpop.permute.xlu2 %931 }
 0x195   : > { %1287 = vrot.lane.b32.xlu1 %v7326_v40, %s6896_s25  ;;  %1006 = vst.msk [vmem:[#allocation4 + $0x210] sm:$0xff] %vm983_vm4, %v932_v25 }
 0x196   : > { %1674 = vrot.lane.b32.xlu0 %v7201_v41, %s6895_s24 }
 0x197   : > { %v924_v21 = vpop.permute.xlu1 %923 }
 0x198   : > { %1002 = vst.msk [vmem:[#allocation4 + $0x1b0] sm:$0xff] %vm983_vm4, %v924_v21  ;;  %v928_v40 = vpop.permute.xlu0 %927  ;;  %v1611_v21 = vld [vmem:[#allocation2 + $0xe1] sm:$0xff] }
 0x199   : > { %1004 = vst.msk [vmem:[#allocation4 + $0x1e0] sm:$0xff] %vm983_vm4, %v928_v40 }
 0x19a   : > { %1865 = vrot.lane.b32.xlu2 %v7290_v23, %s6897_s30 }
 0x19c   : > { %v1274_v5 = vpop.permute.xlu2 %1273 }
 0x19d   : > { %1867 = vrot.lane.b32.xlu1 %v7311_v36, %s6897_s30 }
 0x19e   : > { %1289 = vrot.lane.b32.xlu0 %v7290_v23, %s6896_s25  ;;  %v1024_v23 = vld [vmem:[#allocation2 + $0x79] sm:$0xff] }
 0x19f   : > { %v930_v41 = vpop.permute.xlu1 %929 }
 0x1a0   : > { %1005 = vst.msk [vmem:[#allocation4 + $0x1f8] sm:$0xff] %vm983_vm4, %v930_v41  ;;  %v934_v46 = vpop.permute.xlu0 %933  ;;  %v1612_v41 = vld [vmem:[#allocation2 + $0xf1] sm:$0xff] }
 0x1a1   : > { %1007 = vst.msk [vmem:[#allocation4 + $0x228] sm:$0xff] %vm983_vm4, %v934_v46 }
 0x1a2   : > { %1481 = vrot.lane.b32.xlu2 %v7303_v33, %s6894_s23  ;;  %v1025_v33 = vld [vmem:[#allocation2 + $0x81] sm:$0xff] }
 0x1a4   : > { %v1854_v26 = vpop.permute.xlu2 %1853 }
 0x1a5   : > { %1483 = vrot.lane.b32.xlu1 %v7307_v34, %s6894_s23 }
 0x1a6   : > { %1869 = vrot.lane.b32.xlu0 %v7348_v49, %s6897_s30 }
 0x1a7   : > { %v1081_v48 = vpop.permute.xlu1 %1080 }
 0x1a8   : > { %1177 = vst.msk [vmem:[#allocation4] sm:$0xff] %vm1176_vm6, %v1081_v48  ;;  %v1468_v51 = vpop.permute.xlu0 %1467 }
 0x1a9   : > { %1370 = vst.msk [vmem:[#allocation4] sm:$0xff] %vm1369_vm7, %v1274_v5 }
 0x1aa   : > { %1564 = vst.msk [vmem:[#allocation4] sm:$0xff] %vm1563_vm8, %v1468_v51  ;;  %1096 = vrot.lane.b32.xlu2 %v1024_v23, %s6893_s22  ;;  %v1226_v23 = vld [vmem:[#allocation2 + $0xe2] sm:$0xff]  ;;  %v7749_v51 = vld [vmem:[#allocation2 + $0xf2] sm:$0xff] }
 0x1ac   : > { %v1470_v3 = vpop.permute.xlu2 %1469 }
 0x1ad   : > { %1098 = vrot.lane.b32.xlu1 %v1025_v33, %s6893_s22 }
 0x1ae   : > { %1485 = vrot.lane.b32.xlu0 %v7324_v39, %s6894_s23 }
 0x1af   : > { %v1661_v34 = vpop.permute.xlu1 %1660 }
 0x1b0   : > { %1757 = vst.msk [vmem:[#allocation4] sm:$0xff] %vm1756_vm9, %v1661_v34  ;;  %v1083_v4 = vpop.permute.xlu0 %1082  ;;  %v1419_v34 = vld [vmem:[#allocation2 + $0xf0] sm:$0xff] }
 0x1b1   : > { %1950 = vst.msk [vmem:[#allocation4] sm:$0xff] %vm1949_vm10, %v1854_v26 }
 0x1b2   : > { %1178 = vst.msk [vmem:[#allocation4 + $0x18] sm:$0xff] %vm1176_vm6, %v1083_v4  ;;  %1676 = vrot.lane.b32.xlu2 %v1026_v28, %s6895_s24 }
 0x1b4   : > { %v1085_v53 = vpop.permute.xlu2 %1084 }
 0x1b5   : > { %1678 = vrot.lane.b32.xlu1 %v1605_v15, %s6895_s24  ;;  %1179 = vst.msk [vmem:[#allocation4 + $0x30] sm:$0xff] %vm1176_vm6, %v1085_v53 }
 0x1b6   : > { %1100 = vrot.lane.b32.xlu0 %v1026_v28, %s6893_s22  ;;  %v1806_v28 = vld [vmem:[#allocation2 + $0xfa] sm:$0xff] }
 0x1b7   : > { %v1276_v39 = vpop.permute.xlu1 %1275 }
 0x1b8   : > { %1371 = vst.msk [vmem:[#allocation4 + $0x18] sm:$0xff] %vm1369_vm7, %v1276_v39  ;;  %v1663_v7 = vpop.permute.xlu0 %1662  ;;  %v1982_v18 = vld [vmem:[#allocation4] sm:$0xff] }
 0x1b9   : > { %1565 = vst.msk [vmem:[#allocation4 + $0x18] sm:$0xff] %vm1563_vm8, %v1470_v3  ;;  %6634 = vmatmul.msk.f32.vlgmr.msra.gmra.mxu0 %vm2018_vm11, %v1982_v18 }
 0x1ba   : > { %1758 = vst.msk [vmem:[#allocation4 + $0x18] sm:$0xff] %vm1756_vm9, %v1663_v7  ;;  %1291 = vrot.lane.b32.xlu2 %v7311_v36, %s6896_s25 }
 0x1bc   : > { %v1665_v54 = vpop.permute.xlu2 %1664 }
 0x1bd   : > { %1293 = vrot.lane.b32.xlu1 %v7348_v49, %s6896_s25 }
 0x1be   : > { %1680 = vrot.lane.b32.xlu0 %v1606_v9, %s6895_s24 }
 0x1bf   : > { %v1856_v55 = vpop.permute.xlu1 %1855 }
 0x1c0   : > { %1951 = vst.msk [vmem:[#allocation4 + $0x18] sm:$0xff] %vm1949_vm10, %v1856_v55  ;;  %v1278_v8 = vpop.permute.xlu0 %1277  ;;  %v1035_v55 = vld [vmem:[#allocation2 + $0xf9] sm:$0xff] }
 0x1c1   : > { %1372 = vst.msk [vmem:[#allocation4 + $0x30] sm:$0xff] %vm1369_vm7, %v1278_v8  ;;  %v7797_v8 = vld [vmem:[#allocation2 + $0x109] sm:$0xff] }
 0x1c2   : > { %1871 = vrot.lane.b32.xlu2 %v7317_v37, %s6897_s30 }
 0x1c4   : > { %v1280_v11 = vpop.permute.xlu2 %1279 }
 0x1c5   : > { %1873 = vrot.lane.b32.xlu1 %v7338_v44, %s6897_s30 }
 0x1c6   : > { %1295 = vrot.lane.b32.xlu0 %v7317_v37, %s6896_s25 }
 0x1c7   : > { %v1472_v36 = vpop.permute.xlu1 %1471  ;;  %v1983_v49 = vld [vmem:[#allocation4 + $0x18] sm:$0xff] }
 0x1c8   : > { %1566 = vst.msk [vmem:[#allocation4 + $0x30] sm:$0xff] %vm1563_vm8, %v1472_v36  ;;  %6635 = vmatmul.msk.f32.gmra.mxu0 %vm2018_vm11, %v1983_v49  ;;  %v1858_v12 = vpop.permute.xlu0 %1857 }
 0x1c9   : > { %1759 = vst.msk [vmem:[#allocation4 + $0x30] sm:$0xff] %vm1756_vm9, %v1665_v54 }
 0x1ca   : > { %1952 = vst.msk [vmem:[#allocation4 + $0x30] sm:$0xff] %vm1949_vm10, %v1858_v12  ;;  %1487 = vrot.lane.b32.xlu2 %v7330_v42, %s6894_s23 }
 0x1cc   : > { %v1860_v57 = vpop.permute.xlu2 %1859 }
 0x1cd   : > { %1489 = vrot.lane.b32.xlu1 %v7334_v43, %s6894_s23 }
 0x1ce   : > { %1875 = vrot.lane.b32.xlu0 %v7369_v58, %s6897_s30 }
 0x1cf   : > { %v1087_v37 = vpop.permute.xlu1 %1086 }
 0x1d0   : > { %1180 = vst.msk [vmem:[#allocation4 + $0x48] sm:$0xff] %vm1176_vm6, %v1087_v37  ;;  %v1474_v44 = vpop.permute.xlu0 %1473 }
 0x1d1   : > { %1373 = vst.msk [vmem:[#allocation4 + $0x48] sm:$0xff] %vm1369_vm7, %v1280_v11  ;;  %v1984_v22 = vld [vmem:[#allocation4 + $0x30] sm:$0xff] }
 0x1d2   : > { %1567 = vst.msk [vmem:[#allocation4 + $0x48] sm:$0xff] %vm1563_vm8, %v1474_v44  ;;  %6636 = vmatmul.msk.f32.gmra.mxu0 %vm2018_vm11, %v1984_v22  ;;  %1102 = vrot.lane.b32.xlu2 %v1605_v15, %s6893_s22 }
 0x1d4   : > { %v1476_v42 = vpop.permute.xlu2 %1475 }
 0x1d5   : > { %1104 = vrot.lane.b32.xlu1 %v1606_v9, %s6893_s22 }
 0x1d6   : > { %1491 = vrot.lane.b32.xlu0 %v7346_v47, %s6894_s23 }
 0x1d7   : > { %v1667_v43 = vpop.permute.xlu1 %1666 }
 0x1d8   : > { %1760 = vst.msk [vmem:[#allocation4 + $0x48] sm:$0xff] %vm1756_vm9, %v1667_v43  ;;  %v1089_v29 = vpop.permute.xlu0 %1088  ;;  %v1229_v43 = vld [vmem:[#allocation2 + $0x10a] sm:$0xff] }
 0x1d9   : > { %1953 = vst.msk [vmem:[#allocation4 + $0x48] sm:$0xff] %vm1949_vm10, %v1860_v57  ;;  %v1615_v57 = vld [vmem:[#allocation2 + $0x111] sm:$0xff] }
 0x1da   : > { %1181 = vst.msk [vmem:[#allocation4 + $0x60] sm:$0xff] %vm1176_vm6, %v1089_v29  ;;  %1682 = vrot.lane.b32.xlu2 %v1029_v16, %s6895_s24  ;;  %v7839_v29 = vld [vmem:[#allocation2 + $0x112] sm:$0xff] }
 0x1dc   : > { %v1091_v62 = vpop.permute.xlu2 %1090 }
 0x1dd   : > { %1684 = vrot.lane.b32.xlu1 %v1608_v60, %s6895_s24  ;;  %1182 = vst.msk [vmem:[#allocation4 + $0x78] sm:$0xff] %vm1176_vm6, %v1091_v62 }
 0x1de   : > { %1106 = vrot.lane.b32.xlu0 %v1029_v16, %s6893_s22 }
 0x1df   : > { %v1282_v47 = vpop.permute.xlu1 %1281 }
 0x1e0   : > { %1374 = vst.msk [vmem:[#allocation4 + $0x60] sm:$0xff] %vm1369_vm7, %v1282_v47  ;;  %v1669_v63 = vpop.permute.xlu0 %1668  ;;  %v1985_v13 = vld [vmem:[#allocation4 + $0x48] sm:$0xff]  ;;  %v1423_v47 = vld [vmem:[#allocation2 + $0x120] sm:$0xff] }
 0x1e1   : > { %1568 = vst.msk [vmem:[#allocation4 + $0x60] sm:$0xff] %vm1563_vm8, %v1476_v42  ;;  %6637 = vmatmul.msk.f32.gmra.mxu0 %vm2018_vm11, %v1985_v13 }
 0x1e2   : > { %1761 = vst.msk [vmem:[#allocation4 + $0x60] sm:$0xff] %vm1756_vm9, %v1669_v63  ;;  %1297 = vrot.lane.b32.xlu2 %v1221_v17, %s6896_s25  ;;  %v1422_v17 = vld [vmem:[#allocation2 + $0x110] sm:$0xff]  ;;  %v1809_v63 = vld [vmem:[#allocation2 + $0x122] sm:$0xff] }
 0x1e4   : > { %v1671_v1 = vpop.permute.xlu2 %1670 }
 0x1e5   : > { %1299 = vrot.lane.b32.xlu1 %v7369_v58, %s6896_s25 }
 0x1e6   : > { %1686 = vrot.lane.b32.xlu0 %v1609_v32, %s6895_s24 }
 0x1e7   : > { %v1862_v6 = vpop.permute.xlu1 %1861 }
 0x1e8   : > { %1954 = vst.msk [vmem:[#allocation4 + $0x60] sm:$0xff] %vm1949_vm10, %v1862_v6  ;;  %v1284_v14 = vpop.permute.xlu0 %1283 }
 0x1e9   : > { %1375 = vst.msk [vmem:[#allocation4 + $0x78] sm:$0xff] %vm1369_vm7, %v1284_v14  ;;  %v1424_v14 = vld [vmem:[#allocation2 + $0x128] sm:$0xff] }
 0x1ea   : > { %1877 = vrot.lane.b32.xlu2 %v1223_v27, %s6897_s30 }
 0x1ec   : > { %v1286_v20 = vpop.permute.xlu2 %1285 }
 0x1ed   : > { %1879 = vrot.lane.b32.xlu1 %v1802_v19, %s6897_s30 }
 0x1ee   : > { %1301 = vrot.lane.b32.xlu0 %v1223_v27, %s6896_s25 }
 0x1ef   : > { %v1478_v38 = vpop.permute.xlu1 %1477  ;;  %v1986_v2 = vld [vmem:[#allocation4 + $0x60] sm:$0xff] }
 0x1f0   : > { %1569 = vst.msk [vmem:[#allocation4 + $0x78] sm:$0xff] %vm1563_vm8, %v1478_v38  ;;  %6638 = vmatmul.msk.f32.gmra.mxu0 %vm2018_vm11, %v1986_v2  ;;  %v1864_v58 = vpop.permute.xlu0 %1863  ;;  %v7899_v2 = vld [vmem:[#allocation2 + $0x129] sm:$0xff] }
 0x1f1   : > { %1762 = vst.msk [vmem:[#allocation4 + $0x78] sm:$0xff] %vm1756_vm9, %v1671_v1 }
 0x1f2   : > { %1955 = vst.msk [vmem:[#allocation4 + $0x78] sm:$0xff] %vm1949_vm10, %v1864_v58  ;;  %1493 = vrot.lane.b32.xlu2 %v7352_v50, %s6894_s23  ;;  %v1038_v58 = vld [vmem:[#allocation2 + $0x121] sm:$0xff] }
 0x1f4   : > { %v1866_v24 = vpop.permute.xlu2 %1865 }
 0x1f5   : > { %1495 = vrot.lane.b32.xlu1 %v7355_v52, %s6894_s23 }
 0x1f6   : > { %1881 = vrot.lane.b32.xlu0 %v7390_v10, %s6897_s30 }
 0x1f7   : > { %v1093_v35 = vpop.permute.xlu1 %1092 }
 0x1f8   : > { %1183 = vst.msk [vmem:[#allocation4 + $0x90] sm:$0xff] %vm1176_vm6, %v1093_v35  ;;  %v1480_v31 = vpop.permute.xlu0 %1479 }
 0x1f9   : > { %1376 = vst.msk [vmem:[#allocation4 + $0x90] sm:$0xff] %vm1369_vm7, %v1286_v20  ;;  %v1987_v30 = vld [vmem:[#allocation4 + $0x78] sm:$0xff] }
 0x1fa   : > { %1570 = vst.msk [vmem:[#allocation4 + $0x90] sm:$0xff] %vm1563_vm8, %v1480_v31  ;;  %6639 = vmatmul.msk.f32.gmra.mxu0 %vm2018_vm11, %v1987_v30  ;;  %1108 = vrot.lane.b32.xlu2 %v1608_v60, %s6893_s22 }
 0x1fc   : > { %v1482_v50 = vpop.permute.xlu2 %1481 }
 0x1fd   : > { %1110 = vrot.lane.b32.xlu1 %v1609_v32, %s6893_s22 }
 0x1fe   : > { %1497 = vrot.lane.b32.xlu0 %v7367_v56, %s6894_s23 }
 0x1ff   : > { %v1673_v52 = vpop.permute.xlu1 %1672 }
 0x200   : > { %1763 = vst.msk [vmem:[#allocation4 + $0x90] sm:$0xff] %vm1756_vm9, %v1673_v52  ;;  %v1095_v25 = vpop.permute.xlu0 %1094 }
 0x201   : > { %1956 = vst.msk [vmem:[#allocation4 + $0x90] sm:$0xff] %vm1949_vm10, %v1866_v24 }
 0x202   : > { %1184 = vst.msk [vmem:[#allocation4 + $0xa8] sm:$0xff] %vm1176_vm6, %v1095_v25  ;;  %1688 = vrot.lane.b32.xlu2 %v1032_v45, %s6895_s24 }
 0x204   : > { %v1097_v59 = vpop.permute.xlu2 %1096 }
 0x205   : > { %1690 = vrot.lane.b32.xlu1 %v1611_v21, %s6895_s24  ;;  %1185 = vst.msk [vmem:[#allocation4 + $0xc0] sm:$0xff] %vm1176_vm6, %v1097_v59  ;;  %v1811_v59 = vld [vmem:[#allocation2 + $0x13a] sm:$0xff] }
 0x206   : > { %1112 = vrot.lane.b32.xlu0 %v1032_v45, %s6893_s22 }
 0x207   : > { %v1288_v56 = vpop.permute.xlu1 %1287 }
 0x208   : > { %1377 = vst.msk [vmem:[#allocation4 + $0xa8] sm:$0xff] %vm1369_vm7, %v1288_v56  ;;  %v1675_v40 = vpop.permute.xlu0 %1674  ;;  %v1988_v5 = vld [vmem:[#allocation4 + $0x90] sm:$0xff] }
 0x209   : > { %1571 = vst.msk [vmem:[#allocation4 + $0xa8] sm:$0xff] %vm1563_vm8, %v1482_v50  ;;  %6640 = vmatmul.msk.f32.gmra.mxu0 %vm2018_vm11, %v1988_v5  ;;  %v7924_v50 = vld [vmem:[#allocation2 + $0x139] sm:$0xff]  ;;  %v1232_v56 = vld [vmem:[#allocation2 + $0x12a] sm:$0xff] }
 0x20a   : > { %1764 = vst.msk [vmem:[#allocation4 + $0xa8] sm:$0xff] %vm1756_vm9, %v1675_v40  ;;  %1303 = vrot.lane.b32.xlu2 %v1802_v19, %s6896_s25 }
 0x20c   : > { %v1677_v46 = vpop.permute.xlu2 %1676 }
 0x20d   : > { %1305 = vrot.lane.b32.xlu1 %v7390_v10, %s6896_s25 }
 0x20e   : > { %1692 = vrot.lane.b32.xlu0 %v1612_v41, %s6895_s24 }
 0x20f   : > { %v1868_v26 = vpop.permute.xlu1 %1867 }
 0x210   : > { %1957 = vst.msk [vmem:[#allocation4 + $0xa8] sm:$0xff] %vm1949_vm10, %v1868_v26  ;;  %v1290_v48 = vpop.permute.xlu0 %1289  ;;  %v7960_v26 = vld [vmem:[#allocation2 + $0x140] sm:$0xff] }
 0x211   : > { %1378 = vst.msk [vmem:[#allocation4 + $0xc0] sm:$0xff] %vm1369_vm7, %v1290_v48  ;;  %v7963_v48 = vld [vmem:[#allocation2 + $0x142] sm:$0xff] }
 0x212   : > { %1883 = vrot.lane.b32.xlu2 %v1226_v23, %s6897_s30 }
 0x214   : > { %v1292_v33 = vpop.permute.xlu2 %1291 }
 0x215   : > { %1885 = vrot.lane.b32.xlu1 %v7749_v51, %s6897_s30 }
 0x216   : > { %1307 = vrot.lane.b32.xlu0 %v1226_v23, %s6896_s25 }
 0x217   : > { %v1484_v10 = vpop.permute.xlu1 %1483  ;;  %v1989_v3 = vld [vmem:[#allocation4 + $0xa8] sm:$0xff] }
 0x218   : > { %1572 = vst.msk [vmem:[#allocation4 + $0xc0] sm:$0xff] %vm1563_vm8, %v1484_v10  ;;  %6641 = vmatmul.msk.f32.gmra.mxu0 %vm2018_vm11, %v1989_v3  ;;  %v1870_v4 = vpop.permute.xlu0 %1869 }
 0x219   : > { %1765 = vst.msk [vmem:[#allocation4 + $0xc0] sm:$0xff] %vm1756_vm9, %v1677_v46  ;;  %v847_v46 = vld [vmem:[#allocation2 + $0x138] sm:$0xff] }
 0x21a   : > { %1958 = vst.msk [vmem:[#allocation4 + $0xc0] sm:$0xff] %vm1949_vm10, %v1870_v4  ;;  %1499 = vrot.lane.b32.xlu2 %v1419_v34, %s6894_s23 }
 0x21c   : > { %v1872_v15 = vpop.permute.xlu2 %1871 }
 0x21d   : > { %1501 = vrot.lane.b32.xlu1 %v7376_v61, %s6894_s23  ;;  %v1421_v61 = vld [vmem:[#allocation2 + $0x108] sm:$0xff] }
 0x21e   : > { %1887 = vrot.lane.b32.xlu0 %v1806_v28, %s6897_s30 }
 0x21f   : > { %v1099_v53 = vpop.permute.xlu1 %1098 }
 0x220   : > { %1186 = vst.msk [vmem:[#allocation4 + $0xd8] sm:$0xff] %vm1176_vm6, %v1099_v53  ;;  %v1486_v39 = vpop.permute.xlu0 %1485 }
 0x221   : > { %1379 = vst.msk [vmem:[#allocation4 + $0xd8] sm:$0xff] %vm1369_vm7, %v1292_v33  ;;  %v1990_v7 = vld [vmem:[#allocation4 + $0xc0] sm:$0xff] }
 0x222   : > { %1573 = vst.msk [vmem:[#allocation4 + $0xd8] sm:$0xff] %vm1563_vm8, %v1486_v39  ;;  %6642 = vmatmul.msk.f32.gmra.mxu0 %vm2018_vm11, %v1990_v7  ;;  %1114 = vrot.lane.b32.xlu2 %v1611_v21, %s6893_s22 }
 0x224   : > { %v1488_v18 = vpop.permute.xlu2 %1487 }
 0x225   : > { %1116 = vrot.lane.b32.xlu1 %v1612_v41, %s6893_s22 }
 0x226   : > { %1503 = vrot.lane.b32.xlu0 %v1421_v61, %s6894_s23 }
 0x227   : > { %v1679_v9 = vpop.permute.xlu1 %1678 }
 0x228   : > { %1766 = vst.msk [vmem:[#allocation4 + $0xd8] sm:$0xff] %vm1756_vm9, %v1679_v9  ;;  %v1101_v54 = vpop.permute.xlu0 %1100 }
 0x229   : > { %1959 = vst.msk [vmem:[#allocation4 + $0xd8] sm:$0xff] %vm1949_vm10, %v1872_v15 }
 0x22a   : > { %1187 = vst.msk [vmem:[#allocation4 + $0xf0] sm:$0xff] %vm1176_vm6, %v1101_v54  ;;  %1694 = vrot.lane.b32.xlu2 %v1035_v55, %s6895_s24 }
 0x22c   : > { %v1103_v11 = vpop.permute.xlu2 %1102 }
 0x22d   : > { %1696 = vrot.lane.b32.xlu1 %v7797_v8, %s6895_s24  ;;  %1188 = vst.msk [vmem:[#allocation4 + $0x108] sm:$0xff] %vm1176_vm6, %v1103_v11  ;;  %v1813_v11 = vld [vmem:[#allocation2 + $0x152] sm:$0xff] }
 0x22e   : > { %1118 = vrot.lane.b32.xlu0 %v1035_v55, %s6893_s22  ;;  %v1427_v55 = vld [vmem:[#allocation2 + $0x150] sm:$0xff] }
 0x22f   : > { %v1294_v36 = vpop.permute.xlu1 %1293 }
 0x230   : > { %1380 = vst.msk [vmem:[#allocation4 + $0xf0] sm:$0xff] %vm1369_vm7, %v1294_v36  ;;  %v1681_v49 = vpop.permute.xlu0 %1680  ;;  %v1991_v12 = vld [vmem:[#allocation4 + $0xd8] sm:$0xff] }
 0x231   : > { %1574 = vst.msk [vmem:[#allocation4 + $0xf0] sm:$0xff] %vm1563_vm8, %v1488_v18  ;;  %6643 = vmatmul.msk.f32.gmra.mxu0 %vm2018_vm11, %v1991_v12  ;;  %v7997_v18 = vld [vmem:[#allocation2 + $0x141] sm:$0xff] }
 0x232   : > { %1767 = vst.msk [vmem:[#allocation4 + $0xf0] sm:$0xff] %vm1756_vm9, %v1681_v49  ;;  %1309 = vrot.lane.b32.xlu2 %v7749_v51, %s6896_s25 }
 0x234   : > { %v1683_v44 = vpop.permute.xlu2 %1682 }
 0x235   : > { %1311 = vrot.lane.b32.xlu1 %v1806_v28, %s6896_s25 }
 0x236   : > { %v7826_v37 = vpop.f32.mrf.mxu0  ;;  %1698 = vrot.lane.b32.xlu0 %v1615_v57, %s6895_s24 }
 0x237   : > { %11176 = vst [vmem:[#allocation10_spill] sm:$0xff] %v7826_v37  ;;  %v1874_v22 = vpop.permute.xlu1 %1873 }
 0x238   : > { %2289 = vst.msk [vmem:[#allocation3 + $0x19] sm:$0xff] %vm2232_vm12, %v7826_v37  ;;  %v1296_v42 = vpop.permute.xlu0 %1295 }
 0x239   : > { %1960 = vst.msk [vmem:[#allocation4 + $0xf0] sm:$0xff] %vm1949_vm10, %v1874_v22 }
 0x23a   : > { %1889 = vrot.lane.b32.xlu2 %v1229_v43, %s6897_s30  ;;  %1381 = vst.msk [vmem:[#allocation4 + $0x108] sm:$0xff] %vm1369_vm7, %v1296_v42 }
 0x23c   : > { %v7857_v62 = vpop.permute.xlu2 %1297 }
 0x23d   : > { %1891 = vrot.lane.b32.xlu1 %v7839_v29, %s6897_s30 }
 0x23e   : > { %1313 = vrot.lane.b32.xlu0 %v1229_v43, %s6896_s25 }
 0x23f   : > { %v1490_v16 = vpop.permute.xlu1 %1489  ;;  %v7985_v15 = vld [vmem:[#allocation3 + $0x19] sm:$0xff] }
 0x240   : > { %v1876_v60 = vpop.permute.xlu0 %1875  ;;  %1575 = vst.msk [vmem:[#allocation4 + $0x108] sm:$0xff] %vm1563_vm8, %v1490_v16  ;;  %v1992_v27 = vld [vmem:[#allocation4 + $0xf0] sm:$0xff] }
 0x241   : > { %1768 = vst.msk [vmem:[#allocation4 + $0x108] sm:$0xff] %vm1756_vm9, %v1683_v44  ;;  %6644 = vmatmul.msk.f32.gmra.mxu0 %vm2018_vm11, %v1992_v27 }
 0x242   : > { %1505 = vrot.lane.b32.xlu2 %v1422_v17, %s6894_s23  ;;  %1961 = vst.msk [vmem:[#allocation4 + $0x108] sm:$0xff] %vm1949_vm10, %v1876_v60 }
 0x243   : > { %11181 = vst [vmem:[#allocation15_spill] sm:$0xff] %v7985_v15 }
 0x244   : > { %v1878_v1 = vpop.permute.xlu2 %1877  ;;  %2996 = vst.msk [vmem:[#allocation4 + $0x8] sm:$0xff] %vm2232_vm12, %v7985_v15 }
 0x245   : > { %1507 = vrot.lane.b32.xlu1 %v1423_v47, %s6894_s23  ;;  %v7879_v6 = vpop.f32.mrf.mxu0 }
 0x246   : > { %1893 = vrot.lane.b32.xlu0 %v1809_v63, %s6897_s30  ;;  %11177 = vst [vmem:[#allocation11_spill] sm:$0xff] %v7879_v6 }
 0x247   : > { %v1105_v13 = vpop.permute.xlu1 %1104  ;;  %2290 = vst.msk [vmem:[#allocation3 + $0x21] sm:$0xff] %vm2232_vm12, %v7879_v6 }
 0x248   : > { %v1492_v32 = vpop.permute.xlu0 %1491  ;;  %1189 = vst.msk [vmem:[#allocation4 + $0x120] sm:$0xff] %vm1176_vm6, %v1105_v13 }
 0x249   : > { %v1993_v24 = vld [vmem:[#allocation4 + $0x108] sm:$0xff]  ;;  %1382 = vst.msk [vmem:[#allocation4 + $0x120] sm:$0xff] %vm1369_vm7, %v7857_v62 }
 0x24a   : > { %1120 = vrot.lane.b32.xlu2 %v7797_v8, %s6893_s22  ;;  %6645 = vmatmul.msk.f32.gmra.mxu0 %vm2018_vm11, %v1993_v24  ;;  %1576 = vst.msk [vmem:[#allocation4 + $0x120] sm:$0xff] %vm1563_vm8, %v1492_v32  ;;  %v8044_v62 = vld [vmem:[#allocation3 + $0x18] sm:$0xff] }
 0x24b   : > { %11185 = vst [vmem:[#allocation19_spill] sm:$0xff] %v8044_v62  ;;  %v8081_v24 = vld [vmem:[#allocation2 + $0x168] sm:$0xff] }
 0x24c   : > { %v1494_v38 = vpop.permute.xlu2 %1493  ;;  %2355 = vst.msk [vmem:[#allocation4 + $0x30] sm:$0xff] %vm2232_vm12, %v8044_v62 }
 0x24d   : > { %1122 = vrot.lane.b32.xlu1 %v1615_v57, %s6893_s22 }
 0x24e   : > { %1509 = vrot.lane.b32.xlu0 %v1424_v14, %s6894_s23  ;;  %v8001_v9 = vld [vmem:[#allocation3 + $0x21] sm:$0xff] }
 0x24f   : > { %v1685_v19 = vpop.permute.xlu1 %1684  ;;  %v7935_v52 = vpop.f32.mrf.mxu0  ;;  %11183 = vst [vmem:[#allocation17_spill] sm:$0xff] %v8001_v9  ;;  %v8047_v13 = vld [vmem:[#allocation3 + $0x20] sm:$0xff]  ;;  %v8056_v14 = vld [vmem:[#allocation2 + $0x158] sm:$0xff] }
 0x250   : > { %v1107_v20 = vpop.permute.xlu0 %1106  ;;  %11178 = vst [vmem:[#allocation12_spill] sm:$0xff] %v7935_v52 }
 0x251   : > { %1769 = vst.msk [vmem:[#allocation4 + $0x120] sm:$0xff] %vm1756_vm9, %v1685_v19 }
 0x252   : > { %1700 = vrot.lane.b32.xlu2 %v1038_v58, %s6895_s24  ;;  %2291 = vst.msk [vmem:[#allocation3 + $0x31] sm:$0xff] %vm2232_vm12, %v7935_v52 }
 0x253   : > { %1962 = vst.msk [vmem:[#allocation4 + $0x120] sm:$0xff] %vm1949_vm10, %v1878_v1 }
 0x254   : > { %v1109_v30 = vpop.permute.xlu2 %1108  ;;  %1190 = vst.msk [vmem:[#allocation4 + $0x138] sm:$0xff] %vm1176_vm6, %v1107_v20 }
 0x255   : > { %1702 = vrot.lane.b32.xlu1 %v7899_v2, %s6895_s24  ;;  %1191 = vst.msk [vmem:[#allocation4 + $0x150] sm:$0xff] %vm1176_vm6, %v1109_v30 }
 0x256   : > { %1124 = vrot.lane.b32.xlu0 %v1038_v58, %s6893_s22  ;;  %2997 = vst.msk [vmem:[#allocation4 + $0x20] sm:$0xff] %vm2232_vm12, %v8001_v9 }
 0x257   : > { %v1300_v35 = vpop.permute.xlu1 %1299  ;;  %11186 = vst [vmem:[#allocation20_spill] sm:$0xff] %v8047_v13 }
 0x258   : > { %v1687_v31 = vpop.permute.xlu0 %1686  ;;  %1383 = vst.msk [vmem:[#allocation4 + $0x138] sm:$0xff] %vm1369_vm7, %v1300_v35 }
 0x259   : > { %1577 = vst.msk [vmem:[#allocation4 + $0x138] sm:$0xff] %vm1563_vm8, %v1494_v38  ;;  %v8004_v8 = vld [vmem:[#allocation3 + $0x31] sm:$0xff] }
 0x25a   : > { %1315 = vrot.lane.b32.xlu2 %v7839_v29, %s6896_s25  ;;  %1770 = vst.msk [vmem:[#allocation4 + $0x138] sm:$0xff] %vm1756_vm9, %v1687_v31  ;;  %v1994_v23 = vld [vmem:[#allocation4 + $0x120] sm:$0xff] }
 0x25b   : > { %6646 = vmatmul.msk.f32.gmra.mxu0 %vm2018_vm11, %v1994_v23  ;;  %2998 = vst.msk [vmem:[#allocation4 + $0x38] sm:$0xff] %vm2232_vm12, %v8004_v8  ;;  %v8050_v32 = vld [vmem:[#allocation3 + $0x30] sm:$0xff] }
 0x25c   : > { %v1689_v21 = vpop.permute.xlu2 %1688  ;;  %11187 = vst [vmem:[#allocation21_spill] sm:$0xff] %v8050_v32  ;;  %v3221_v62 = vld [vmem:[#allocation3 + $0x30] sm:$0xff] }
 0x25d   : > { %1317 = vrot.lane.b32.xlu1 %v1809_v63, %s6896_s25  ;;  %v1620_v63 = vld [vmem:[#allocation2 + $0x151] sm:$0xff]  ;;  %2356 = vst.msk [vmem:[#allocation4 + $0x48] sm:$0xff] %vm2232_vm12, %v8047_v13 }
 0x25e   : > { %1704 = vrot.lane.b32.xlu0 %v7924_v50, %s6895_s24  ;;  %v7952_v0 = vpop.f32.mrf.mxu0  ;;  %2357 = vst.msk [vmem:[#allocation4 + $0x60] sm:$0xff] %vm2232_vm12, %v8050_v32 }
 0x25f   : > { %v1880_v25 = vpop.permute.xlu1 %1879  ;;  %11179 = vst [vmem:[#allocation13_spill] sm:$0xff] %v7952_v0 }
 0x260   : > { %v1302_v45 = vpop.permute.xlu0 %1301  ;;  %2292 = vst.msk [vmem:[#allocation3 + $0x39] sm:$0xff] %vm2232_vm12, %v7952_v0 }
 0x261   : > { %1963 = vst.msk [vmem:[#allocation4 + $0x138] sm:$0xff] %vm1949_vm10, %v1880_v25  ;;  %v3800_v25 = vld [vmem:[%s11095_s3 + $0x118] sm:$0xff] }
 0x262   : > { %1895 = vrot.lane.b32.xlu2 %v1232_v56, %s6897_s30  ;;  %1384 = vst.msk [vmem:[#allocation4 + $0x150] sm:$0xff] %vm1369_vm7, %v1302_v45  ;;  %6760 = vmatpush.msra.mxu3 %v3800_v25 }
 0x264   : > { %v1304_v41 = vpop.permute.xlu2 %1303 }
 0x265   : > { %1897 = vrot.lane.b32.xlu1 %v1811_v59, %s6897_s30 }
 0x266   : > { %1319 = vrot.lane.b32.xlu0 %v1232_v56, %s6896_s25  ;;  %v3799_v56 = vld [vmem:[%s11095_s3 + $0x110] sm:$0xff] }
 0x267   : > { %v1496_v40 = vpop.permute.xlu1 %1495  ;;  %v3605_v34 = vld [vmem:[#allocation3 + $0x32] sm:$0xff]  ;;  %v3606_v4 = vld [vmem:[#allocation3 + $0x3a] sm:$0xff]  ;;  %6761 = vmatpush.msra.mxu3 %v3799_v56 }
 0x268   : > { %v1882_v5 = vpop.permute.xlu0 %1881  ;;  %1578 = vst.msk [vmem:[#allocation4 + $0x150] sm:$0xff] %vm1563_vm8, %v1496_v40  ;;  %v1995_v28 = vld [vmem:[#allocation4 + $0x138] sm:$0xff]  ;;  %v8009_v36 = vld [vmem:[#allocation3 + $0x39] sm:$0xff] }
 0x269   : > { %1771 = vst.msk [vmem:[#allocation4 + $0x150] sm:$0xff] %vm1756_vm9, %v1689_v21  ;;  %6647 = vmatmul.msk.f32.gmra.mxu0 %vm2018_vm11, %v1995_v28  ;;  %v8052_v1 = vld [vmem:[#allocation3 + $0x38] sm:$0xff]  ;;  %v1814_v21 = vld [vmem:[#allocation2 + $0x15a] sm:$0xff] }
 0x26a   : > { %1511 = vrot.lane.b32.xlu2 %v847_v46, %s6894_s23  ;;  %1964 = vst.msk [vmem:[#allocation4 + $0x150] sm:$0xff] %vm1949_vm10, %v1882_v5  ;;  %v3798_v40 = vld [vmem:[%s11095_s3 + $0x108] sm:$0xff]  ;;  %v338_v5 = vld [vmem:[%s7062_s19 + $0xf0] sm:$0xff] }
 0x26b   : > { %3637 = vst.msk [vmem:[#allocation4 + $0x10] sm:$0xff] %vm2232_vm12, %v3605_v34  ;;  %6762 = vmatpush.msra.mxu3 %v3798_v40  ;;  %v3030_v15 = vld [vmem:[#allocation3 + $0x32] sm:$0xff] }
 0x26c   : > { %v1884_v3 = vpop.permute.xlu2 %1883  ;;  %3638 = vst.msk [vmem:[#allocation4 + $0x28] sm:$0xff] %vm2232_vm12, %v3606_v4 }
 0x26d   : > { %1513 = vrot.lane.b32.xlu1 %v7960_v26, %s6894_s23  ;;  %v7972_v51 = vpop.f32.mrf.mxu0  ;;  %2999 = vst.msk [vmem:[#allocation4 + $0x50] sm:$0xff] %vm2232_vm12, %v8009_v36 }
 0x26e   : > { %11180 = vst [vmem:[#allocation14_spill] sm:$0xff] %v7972_v51  ;;  %1899 = vrot.lane.b32.xlu0 %v7963_v48, %s6897_s30 }
 0x26f   : > { %v1111_v33 = vpop.permute.xlu1 %1110  ;;  %2293 = vst.msk [vmem:[#allocation3 + $0x49] sm:$0xff] %vm2232_vm12, %v7972_v51 }
 0x270   : > { %v1498_v10 = vpop.permute.xlu0 %1497  ;;  %1192 = vst.msk [vmem:[#allocation4 + $0x168] sm:$0xff] %vm1176_vm6, %v1111_v33 }
 0x271   : > { %1385 = vst.msk [vmem:[#allocation4 + $0x168] sm:$0xff] %vm1369_vm7, %v1304_v41  ;;  %v1996_v54 = vld [vmem:[#allocation4 + $0x150] sm:$0xff] }
 0x272   : > { %1126 = vrot.lane.b32.xlu2 %v7899_v2, %s6893_s22  ;;  %1579 = vst.msk [vmem:[#allocation4 + $0x168] sm:$0xff] %vm1563_vm8, %v1498_v10  ;;  %6648 = vmatmul.msk.f32.gmra.mxu0 %vm2018_vm11, %v1996_v54  ;;  %v1815_v41 = vld [vmem:[#allocation2 + $0x16a] sm:$0xff] }
 0x273   : > { %11188 = vst [vmem:[#allocation22_spill] sm:$0xff] %v8052_v1 }
 0x274   : > { %v1500_v61 = vpop.permute.xlu2 %1499  ;;  %2358 = vst.msk [vmem:[#allocation4 + $0x78] sm:$0xff] %vm2232_vm12, %v8052_v1 }
 0x275   : > { %935 = vrot.lane.b32.xlu1 %v847_v46, %s6892_s21  ;;  %371 = vst.msk [vmem:[#allocation2 + $0x181] sm:$0xff] %vm252_vm0, %v338_v5 }
 0x276   : > { %1321 = vrot.lane.b32.xlu0 %v1811_v59, %s6896_s25  ;;  %v8011_v49 = vld [vmem:[#allocation3 + $0x49] sm:$0xff] }
 0x277   : > { %v1691_v53 = vpop.permute.xlu1 %1690  ;;  %v7992_v39 = vpop.f32.mrf.mxu0  ;;  %3000 = vst.msk [vmem:[#allocation4 + $0x68] sm:$0xff] %vm2232_vm12, %v8011_v49  ;;  %v8065_v27 = vld [vmem:[#allocation3 + $0x48] sm:$0xff] }
 0x278   : > { %11182 = vst [vmem:[#allocation16_spill] sm:$0xff] %v7992_v39  ;;  %v1113_v7 = vpop.permute.xlu0 %1112 }
 0x279   : > { %1772 = vst.msk [vmem:[#allocation4 + $0x168] sm:$0xff] %vm1756_vm9, %v1691_v53 }
 0x27a   : > { %2294 = vst.msk [vmem:[#allocation3 + $0x51] sm:$0xff] %vm2232_vm12, %v7992_v39  ;;  %1706 = vrot.lane.b32.xlu2 %v7997_v18, %s6895_s24 }
 0x27b   : > { %1965 = vst.msk [vmem:[#allocation4 + $0x168] sm:$0xff] %vm1949_vm10, %v1884_v3  ;;  %v1621_v3 = vld [vmem:[#allocation2 + $0x159] sm:$0xff] }
 0x27c   : > { %1193 = vst.msk [vmem:[#allocation4 + $0x180] sm:$0xff] %vm1176_vm6, %v1113_v7  ;;  %v1115_v42 = vpop.permute.xlu2 %1114 }
 0x27d   : > { %1515 = vrot.lane.b32.xlu1 %v1427_v55, %s6894_s23  ;;  %1194 = vst.msk [vmem:[#allocation4 + $0x198] sm:$0xff] %vm1176_vm6, %v1115_v42 }
 0x27e   : > { %1901 = vrot.lane.b32.xlu0 %v1813_v11, %s6897_s30  ;;  %11189 = vst [vmem:[#allocation23_spill] sm:$0xff] %v8065_v27 }
 0x27f   : > { %v1306_v12 = vpop.permute.xlu1 %1305  ;;  %2359 = vst.msk [vmem:[#allocation4 + $0x90] sm:$0xff] %vm2232_vm12, %v8065_v27  ;;  %v3769_v27 = vld [vmem:[%s11095_s3 + $0x20] sm:$0xff] }
 0x280   : > { %1386 = vst.msk [vmem:[#allocation4 + $0x180] sm:$0xff] %vm1369_vm7, %v1306_v12  ;;  %v1693_v22 = vpop.permute.xlu0 %1692  ;;  %v3797_v12 = vld [vmem:[%s11095_s3 + $0x100] sm:$0xff] }
 0x281   : > { %v3607_v57 = vld [vmem:[#allocation3 + $0x4a] sm:$0xff]  ;;  %v3608_v44 = vld [vmem:[#allocation3 + $0x52] sm:$0xff]  ;;  %1580 = vst.msk [vmem:[#allocation4 + $0x180] sm:$0xff] %vm1563_vm8, %v1500_v61  ;;  %6763 = vmatpush.msra.mxu3 %v3797_v12 }
 0x282   : > { %3639 = vst.msk [vmem:[#allocation4 + $0x40] sm:$0xff] %vm2232_vm12, %v3607_v57  ;;  %v1997_v43 = vld [vmem:[#allocation4 + $0x168] sm:$0xff]  ;;  %1128 = vrot.lane.b32.xlu2 %v7924_v50, %s6893_s22  ;;  %v8097_v59 = vld [vmem:[#allocation3 + $0x50] sm:$0xff]  ;;  %v339_v57 = vld [vmem:[%s7062_s19 + $0xf8] sm:$0xff]  ;;  %s6898_s19 = smov 64  }
 0x283   : > { %3640 = vst.msk [vmem:[#allocation4 + $0x58] sm:$0xff] %vm2232_vm12, %v3608_v44  ;;  %v8030_v29 = vld [vmem:[#allocation3 + $0x51] sm:$0xff]  ;;  %6649 = vmatmul.msk.f32.gmra.mxu0 %vm2018_vm11, %v1997_v43  ;;  %v1622_v61 = vld [vmem:[#allocation2 + $0x169] sm:$0xff] }
 0x284   : > { %1773 = vst.msk [vmem:[#allocation4 + $0x180] sm:$0xff] %vm1756_vm9, %v1693_v22  ;;  %v1695_v17 = vpop.permute.xlu2 %1694 }
 0x285   : > { %937 = vrot.lane.b32.xlu1 %v7960_v26, %s6892_s21  ;;  %3001 = vst.msk [vmem:[#allocation4 + $0x80] sm:$0xff] %vm2232_vm12, %v8030_v29 }
 0x286   : > { %v8037_v16 = vpop.f32.mrf.mxu0  ;;  %939 = vrot.lane.b32.xlu0 %v1427_v55, %s6892_s21  ;;  %11191 = vst [vmem:[#allocation25_spill] sm:$0xff] %v8097_v59  ;;  %v1430_v55 = vld [vmem:[#allocation2 + $0x170] sm:$0xff] }
 0x287   : > { %11184 = vst [vmem:[#allocation18_spill] sm:$0xff] %v8037_v16  ;;  %v1886_v60 = vpop.permute.xlu1 %1885 }
 0x288   : > { %2295 = vst.msk [vmem:[#allocation3 + $0x61] sm:$0xff] %vm2232_vm12, %v8037_v16  ;;  %v1308_v47 = vpop.permute.xlu0 %1307 }
 0x289   : > { %1966 = vst.msk [vmem:[#allocation4 + $0x180] sm:$0xff] %vm1949_vm10, %v1886_v60 }
 0x28a   : > { %1387 = vst.msk [vmem:[#allocation4 + $0x198] sm:$0xff] %vm1369_vm7, %v1308_v47  ;;  %1708 = vrot.lane.b32.xlu2 %v1620_v63, %s6895_s24 }
 0x28b   : > { %2360 = vst.msk [vmem:[#allocation4 + $0xa8] sm:$0xff] %vm2232_vm12, %v8097_v59 }
 0x28c   : > { %v1310_v58 = vpop.permute.xlu2 %1309  ;;  %372 = vst.msk [vmem:[#allocation2 + $0x189] sm:$0xff] %vm252_vm0, %v339_v57  ;;  %vm2931_vm0 = vcmask 1048320  }
 0x28d   : > { %1323 = vrot.lane.b32.xlu1 %v7963_v48, %s6896_s25 }
 0x28e   : > { %1517 = vrot.lane.b32.xlu0 %v8056_v14, %s6894_s23 }
 0x28f   : > { %v8071_v19 = vld [vmem:[#allocation3 + $0x61] sm:$0xff]  ;;  %v1502_v20 = vpop.permute.xlu1 %1501 }
 0x290   : > { %v1998_v38 = vld [vmem:[#allocation4 + $0x180] sm:$0xff]  ;;  %3002 = vst.msk [vmem:[#allocation4 + $0x98] sm:$0xff] %vm2232_vm12, %v8071_v19  ;;  %v1888_v2 = vpop.permute.xlu0 %1887  ;;  %v8131_v4 = vld [vmem:[#allocation3 + $0x60] sm:$0xff] }
 0x291   : > { %1581 = vst.msk [vmem:[#allocation4 + $0x198] sm:$0xff] %vm1563_vm8, %v1502_v20  ;;  %6650 = vmatmul.msk.f32.gmra.mxu0 %vm2018_vm11, %v1998_v38  ;;  %v1623_v20 = vld [vmem:[#allocation2 + $0x171] sm:$0xff] }
 0x292   : > { %1774 = vst.msk [vmem:[#allocation4 + $0x198] sm:$0xff] %vm1756_vm9, %v1695_v17  ;;  %1130 = vrot.lane.b32.xlu2 %v7997_v18, %s6893_s22 }
 0x293   : > { %1967 = vst.msk [vmem:[#allocation4 + $0x198] sm:$0xff] %vm1949_vm10, %v1888_v2 }
 0x294   : > { %v1890_v50 = vpop.permute.xlu2 %1889  ;;  %11193 = vst [vmem:[#allocation27_spill] sm:$0xff] %v8131_v4 }
 0x295   : > { %1325 = vrot.lane.b32.xlu1 %v1813_v11, %s6896_s25  ;;  %v8086_v35 = vpop.f32.mrf.mxu0  ;;  %2361 = vst.msk [vmem:[#allocation4 + $0xc0] sm:$0xff] %vm2232_vm12, %v8131_v4  ;;  %v1816_v11 = vld [vmem:[#allocation2 + $0x172] sm:$0xff] }
 0x296   : > { %11190 = vst [vmem:[#allocation24_spill] sm:$0xff] %v8086_v35  ;;  %1519 = vrot.lane.b32.xlu0 %v8081_v24, %s6894_s23 }
 0x297   : > { %2296 = vst.msk [vmem:[#allocation3 + $0x69] sm:$0xff] %vm2232_vm12, %v8086_v35  ;;  %v1117_v31 = vpop.permute.xlu1 %1116 }
 0x298   : > { %1195 = vst.msk [vmem:[#allocation4 + $0x1b0] sm:$0xff] %vm1176_vm6, %v1117_v31  ;;  %v1504_v30 = vpop.permute.xlu0 %1503  ;;  %v1817_v31 = vld [vmem:[#allocation2 + $0x182] sm:$0xff] }
 0x299   : > { %1388 = vst.msk [vmem:[#allocation4 + $0x1b0] sm:$0xff] %vm1369_vm7, %v1310_v58  ;;  %v1431_v58 = vld [vmem:[#allocation2 + $0x180] sm:$0xff] }
 0x29a   : > { %v1999_v45 = vld [vmem:[#allocation4 + $0x198] sm:$0xff]  ;;  %1582 = vst.msk [vmem:[#allocation4 + $0x1b0] sm:$0xff] %vm1563_vm8, %v1504_v30  ;;  %1132 = vrot.lane.b32.xlu2 %v1620_v63, %s6893_s22 }
 0x29b   : > { %6651 = vmatmul.msk.f32.gmra.mxu0 %vm2018_vm11, %v1999_v45 }
 0x29c   : > { %v1506_v10 = vpop.permute.xlu2 %1505 }
 0x29d   : > { %1903 = vrot.lane.b32.xlu1 %v1814_v21, %s6897_s30 }
 0x29e   : > { %v3609_v46 = vld [vmem:[#allocation3 + $0x62] sm:$0xff]  ;;  %v3610_v26 = vld [vmem:[#allocation3 + $0x6a] sm:$0xff]  ;;  %1905 = vrot.lane.b32.xlu0 %v1815_v41, %s6897_s30 }
 0x29f   : > { %3641 = vst.msk [vmem:[#allocation4 + $0x70] sm:$0xff] %vm2232_vm12, %v3609_v46  ;;  %v1697_v48 = vpop.permute.xlu1 %1696  ;;  %v8116_v23 = vpop.f32.mrf.mxu0  ;;  %v8121_v34 = vld [vmem:[#allocation3 + $0x69] sm:$0xff] }
 0x2a0   : > { %3642 = vst.msk [vmem:[#allocation4 + $0x88] sm:$0xff] %vm2232_vm12, %v3610_v26  ;;  %v1119_v33 = vpop.permute.xlu0 %1118  ;;  %v1624_v26 = vld [vmem:[#allocation2 + $0x181] sm:$0xff] }
 0x2a1   : > { %11192 = vst [vmem:[#allocation26_spill] sm:$0xff] %v8116_v23 }
 0x2a2   : > { %1775 = vst.msk [vmem:[#allocation4 + $0x1b0] sm:$0xff] %vm1756_vm9, %v1697_v48  ;;  %1710 = vrot.lane.b32.xlu2 %v1621_v3, %s6895_s24  ;;  %v1432_v48 = vld [vmem:[#allocation2 + $0x188] sm:$0xff] }
 0x2a3   : > { %2297 = vst.msk [vmem:[#allocation3 + $0x79] sm:$0xff] %vm2232_vm12, %v8116_v23 }
 0x2a4   : > { %1968 = vst.msk [vmem:[#allocation4 + $0x1b0] sm:$0xff] %vm1949_vm10, %v1890_v50  ;;  %v1121_v7 = vpop.permute.xlu2 %1120 }
 0x2a5   : > { %1196 = vst.msk [vmem:[#allocation4 + $0x1c8] sm:$0xff] %vm1176_vm6, %v1119_v33  ;;  %941 = vrot.lane.b32.xlu1 %v8056_v14, %s6892_s21  ;;  %v1818_v33 = vld [vmem:[#allocation2 + $0x18a] sm:$0xff] }
 0x2a6   : > { %3003 = vst.msk [vmem:[#allocation4 + $0xb0] sm:$0xff] %vm2232_vm12, %v8121_v34  ;;  %1327 = vrot.lane.b32.xlu0 %v1814_v21, %s6896_s25 }
 0x2a7   : > { %v1312_v28 = vpop.permute.xlu1 %1311  ;;  %1197 = vst.msk [vmem:[#allocation4 + $0x1e0] sm:$0xff] %vm1176_vm6, %v1121_v7 }
 0x2a8   : > { %1389 = vst.msk [vmem:[#allocation4 + $0x1c8] sm:$0xff] %vm1369_vm7, %v1312_v28  ;;  %v1699_v53 = vpop.permute.xlu0 %1698 }
 0x2a9   : > { %1583 = vst.msk [vmem:[#allocation4 + $0x1c8] sm:$0xff] %vm1563_vm8, %v1506_v10 }
 0x2aa   : > { %v8137_v54 = vld [vmem:[#allocation3 + $0x79] sm:$0xff]  ;;  %1776 = vst.msk [vmem:[#allocation4 + $0x1c8] sm:$0xff] %vm1756_vm9, %v1699_v53  ;;  %1712 = vrot.lane.b32.xlu2 %v1622_v61, %s6895_s24 }
 0x2ab   : > { %v2000_v18 = vld [vmem:[#allocation4 + $0x1b0] sm:$0xff]  ;;  %3004 = vst.msk [vmem:[#allocation4 + $0xc8] sm:$0xff] %vm2232_vm12, %v8137_v54  ;;  %v8181_v21 = vld [vmem:[#allocation3 + $0x78] sm:$0xff] }
 0x2ac   : > { %6652 = vmatmul.msk.f32.gmra.mxu0 %vm2018_vm11, %v2000_v18  ;;  %v1701_v43 = vpop.permute.xlu2 %1700  ;;  %11196 = vst [vmem:[#allocation30_spill] sm:$0xff] %v8181_v21 }
 0x2ad   : > { %1521 = vrot.lane.b32.xlu1 %v1430_v55, %s6894_s23  ;;  %2363 = vst.msk [vmem:[#allocation4 + $0xf0] sm:$0xff] %vm2232_vm12, %v8181_v21  ;;  %v3775_v21 = vld [vmem:[%s11095_s3 + $0x50] sm:$0xff] }
 0x2ae   : > { %v8150_v44 = vpop.f32.mrf.mxu0  ;;  %1907 = vrot.lane.b32.xlu0 %v1816_v11, %s6897_s30 }
 0x2af   : > { %11194 = vst [vmem:[#allocation28_spill] sm:$0xff] %v8150_v44  ;;  %v1892_v22 = vpop.permute.xlu1 %1891 }
 0x2b0   : > { %2298 = vst.msk [vmem:[#allocation3 + $0x81] sm:$0xff] %vm2232_vm12, %v8150_v44  ;;  %v1314_v42 = vpop.permute.xlu0 %1313 }
 0x2b1   : > { %1969 = vst.msk [vmem:[#allocation4 + $0x1c8] sm:$0xff] %vm1949_vm10, %v1892_v22  ;;  %v1433_v22 = vld [vmem:[#allocation2 + $0x198] sm:$0xff] }
 0x2b2   : > { %1390 = vst.msk [vmem:[#allocation4 + $0x1e0] sm:$0xff] %vm1369_vm7, %v1314_v42  ;;  %1134 = vrot.lane.b32.xlu2 %v1621_v3, %s6893_s22  ;;  %v1819_v42 = vld [vmem:[#allocation2 + $0x19a] sm:$0xff] }
 0x2b4   : > { %v1316_v14 = vpop.permute.xlu2 %1315 }
 0x2b5   : > { %943 = vrot.lane.b32.xlu1 %v8081_v24, %s6892_s21  ;;  %v8169_v24 = vld [vmem:[#allocation3 + $0x68] sm:$0xff] }
 0x2b6   : > { %1329 = vrot.lane.b32.xlu0 %v1815_v41, %s6896_s25  ;;  %11195 = vst [vmem:[#allocation29_spill] sm:$0xff] %v8169_v24 }
 0x2b7   : > { %v3611_v60 = vld [vmem:[#allocation3 + $0x7a] sm:$0xff]  ;;  %v1508_v47 = vpop.permute.xlu1 %1507  ;;  %v3612_v38 = vld [vmem:[#allocation3 + $0x82] sm:$0xff]  ;;  %2362 = vst.msk [vmem:[#allocation4 + $0xd8] sm:$0xff] %vm2232_vm12, %v8169_v24 }
 0x2b8   : > { %3643 = vst.msk [vmem:[#allocation4 + $0xa0] sm:$0xff] %vm2232_vm12, %v3611_v60  ;;  %v2001_v17 = vld [vmem:[#allocation4 + $0x1c8] sm:$0xff]  ;;  %v1894_v63 = vpop.permute.xlu0 %1893  ;;  %v8166_v2 = vld [vmem:[#allocation3 + $0x81] sm:$0xff] }
 0x2b9   : > { %1584 = vst.msk [vmem:[#allocation4 + $0x1e0] sm:$0xff] %vm1563_vm8, %v1508_v47  ;;  %6653 = vmatmul.msk.f32.gmra.mxu0 %vm2018_vm11, %v2001_v17 }
 0x2ba   : > { %1777 = vst.msk [vmem:[#allocation4 + $0x1e0] sm:$0xff] %vm1756_vm9, %v1701_v43  ;;  %1714 = vrot.lane.b32.xlu2 %v1623_v20, %s6895_s24  ;;  %v1625_v43 = vld [vmem:[#allocation2 + $0x189] sm:$0xff] }
 0x2bb   : > { %1970 = vst.msk [vmem:[#allocation4 + $0x1e0] sm:$0xff] %vm1949_vm10, %v1894_v63 }
 0x2bc   : > { %3644 = vst.msk [vmem:[#allocation4 + $0xb8] sm:$0xff] %vm2232_vm12, %v3612_v38  ;;  %v1896_v45 = vpop.permute.xlu2 %1895 }
 0x2bd   : > { %3005 = vst.msk [vmem:[#allocation4 + $0xe0] sm:$0xff] %vm2232_vm12, %v8166_v2  ;;  %1523 = vrot.lane.b32.xlu1 %v1431_v58, %s6894_s23 }
 0x2be   : > { %1909 = vrot.lane.b32.xlu0 %v1817_v31, %s6897_s30  ;;  %v8196_v10 = vpop.f32.mrf.mxu0 }
 0x2bf   : > { %v3689_v30 = vld [vmem:[#allocation4 + $0xa0] sm:$0xff]  ;;  %v1123_v50 = vpop.permute.xlu1 %1122  ;;  %11197 = vst [vmem:[#allocation31_spill] sm:$0xff] %v8196_v10 }
 0x2c0   : > { %6672 = vmatmul.msk.f32.vlgmr.msra.gmra.mxu3 %vm2232_vm12, %v3689_v30  ;;  %1198 = vst.msk [vmem:[#allocation4 + $0x1f8] sm:$0xff] %vm1176_vm6, %v1123_v50  ;;  %v1510_v25 = vpop.permute.xlu0 %1509 }
 0x2c1   : > { %1391 = vst.msk [vmem:[#allocation4 + $0x1f8] sm:$0xff] %vm1369_vm7, %v1316_v14 }
 0x2c2   : > { %v2002_v56 = vld [vmem:[#allocation4 + $0x1e0] sm:$0xff]  ;;  %1585 = vst.msk [vmem:[#allocation4 + $0x1f8] sm:$0xff] %vm1563_vm8, %v1510_v25  ;;  %1136 = vrot.lane.b32.xlu2 %v1622_v61, %s6893_s22  ;;  %v8205_v61 = vld [vmem:[#allocation3 + $0x80] sm:$0xff] }
 0x2c3   : > { %6654 = vmatmul.msk.f32.gmra.mxu0 %vm2018_vm11, %v2002_v56  ;;  %v3692_v40 = vld [vmem:[#allocation4 + $0xb8] sm:$0xff]  ;;  %2299 = vst.msk [vmem:[#allocation3 + $0x91] sm:$0xff] %vm2232_vm12, %v8196_v10 }
 0x2c4   : > { %v1512_v46 = vpop.permute.xlu2 %1511  ;;  %11198 = vst [vmem:[#allocation32_spill] sm:$0xff] %v8205_v61  ;;  %v1626_v56 = vld [vmem:[#allocation2 + $0x199] sm:$0xff] }
 0x2c5   : > { %945 = vrot.lane.b32.xlu1 %v1430_v55, %s6892_s21  ;;  %2364 = vst.msk [vmem:[#allocation4 + $0x108] sm:$0xff] %vm2232_vm12, %v8205_v61  ;;  %v3776_v61 = vld [vmem:[%s11095_s3 + $0x58] sm:$0xff] }
 0x2c6   : > { %1331 = vrot.lane.b32.xlu0 %v1816_v11, %s6896_s25 }
 0x2c7   : > { %v1703_v5 = vpop.permute.xlu1 %1702  ;;  %v8210_v18 = vpop.f32.mrf.mxu0 }
 0x2c8   : > { %6673 = vmatmul.msk.f32.gmra.mxu3 %vm2232_vm12, %v3692_v40  ;;  %1778 = vst.msk [vmem:[#allocation4 + $0x1f8] sm:$0xff] %vm1756_vm9, %v1703_v5  ;;  %v1125_v41 = vpop.permute.xlu0 %1124 }
 0x2c9   : > { %1971 = vst.msk [vmem:[#allocation4 + $0x1f8] sm:$0xff] %vm1949_vm10, %v1896_v45 }
 0x2ca   : > { %1199 = vst.msk [vmem:[#allocation4 + $0x210] sm:$0xff] %vm1176_vm6, %v1125_v41  ;;  %1716 = vrot.lane.b32.xlu2 %v1624_v26, %s6895_s24  ;;  %v8212_v55 = vld [vmem:[#allocation3 + $0x91] sm:$0xff] }
 0x2cb   : > { %11199 = vst [vmem:[#allocation33_spill] sm:$0xff] %v8210_v18  ;;  %v1434_v41 = vld [vmem:[#allocation2 + $0x1a0] sm:$0xff] }
 0x2cc   : > { %v1127_v7 = vpop.permute.xlu2 %1126  ;;  %2300 = vst.msk [vmem:[#allocation3 + $0x99] sm:$0xff] %vm2232_vm12, %v8210_v18 }
 0x2cd   : > { %1525 = vrot.lane.b32.xlu1 %v1432_v48, %s6894_s23  ;;  %1200 = vst.msk [vmem:[#allocation4 + $0x228] sm:$0xff] %vm1176_vm6, %v1127_v7 }
 0x2ce   : > { %1911 = vrot.lane.b32.xlu0 %v1818_v33, %s6897_s30  ;;  %3006 = vst.msk [vmem:[#allocation4 + $0xf8] sm:$0xff] %vm2232_vm12, %v8212_v55 }
 0x2cf   : > { %v1318_v3 = vpop.permute.xlu1 %1317 }
 0x2d0   : > { %1392 = vst.msk [vmem:[#allocation4 + $0x210] sm:$0xff] %vm1369_vm7, %v1318_v3  ;;  %v1705_v28 = vpop.permute.xlu0 %1704  ;;  %v2003_v53 = vld [vmem:[#allocation4 + $0x1f8] sm:$0xff] }
 0x2d1   : > { %1586 = vst.msk [vmem:[#allocation4 + $0x210] sm:$0xff] %vm1563_vm8, %v1512_v46  ;;  %6655 = vmatmul.msk.f32.gmra.mxu0 %vm2018_vm11, %v2003_v53  ;;  %v1820_v46 = vld [vmem:[#allocation2 + $0x1a2] sm:$0xff] }
 0x2d2   : > { %1779 = vst.msk [vmem:[#allocation4 + $0x210] sm:$0xff] %vm1756_vm9, %v1705_v28  ;;  %1138 = vrot.lane.b32.xlu2 %v1623_v20, %s6893_s22 }
 0x2d3   : > { %v3613_v60 = vld [vmem:[#allocation3 + $0x92] sm:$0xff]  ;;  %v8224_v47 = vld [vmem:[#allocation3 + $0x9a] sm:$0xff] }
 0x2d4   : > { %v1707_v57 = vpop.permute.xlu2 %1706  ;;  %3645 = vst.msk [vmem:[#allocation4 + $0xd0] sm:$0xff] %vm2232_vm12, %v3613_v60  ;;  %v8229_v17 = vld [vmem:[#allocation3 + $0x99] sm:$0xff] }
 0x2d5   : > { %947 = vrot.lane.b32.xlu1 %v1431_v58, %s6892_s21  ;;  %3646 = vst.msk [vmem:[#allocation4 + $0xe8] sm:$0xff] %vm2232_vm12, %v8224_v47  ;;  %v8238_v58 = vld [vmem:[#allocation3 + $0x90] sm:$0xff]  ;;  %v8250_v40 = vld [vmem:[#allocation3 + $0x98] sm:$0xff] }
 0x2d6   : > { %1333 = vrot.lane.b32.xlu0 %v1817_v31, %s6896_s25  ;;  %3007 = vst.msk [vmem:[#allocation4 + $0x110] sm:$0xff] %vm2232_vm12, %v8229_v17 }
 0x2d7   : > { %v1898_v11 = vpop.permute.xlu1 %1897  ;;  %11200 = vst [vmem:[#allocation34_spill] sm:$0xff] %v8238_v58 }
 0x2d8   : > { %1972 = vst.msk [vmem:[#allocation4 + $0x210] sm:$0xff] %vm1949_vm10, %v1898_v11  ;;  %v1320_v12 = vpop.permute.xlu0 %1319  ;;  %v8252_v5 = vpop.f32.mrf.mxu0 }
 0x2d9   : > { %1393 = vst.msk [vmem:[#allocation4 + $0x228] sm:$0xff] %vm1369_vm7, %v1320_v12 }
 0x2da   : > { %1718 = vrot.lane.b32.xlu2 %v1625_v43, %s6895_s24  ;;  %2365 = vst.msk [vmem:[#allocation4 + $0x120] sm:$0xff] %vm2232_vm12, %v8238_v58  ;;  %v3777_v58 = vld [vmem:[%s11095_s3 + $0x60] sm:$0xff] }
 0x2db   : > { %v3695_v31 = vld [vmem:[#allocation4 + $0xd0] sm:$0xff]  ;;  %11201 = vst [vmem:[#allocation35_spill] sm:$0xff] %v8250_v40 }
 0x2dc   : > { %v1129_v38 = vpop.permute.xlu2 %1128  ;;  %6674 = vmatmul.msk.f32.gmra.mxu3 %vm2232_vm12, %v3695_v31  ;;  %11202 = vst [vmem:[#allocation36_spill] sm:$0xff] %v8252_v5 }
 0x2dd   : > { %1527 = vrot.lane.b32.xlu1 %v1433_v22, %s6894_s23  ;;  %2301 = vst.msk [vmem:[#allocation3 + $0xa9] sm:$0xff] %vm2232_vm12, %v8252_v5 }
 0x2de   : > { %1913 = vrot.lane.b32.xlu0 %v1819_v42, %s6897_s30  ;;  %2366 = vst.msk [vmem:[#allocation4 + $0x138] sm:$0xff] %vm2232_vm12, %v8250_v40  ;;  %v1627_v42 = vld [vmem:[#allocation2 + $0x1a1] sm:$0xff] }
 0x2df   : > { %v1514_v63 = vpop.permute.xlu1 %1513  ;;  %v2004_v14 = vld [vmem:[#allocation4 + $0x210] sm:$0xff] }
 0x2e0   : > { %1587 = vst.msk [vmem:[#allocation4 + $0x228] sm:$0xff] %vm1563_vm8, %v1514_v63  ;;  %6656 = vmatmul.msk.f32.gmra.mxu0 %vm2018_vm11, %v2004_v14  ;;  %v1900_v20 = vpop.permute.xlu0 %1899 }
 0x2e1   : > { %1780 = vst.msk [vmem:[#allocation4 + $0x228] sm:$0xff] %vm1756_vm9, %v1707_v57 }
 0x2e2   : > { %1973 = vst.msk [vmem:[#allocation4 + $0x228] sm:$0xff] %vm1949_vm10, %v1900_v20  ;;  %1140 = vrot.lane.b32.xlu2 %v1624_v26, %s6893_s22  ;;  %v3698_v26 = vld [vmem:[#allocation4 + $0xe8] sm:$0xff] }
 0x2e4   : > { %v1709_v25 = vpop.permute.xlu2 %1708  ;;  %6675 = vmatmul.msk.f32.gmra.mxu3 %vm2232_vm12, %v3698_v26  ;;  %v8269_v53 = vld [vmem:[#allocation3 + $0xa9] sm:$0xff] }
 0x2e5   : > { %949 = vrot.lane.b32.xlu1 %v1432_v48, %s6892_s21  ;;  %3008 = vst.msk [vmem:[#allocation4 + $0x128] sm:$0xff] %vm2232_vm12, %v8269_v53  ;;  %v8276_v7 = vld [vmem:[#allocation3 + $0xa8] sm:$0xff]  ;;  %s6899_s21 = smov 32  }
 0x2e6   : > { %1335 = vrot.lane.b32.xlu0 %v1818_v33, %s6896_s25  ;;  %v8266_v28 = vpop.f32.mrf.mxu0  ;;  %11204 = vst [vmem:[#allocation38_spill] sm:$0xff] %v8276_v7 }
 0x2e7   : > { %v936_v30 = vpop.permute.xlu1 %935  ;;  %11203 = vst [vmem:[#allocation37_spill] sm:$0xff] %v8266_v28 }
 0x2e8   : > { %1008 = vst.msk [vmem:[#allocation4 + $0x240] sm:$0xff] %vm983_vm4, %v936_v30  ;;  %v1322_v50 = vpop.permute.xlu0 %1321 }
 0x2e9   : > { %1201 = vst.msk [vmem:[#allocation4 + $0x240] sm:$0xff] %vm1176_vm6, %v1129_v38  ;;  %v2005_v45 = vld [vmem:[#allocation4 + $0x228] sm:$0xff] }
 0x2ea   : > { %1394 = vst.msk [vmem:[#allocation4 + $0x240] sm:$0xff] %vm1369_vm7, %v1322_v50  ;;  %6657 = vmatmul.msk.f32.gmra.mxu0 %vm2018_vm11, %v2005_v45  ;;  %1720 = vrot.lane.b32.xlu2 %v1626_v56, %s6895_s24 }
 0x2eb   : > { %2302 = vst.msk [vmem:[#allocation3 + $0xb1] sm:$0xff] %vm2232_vm12, %v8266_v28 }
 0x2ec   : > { %v1131_v3 = vpop.permute.xlu2 %1130  ;;  %2367 = vst.msk [vmem:[#allocation4 + $0x150] sm:$0xff] %vm2232_vm12, %v8276_v7 }
 0x2ed   : > { %1529 = vrot.lane.b32.xlu1 %v1434_v41, %s6894_s23  ;;  %s4236_s23 = sld [smem:[#allocation6]] }
 0x2ee   : > { %1915 = vrot.lane.b32.xlu0 %v1820_v46, %s6897_s30 }
 0x2ef   : > { %v1516_v48 = vpop.permute.xlu1 %1515 }
 0x2f0   : > { %1588 = vst.msk [vmem:[#allocation4 + $0x240] sm:$0xff] %vm1563_vm8, %v1516_v48  ;;  %v1902_v33 = vpop.permute.xlu0 %1901 }
 0x2f1   : > { %1781 = vst.msk [vmem:[#allocation4 + $0x240] sm:$0xff] %vm1756_vm9, %v1709_v25 }
 0x2f2   : > { %1974 = vst.msk [vmem:[#allocation4 + $0x240] sm:$0xff] %vm1949_vm10, %v1902_v33  ;;  %1142 = vrot.lane.b32.xlu2 %v1625_v43, %s6893_s22  ;;  %v8282_v60 = vld [vmem:[#allocation3 + $0xaa] sm:$0xff]  ;;  %v8284_v43 = vpop.f32.mrf.mxu0  ;;  %v8288_v63 = vld [vmem:[#allocation3 + $0xb2] sm:$0xff]  ;;  %s6900_s22 = smov 96  }
 0x2f3   : > { %11205 = vst [vmem:[#allocation39_spill] sm:$0xff] %v8284_v43  ;;  %v8306_v50 = vld [vmem:[#allocation3 + $0xb1] sm:$0xff] }
 0x2f4   : > { %v1133_v57 = vpop.permute.xlu2 %1132  ;;  %3647 = vst.msk [vmem:[#allocation4 + $0x100] sm:$0xff] %vm2232_vm12, %v8282_v60 }
 0x2f5   : > { %2303 = vst.msk [vmem:[#allocation3 + $0xc1] sm:$0xff] %vm2232_vm12, %v8284_v43 }
 0x2f6   : > { %3648 = vst.msk [vmem:[#allocation4 + $0x118] sm:$0xff] %vm2232_vm12, %v8288_v63 }
 0x2f7   : > { %v938_v11 = vpop.permute.xlu1 %937  ;;  %3009 = vst.msk [vmem:[#allocation4 + $0x140] sm:$0xff] %vm2232_vm12, %v8306_v50 }
 0x2f8   : > { %1009 = vst.msk [vmem:[#allocation4 + $0x258] sm:$0xff] %vm983_vm4, %v938_v11  ;;  %v940_v12 = vpop.permute.xlu0 %939 }
 0x2f9   : > { %1202 = vst.msk [vmem:[#allocation4 + $0x258] sm:$0xff] %vm1176_vm6, %v1131_v3  ;;  %v2006_v22 = vld [vmem:[#allocation4 + $0x240] sm:$0xff] }
 0x2fa   : > { %1010 = vst.msk [vmem:[#allocation4 + $0x270] sm:$0xff] %vm983_vm4, %v940_v12  ;;  %6658 = vmatmul.msk.f32.gmra.mxu0 %vm2018_vm11, %v2006_v22  ;;  %1722 = vrot.lane.b32.xlu2 %v1627_v42, %s6895_s24  ;;  %s6549_s24 = scalar_lea.sflag [#allocation8], %s244_s16 }
 0x2fb   : > { %1203 = vst.msk [vmem:[#allocation4 + $0x270] sm:$0xff] %vm1176_vm6, %v1133_v57  ;;  %v3701_v31 = vld [vmem:[#allocation4 + $0x100] sm:$0xff] }
 0x2fc   : > { %v1711_v38 = vpop.permute.xlu2 %1710  ;;  %6676 = vmatmul.msk.f32.gmra.mxu3 %vm2232_vm12, %v3701_v31  ;;  %v8326_v3 = vld [vmem:[#allocation3 + $0xc1] sm:$0xff] }
 0x2fd   : > { %v3704_v46 = vld [vmem:[#allocation4 + $0x118] sm:$0xff]  ;;  %3010 = vst.msk [vmem:[#allocation4 + $0x158] sm:$0xff] %vm2232_vm12, %v8326_v3 }
 0x2ff   : > { %v1324_v14 = vpop.permute.xlu1 %1323 }
 0x300   : > { %1395 = vst.msk [vmem:[#allocation4 + $0x258] sm:$0xff] %vm1369_vm7, %v1324_v14  ;;  %v1518_v20 = vpop.permute.xlu0 %1517  ;;  %v8300_v30 = vpop.f32.mrf.mxu0 }
 0x301   : > { %1589 = vst.msk [vmem:[#allocation4 + $0x258] sm:$0xff] %vm1563_vm8, %v1518_v20 }
 0x302   : > { %11206 = vst [vmem:[#allocation40_spill] sm:$0xff] %v8300_v30 }
 0x303   : > { %1782 = vst.msk [vmem:[#allocation4 + $0x258] sm:$0xff] %vm1756_vm9, %v1711_v38 }
 0x304   : > { %2304 = vst.msk [vmem:[#allocation3 + $0xc9] sm:$0xff] %vm2232_vm12, %v8300_v30  ;;  %v1713_v56 = vpop.permute.xlu2 %1712  ;;  %6677 = vmatmul.msk.f32.gmra.mxu3 %vm2232_vm12, %v3704_v46 }
 0x307   : > { %v1326_v25 = vpop.permute.xlu1 %1325 }
 0x308   : > { %1396 = vst.msk [vmem:[#allocation4 + $0x270] sm:$0xff] %vm1369_vm7, %v1326_v25  ;;  %v1520_v45 = vpop.permute.xlu0 %1519  ;;  %v8340_v25 = vld [vmem:[#allocation3 + $0xb0] sm:$0xff] }
 0x309   : > { %1590 = vst.msk [vmem:[#allocation4 + $0x270] sm:$0xff] %vm1563_vm8, %v1520_v45 }
 0x30a   : > { %1783 = vst.msk [vmem:[#allocation4 + $0x270] sm:$0xff] %vm1756_vm9, %v1713_v56 }
 0x30b   : > { %v8312_v41 = vld [vmem:[#allocation3 + $0xc2] sm:$0xff]  ;;  %v8315_v26 = vld [vmem:[#allocation3 + $0xca] sm:$0xff]  ;;  %11209 = vst [vmem:[#allocation43_spill] sm:$0xff] %v8340_v25 }
 0x30c   : > { %3649 = vst.msk [vmem:[#allocation4 + $0x130] sm:$0xff] %vm2232_vm12, %v8312_v41  ;;  %v1135_v12 = vpop.permute.xlu2 %1134  ;;  %v8347_v56 = vld [vmem:[#allocation3 + $0xc9] sm:$0xff] }
 0x30d   : > { %3650 = vst.msk [vmem:[#allocation4 + $0x148] sm:$0xff] %vm2232_vm12, %v8315_v26 }
 0x30e   : > { %v8322_v48 = vpop.f32.mrf.mxu0  ;;  %2368 = vst.msk [vmem:[#allocation4 + $0x168] sm:$0xff] %vm2232_vm12, %v8340_v25 }
 0x30f   : > { %11207 = vst [vmem:[#allocation41_spill] sm:$0xff] %v8322_v48  ;;  %v1904_v33 = vpop.permute.xlu1 %1903 }
 0x310   : > { %2305 = vst.msk [vmem:[#allocation3 + $0xd9] sm:$0xff] %vm2232_vm12, %v8322_v48  ;;  %v1906_v11 = vpop.permute.xlu0 %1905 }
 0x311   : > { %1975 = vst.msk [vmem:[#allocation4 + $0x258] sm:$0xff] %vm1949_vm10, %v1904_v33 }
 0x312   : > { %1976 = vst.msk [vmem:[#allocation4 + $0x270] sm:$0xff] %vm1949_vm10, %v1906_v11 }
 0x313   : > { %v3707_v57 = vld [vmem:[#allocation4 + $0x130] sm:$0xff]  ;;  %3011 = vst.msk [vmem:[#allocation4 + $0x170] sm:$0xff] %vm2232_vm12, %v8347_v56 }
 0x314   : > { %6678 = vmatmul.msk.f32.gmra.mxu3 %vm2232_vm12, %v3707_v57  ;;  %v1715_v31 = vpop.permute.xlu2 %1714  ;;  %v3710_v45 = vld [vmem:[#allocation4 + $0x148] sm:$0xff] }
 0x317   : > { %v942_v22 = vpop.permute.xlu1 %941 }
 0x318   : > { %v8333_v42 = vpop.f32.mrf.mxu0  ;;  %v2007_v14 = vld [vmem:[#allocation4 + $0x258] sm:$0xff]  ;;  %1011 = vst.msk [vmem:[#allocation4 + $0x288] sm:$0xff] %vm983_vm4, %v942_v22  ;;  %v1328_v20 = vpop.permute.xlu0 %1327  ;;  %v8359_v22 = vld [vmem:[#allocation3 + $0xc0] sm:$0xff] }
 0x319   : > { %11208 = vst [vmem:[#allocation42_spill] sm:$0xff] %v8333_v42  ;;  %6659 = vmatmul.msk.f32.gmra.mxu0 %vm2018_vm11, %v2007_v14  ;;  %v2008_v38 = vld [vmem:[#allocation4 + $0x270] sm:$0xff] }
 0x31a   : > { %2306 = vst.msk [vmem:[#allocation3 + $0xe1] sm:$0xff] %vm2232_vm12, %v8333_v42  ;;  %6660 = vmatmul.msk.f32.vlgmr.msra.gmra.mxu2 %vm2018_vm11, %v2008_v38 }
 0x31b   : > { %1204 = vst.msk [vmem:[#allocation4 + $0x288] sm:$0xff] %vm1176_vm6, %v1135_v12 }
 0x31c   : > { %6679 = vmatmul.msk.f32.gmra.mxu3 %vm2232_vm12, %v3710_v45  ;;  %1397 = vst.msk [vmem:[#allocation4 + $0x288] sm:$0xff] %vm1369_vm7, %v1328_v20  ;;  %v1137_v57 = vpop.permute.xlu2 %1136 }
 0x31d   : > { %11210 = vst [vmem:[#allocation44_spill] sm:$0xff] %v8359_v22 }
 0x31e   : > { %2369 = vst.msk [vmem:[#allocation4 + $0x180] sm:$0xff] %vm2232_vm12, %v8359_v22 }
 0x31f   : > { %v1522_v46 = vpop.permute.xlu1 %1521 }
 0x320   : > { %1591 = vst.msk [vmem:[#allocation4 + $0x288] sm:$0xff] %vm1563_vm8, %v1522_v46  ;;  %v1908_v11 = vpop.permute.xlu0 %1907 }
 0x321   : > { %v8351_v33 = vld [vmem:[#allocation3 + $0xda] sm:$0xff]  ;;  %v8356_v12 = vld [vmem:[#allocation3 + $0xe2] sm:$0xff]  ;;  %1784 = vst.msk [vmem:[#allocation4 + $0x288] sm:$0xff] %vm1756_vm9, %v1715_v31 }
 0x322   : > { %3651 = vst.msk [vmem:[#allocation4 + $0x160] sm:$0xff] %vm2232_vm12, %v8351_v33  ;;  %v8427_v5 = vld [vmem:[#allocation3 + $0xe0] sm:$0xff] }
 0x323   : > { %1977 = vst.msk [vmem:[#allocation4 + $0x288] sm:$0xff] %vm1949_vm10, %v1908_v11  ;;  %v8375_v11 = vld [vmem:[#allocation3 + $0xd9] sm:$0xff] }
 0x324   : > { %3652 = vst.msk [vmem:[#allocation4 + $0x178] sm:$0xff] %vm2232_vm12, %v8356_v12  ;;  %v1717_v46 = vpop.permute.xlu2 %1716 }
 0x325   : > { %3012 = vst.msk [vmem:[#allocation4 + $0x188] sm:$0xff] %vm2232_vm12, %v8375_v11 }
 0x326   : > { %11216 = vst [vmem:[#allocation50_spill] sm:$0xff] %v8427_v5 }
 0x327   : > { %v944_v20 = vpop.permute.xlu1 %943  ;;  %2372 = vst.msk [vmem:[#allocation4 + $0x1c8] sm:$0xff] %vm2232_vm12, %v8427_v5 }
 0x328   : > { %v1330_v45 = vpop.permute.xlu0 %1329  ;;  %1012 = vst.msk [vmem:[#allocation4 + $0x2a0] sm:$0xff] %vm983_vm4, %v944_v20 }
 0x329   : > { %v8366_v14 = vpop.f32.mrf.mxu0  ;;  %v3713_v38 = vld [vmem:[#allocation4 + $0x160] sm:$0xff]  ;;  %1205 = vst.msk [vmem:[#allocation4 + $0x2a0] sm:$0xff] %vm1176_vm6, %v1137_v57  ;;  %v8383_v57 = vld [vmem:[#allocation3 + $0xc8] sm:$0xff] }
 0x32a   : > { %11211 = vst [vmem:[#allocation45_spill] sm:$0xff] %v8366_v14  ;;  %6680 = vmatmul.msk.f32.gmra.mxu3 %vm2232_vm12, %v3713_v38  ;;  %v2009_v31 = vld [vmem:[#allocation4 + $0x288] sm:$0xff] }
 0x32b   : > { %2307 = vst.msk [vmem:[#allocation3 + $0xf1] sm:$0xff] %vm2232_vm12, %v8366_v14  ;;  %6661 = vmatmul.msk.f32.gmra.mxu2 %vm2018_vm11, %v2009_v31  ;;  %v3716_v42 = vld [vmem:[#allocation4 + $0x178] sm:$0xff] }
 0x32c   : > { %1398 = vst.msk [vmem:[#allocation4 + $0x2a0] sm:$0xff] %vm1369_vm7, %v1330_v45  ;;  %v1139_v20 = vpop.permute.xlu2 %1138 }
 0x32d   : > { %11212 = vst [vmem:[#allocation46_spill] sm:$0xff] %v8383_v57 }
 0x32e   : > { %2370 = vst.msk [vmem:[#allocation4 + $0x198] sm:$0xff] %vm2232_vm12, %v8383_v57 }
 0x32f   : > { %v1524_v14 = vpop.permute.xlu1 %1523 }
 0x330   : > { %1592 = vst.msk [vmem:[#allocation4 + $0x2a0] sm:$0xff] %vm1563_vm8, %v1524_v14  ;;  %v1910_v48 = vpop.permute.xlu0 %1909 }
 0x331   : > { %1785 = vst.msk [vmem:[#allocation4 + $0x2a0] sm:$0xff] %vm1756_vm9, %v1717_v46  ;;  %v8392_v46 = vld [vmem:[#allocation3 + $0xe1] sm:$0xff] }
 0x332   : > { %6681 = vmatmul.msk.f32.gmra.mxu3 %vm2232_vm12, %v3716_v42  ;;  %1978 = vst.msk [vmem:[#allocation4 + $0x2a0] sm:$0xff] %vm1949_vm10, %v1910_v48  ;;  %v8419_v28 = vld [vmem:[#allocation3 + $0xf1] sm:$0xff] }
 0x333   : > { %3013 = vst.msk [vmem:[#allocation4 + $0x1a0] sm:$0xff] %vm2232_vm12, %v8392_v46 }
 0x334   : > { %v1719_v31 = vpop.permute.xlu2 %1718  ;;  %3014 = vst.msk [vmem:[#allocation4 + $0x1b8] sm:$0xff] %vm2232_vm12, %v8419_v28 }
 0x336   : > { %v8387_v38 = vpop.f32.mrf.mxu0 }
 0x337   : > { %11213 = vst [vmem:[#allocation47_spill] sm:$0xff] %v8387_v38  ;;  %v946_v14 = vpop.permute.xlu1 %945 }
 0x338   : > { %2308 = vst.msk [vmem:[#allocation3 + $0xf9] sm:$0xff] %vm2232_vm12, %v8387_v38  ;;  %v1332_v45 = vpop.permute.xlu0 %1331 }
 0x339   : > { %1013 = vst.msk [vmem:[#allocation4 + $0x2b8] sm:$0xff] %vm983_vm4, %v946_v14  ;;  %v2010_v48 = vld [vmem:[#allocation4 + $0x2a0] sm:$0xff] }
 0x33a   : > { %1206 = vst.msk [vmem:[#allocation4 + $0x2b8] sm:$0xff] %vm1176_vm6, %v1139_v20  ;;  %6662 = vmatmul.msk.f32.gmra.mxu2 %vm2018_vm11, %v2010_v48  ;;  %v8412_v48 = vld [vmem:[#allocation3 + $0xd8] sm:$0xff] }
 0x33b   : > { %1399 = vst.msk [vmem:[#allocation4 + $0x2b8] sm:$0xff] %vm1369_vm7, %v1332_v45 }
 0x33c   : > { %v1141_v45 = vpop.permute.xlu2 %1140  ;;  %11215 = vst [vmem:[#allocation49_spill] sm:$0xff] %v8412_v48 }
 0x33d   : > { %2371 = vst.msk [vmem:[#allocation4 + $0x1b0] sm:$0xff] %vm2232_vm12, %v8412_v48 }
 0x33f   : > { %v8399_v42 = vld [vmem:[#allocation3 + $0xf2] sm:$0xff]  ;;  %v8401_v38 = vld [vmem:[#allocation3 + $0xfa] sm:$0xff]  ;;  %v1526_v14 = vpop.permute.xlu1 %1525 }
 0x340   : > { %3653 = vst.msk [vmem:[#allocation4 + $0x190] sm:$0xff] %vm2232_vm12, %v8399_v42  ;;  %v8405_v30 = vpop.f32.mrf.mxu0  ;;  %v1912_v20 = vpop.permute.xlu0 %1911 }
 0x341   : > { %11214 = vst [vmem:[#allocation48_spill] sm:$0xff] %v8405_v30 }
 0x342   : > { %3654 = vst.msk [vmem:[#allocation4 + $0x1a8] sm:$0xff] %vm2232_vm12, %v8401_v38 }
 0x343   : > { %1593 = vst.msk [vmem:[#allocation4 + $0x2b8] sm:$0xff] %vm1563_vm8, %v1526_v14 }
 0x344   : > { %2309 = vst.msk [vmem:[#allocation3 + $0x109] sm:$0xff] %vm2232_vm12, %v8405_v30 }
 0x345   : > { %1786 = vst.msk [vmem:[#allocation4 + $0x2b8] sm:$0xff] %vm1756_vm9, %v1719_v31 }
 0x346   : > { %1979 = vst.msk [vmem:[#allocation4 + $0x2b8] sm:$0xff] %vm1949_vm10, %v1912_v20  ;;  %v1721_v20 = vpop.permute.xlu2 %1720 }
 0x347   : > { %v3719_v43 = vld [vmem:[#allocation4 + $0x190] sm:$0xff]  ;;  %v948_v14 = vpop.permute.xlu1 %947 }
 0x348   : > { %6682 = vmatmul.msk.f32.gmra.mxu3 %vm2232_vm12, %v3719_v43  ;;  %1014 = vst.msk [vmem:[#allocation4 + $0x2d0] sm:$0xff] %vm983_vm4, %v948_v14  ;;  %v1334_v30 = vpop.permute.xlu0 %1333 }
 0x349   : > { %1207 = vst.msk [vmem:[#allocation4 + $0x2d0] sm:$0xff] %vm1176_vm6, %v1141_v45  ;;  %v3722_v43 = vld [vmem:[#allocation4 + $0x1a8] sm:$0xff] }
 0x34a   : > { %1400 = vst.msk [vmem:[#allocation4 + $0x2d0] sm:$0xff] %vm1369_vm7, %v1334_v30 }
 0x34b   : > { %v8472_v35 = vld [vmem:[#allocation3 + $0x109] sm:$0xff] }
 0x34c   : > { %3016 = vst.msk [vmem:[#allocation4 + $0x1e8] sm:$0xff] %vm2232_vm12, %v8472_v35 }
 0x34d   : > { %v2011_v31 = vld [vmem:[#allocation4 + $0x2b8] sm:$0xff] }
 0x34e   : > { %6663 = vmatmul.msk.f32.gmra.mxu2 %vm2018_vm11, %v2011_v31  ;;  %v8431_v18 = vpop.f32.mrf.mxu0  ;;  %v1143_v14 = vpop.permute.xlu2 %1142  ;;  %v8439_v31 = vld [vmem:[#allocation3 + $0xf9] sm:$0xff] }
 0x34f   : > { %11217 = vst [vmem:[#allocation51_spill] sm:$0xff] %v8431_v18  ;;  %v1528_v45 = vpop.permute.xlu1 %1527 }
 0x350   : > { %6683 = vmatmul.msk.f32.gmra.mxu3 %vm2232_vm12, %v3722_v43  ;;  %2310 = vst.msk [vmem:[#allocation3 + $0x111] sm:$0xff] %vm2232_vm12, %v8431_v18  ;;  %v1914_v30 = vpop.permute.xlu0 %1913  ;;  %v8458_v18 = vld [vmem:[#allocation3 + $0xf0] sm:$0xff] }
 0x351   : > { %1594 = vst.msk [vmem:[#allocation4 + $0x2d0] sm:$0xff] %vm1563_vm8, %v1528_v45 }
 0x352   : > { %1787 = vst.msk [vmem:[#allocation4 + $0x2d0] sm:$0xff] %vm1756_vm9, %v1721_v20 }
 0x353   : > { %1980 = vst.msk [vmem:[#allocation4 + $0x2d0] sm:$0xff] %vm1949_vm10, %v1914_v30 }
 0x354   : > { %3015 = vst.msk [vmem:[#allocation4 + $0x1d0] sm:$0xff] %vm2232_vm12, %v8439_v31 }
 0x355   : > { %11218 = vst [vmem:[#allocation52_spill] sm:$0xff] %v8458_v18 }
 0x356   : > { %2373 = vst.msk [vmem:[#allocation4 + $0x1e0] sm:$0xff] %vm2232_vm12, %v8458_v18 }
 0x357   : > { %v8441_v10 = vld [vmem:[#allocation3 + $0x10a] sm:$0xff]  ;;  %v8443_v44 = vld [vmem:[#allocation3 + $0x112] sm:$0xff]  ;;  %v950_v43 = vpop.permute.xlu1 %949 }
 0x358   : > { %v2408_v23 = vld [vmem:[#allocation3 + $0x111] sm:$0xff]  ;;  %3655 = vst.msk [vmem:[#allocation4 + $0x1c0] sm:$0xff] %vm2232_vm12, %v8441_v10  ;;  %2688 = vrot.lane.b32.xlu2 %v8443_v44, %s6898_s19  ;;  %v1336_v20 = vpop.permute.xlu0 %1335 }
 0x359   : > { %2495 = vrot.lane.b32.xlu1 %v2408_v23, %s6899_s21  ;;  %1015 = vst.msk [vmem:[#allocation4 + $0x2e8] sm:$0xff] %vm983_vm4, %v950_v43  ;;  %v8454_v30 = vld [vmem:[#allocation3 + $0x110] sm:$0xff]  ;;  %v1723_v43 = vpop.permute.xlu2 %1722 }
 0x35a   : > { %1208 = vst.msk [vmem:[#allocation4 + $0x2e8] sm:$0xff] %vm1176_vm6, %v1143_v14  ;;  %v2012_v45 = vld [vmem:[#allocation4 + $0x2d0] sm:$0xff] }
 0x35b   : > { %1401 = vst.msk [vmem:[#allocation4 + $0x2e8] sm:$0xff] %vm1369_vm7, %v1336_v20  ;;  %6664 = vmatmul.msk.f32.gmra.mxu2 %vm2018_vm11, %v2012_v45 }
 0x35c   : > { %3656 = vst.msk [vmem:[#allocation4 + $0x1d8] sm:$0xff] %vm2232_vm12, %v8443_v44 }
 0x35d   : > { %2376 = vst.msk [vmem:[#allocation4 + $0x228] sm:$0xff] %vm2232_vm12, %v8454_v30  ;;  %v8464_v23 = vpop.f32.mrf.mxu0 }
 0x35e   : > { %11219 = vst [vmem:[#allocation53_spill] sm:$0xff] %v8464_v23 }
 0x35f   : > { %2311 = vst.msk [vmem:[#allocation3 + $0x121] sm:$0xff] %vm2232_vm12, %v8464_v23  ;;  %v3725_v14 = vld [vmem:[#allocation4 + $0x1c0] sm:$0xff]  ;;  %v1530_v20 = vpop.permute.xlu1 %1529 }
 0x360   : > { %6684 = vmatmul.msk.f32.gmra.mxu3 %vm2232_vm12, %v3725_v14  ;;  %1595 = vst.msk [vmem:[#allocation4 + $0x2e8] sm:$0xff] %vm1563_vm8, %v1530_v20  ;;  %v1916_v45 = vpop.permute.xlu0 %1915  ;;  %v8488_v20 = vld [vmem:[#allocation3 + $0xf8] sm:$0xff] }
 0x361   : > { %1788 = vst.msk [vmem:[#allocation4 + $0x2e8] sm:$0xff] %vm1756_vm9, %v1723_v43 }
 0x362   : > { %1981 = vst.msk [vmem:[#allocation4 + $0x2e8] sm:$0xff] %vm1949_vm10, %v1916_v45 }
 0x363   : > { %v3728_v23 = vld [vmem:[#allocation4 + $0x1d8] sm:$0xff]  ;;  %11221 = vst [vmem:[#allocation55_spill] sm:$0xff] %v8488_v20 }
 0x364   : > { %2374 = vst.msk [vmem:[#allocation4 + $0x1f8] sm:$0xff] %vm2232_vm12, %v8488_v20 }
 0x366   : > { %v2409_v16 = vld [vmem:[#allocation3 + $0x121] sm:$0xff] }
 0x367   : > { %v8478_v39 = vld [vmem:[#allocation3 + $0x120] sm:$0xff]  ;;  %2497 = vrot.lane.b32.xlu1 %v2409_v16, %s6899_s21  ;;  %v8483_v14 = vpop.f32.mrf.mxu0  ;;  %v8493_v16 = vld [vmem:[#allocation3 + $0x111] sm:$0xff] }
 0x368   : > { %2377 = vst.msk [vmem:[#allocation4 + $0x240] sm:$0xff] %vm2232_vm12, %v8478_v39  ;;  %6685 = vmatmul.msk.f32.gmra.mxu3 %vm2232_vm12, %v3728_v23 }
 0x369   : > { %11220 = vst [vmem:[#allocation54_spill] sm:$0xff] %v8483_v14  ;;  %v2013_v43 = vld [vmem:[#allocation4 + $0x2e8] sm:$0xff] }
 0x36a   : > { %2312 = vst.msk [vmem:[#allocation3 + $0x129] sm:$0xff] %vm2232_vm12, %v8483_v14  ;;  %6665 = vmatmul.msk.f32.gmra.mxu2 %vm2018_vm11, %v2013_v43  ;;  %v8514_v43 = vld [vmem:[#allocation3 + $0x108] sm:$0xff] }
 0x36b   : > { %3017 = vst.msk [vmem:[#allocation4 + $0x200] sm:$0xff] %vm2232_vm12, %v8493_v16 }
 0x36c   : > { %11222 = vst [vmem:[#allocation56_spill] sm:$0xff] %v8514_v43 }
 0x36d   : > { %2375 = vst.msk [vmem:[#allocation4 + $0x210] sm:$0xff] %vm2232_vm12, %v8514_v43 }
 0x371   : > { %v8495_v45 = vld [vmem:[#allocation3 + $0x122] sm:$0xff]  ;;  %v8507_v23 = vld [vmem:[#allocation3 + $0x12a] sm:$0xff] }
 0x372   : > { %v8497_v51 = vld [vmem:[#allocation3 + $0x128] sm:$0xff]  ;;  %3657 = vst.msk [vmem:[#allocation4 + $0x1f0] sm:$0xff] %vm2232_vm12, %v8495_v45  ;;  %2690 = vrot.lane.b32.xlu2 %v8495_v45, %s6898_s19 }
 0x373   : > { %v2410_v0 = vld [vmem:[#allocation3 + $0x129] sm:$0xff]  ;;  %2881 = vrot.lane.b32.xlu0 %v8497_v51, %s6900_s22  ;;  %3658 = vst.msk [vmem:[#allocation4 + $0x208] sm:$0xff] %vm2232_vm12, %v8507_v23 }
 0x374   : > { %2499 = vrot.lane.b32.xlu1 %v2410_v0, %s6899_s21  ;;  %2378 = vst.msk [vmem:[#allocation4 + $0x258] sm:$0xff] %vm2232_vm12, %v8497_v51  ;;  %v8525_v0 = vld [vmem:[#allocation3 + $0x121] sm:$0xff] }
 0x375   : > { %3018 = vst.msk [vmem:[#allocation4 + $0x218] sm:$0xff] %vm2232_vm12, %v8525_v0 }
 0x377   : > { %v8518_v14 = vpop.f32.mrf.mxu0 }
 0x378   : > { %11223 = vst [vmem:[#allocation57_spill] sm:$0xff] %v8518_v14 }
 0x379   : > { %v3731_v52 = vld [vmem:[#allocation4 + $0x1f0] sm:$0xff]  ;;  %2313 = vst.msk [vmem:[#allocation3 + $0x139] sm:$0xff] %vm2232_vm12, %v8518_v14 }
 0x37a   : > { %6686 = vmatmul.msk.f32.gmra.mxu3 %vm2232_vm12, %v3731_v52  ;;  %2692 = vrot.lane.b32.xlu2 %v8507_v23, %s6898_s19  ;;  %v3734_v6 = vld [vmem:[#allocation4 + $0x208] sm:$0xff]  ;;  %v8537_v52 = vld [vmem:[#allocation3 + $0x129] sm:$0xff] }
 0x37b   : > { %3019 = vst.msk [vmem:[#allocation4 + $0x230] sm:$0xff] %vm2232_vm12, %v8537_v52 }
 0x380   : > { %v8529_v37 = vld [vmem:[#allocation3 + $0x138] sm:$0xff] }
 0x381   : > { %v2411_v43 = vld [vmem:[#allocation3 + $0x139] sm:$0xff]  ;;  %2883 = vrot.lane.b32.xlu0 %v8529_v37, %s6900_s22  ;;  %2379 = vst.msk [vmem:[#allocation4 + $0x270] sm:$0xff] %vm2232_vm12, %v8529_v37 }
 0x382   : > { %6687 = vmatmul.msk.f32.gmra.mxu3 %vm2232_vm12, %v3734_v6  ;;  %2501 = vrot.lane.b32.xlu1 %v2411_v43, %s6899_s21  ;;  %v8545_v20 = vld [vmem:[#allocation3 + $0x139] sm:$0xff] }
 0x383   : > { %3020 = vst.msk [vmem:[#allocation4 + $0x248] sm:$0xff] %vm2232_vm12, %v8545_v20 }
 0x396   : > { %v8541_v14 = vpop.f32.mrf.mxu0 }
 0x397   : > { %11224 = vst [vmem:[#allocation58_spill] sm:$0xff] %v8541_v14 }
 0x398   : > { %2314 = vst.msk [vmem:[#allocation3 + $0x141] sm:$0xff] %vm2232_vm12, %v8541_v14 }
 0x39d   : > { %v8549_v6 = vpop.f32.mrf.mxu2 }
 0x39e   : > { %11225 = vst [vmem:[#allocation59_spill] sm:$0xff] %v8549_v6 }
 0x39f   : > { %v8551_v18 = vld [vmem:[#allocation3 + $0x13a] sm:$0xff]  ;;  %2315 = vst.msk [vmem:[#allocation3 + $0x151] sm:$0xff] %vm2232_vm12, %v8549_v6  ;;  %v8563_v14 = vld [vmem:[#allocation3 + $0x142] sm:$0xff] }
 0x3a0   : > { %v8555_v43 = vld [vmem:[#allocation3 + $0x140] sm:$0xff]  ;;  %3659 = vst.msk [vmem:[#allocation4 + $0x220] sm:$0xff] %vm2232_vm12, %v8551_v18  ;;  %2694 = vrot.lane.b32.xlu2 %v8551_v18, %s6898_s19 }
 0x3a1   : > { %v2412_v5 = vld [vmem:[#allocation3 + $0x141] sm:$0xff]  ;;  %2885 = vrot.lane.b32.xlu0 %v8555_v43, %s6900_s22  ;;  %3660 = vst.msk [vmem:[#allocation4 + $0x238] sm:$0xff] %vm2232_vm12, %v8563_v14 }
 0x3a2   : > { %2503 = vrot.lane.b32.xlu1 %v2412_v5, %s6899_s21  ;;  %2380 = vst.msk [vmem:[#allocation4 + $0x288] sm:$0xff] %vm2232_vm12, %v8555_v43  ;;  %v3780_v5 = vld [vmem:[%s11095_s3 + $0x78] sm:$0xff] }
 0x3a3   : > { %6744 = vmatpush.msrb.mxu2 %v3780_v5  ;;  %3897 = vmatpush.msra.mxu1 %v3780_v5  ;;  %v3779_v5 = vld [vmem:[%s11095_s3 + $0x70] sm:$0xff] }
 0x3a5   : > { %6745 = vmatpush.msrb.mxu2 %v3779_v5  ;;  %3898 = vmatpush.msra.mxu1 %v3779_v5 }
 0x3a6   : > { %v8570_v6 = vld [vmem:[#allocation3 + $0x150] sm:$0xff] }
 0x3a7   : > { %v2413_v48 = vld [vmem:[#allocation3 + $0x151] sm:$0xff]  ;;  %2381 = vst.msk [vmem:[#allocation4 + $0x2a0] sm:$0xff] %vm2232_vm12, %v8570_v6 }
 0x3a8   : > { %v3737_v57 = vld [vmem:[#allocation4 + $0x220] sm:$0xff]  ;;  %2696 = vrot.lane.b32.xlu2 %v8563_v14, %s6898_s19  ;;  %v3740_v22 = vld [vmem:[#allocation4 + $0x238] sm:$0xff] }
 0x3a9   : > { %6688 = vmatmul.msk.f32.gmra.mxu3 %vm2232_vm12, %v3737_v57  ;;  %2887 = vrot.lane.b32.xlu0 %v8570_v6, %s6900_s22  ;;  %v8588_v57 = vld [vmem:[#allocation3 + $0x141] sm:$0xff]  ;;  %v8626_v24 = vld [vmem:[#allocation3 + $0x151] sm:$0xff] }
 0x3aa   : > { %2505 = vrot.lane.b32.xlu1 %v2413_v48, %s6899_s21  ;;  %3021 = vst.msk [vmem:[#allocation4 + $0x260] sm:$0xff] %vm2232_vm12, %v8588_v57 }
 0x3ab   : > { %3022 = vst.msk [vmem:[#allocation4 + $0x278] sm:$0xff] %vm2232_vm12, %v8626_v24 }
 0x3ae   : > { %v8583_v25 = vpop.f32.mrf.mxu2 }
 0x3af   : > { %11226 = vst [vmem:[#allocation60_spill] sm:$0xff] %v8583_v25 }
 0x3b0   : > { %2316 = vst.msk [vmem:[#allocation3 + $0x159] sm:$0xff] %vm2232_vm12, %v8583_v25  ;;  %v3778_v25 = vld [vmem:[%s11095_s3 + $0x68] sm:$0xff] }
 0x3b1   : > { %6689 = vmatmul.msk.f32.gmra.mxu3 %vm2232_vm12, %v3740_v22  ;;  %6746 = vmatpush.msrb.mxu2 %v3778_v25 }
 0x3b2   : > { %3899 = vmatpush.msra.mxu1 %v3778_v25  ;;  %v3774_v25 = vld [vmem:[%s11095_s3 + $0x48] sm:$0xff] }
 0x3b3   : > { %6747 = vmatpush.msrb.mxu2 %v3777_v58 }
 0x3b4   : > { %3900 = vmatpush.msra.mxu1 %v3777_v58  ;;  %v3773_v58 = vld [vmem:[%s11095_s3 + $0x40] sm:$0xff] }
 0x3b5   : > { %6748 = vmatpush.msrb.mxu2 %v3776_v61 }
 0x3b6   : > { %3901 = vmatpush.msra.mxu1 %v3776_v61  ;;  %v3771_v61 = vld [vmem:[%s11095_s3 + $0x30] sm:$0xff] }
 0x3b7   : > { %v8590_v7 = vld [vmem:[#allocation3 + $0x152] sm:$0xff]  ;;  %v8602_v22 = vld [vmem:[#allocation3 + $0x15a] sm:$0xff]  ;;  %6749 = vmatpush.msrb.mxu2 %v3775_v21 }
 0x3b8   : > { %v8592_v40 = vld [vmem:[#allocation3 + $0x158] sm:$0xff]  ;;  %3661 = vst.msk [vmem:[#allocation4 + $0x250] sm:$0xff] %vm2232_vm12, %v8590_v7  ;;  %2698 = vrot.lane.b32.xlu2 %v8590_v7, %s6898_s19  ;;  %3902 = vmatpush.msra.mxu1 %v3775_v21 }
 0x3b9   : > { %v2414_v48 = vld [vmem:[#allocation3 + $0x159] sm:$0xff]  ;;  %2889 = vrot.lane.b32.xlu0 %v8592_v40, %s6900_s22  ;;  %3662 = vst.msk [vmem:[#allocation4 + $0x268] sm:$0xff] %vm2232_vm12, %v8602_v22  ;;  %6750 = vmatpush.msrb.mxu2 %v3774_v25 }
 0x3ba   : > { %2507 = vrot.lane.b32.xlu1 %v2414_v48, %s6899_s21  ;;  %2382 = vst.msk [vmem:[#allocation4 + $0x2b8] sm:$0xff] %vm2232_vm12, %v8592_v40  ;;  %3903 = vmatpush.msra.mxu1 %v3774_v25  ;;  %v3770_v21 = vld [vmem:[%s11095_s3 + $0x28] sm:$0xff] }
 0x3bb   : > { %6751 = vmatpush.msrb.mxu2 %v3773_v58 }
 0x3bc   : > { %3904 = vmatpush.msra.mxu1 %v3773_v58  ;;  %v8666_v58 = vld [vmem:[#allocation3 + $0x159] sm:$0xff] }
 0x3bd   : > { %v8621_v48 = vpop.f32.mrf.mxu2  ;;  %3023 = vst.msk [vmem:[#allocation4 + $0x290] sm:$0xff] %vm2232_vm12, %v8666_v58 }
 0x3be   : > { %11227 = vst [vmem:[#allocation61_spill] sm:$0xff] %v8621_v48 }
 0x3bf   : > { %2317 = vst.msk [vmem:[#allocation3 + $0x169] sm:$0xff] %vm2232_vm12, %v8621_v48  ;;  %v3743_v5 = vld [vmem:[#allocation4 + $0x250] sm:$0xff] }
 0x3c0   : > { %6690 = vmatmul.msk.f32.gmra.mxu3 %vm2232_vm12, %v3743_v5  ;;  %2700 = vrot.lane.b32.xlu2 %v8602_v22, %s6898_s19  ;;  %v3772_v5 = vld [vmem:[%s11095_s3 + $0x38] sm:$0xff]  ;;  %v3746_v59 = vld [vmem:[#allocation4 + $0x268] sm:$0xff] }
 0x3c1   : > { %6752 = vmatpush.msrb.mxu2 %v3772_v5  ;;  %3905 = vmatpush.msra.mxu1 %v3772_v5  ;;  %v3766_v5 = vld [vmem:[%s11095_s3 + $0x8] sm:$0xff] }
 0x3c3   : > { %6753 = vmatpush.msrb.mxu2 %v3771_v61  ;;  %3906 = vmatpush.msra.mxu1 %v3771_v61  ;;  %v3765_v61 = vld [vmem:[%s11095_s3] sm:$0xff] }
 0x3c5   : > { %6754 = vmatpush.msrb.mxu2 %v3770_v21  ;;  %3907 = vmatpush.msra.mxu1 %v3770_v21 }
 0x3c6   : > { %v8644_v48 = vld [vmem:[#allocation3 + $0x168] sm:$0xff] }
 0x3c7   : > { %v2415_v4 = vld [vmem:[#allocation3 + $0x169] sm:$0xff]  ;;  %2891 = vrot.lane.b32.xlu0 %v8644_v48, %s6900_s22  ;;  %2383 = vst.msk [vmem:[#allocation4 + $0x2d0] sm:$0xff] %vm2232_vm12, %v8644_v48  ;;  %6755 = vmatpush.msrb.mxu2 %v3769_v27 }
 0x3c8   : > { %2509 = vrot.lane.b32.xlu1 %v2415_v4, %s6899_s21  ;;  %6691 = vmatmul.msk.f32.gmra.mxu3 %vm2232_vm12, %v3746_v59  ;;  %v2689_v4 = vpop.permute.xlu2 %2688  ;;  %v3768_v59 = vld [vmem:[%s11095_s3 + $0x18] sm:$0xff] }
 0x3c9   : > { %6756 = vmatpush.msrb.mxu2 %v3768_v59  ;;  %3908 = vmatpush.msra.mxu1 %v3769_v27  ;;  %v8704_v32 = vld [vmem:[#allocation3 + $0x169] sm:$0xff] }
 0x3ca   : > { %11230 = vst [vmem:[#allocation64_spill] sm:$0xff] %v8704_v32 }
 0x3cb   : > { %v2496_v25 = vpop.permute.xlu1 %2495  ;;  %3909 = vmatpush.msra.mxu1 %v3768_v59  ;;  %3024 = vst.msk [vmem:[#allocation4 + $0x2a8] sm:$0xff] %vm2232_vm12, %v8704_v32 }
 0x3cc   : > { %2569 = vst.msk [vmem:[#allocation4 + $0x228] sm:$0xff] %vm2545_vm14, %v2496_v25  ;;  %v3767_v25 = vld [vmem:[%s11095_s3 + $0x10] sm:$0xff] }
 0x3cd   : > { %2762 = vst.msk [vmem:[#allocation4 + $0x228] sm:$0xff] %vm2738_vm15, %v2689_v4  ;;  %6757 = vmatpush.msrb.mxu2 %v3767_v25  ;;  %3910 = vmatpush.msra.mxu1 %v3767_v25 }
 0x3cf   : > { %6758 = vmatpush.msrb.mxu2 %v3766_v5  ;;  %3911 = vmatpush.msra.mxu1 %v3766_v5 }
 0x3d0   : > { %v2691_v25 = vpop.permute.xlu2 %2690 }
 0x3d1   : > { %v8668_v1 = vpop.f32.mrf.mxu2  ;;  %6759 = vmatpush.msrb.mxu2 %v3765_v61  ;;  %3912 = vmatpush.msra.mxu1 %v3765_v61  ;;  %v3028_v61 = vld [vmem:[#allocation3 + $0x1a] sm:$0xff] }
 0x3d2   : > { %11228 = vst [vmem:[#allocation62_spill] sm:$0xff] %v8668_v1 }
 0x3d3   : > { %2318 = vst.msk [vmem:[#allocation3 + $0x171] sm:$0xff] %vm2232_vm12, %v8668_v1 }
 0x3d8   : > { %v2693_v13 = vpop.permute.xlu2 %2692 }
 0x3d9   : > { %v2498_v59 = vpop.permute.xlu1 %2497 }
 0x3da   : > { %v8683_v4 = vld [vmem:[#allocation3 + $0x16a] sm:$0xff]  ;;  %v8693_v27 = vld [vmem:[#allocation3 + $0x172] sm:$0xff]  ;;  %2570 = vst.msk [vmem:[#allocation4 + $0x240] sm:$0xff] %vm2545_vm14, %v2498_v59 }
 0x3db   : > { %v8685_v21 = vld [vmem:[#allocation3 + $0x170] sm:$0xff]  ;;  %3663 = vst.msk [vmem:[#allocation4 + $0x280] sm:$0xff] %vm2232_vm12, %v8683_v4  ;;  %2702 = vrot.lane.b32.xlu2 %v8683_v4, %s6898_s19 }
 0x3dc   : > { %v2416_v1 = vld [vmem:[#allocation3 + $0x171] sm:$0xff]  ;;  %2893 = vrot.lane.b32.xlu0 %v8685_v21, %s6900_s22  ;;  %3664 = vst.msk [vmem:[#allocation4 + $0x298] sm:$0xff] %vm2232_vm12, %v8693_v27 }
 0x3dd   : > { %2511 = vrot.lane.b32.xlu1 %v2416_v1, %s6899_s21  ;;  %2763 = vst.msk [vmem:[#allocation4 + $0x240] sm:$0xff] %vm2738_vm15, %v2691_v25 }
 0x3de   : > { %2384 = vst.msk [vmem:[#allocation4 + $0x2e8] sm:$0xff] %vm2232_vm12, %v8685_v21  ;;  %v8702_v5 = vpop.f32.mrf.mxu2 }
 0x3df   : > { %11229 = vst [vmem:[#allocation63_spill] sm:$0xff] %v8702_v5 }
 0x3e0   : > { %2319 = vst.msk [vmem:[#allocation3 + $0x181] sm:$0xff] %vm2232_vm12, %v8702_v5 }
 0x3e2   : > { %v3749_v1 = vld [vmem:[#allocation4 + $0x280] sm:$0xff] }
 0x3e3   : > { %6692 = vmatmul.msk.f32.gmra.mxu3 %vm2232_vm12, %v3749_v1  ;;  %2704 = vrot.lane.b32.xlu2 %v8693_v27, %s6898_s19  ;;  %v3752_v5 = vld [vmem:[#allocation4 + $0x298] sm:$0xff] }
 0x3e5   : > { %3092 = vrot.lane.b32.xlu1 %v3028_v61, %s6899_s21  ;;  %v2882_v59 = vpop.permute.xlu0 %2881  ;;  %v3029_v61 = vld [vmem:[#allocation3 + $0x22] sm:$0xff] }
 0x3e6   : > { %2955 = vst.msk [vmem:[#allocation4 + $0x228] sm:$0xff] %vm2931_vm0, %v2882_v59  ;;  %v2500_v25 = vpop.permute.xlu1 %2499 }
 0x3e7   : > { %2571 = vst.msk [vmem:[#allocation4 + $0x258] sm:$0xff] %vm2545_vm14, %v2500_v25  ;;  %v8717_v1 = vld [vmem:[#allocation3 + $0x180] sm:$0xff]  ;;  %v8726_v25 = vld [vmem:[#allocation3 + $0x171] sm:$0xff] }
 0x3e8   : > { %2764 = vst.msk [vmem:[#allocation4 + $0x258] sm:$0xff] %vm2738_vm15, %v2693_v13  ;;  %2895 = vrot.lane.b32.xlu0 %v8717_v1, %s6900_s22  ;;  %v3222_v13 = vld [vmem:[#allocation3 + $0x38] sm:$0xff]  ;;  %v8751_v32 = vld [vmem:[#allocation3 + $0x181] sm:$0xff] }
 0x3e9   : > { %11232 = vst [vmem:[#allocation66_spill] sm:$0xff] %v8726_v25 }
 0x3ea   : > { %3025 = vst.msk [vmem:[#allocation4 + $0x2c0] sm:$0xff] %vm2232_vm12, %v8726_v25 }
 0x3eb   : > { %6693 = vmatmul.msk.f32.gmra.mxu3 %vm2232_vm12, %v3752_v5  ;;  %3285 = vrot.lane.b32.xlu2 %v3221_v62, %s6898_s19  ;;  %11233 = vst [vmem:[#allocation67_spill] sm:$0xff] %v8751_v32 }
 0x3ec   : > { %3026 = vst.msk [vmem:[#allocation4 + $0x2d8] sm:$0xff] %vm2232_vm12, %v8751_v32 }
 0x3ed   : > { %3094 = vrot.lane.b32.xlu1 %v3029_v61, %s6899_s21  ;;  %v3738_v59 = vld [vmem:[#allocation4 + $0x228] sm:$0xff]  ;;  %v8724_v9 = vpop.f32.mrf.mxu2 }
 0x3ee   : > { %3982 = vmatmul.f32.vlgmr.msrb.gmra.mxu2 %v3738_v59  ;;  %11231 = vst [vmem:[#allocation65_spill] sm:$0xff] %v8724_v9 }
 0x3ef   : > { %2320 = vst.msk [vmem:[#allocation3 + $0x189] sm:$0xff] %vm2232_vm12, %v8724_v9 }
 0x3f3   : > { %3287 = vrot.lane.b32.xlu2 %v3222_v13, %s6898_s19  ;;  %v2884_v62 = vpop.permute.xlu0 %2883  ;;  %v3223_v13 = vld [vmem:[#allocation3 + $0x48] sm:$0xff] }
 0x3f4   : > { %2956 = vst.msk [vmem:[#allocation4 + $0x240] sm:$0xff] %vm2931_vm0, %v2884_v62  ;;  %v2502_v5 = vpop.permute.xlu1 %2501 }
 0x3f5   : > { %3096 = vrot.lane.b32.xlu1 %v3030_v15, %s6899_s21  ;;  %2572 = vst.msk [vmem:[#allocation4 + $0x270] sm:$0xff] %vm2545_vm14, %v2502_v5  ;;  %v3031_v15 = vld [vmem:[#allocation3 + $0x3a] sm:$0xff] }
 0x3f6   : > { %v8736_v61 = vld [vmem:[#allocation3 + $0x182] sm:$0xff]  ;;  %v8740_v9 = vld [vmem:[#allocation3 + $0x18a] sm:$0xff] }
 0x3f7   : > { %v8738_v59 = vld [vmem:[#allocation3 + $0x188] sm:$0xff]  ;;  %3665 = vst.msk [vmem:[#allocation4 + $0x2b0] sm:$0xff] %vm2232_vm12, %v8736_v61 }
 0x3f8   : > { %2897 = vrot.lane.b32.xlu0 %v8738_v59, %s6900_s22  ;;  %3666 = vst.msk [vmem:[#allocation4 + $0x2c8] sm:$0xff] %vm2232_vm12, %v8740_v9 }
 0x3fa   : > { %v2695_v62 = vpop.permute.xlu2 %2694 }
 0x3fb   : > { %3289 = vrot.lane.b32.xlu2 %v3223_v13, %s6898_s19  ;;  %2765 = vst.msk [vmem:[#allocation4 + $0x270] sm:$0xff] %vm2738_vm15, %v2695_v62  ;;  %v3741_v5 = vld [vmem:[#allocation4 + $0x240] sm:$0xff] }
 0x3fc   : > { %3985 = vmatmul.f32.gmra.mxu2 %v3741_v5  ;;  %v3224_v13 = vld [vmem:[#allocation3 + $0x50] sm:$0xff]  ;;  %v3225_v5 = vld [vmem:[#allocation3 + $0x60] sm:$0xff] }
 0x3fd   : > { %3098 = vrot.lane.b32.xlu1 %v3031_v15, %s6899_s21  ;;  %v3032_v15 = vld [vmem:[#allocation3 + $0x4a] sm:$0xff] }
 0x3fe   : > { %v3755_v25 = vld [vmem:[#allocation4 + $0x2b0] sm:$0xff] }
 0x3ff   : > { %6694 = vmatmul.msk.f32.gmra.mxu3 %vm2232_vm12, %v3755_v25  ;;  %v3758_v62 = vld [vmem:[#allocation4 + $0x2c8] sm:$0xff] }
 0x400   : > { %3477 = vrot.lane.b32.xlu0 %v8004_v8, %s6900_s22  ;;  %v3033_v25 = vld [vmem:[#allocation3 + $0x52] sm:$0xff]  ;;  %v8765_v8 = vld [vmem:[#allocation3 + $0x189] sm:$0xff] }
 0x401   : > { %11234 = vst [vmem:[#allocation68_spill] sm:$0xff] %v8765_v8 }
 0x402   : > { %3027 = vst.msk [vmem:[#allocation4 + $0x2f0] sm:$0xff] %vm2232_vm12, %v8765_v8 }
 0x403   : > { %3291 = vrot.lane.b32.xlu2 %v3224_v13, %s6898_s19  ;;  %v3226_v13 = vld [vmem:[#allocation3 + $0x68] sm:$0xff] }
 0x405   : > { %3100 = vrot.lane.b32.xlu1 %v3032_v15, %s6899_s21  ;;  %v3034_v15 = vld [vmem:[#allocation3 + $0x62] sm:$0xff] }
 0x407   : > { %6695 = vmatmul.msk.f32.gmra.mxu3 %vm2232_vm12, %v3758_v62 }
 0x408   : > { %3479 = vrot.lane.b32.xlu0 %v8009_v36, %s6900_s22 }
 0x40b   : > { %3293 = vrot.lane.b32.xlu2 %v3225_v5, %s6898_s19  ;;  %v2697_v5 = vpop.permute.xlu2 %2696 }
 0x40d   : > { %3102 = vrot.lane.b32.xlu1 %v3033_v25, %s6899_s21  ;;  %v3795_v25 = vld [vmem:[%s11095_s3 + $0xf0] sm:$0xff] }
 0x410   : > { %3481 = vrot.lane.b32.xlu0 %v8011_v49, %s6900_s22  ;;  %v3796_v49 = vld [vmem:[%s11095_s3 + $0xf8] sm:$0xff] }
 0x411   : > { %4010 = vmatpush.msra.mxu2 %v3796_v49  ;;  %v3036_v49 = vld [vmem:[#allocation3 + $0x7a] sm:$0xff] }
 0x413   : > { %3295 = vrot.lane.b32.xlu2 %v3226_v13, %s6898_s19  ;;  %v2886_v36 = vpop.permute.xlu0 %2885  ;;  %4011 = vmatpush.msra.mxu2 %v3795_v25  ;;  %v3227_v13 = vld [vmem:[#allocation3 + $0x78] sm:$0xff]  ;;  %v2699_v32 = vpop.permute.xlu2 %2698 }
 0x414   : > { %2957 = vst.msk [vmem:[#allocation4 + $0x258] sm:$0xff] %vm2931_vm0, %v2886_v36  ;;  %v2504_v62 = vpop.permute.xlu1 %2503 }
 0x415   : > { %3104 = vrot.lane.b32.xlu1 %v3034_v15, %s6899_s21  ;;  %2573 = vst.msk [vmem:[#allocation4 + $0x288] sm:$0xff] %vm2545_vm14, %v2504_v62  ;;  %v3035_v15 = vld [vmem:[#allocation3 + $0x6a] sm:$0xff] }
 0x416   : > { %2766 = vst.msk [vmem:[#allocation4 + $0x288] sm:$0xff] %vm2738_vm15, %v2697_v5  ;;  %v3228_v5 = vld [vmem:[#allocation3 + $0x80] sm:$0xff] }
 0x418   : > { %3483 = vrot.lane.b32.xlu0 %v8030_v29, %s6900_s22  ;;  %v3794_v29 = vld [vmem:[%s11095_s3 + $0xe8] sm:$0xff] }
 0x419   : > { %4012 = vmatpush.msra.mxu2 %v3794_v29 }
 0x41b   : > { %3297 = vrot.lane.b32.xlu2 %v3227_v13, %s6898_s19  ;;  %v2888_v36 = vpop.permute.xlu0 %2887  ;;  %v3744_v62 = vld [vmem:[#allocation4 + $0x258] sm:$0xff] }
 0x41c   : > { %2958 = vst.msk [vmem:[#allocation4 + $0x270] sm:$0xff] %vm2931_vm0, %v2888_v36  ;;  %v2506_v8 = vpop.permute.xlu1 %2505  ;;  %3988 = vmatmul.f32.gmra.mxu2 %v3744_v62  ;;  %v3037_v13 = vld [vmem:[#allocation3 + $0x82] sm:$0xff]  ;;  %v2701_v36 = vpop.permute.xlu2 %2700 }
 0x41d   : > { %3106 = vrot.lane.b32.xlu1 %v3035_v15, %s6899_s21  ;;  %2574 = vst.msk [vmem:[#allocation4 + $0x2a0] sm:$0xff] %vm2545_vm14, %v2506_v8  ;;  %v3793_v8 = vld [vmem:[%s11095_s3 + $0xe0] sm:$0xff]  ;;  %v3791_v15 = vld [vmem:[%s11095_s3 + $0xd0] sm:$0xff] }
 0x41e   : > { %2767 = vst.msk [vmem:[#allocation4 + $0x2a0] sm:$0xff] %vm2738_vm15, %v2699_v32  ;;  %4013 = vmatpush.msra.mxu2 %v3793_v8  ;;  %v3792_v32 = vld [vmem:[%s11095_s3 + $0xd8] sm:$0xff] }
 0x420   : > { %3485 = vrot.lane.b32.xlu0 %v8071_v19, %s6900_s22  ;;  %4014 = vmatpush.msra.mxu2 %v3792_v32  ;;  %v3229_v19 = vld [vmem:[#allocation3 + $0x90] sm:$0xff] }
 0x421   : > { %v3789_v32 = vld [vmem:[%s11095_s3 + $0xc0] sm:$0xff] }
 0x422   : > { %4015 = vmatpush.msra.mxu2 %v3791_v15 }
 0x423   : > { %3299 = vrot.lane.b32.xlu2 %v3228_v5, %s6898_s19  ;;  %v3747_v25 = vld [vmem:[#allocation4 + $0x270] sm:$0xff]  ;;  %v3230_v5 = vld [vmem:[#allocation3 + $0x98] sm:$0xff] }
 0x424   : > { %3991 = vmatmul.f32.gmra.mxu2 %v3747_v25 }
 0x425   : > { %3108 = vrot.lane.b32.xlu1 %v3036_v49, %s6899_s21  ;;  %v3038_v49 = vld [vmem:[#allocation3 + $0x92] sm:$0xff] }
 0x428   : > { %3487 = vrot.lane.b32.xlu0 %v8121_v34, %s6900_s22  ;;  %v3790_v34 = vld [vmem:[%s11095_s3 + $0xc8] sm:$0xff] }
 0x429   : > { %4016 = vmatpush.msra.mxu2 %v3790_v34 }
 0x42b   : > { %3301 = vrot.lane.b32.xlu2 %v3229_v19, %s6898_s19  ;;  %v2890_v62 = vpop.permute.xlu0 %2889  ;;  %v3788_v19 = vld [vmem:[%s11095_s3 + $0xb8] sm:$0xff]  ;;  %4017 = vmatpush.msra.mxu2 %v3789_v32  ;;  %v3782_v32 = vld [vmem:[%s11095_s3 + $0x88] sm:$0xff] }
 0x42c   : > { %2959 = vst.msk [vmem:[#allocation4 + $0x288] sm:$0xff] %vm2931_vm0, %v2890_v62  ;;  %v2508_v29 = vpop.permute.xlu1 %2507  ;;  %v3786_v62 = vld [vmem:[%s11095_s3 + $0xa8] sm:$0xff] }
 0x42d   : > { %3110 = vrot.lane.b32.xlu1 %v3037_v13, %s6899_s21  ;;  %2575 = vst.msk [vmem:[#allocation4 + $0x2b8] sm:$0xff] %vm2545_vm14, %v2508_v29  ;;  %4018 = vmatpush.msra.mxu2 %v3788_v19 }
 0x42e   : > { %2768 = vst.msk [vmem:[#allocation4 + $0x2b8] sm:$0xff] %vm2738_vm15, %v2701_v36 }
 0x430   : > { %3489 = vrot.lane.b32.xlu0 %v8137_v54, %s6900_s22  ;;  %v3231_v54 = vld [vmem:[#allocation3 + $0xa8] sm:$0xff] }
 0x433   : > { %3303 = vrot.lane.b32.xlu2 %v3230_v5, %s6898_s19  ;;  %v3750_v8 = vld [vmem:[#allocation4 + $0x288] sm:$0xff]  ;;  %v3785_v5 = vld [vmem:[%s11095_s3 + $0xa0] sm:$0xff] }
 0x434   : > { %3994 = vmatmul.f32.gmra.mxu2 %v3750_v8 }
 0x435   : > { %3112 = vrot.lane.b32.xlu1 %v3038_v49, %s6899_s21  ;;  %v2703_v25 = vpop.permute.xlu2 %2702  ;;  %v3233_v49 = vld [vmem:[#allocation3 + $0xc0] sm:$0xff] }
 0x438   : > { %3491 = vrot.lane.b32.xlu0 %v8166_v2, %s6900_s22  ;;  %v3787_v2 = vld [vmem:[%s11095_s3 + $0xb0] sm:$0xff] }
 0x439   : > { %v2892_v13 = vpop.permute.xlu0 %2891  ;;  %4019 = vmatpush.msra.mxu2 %v3787_v2  ;;  %v6822_v2 = vld [vmem:[%s11095_s3 + $0x110] sm:$0xff] }
 0x43a   : > { %v2510_v15 = vpop.permute.xlu1 %2509  ;;  %2960 = vst.msk [vmem:[#allocation4 + $0x2a0] sm:$0xff] %vm2931_vm0, %v2892_v13 }
 0x43b   : > { %3305 = vrot.lane.b32.xlu2 %v3231_v54, %s6898_s19  ;;  %2576 = vst.msk [vmem:[#allocation4 + $0x2d0] sm:$0xff] %vm2545_vm14, %v2510_v15  ;;  %4020 = vmatpush.msra.mxu2 %v3786_v62  ;;  %v6821_v15 = vld [vmem:[%s11095_s3 + $0x118] sm:$0xff] }
 0x43c   : > { %2769 = vst.msk [vmem:[#allocation4 + $0x2d0] sm:$0xff] %vm2738_vm15, %v2703_v25 }
 0x43d   : > { %3114 = vrot.lane.b32.xlu1 %v8224_v47, %s6899_s21  ;;  %v2705_v36 = vpop.permute.xlu2 %2704  ;;  %v3232_v47 = vld [vmem:[#allocation3 + $0xb0] sm:$0xff]  ;;  %4021 = vmatpush.msra.mxu2 %v3785_v5 }
 0x440   : > { %3493 = vrot.lane.b32.xlu0 %v8212_v55, %s6900_s22  ;;  %v3784_v55 = vld [vmem:[%s11095_s3 + $0x98] sm:$0xff] }
 0x441   : > { %v3753_v29 = vld [vmem:[#allocation4 + $0x2a0] sm:$0xff]  ;;  %4022 = vmatpush.msra.mxu2 %v3784_v55 }
 0x442   : > { %3997 = vmatmul.f32.gmra.mxu2 %v3753_v29  ;;  %v3236_v29 = vld [vmem:[#allocation3 + $0xe0] sm:$0xff]  ;;  %v3237_v55 = vld [vmem:[#allocation3 + $0xf0] sm:$0xff] }
 0x443   : > { %3307 = vrot.lane.b32.xlu2 %v3232_v47, %s6898_s19  ;;  %v6823_v47 = vld [vmem:[%s11095_s3 + $0x108] sm:$0xff] }
 0x445   : > { %3116 = vrot.lane.b32.xlu1 %v8282_v60, %s6899_s21  ;;  %v3286_v34 = vpop.permute.xlu2 %3285 }
 0x448   : > { %3495 = vrot.lane.b32.xlu0 %v8229_v17, %s6900_s22  ;;  %v3783_v17 = vld [vmem:[%s11095_s3 + $0x90] sm:$0xff] }
 0x449   : > { %4023 = vmatpush.msra.mxu2 %v3783_v17 }
 0x44b   : > { %3309 = vrot.lane.b32.xlu2 %v3233_v49, %s6898_s19  ;;  %4024 = vmatpush.msra.mxu2 %v3782_v32 }
 0x44d   : > { %3118 = vrot.lane.b32.xlu1 %v8288_v63, %s6899_s21  ;;  %v3288_v25 = vpop.permute.xlu2 %3287  ;;  %v3234_v63 = vld [vmem:[#allocation3 + $0xc8] sm:$0xff] }
 0x44e   : > { %v2894_v60 = vpop.permute.xlu0 %2893 }
 0x44f   : > { %2961 = vst.msk [vmem:[#allocation4 + $0x2b8] sm:$0xff] %vm2931_vm0, %v2894_v60  ;;  %v2512_v8 = vpop.permute.xlu1 %2511 }
 0x450   : > { %2577 = vst.msk [vmem:[#allocation4 + $0x2e8] sm:$0xff] %vm2545_vm14, %v2512_v8  ;;  %3497 = vrot.lane.b32.xlu0 %v8269_v53, %s6900_s22  ;;  %v3781_v53 = vld [vmem:[%s11095_s3 + $0x80] sm:$0xff] }
 0x451   : > { %2770 = vst.msk [vmem:[#allocation4 + $0x2e8] sm:$0xff] %vm2738_vm15, %v2705_v36  ;;  %4025 = vmatpush.msra.mxu2 %v3781_v53 }
 0x453   : > { %3311 = vrot.lane.b32.xlu2 %v3234_v63, %s6898_s19  ;;  %4135 = vmatpush.msrb.mxu2 %v6821_v15 }
 0x455   : > { %3120 = vrot.lane.b32.xlu1 %v8312_v41, %s6899_s21  ;;  %v3290_v19 = vpop.permute.xlu2 %3289  ;;  %v3235_v41 = vld [vmem:[#allocation3 + $0xd8] sm:$0xff]  ;;  %4136 = vmatpush.msrb.mxu2 %v6822_v2 }
 0x456   : > { %v3756_v54 = vld [vmem:[#allocation4 + $0x2b8] sm:$0xff] }
 0x457   : > { %v3093_v13 = vpop.permute.xlu1 %3092  ;;  %4000 = vmatmul.f32.gmra.mxu2 %v3756_v54 }
 0x458   : > { %3188 = vst.msk [vmem:[#allocation4 + $0x8] sm:$0xff] %vm2545_vm14, %v3093_v13  ;;  %3499 = vrot.lane.b32.xlu0 %v8306_v50, %s6900_s22  ;;  %4137 = vmatpush.msrb.mxu2 %v6823_v47 }
 0x459   : > { %3381 = vst.msk [vmem:[#allocation4 + $0x8] sm:$0xff] %vm2738_vm15, %v3286_v34 }
 0x45a   : > { %v2896_v36 = vpop.permute.xlu0 %2895 }
 0x45b   : > { %3313 = vrot.lane.b32.xlu2 %v3235_v41, %s6898_s19  ;;  %2962 = vst.msk [vmem:[#allocation4 + $0x2d0] sm:$0xff] %vm2931_vm0, %v2896_v36 }
 0x45d   : > { %3122 = vrot.lane.b32.xlu1 %v8315_v26, %s6899_s21  ;;  %v3292_v50 = vpop.permute.xlu2 %3291  ;;  %v6824_v26 = vld [vmem:[%s11095_s3 + $0x100] sm:$0xff] }
 0x45e   : > { %4138 = vmatpush.msrb.mxu2 %v6824_v26 }
 0x45f   : > { %v3095_v62 = vpop.permute.xlu1 %3094 }
 0x460   : > { %3189 = vst.msk [vmem:[#allocation4 + $0x20] sm:$0xff] %vm2545_vm14, %v3095_v62  ;;  %3501 = vrot.lane.b32.xlu0 %v8326_v3, %s6900_s22 }
 0x461   : > { %3382 = vst.msk [vmem:[#allocation4 + $0x20] sm:$0xff] %vm2738_vm15, %v3288_v25  ;;  %v3238_v25 = vld [vmem:[#allocation3 + $0xf8] sm:$0xff] }
 0x462   : > { %v3759_v34 = vld [vmem:[#allocation4 + $0x2d0] sm:$0xff] }
 0x463   : > { %3315 = vrot.lane.b32.xlu2 %v3236_v29, %s6898_s19  ;;  %4003 = vmatmul.f32.gmra.mxu2 %v3759_v34 }
 0x465   : > { %3124 = vrot.lane.b32.xlu1 %v8351_v33, %s6899_s21  ;;  %v3294_v5 = vpop.permute.xlu2 %3293 }
 0x467   : > { %v3097_v49 = vpop.permute.xlu1 %3096 }
 0x468   : > { %3190 = vst.msk [vmem:[#allocation4 + $0x38] sm:$0xff] %vm2545_vm14, %v3097_v49  ;;  %3503 = vrot.lane.b32.xlu0 %v8347_v56, %s6900_s22 }
 0x469   : > { %3383 = vst.msk [vmem:[#allocation4 + $0x38] sm:$0xff] %vm2738_vm15, %v3290_v19 }
 0x46a   : > { %v2898_v3 = vpop.permute.xlu0 %2897 }
 0x46b   : > { %3317 = vrot.lane.b32.xlu2 %v3237_v55, %s6898_s19  ;;  %2963 = vst.msk [vmem:[#allocation4 + $0x2e8] sm:$0xff] %vm2931_vm0, %v2898_v3 }
 0x46d   : > { %3126 = vrot.lane.b32.xlu1 %v8356_v12, %s6899_s21  ;;  %v3296_v33 = vpop.permute.xlu2 %3295 }
 0x46f   : > { %v3099_v60 = vpop.permute.xlu1 %3098 }
 0x470   : > { %3191 = vst.msk [vmem:[#allocation4 + $0x50] sm:$0xff] %vm2545_vm14, %v3099_v60  ;;  %3505 = vrot.lane.b32.xlu0 %v8375_v11, %s6900_s22  ;;  %v3239_v11 = vld [vmem:[#allocation3 + $0x108] sm:$0xff]  ;;  %v3251_v60 = vld [vmem:[#allocation3 + $0x198] sm:$0xff] }
 0x471   : > { %3384 = vst.msk [vmem:[#allocation4 + $0x50] sm:$0xff] %vm2738_vm15, %v3292_v50  ;;  %v8986_v50 = vpop.f32.mrf.mxu2 }
 0x472   : > { %v3478_v56 = vpop.permute.xlu0 %3477  ;;  %v3762_v12 = vld [vmem:[#allocation4 + $0x2e8] sm:$0xff] }
 0x473   : > { %3319 = vrot.lane.b32.xlu2 %v3238_v25, %s6898_s19  ;;  %3573 = vst.msk [vmem:[#allocation4 + $0x8] sm:$0xff] %vm2931_vm0, %v3478_v56  ;;  %4006 = vmatmul.f32.gmra.mxu2 %v3762_v12  ;;  %v11236_v25 = vld [vmem:[#allocation66_spill] sm:$0xff] }
 0x475   : > { %3128 = vrot.lane.b32.xlu1 %v8399_v42, %s6899_s21  ;;  %v3298_v8 = vpop.permute.xlu2 %3297 }
 0x477   : > { %v3101_v17 = vpop.permute.xlu1 %3100 }
 0x478   : > { %3192 = vst.msk [vmem:[#allocation4 + $0x68] sm:$0xff] %vm2545_vm14, %v3101_v17  ;;  %3507 = vrot.lane.b32.xlu0 %v8392_v46, %s6900_s22  ;;  %v3252_v17 = vld [vmem:[#allocation3 + $0x1a0] sm:$0xff] }
 0x479   : > { %3385 = vst.msk [vmem:[#allocation4 + $0x68] sm:$0xff] %vm2738_vm15, %v3294_v5 }
 0x47a   : > { %v3480_v42 = vpop.permute.xlu0 %3479  ;;  %v3670_v63 = vld [vmem:[#allocation4 + $0x8] sm:$0xff] }
 0x47b   : > { %3321 = vrot.lane.b32.xlu2 %v3239_v11, %s6898_s19  ;;  %3574 = vst.msk [vmem:[#allocation4 + $0x20] sm:$0xff] %vm2931_vm0, %v3480_v42  ;;  %4026 = vmatmul.f32.vlgmr.msra.gmra.mxu2 %v3670_v63  ;;  %v2385_v11 = vld [vmem:[#allocation3 + $0x1] sm:$0xff]  ;;  %v11237_v42 = vld [vmem:[#allocation67_spill] sm:$0xff] }
 0x47d   : > { %3130 = vrot.lane.b32.xlu1 %v8401_v38, %s6899_s21  ;;  %v3300_v32 = vpop.permute.xlu2 %3299 }
 0x47f   : > { %v3103_v19 = vpop.permute.xlu1 %3102  ;;  %v8997_v47 = vpop.f32.mrf.mxu2 }
 0x480   : > { %3193 = vst.msk [vmem:[#allocation4 + $0x80] sm:$0xff] %vm2545_vm14, %v3103_v19  ;;  %3509 = vrot.lane.b32.xlu0 %v8419_v28, %s6900_s22 }
 0x481   : > { %3386 = vst.msk [vmem:[#allocation4 + $0x80] sm:$0xff] %vm2738_vm15, %v3296_v33 }
 0x482   : > { %v3482_v38 = vpop.permute.xlu0 %3481  ;;  %v3673_v46 = vld [vmem:[#allocation4 + $0x20] sm:$0xff] }
 0x483   : > { %3323 = vrot.lane.b32.xlu2 %v8454_v30, %s6898_s19  ;;  %3575 = vst.msk [vmem:[#allocation4 + $0x38] sm:$0xff] %vm2931_vm0, %v3482_v38  ;;  %4029 = vmatmul.f32.gmra.mxu2 %v3673_v46  ;;  %v2578_v46 = vld [vmem:[#allocation3 + $0x2] sm:$0xff] }
 0x485   : > { %3132 = vrot.lane.b32.xlu1 %v8441_v10, %s6899_s21  ;;  %v3302_v54 = vpop.permute.xlu2 %3301 }
 0x487   : > { %v3105_v13 = vpop.permute.xlu1 %3104 }
 0x488   : > { %3194 = vst.msk [vmem:[#allocation4 + $0x98] sm:$0xff] %vm2545_vm14, %v3105_v13  ;;  %3511 = vrot.lane.b32.xlu0 %v8439_v31, %s6900_s22  ;;  %v11238_v13 = vld [vmem:[#allocation68_spill] sm:$0xff] }
 0x489   : > { %3387 = vst.msk [vmem:[#allocation4 + $0x98] sm:$0xff] %vm2738_vm15, %v3298_v8 }
 0x48a   : > { %v3484_v10 = vpop.permute.xlu0 %3483  ;;  %v3676_v28 = vld [vmem:[#allocation4 + $0x38] sm:$0xff] }
 0x48b   : > { %3325 = vrot.lane.b32.xlu2 %v8478_v39, %s6898_s19  ;;  %3576 = vst.msk [vmem:[#allocation4 + $0x50] sm:$0xff] %vm2931_vm0, %v3484_v10  ;;  %4032 = vmatmul.f32.gmra.mxu2 %v3676_v28 }
 0x48d   : > { %3134 = vrot.lane.b32.xlu1 %v8443_v44, %s6899_s21  ;;  %v3304_v30 = vpop.permute.xlu2 %3303 }
 0x48f   : > { %v3107_v53 = vpop.permute.xlu1 %3106 }
 0x490   : > { %3195 = vst.msk [vmem:[#allocation4 + $0xb0] sm:$0xff] %vm2545_vm14, %v3107_v53  ;;  %3513 = vrot.lane.b32.xlu0 %v8472_v35, %s6900_s22 }
 0x491   : > { %3388 = vst.msk [vmem:[#allocation4 + $0xb0] sm:$0xff] %vm2738_vm15, %v3300_v32 }
 0x492   : > { %v3486_v39 = vpop.permute.xlu0 %3485  ;;  %v3679_v44 = vld [vmem:[#allocation4 + $0x50] sm:$0xff] }
 0x493   : > { %3327 = vrot.lane.b32.xlu2 %v8497_v51, %s6898_s19  ;;  %3577 = vst.msk [vmem:[#allocation4 + $0x68] sm:$0xff] %vm2931_vm0, %v3486_v39  ;;  %4035 = vmatmul.f32.gmra.mxu2 %v3679_v44  ;;  %v3443_v39 = vld [vmem:[#allocation3 + $0x199] sm:$0xff] }
 0x495   : > { %3136 = vrot.lane.b32.xlu1 %v8495_v45, %s6899_s21  ;;  %v3306_v31 = vpop.permute.xlu2 %3305 }
 0x497   : > { %v3109_v41 = vpop.permute.xlu1 %3108 }
 0x498   : > { %3196 = vst.msk [vmem:[#allocation4 + $0xc8] sm:$0xff] %vm2545_vm14, %v3109_v41  ;;  %3515 = vrot.lane.b32.xlu0 %v8493_v16, %s6900_s22  ;;  %v11239_v41 = vld [vmem:[#allocation15_spill] sm:$0xff] }
 0x499   : > { %3389 = vst.msk [vmem:[#allocation4 + $0xc8] sm:$0xff] %vm2738_vm15, %v3302_v54  ;;  %v2386_v54 = vld [vmem:[#allocation3 + $0x9] sm:$0xff] }
 0x49a   : > { %v3488_v51 = vpop.permute.xlu0 %3487  ;;  %v3682_v35 = vld [vmem:[#allocation4 + $0x68] sm:$0xff] }
 0x49b   : > { %3329 = vrot.lane.b32.xlu2 %v8529_v37, %s6898_s19  ;;  %3578 = vst.msk [vmem:[#allocation4 + $0x80] sm:$0xff] %vm2931_vm0, %v3488_v51  ;;  %4038 = vmatmul.f32.gmra.mxu2 %v3682_v35 }
 0x49d   : > { %3138 = vrot.lane.b32.xlu1 %v8507_v23, %s6899_s21  ;;  %v3308_v45 = vpop.permute.xlu2 %3307 }
 0x49f   : > { %v3111_v15 = vpop.permute.xlu1 %3110  ;;  %v9008_v29 = vpop.f32.mrf.mxu2 }
 0x4a0   : > { %3197 = vst.msk [vmem:[#allocation4 + $0xe0] sm:$0xff] %vm2545_vm14, %v3111_v15  ;;  %3517 = vrot.lane.b32.xlu0 %v8525_v0, %s6900_s22 }
 0x4a1   : > { %3390 = vst.msk [vmem:[#allocation4 + $0xe0] sm:$0xff] %vm2738_vm15, %v3304_v30 }
 0x4a2   : > { %v3490_v37 = vpop.permute.xlu0 %3489  ;;  %v3685_v16 = vld [vmem:[#allocation4 + $0x80] sm:$0xff] }
 0x4a3   : > { %3331 = vrot.lane.b32.xlu2 %v8555_v43, %s6898_s19  ;;  %3579 = vst.msk [vmem:[#allocation4 + $0x98] sm:$0xff] %vm2931_vm0, %v3490_v37  ;;  %4041 = vmatmul.f32.gmra.mxu2 %v3685_v16  ;;  %v3444_v37 = vld [vmem:[#allocation3 + $0x1a1] sm:$0xff] }
 0x4a5   : > { %3140 = vrot.lane.b32.xlu1 %v8551_v18, %s6899_s21  ;;  %v3310_v23 = vpop.permute.xlu2 %3309 }
 0x4a7   : > { %v3113_v36 = vpop.permute.xlu1 %3112  ;;  %v9020_v49 = vpop.f32.mrf.mxu2 }
 0x4a8   : > { %3198 = vst.msk [vmem:[#allocation4 + $0xf8] sm:$0xff] %vm2545_vm14, %v3113_v36  ;;  %3519 = vrot.lane.b32.xlu0 %v8537_v52, %s6900_s22  ;;  %v11240_v36 = vld [vmem:[#allocation17_spill] sm:$0xff] }
 0x4a9   : > { %3391 = vst.msk [vmem:[#allocation4 + $0xf8] sm:$0xff] %vm2738_vm15, %v3306_v31  ;;  %v2579_v31 = vld [vmem:[#allocation3 + $0xa] sm:$0xff] }
 0x4aa   : > { %v3492_v18 = vpop.permute.xlu0 %3491  ;;  %v3688_v0 = vld [vmem:[#allocation4 + $0x98] sm:$0xff] }
 0x4ab   : > { %3333 = vrot.lane.b32.xlu2 %v8570_v6, %s6898_s19  ;;  %3580 = vst.msk [vmem:[#allocation4 + $0xb0] sm:$0xff] %vm2931_vm0, %v3492_v18  ;;  %4044 = vmatmul.f32.gmra.mxu2 %v3688_v0 }
 0x4ad   : > { %3142 = vrot.lane.b32.xlu1 %v8563_v14, %s6899_s21  ;;  %v3312_v43 = vpop.permute.xlu2 %3311 }
 0x4af   : > { %v3115_v2 = vpop.permute.xlu1 %3114 }
 0x4b0   : > { %3199 = vst.msk [vmem:[#allocation4 + $0x110] sm:$0xff] %vm2545_vm14, %v3115_v2  ;;  %3521 = vrot.lane.b32.xlu0 %v8545_v20, %s6900_s22 }
 0x4b1   : > { %3392 = vst.msk [vmem:[#allocation4 + $0x110] sm:$0xff] %vm2738_vm15, %v3308_v45 }
 0x4b2   : > { %v3494_v14 = vpop.permute.xlu0 %3493  ;;  %v3691_v52 = vld [vmem:[#allocation4 + $0xb0] sm:$0xff] }
 0x4b3   : > { %3335 = vrot.lane.b32.xlu2 %v8592_v40, %s6898_s19  ;;  %3581 = vst.msk [vmem:[#allocation4 + $0xc8] sm:$0xff] %vm2931_vm0, %v3494_v14  ;;  %4047 = vmatmul.f32.gmra.mxu2 %v3691_v52  ;;  %v11241_v52 = vld [vmem:[#allocation19_spill] sm:$0xff] }
 0x4b5   : > { %3144 = vrot.lane.b32.xlu1 %v8590_v7, %s6899_s21  ;;  %v3314_v6 = vpop.permute.xlu2 %3313 }
 0x4b7   : > { %v3117_v62 = vpop.permute.xlu1 %3116  ;;  %v9031_v33 = vpop.f32.mrf.mxu2 }
 0x4b8   : > { %3200 = vst.msk [vmem:[#allocation4 + $0x128] sm:$0xff] %vm2545_vm14, %v3117_v62  ;;  %3523 = vrot.lane.b32.xlu0 %v8588_v57, %s6900_s22  ;;  %v2389_v62 = vld [vmem:[#allocation3 + $0x31] sm:$0xff] }
 0x4b9   : > { %3393 = vst.msk [vmem:[#allocation4 + $0x128] sm:$0xff] %vm2738_vm15, %v3310_v23  ;;  %v2580_v23 = vld [vmem:[#allocation3 + $0x1a] sm:$0xff] }
 0x4ba   : > { %v3496_v40 = vpop.permute.xlu0 %3495  ;;  %v3694_v7 = vld [vmem:[#allocation4 + $0xc8] sm:$0xff] }
 0x4bb   : > { %3337 = vrot.lane.b32.xlu2 %v8644_v48, %s6898_s19  ;;  %3582 = vst.msk [vmem:[#allocation4 + $0xe0] sm:$0xff] %vm2931_vm0, %v3496_v40  ;;  %4050 = vmatmul.f32.gmra.mxu2 %v3694_v7 }
 0x4bd   : > { %3146 = vrot.lane.b32.xlu1 %v8602_v22, %s6899_s21  ;;  %v3316_v20 = vpop.permute.xlu2 %3315 }
 0x4bf   : > { %v3119_v26 = vpop.permute.xlu1 %3118 }
 0x4c0   : > { %3201 = vst.msk [vmem:[#allocation4 + $0x140] sm:$0xff] %vm2545_vm14, %v3119_v26  ;;  %3525 = vrot.lane.b32.xlu0 %v8626_v24, %s6900_s22 }
 0x4c1   : > { %3394 = vst.msk [vmem:[#allocation4 + $0x140] sm:$0xff] %vm2738_vm15, %v3312_v43 }
 0x4c2   : > { %v3498_v57 = vpop.permute.xlu0 %3497  ;;  %v3697_v22 = vld [vmem:[#allocation4 + $0xe0] sm:$0xff] }
 0x4c3   : > { %3339 = vrot.lane.b32.xlu2 %v8685_v21, %s6898_s19  ;;  %3583 = vst.msk [vmem:[#allocation4 + $0xf8] sm:$0xff] %vm2931_vm0, %v3498_v57  ;;  %4053 = vmatmul.f32.gmra.mxu2 %v3697_v22  ;;  %v11242_v22 = vld [vmem:[#allocation20_spill] sm:$0xff] }
 0x4c5   : > { %3148 = vrot.lane.b32.xlu1 %v8683_v4, %s6899_s21  ;;  %v3318_v48 = vpop.permute.xlu2 %3317  ;;  %v9041_v8 = vpop.f32.mrf.mxu2 }
 0x4c7   : > { %v3121_v34 = vpop.permute.xlu1 %3120 }
 0x4c8   : > { %3202 = vst.msk [vmem:[#allocation4 + $0x158] sm:$0xff] %vm2545_vm14, %v3121_v34  ;;  %3527 = vrot.lane.b32.xlu0 %v8666_v58, %s6900_s22  ;;  %v11235_v58 = vld [vmem:[#allocation64_spill] sm:$0xff] }
 0x4c9   : > { %3395 = vst.msk [vmem:[#allocation4 + $0x158] sm:$0xff] %vm2738_vm15, %v3314_v6  ;;  %v2581_v6 = vld [vmem:[#allocation3 + $0x22] sm:$0xff]  ;;  %v2390_v34 = vld [vmem:[#allocation3 + $0x39] sm:$0xff] }
 0x4ca   : > { %v3500_v24 = vpop.permute.xlu0 %3499  ;;  %v3700_v4 = vld [vmem:[#allocation4 + $0xf8] sm:$0xff] }
 0x4cb   : > { %3341 = vrot.lane.b32.xlu2 %v8717_v1, %s6898_s19  ;;  %3584 = vst.msk [vmem:[#allocation4 + $0x110] sm:$0xff] %vm2931_vm0, %v3500_v24  ;;  %4056 = vmatmul.f32.gmra.mxu2 %v3700_v4 }
 0x4cd   : > { %3150 = vrot.lane.b32.xlu1 %v8693_v27, %s6899_s21  ;;  %v3320_v21 = vpop.permute.xlu2 %3319 }
 0x4cf   : > { %v3123_v5 = vpop.permute.xlu1 %3122 }
 0x4d0   : > { %3203 = vst.msk [vmem:[#allocation4 + $0x170] sm:$0xff] %vm2545_vm14, %v3123_v5  ;;  %3529 = vrot.lane.b32.xlu0 %v11235_v58, %s6900_s22 }
 0x4d1   : > { %3396 = vst.msk [vmem:[#allocation4 + $0x170] sm:$0xff] %vm2738_vm15, %v3316_v20 }
 0x4d2   : > { %v3502_v27 = vpop.permute.xlu0 %3501  ;;  %v3703_v1 = vld [vmem:[#allocation4 + $0x110] sm:$0xff] }
 0x4d3   : > { %3343 = vrot.lane.b32.xlu2 %v8738_v59, %s6898_s19  ;;  %3585 = vst.msk [vmem:[#allocation4 + $0x128] sm:$0xff] %vm2931_vm0, %v3502_v27  ;;  %4059 = vmatmul.f32.gmra.mxu2 %v3703_v1  ;;  %v11243_v27 = vld [vmem:[#allocation21_spill] sm:$0xff]  ;;  %v2583_v1 = vld [vmem:[#allocation3 + $0x3a] sm:$0xff] }
 0x4d5   : > { %3152 = vrot.lane.b32.xlu1 %v8736_v61, %s6899_s21  ;;  %v3322_v55 = vpop.permute.xlu2 %3321 }
 0x4d7   : > { %v3125_v3 = vpop.permute.xlu1 %3124 }
 0x4d8   : > { %3204 = vst.msk [vmem:[#allocation4 + $0x188] sm:$0xff] %vm2545_vm14, %v3125_v3  ;;  %3531 = vrot.lane.b32.xlu0 %v11236_v25, %s6900_s22 }
 0x4d9   : > { %3397 = vst.msk [vmem:[#allocation4 + $0x188] sm:$0xff] %vm2738_vm15, %v3318_v48  ;;  %v2582_v48 = vld [vmem:[#allocation3 + $0x32] sm:$0xff] }
 0x4da   : > { %v3504_v61 = vpop.permute.xlu0 %3503  ;;  %v3706_v59 = vld [vmem:[#allocation4 + $0x128] sm:$0xff]  ;;  %v9050_v38 = vpop.f32.mrf.mxu2 }
 0x4db   : > { %3345 = vrot.lane.b32.xlu2 %v3251_v60, %s6898_s19  ;;  %3586 = vst.msk [vmem:[#allocation4 + $0x140] sm:$0xff] %vm2931_vm0, %v3504_v61  ;;  %4062 = vmatmul.f32.gmra.mxu2 %v3706_v59  ;;  %v9103_v61 = vpop.f32.mrf.mxu3 }
 0x4dd   : > { %3154 = vrot.lane.b32.xlu1 %v8740_v9, %s6899_s21  ;;  %v3324_v56 = vpop.permute.xlu2 %3323 }
 0x4df   : > { %v3127_v12 = vpop.permute.xlu1 %3126 }
 0x4e0   : > { %3205 = vst.msk [vmem:[#allocation4 + $0x1a0] sm:$0xff] %vm2545_vm14, %v3127_v12  ;;  %3533 = vrot.lane.b32.xlu0 %v11237_v42, %s6900_s22  ;;  %v11244_v12 = vld [vmem:[#allocation22_spill] sm:$0xff] }
 0x4e1   : > { %3398 = vst.msk [vmem:[#allocation4 + $0x1a0] sm:$0xff] %vm2738_vm15, %v3320_v21 }
 0x4e2   : > { %v3506_v9 = vpop.permute.xlu0 %3505  ;;  %v3709_v63 = vld [vmem:[#allocation4 + $0x140] sm:$0xff] }
 0x4e3   : > { %3347 = vrot.lane.b32.xlu2 %v3252_v17, %s6898_s19  ;;  %3587 = vst.msk [vmem:[#allocation4 + $0x158] sm:$0xff] %vm2931_vm0, %v3506_v9  ;;  %4065 = vmatmul.f32.gmra.mxu2 %v3709_v63  ;;  %v2584_v17 = vld [vmem:[#allocation3 + $0x4a] sm:$0xff] }
 0x4e5   : > { %2449 = vrot.lane.b32.xlu1 %v2385_v11, %s6899_s21  ;;  %v3326_v32 = vpop.permute.xlu2 %3325  ;;  %v2392_v11 = vld [vmem:[#allocation3 + $0x51] sm:$0xff] }
 0x4e6   : > { %v9059_v44 = vpop.f32.mrf.mxu2 }
 0x4e7   : > { %v3129_v19 = vpop.permute.xlu1 %3128 }
 0x4e8   : > { %3206 = vst.msk [vmem:[#allocation4 + $0x1b8] sm:$0xff] %vm2545_vm14, %v3129_v19  ;;  %3535 = vrot.lane.b32.xlu0 %v11238_v13, %s6900_s22  ;;  %v9115_v19 = vpop.f32.mrf.mxu3  ;;  %v2585_v13 = vld [vmem:[#allocation3 + $0x52] sm:$0xff] }
 0x4e9   : > { %3399 = vst.msk [vmem:[#allocation4 + $0x1b8] sm:$0xff] %vm2738_vm15, %v3322_v55  ;;  %v2391_v55 = vld [vmem:[#allocation3 + $0x49] sm:$0xff] }
 0x4ea   : > { %v3508_v10 = vpop.permute.xlu0 %3507  ;;  %v3712_v28 = vld [vmem:[#allocation4 + $0x158] sm:$0xff] }
 0x4eb   : > { %2642 = vrot.lane.b32.xlu2 %v2578_v46, %s6898_s19  ;;  %3588 = vst.msk [vmem:[#allocation4 + $0x170] sm:$0xff] %vm2931_vm0, %v3508_v10  ;;  %4068 = vmatmul.f32.gmra.mxu2 %v3712_v28  ;;  %v2393_v10 = vld [vmem:[#allocation3 + $0x61] sm:$0xff] }
 0x4ed   : > { %2451 = vrot.lane.b32.xlu1 %v2386_v54, %s6899_s21  ;;  %v3328_v30 = vpop.permute.xlu2 %3327  ;;  %v11245_v54 = vld [vmem:[#allocation23_spill] sm:$0xff] }
 0x4ef   : > { %v3131_v53 = vpop.permute.xlu1 %3130 }
 0x4f0   : > { %3207 = vst.msk [vmem:[#allocation4 + $0x1d0] sm:$0xff] %vm2545_vm14, %v3131_v53  ;;  %3537 = vrot.lane.b32.xlu0 %v3443_v39, %s6900_s22 }
 0x4f1   : > { %3400 = vst.msk [vmem:[#allocation4 + $0x1d0] sm:$0xff] %vm2738_vm15, %v3324_v56 }
 0x4f2   : > { %v3510_v51 = vpop.permute.xlu0 %3509  ;;  %v3715_v35 = vld [vmem:[#allocation4 + $0x170] sm:$0xff] }
 0x4f3   : > { %2644 = vrot.lane.b32.xlu2 %v2579_v31, %s6898_s19  ;;  %3589 = vst.msk [vmem:[#allocation4 + $0x188] sm:$0xff] %vm2931_vm0, %v3510_v51  ;;  %4071 = vmatmul.f32.gmra.mxu2 %v3715_v35  ;;  %v9126_v31 = vpop.f32.mrf.mxu3  ;;  %v11246_v51 = vld [vmem:[#allocation25_spill] sm:$0xff] }
 0x4f4   : > { %v2586_v35 = vld [vmem:[#allocation3 + $0x62] sm:$0xff] }
 0x4f5   : > { %2453 = vrot.lane.b32.xlu1 %v11239_v41, %s6899_s21  ;;  %v3330_v45 = vpop.permute.xlu2 %3329 }
 0x4f6   : > { %v9069_v16 = vpop.f32.mrf.mxu2 }
 0x4f7   : > { %v3133_v15 = vpop.permute.xlu1 %3132 }
 0x4f8   : > { %3208 = vst.msk [vmem:[#allocation4 + $0x1e8] sm:$0xff] %vm2545_vm14, %v3133_v15  ;;  %3539 = vrot.lane.b32.xlu0 %v3444_v37, %s6900_s22 }
 0x4f9   : > { %3401 = vst.msk [vmem:[#allocation4 + $0x1e8] sm:$0xff] %vm2738_vm15, %v3326_v32 }
 0x4fa   : > { %v3512_v18 = vpop.permute.xlu0 %3511  ;;  %v3718_v0 = vld [vmem:[#allocation4 + $0x188] sm:$0xff] }
 0x4fb   : > { %2646 = vrot.lane.b32.xlu2 %v2580_v23, %s6898_s19  ;;  %3590 = vst.msk [vmem:[#allocation4 + $0x1a0] sm:$0xff] %vm2931_vm0, %v3512_v18  ;;  %4074 = vmatmul.f32.gmra.mxu2 %v3718_v0  ;;  %v9140_v0 = vpop.f32.mrf.mxu3 }
 0x4fd   : > { %2455 = vrot.lane.b32.xlu1 %v11240_v36, %s6899_s21  ;;  %v3332_v43 = vpop.permute.xlu2 %3331 }
 0x4fe   : > { %v9078_v14 = vpop.f32.mrf.mxu2 }
 0x4ff   : > { %v3135_v2 = vpop.permute.xlu1 %3134 }
 0x500   : > { %3209 = vst.msk [vmem:[#allocation4 + $0x200] sm:$0xff] %vm2545_vm14, %v3135_v2  ;;  %2835 = vrot.lane.b32.xlu0 %v11241_v52, %s6900_s22  ;;  %v2587_v2 = vld [vmem:[#allocation3 + $0x6a] sm:$0xff]  ;;  %v2395_v52 = vld [vmem:[#allocation3 + $0x79] sm:$0xff] }
 0x501   : > { %3402 = vst.msk [vmem:[#allocation4 + $0x200] sm:$0xff] %vm2738_vm15, %v3328_v30 }
 0x502   : > { %v3514_v40 = vpop.permute.xlu0 %3513  ;;  %v3721_v7 = vld [vmem:[#allocation4 + $0x1a0] sm:$0xff] }
 0x503   : > { %2648 = vrot.lane.b32.xlu2 %v2581_v6, %s6898_s19  ;;  %3591 = vst.msk [vmem:[#allocation4 + $0x1b8] sm:$0xff] %vm2931_vm0, %v3514_v40  ;;  %4077 = vmatmul.f32.gmra.mxu2 %v3721_v7  ;;  %v2321_v7 = vld [vmem:[#allocation3] sm:$0xff] }
 0x504   : > { %2353 = vst.msk [vmem:[#allocation4] sm:$0xff] %vm2232_vm12, %v2321_v7  ;;  %v2592_v7 = vld [vmem:[#allocation3 + $0xaa] sm:$0xff] }
 0x505   : > { %2457 = vrot.lane.b32.xlu1 %v2389_v62, %s6899_s21  ;;  %v3334_v20 = vpop.permute.xlu2 %3333 }
 0x506   : > { %v9087_v57 = vpop.f32.mrf.mxu2 }
 0x507   : > { %v3137_v26 = vpop.permute.xlu1 %3136 }
 0x508   : > { %3210 = vst.msk [vmem:[#allocation4 + $0x218] sm:$0xff] %vm2545_vm14, %v3137_v26  ;;  %2837 = vrot.lane.b32.xlu0 %v11242_v22, %s6900_s22  ;;  %v9152_v22 = vpop.f32.mrf.mxu3 }
 0x509   : > { %3403 = vst.msk [vmem:[#allocation4 + $0x218] sm:$0xff] %vm2738_vm15, %v3330_v45  ;;  %v2394_v45 = vld [vmem:[#allocation3 + $0x69] sm:$0xff] }
 0x50a   : > { %v3516_v24 = vpop.permute.xlu0 %3515  ;;  %v3724_v4 = vld [vmem:[#allocation4 + $0x1b8] sm:$0xff] }
 0x50b   : > { %2650 = vrot.lane.b32.xlu2 %v2582_v48, %s6898_s19  ;;  %3592 = vst.msk [vmem:[#allocation4 + $0x1d0] sm:$0xff] %vm2931_vm0, %v3516_v24  ;;  %4080 = vmatmul.f32.gmra.mxu2 %v3724_v4  ;;  %v11248_v48 = vld [vmem:[#allocation29_spill] sm:$0xff] }
 0x50c   : > { %v2396_v24 = vld [vmem:[#allocation3 + $0x81] sm:$0xff] }
 0x50d   : > { %2459 = vrot.lane.b32.xlu1 %v2390_v34, %s6899_s21  ;;  %v3336_v21 = vpop.permute.xlu2 %3335  ;;  %v2588_v34 = vld [vmem:[#allocation3 + $0x7a] sm:$0xff] }
 0x50e   : > { %v9096_v58 = vpop.f32.mrf.mxu2 }
 0x50f   : > { %v3139_v5 = vpop.permute.xlu1 %3138 }
 0x510   : > { %3211 = vst.msk [vmem:[#allocation4 + $0x230] sm:$0xff] %vm2545_vm14, %v3139_v5  ;;  %2839 = vrot.lane.b32.xlu0 %v11243_v27, %s6900_s22  ;;  %v2322_v27 = vld [vmem:[#allocation3 + $0x8] sm:$0xff] }
 0x511   : > { %3404 = vst.msk [vmem:[#allocation4 + $0x230] sm:$0xff] %vm2738_vm15, %v3332_v43  ;;  %v11247_v43 = vld [vmem:[#allocation27_spill] sm:$0xff] }
 0x512   : > { %v3518_v3 = vpop.permute.xlu0 %3517  ;;  %v3727_v60 = vld [vmem:[#allocation4 + $0x1d0] sm:$0xff]  ;;  %2354 = vst.msk [vmem:[#allocation4 + $0x18] sm:$0xff] %vm2232_vm12, %v2322_v27 }
 0x513   : > { %2652 = vrot.lane.b32.xlu2 %v2583_v1, %s6898_s19  ;;  %3593 = vst.msk [vmem:[#allocation4 + $0x1e8] sm:$0xff] %vm2931_vm0, %v3518_v3  ;;  %4083 = vmatmul.f32.gmra.mxu2 %v3727_v60  ;;  %v11249_v3 = vld [vmem:[#allocation30_spill] sm:$0xff]  ;;  %v2589_v60 = vld [vmem:[#allocation3 + $0x82] sm:$0xff] }
 0x515   : > { %2461 = vrot.lane.b32.xlu1 %v2391_v55, %s6899_s21  ;;  %v3338_v25 = vpop.permute.xlu2 %3337 }
 0x516   : > { %v9107_v56 = vpop.f32.mrf.mxu2 }
 0x517   : > { %v3141_v59 = vpop.permute.xlu1 %3140 }
 0x518   : > { %3212 = vst.msk [vmem:[#allocation4 + $0x248] sm:$0xff] %vm2545_vm14, %v3141_v59  ;;  %2841 = vrot.lane.b32.xlu0 %v11244_v12, %s6900_s22  ;;  %v9167_v59 = vpop.f32.mrf.mxu3 }
 0x519   : > { %3405 = vst.msk [vmem:[#allocation4 + $0x248] sm:$0xff] %vm2738_vm15, %v3334_v20 }
 0x51a   : > { %v3520_v42 = vpop.permute.xlu0 %3519  ;;  %v3730_v9 = vld [vmem:[#allocation4 + $0x1e8] sm:$0xff] }
 0x51b   : > { %2654 = vrot.lane.b32.xlu2 %v2584_v17, %s6898_s19  ;;  %3594 = vst.msk [vmem:[#allocation4 + $0x200] sm:$0xff] %vm2931_vm0, %v3520_v42  ;;  %4086 = vmatmul.f32.gmra.mxu2 %v3730_v9 }
 0x51d   : > { %2463 = vrot.lane.b32.xlu1 %v2392_v11, %s6899_s21  ;;  %v3340_v63 = vpop.permute.xlu2 %3339 }
 0x51e   : > { %v9118_v46 = vpop.f32.mrf.mxu2 }
 0x51f   : > { %v3143_v32 = vpop.permute.xlu1 %3142 }
 0x520   : > { %3213 = vst.msk [vmem:[#allocation4 + $0x260] sm:$0xff] %vm2545_vm14, %v3143_v32  ;;  %2843 = vrot.lane.b32.xlu0 %v11245_v54, %s6900_s22  ;;  %v2590_v32 = vld [vmem:[#allocation3 + $0x92] sm:$0xff] }
 0x521   : > { %3406 = vst.msk [vmem:[#allocation4 + $0x260] sm:$0xff] %vm2738_vm15, %v3336_v21  ;;  %v2398_v54 = vld [vmem:[#allocation3 + $0x99] sm:$0xff] }
 0x522   : > { %v3522_v28 = vpop.permute.xlu0 %3521  ;;  %v3733_v30 = vld [vmem:[#allocation4 + $0x200] sm:$0xff] }
 0x523   : > { %2656 = vrot.lane.b32.xlu2 %v2585_v13, %s6898_s19  ;;  %3595 = vst.msk [vmem:[#allocation4 + $0x218] sm:$0xff] %vm2931_vm0, %v3522_v28  ;;  %4089 = vmatmul.f32.gmra.mxu2 %v3733_v30  ;;  %v9178_v13 = vpop.f32.mrf.mxu3 }
 0x525   : > { %2465 = vrot.lane.b32.xlu1 %v2393_v10, %s6899_s21  ;;  %v3342_v53 = vpop.permute.xlu2 %3341 }
 0x526   : > { %v9129_v41 = vpop.f32.mrf.mxu2 }
 0x527   : > { %v3145_v39 = vpop.permute.xlu1 %3144 }
 0x528   : > { %3214 = vst.msk [vmem:[#allocation4 + $0x278] sm:$0xff] %vm2545_vm14, %v3145_v39  ;;  %2845 = vrot.lane.b32.xlu0 %v11246_v51, %s6900_s22  ;;  %v3635_v51 = vld [vmem:[#allocation3 + $0x19a] sm:$0xff] }
 0x529   : > { %3407 = vst.msk [vmem:[#allocation4 + $0x278] sm:$0xff] %vm2738_vm15, %v3338_v25  ;;  %v2397_v25 = vld [vmem:[#allocation3 + $0x91] sm:$0xff] }
 0x52a   : > { %v3524_v15 = vpop.permute.xlu0 %3523  ;;  %v3736_v37 = vld [vmem:[#allocation4 + $0x218] sm:$0xff]  ;;  %3667 = vst.msk [vmem:[#allocation4 + $0x2e0] sm:$0xff] %vm2232_vm12, %v3635_v51 }
 0x52b   : > { %2658 = vrot.lane.b32.xlu2 %v2586_v35, %s6898_s19  ;;  %3596 = vst.msk [vmem:[#allocation4 + $0x230] sm:$0xff] %vm2931_vm0, %v3524_v15  ;;  %4092 = vmatmul.f32.gmra.mxu2 %v3736_v37  ;;  %v11251_v35 = vld [vmem:[#allocation34_spill] sm:$0xff] }
 0x52c   : > { %v2399_v15 = vld [vmem:[#allocation3 + $0xa9] sm:$0xff] }
 0x52d   : > { %2467 = vrot.lane.b32.xlu1 %v2394_v45, %s6899_s21  ;;  %v3344_v23 = vpop.permute.xlu2 %3343  ;;  %v2591_v45 = vld [vmem:[#allocation3 + $0x9a] sm:$0xff] }
 0x52e   : > { %v9138_v18 = vpop.f32.mrf.mxu2 }
 0x52f   : > { %v3147_v36 = vpop.permute.xlu1 %3146 }
 0x530   : > { %3215 = vst.msk [vmem:[#allocation4 + $0x290] sm:$0xff] %vm2545_vm14, %v3147_v36  ;;  %2847 = vrot.lane.b32.xlu0 %v11247_v43, %s6900_s22  ;;  %v9192_v43 = vpop.f32.mrf.mxu3 }
 0x531   : > { %3408 = vst.msk [vmem:[#allocation4 + $0x290] sm:$0xff] %vm2738_vm15, %v3340_v63  ;;  %v11250_v63 = vld [vmem:[#allocation32_spill] sm:$0xff] }
 0x532   : > { %v3526_v6 = vpop.permute.xlu0 %3525  ;;  %v3739_v62 = vld [vmem:[#allocation4 + $0x230] sm:$0xff] }
 0x533   : > { %2660 = vrot.lane.b32.xlu2 %v2587_v2, %s6898_s19  ;;  %3597 = vst.msk [vmem:[#allocation4 + $0x248] sm:$0xff] %vm2931_vm0, %v3526_v6  ;;  %4095 = vmatmul.f32.gmra.mxu2 %v3739_v62  ;;  %v3761_v6 = vld [vmem:[#allocation4 + $0x2e0] sm:$0xff]  ;;  %v3636_v62 = vld [vmem:[#allocation3 + $0x1a2] sm:$0xff] }
 0x534   : > { %6696 = vmatmul.msk.f32.gmra.mxu3 %vm2232_vm12, %v3761_v6  ;;  %5740 = vst.msk [vmem:[#allocation4 + $0x2e0] sm:$0xff] %vm2232_vm12, %v3635_v51 }
 0x535   : > { %2469 = vrot.lane.b32.xlu1 %v2395_v52, %s6899_s21  ;;  %v3346_v40 = vpop.permute.xlu2 %3345  ;;  %3668 = vst.msk [vmem:[#allocation4 + $0x2f8] sm:$0xff] %vm2232_vm12, %v3636_v62 }
 0x536   : > { %v9150_v26 = vpop.f32.mrf.mxu2 }
 0x537   : > { %v3149_v20 = vpop.permute.xlu1 %3148 }
 0x538   : > { %3216 = vst.msk [vmem:[#allocation4 + $0x2a8] sm:$0xff] %vm2545_vm14, %v3149_v20  ;;  %2849 = vrot.lane.b32.xlu0 %v11248_v48, %s6900_s22  ;;  %v2400_v20 = vld [vmem:[#allocation3 + $0xb1] sm:$0xff] }
 0x539   : > { %3409 = vst.msk [vmem:[#allocation4 + $0x2a8] sm:$0xff] %vm2738_vm15, %v3342_v53 }
 0x53a   : > { %v3528_v4 = vpop.permute.xlu0 %3527  ;;  %v3742_v21 = vld [vmem:[#allocation4 + $0x248] sm:$0xff] }
 0x53b   : > { %2662 = vrot.lane.b32.xlu2 %v2588_v34, %s6898_s19  ;;  %3598 = vst.msk [vmem:[#allocation4 + $0x260] sm:$0xff] %vm2931_vm0, %v3528_v4  ;;  %4098 = vmatmul.f32.gmra.mxu2 %v3742_v21  ;;  %v9206_v4 = vpop.f32.mrf.mxu3 }
 0x53c   : > { %v3764_v27 = vld [vmem:[#allocation4 + $0x2f8] sm:$0xff] }
 0x53d   : > { %2471 = vrot.lane.b32.xlu1 %v2396_v24, %s6899_s21  ;;  %v3348_v5 = vpop.permute.xlu2 %3347  ;;  %6697 = vmatmul.msk.f32.gmra.mxu3 %vm2232_vm12, %v3764_v27  ;;  %5741 = vst.msk [vmem:[#allocation4 + $0x2f8] sm:$0xff] %vm2232_vm12, %v3636_v62  ;;  %v3671_v27 = vld [vmem:[#allocation4 + $0x10] sm:$0xff] }
 0x53e   : > { %v9162_v55 = vpop.f32.mrf.mxu2 }
 0x53f   : > { %v3151_v1 = vpop.permute.xlu1 %3150 }
 0x540   : > { %3217 = vst.msk [vmem:[#allocation4 + $0x2c0] sm:$0xff] %vm2545_vm14, %v3151_v1  ;;  %2851 = vrot.lane.b32.xlu0 %v11249_v3, %s6900_s22  ;;  %v11253_v1 = vld [vmem:[#allocation38_spill] sm:$0xff] }
 0x541   : > { %3410 = vst.msk [vmem:[#allocation4 + $0x2c0] sm:$0xff] %vm2738_vm15, %v3344_v23  ;;  %v2593_v3 = vld [vmem:[#allocation3 + $0xb2] sm:$0xff] }
 0x542   : > { %v3530_v12 = vpop.permute.xlu0 %3529  ;;  %v3745_v17 = vld [vmem:[#allocation4 + $0x260] sm:$0xff] }
 0x543   : > { %2664 = vrot.lane.b32.xlu2 %v2589_v60, %s6898_s19  ;;  %3599 = vst.msk [vmem:[#allocation4 + $0x278] sm:$0xff] %vm2931_vm0, %v3530_v12  ;;  %4101 = vmatmul.f32.gmra.mxu2 %v3745_v17  ;;  %v2401_v60 = vld [vmem:[#allocation3 + $0xc1] sm:$0xff] }
 0x545   : > { %2473 = vrot.lane.b32.xlu1 %v2397_v25, %s6899_s21  ;;  %v2643_v11 = vpop.permute.xlu2 %2642 }
 0x546   : > { %v9173_v9 = vpop.f32.mrf.mxu2 }
 0x547   : > { %v3153_v42 = vpop.permute.xlu1 %3152 }
 0x548   : > { %3218 = vst.msk [vmem:[#allocation4 + $0x2d8] sm:$0xff] %vm2545_vm14, %v3153_v42  ;;  %2853 = vrot.lane.b32.xlu0 %v11250_v63, %s6900_s22  ;;  %v9220_v42 = vpop.f32.mrf.mxu3 }
 0x549   : > { %3411 = vst.msk [vmem:[#allocation4 + $0x2d8] sm:$0xff] %vm2738_vm15, %v3346_v40  ;;  %v11252_v40 = vld [vmem:[#allocation35_spill] sm:$0xff] }
 0x54a   : > { %v3532_v10 = vpop.permute.xlu0 %3531  ;;  %v3748_v28 = vld [vmem:[#allocation4 + $0x278] sm:$0xff] }
 0x54b   : > { %2666 = vrot.lane.b32.xlu2 %v2590_v32, %s6898_s19  ;;  %3600 = vst.msk [vmem:[#allocation4 + $0x290] sm:$0xff] %vm2931_vm0, %v3532_v10  ;;  %4104 = vmatmul.f32.gmra.mxu2 %v3748_v28  ;;  %v11254_v32 = vld [vmem:[#allocation43_spill] sm:$0xff]  ;;  %v2402_v10 = vld [vmem:[#allocation3 + $0xc9] sm:$0xff] }
 0x54d   : > { %2475 = vrot.lane.b32.xlu1 %v2398_v54, %s6899_s21  ;;  %v2645_v30 = vpop.permute.xlu2 %2644  ;;  %v2594_v54 = vld [vmem:[#allocation3 + $0xc2] sm:$0xff] }
 0x54e   : > { %v9184_v39 = vpop.f32.mrf.mxu2 }
 0x54f   : > { %v3155_v53 = vpop.permute.xlu1 %3154 }
 0x550   : > { %3219 = vst.msk [vmem:[#allocation4 + $0x2f0] sm:$0xff] %vm2545_vm14, %v3155_v53  ;;  %2855 = vrot.lane.b32.xlu0 %v11251_v35, %s6900_s22  ;;  %v9231_v35 = vpop.f32.mrf.mxu3 }
 0x551   : > { %3412 = vst.msk [vmem:[#allocation4 + $0x2f0] sm:$0xff] %vm2738_vm15, %v3348_v5 }
 0x552   : > { %v3534_v37 = vpop.permute.xlu0 %3533  ;;  %v3751_v23 = vld [vmem:[#allocation4 + $0x290] sm:$0xff] }
 0x553   : > { %2668 = vrot.lane.b32.xlu2 %v2591_v45, %s6898_s19  ;;  %3601 = vst.msk [vmem:[#allocation4 + $0x2a8] sm:$0xff] %vm2931_vm0, %v3534_v37  ;;  %4107 = vmatmul.f32.gmra.mxu2 %v3751_v23  ;;  %v2595_v37 = vld [vmem:[#allocation3 + $0xca] sm:$0xff]  ;;  %v2403_v23 = vld [vmem:[#allocation3 + $0xd9] sm:$0xff] }
 0x555   : > { %2477 = vrot.lane.b32.xlu1 %v2399_v15, %s6899_s21  ;;  %v2647_v36 = vpop.permute.xlu2 %2646  ;;  %v11255_v15 = vld [vmem:[#allocation44_spill] sm:$0xff] }
 0x556   : > { %v9196_v52 = vpop.f32.mrf.mxu2 }
 0x557   : > { %v2450_v2 = vpop.permute.xlu1 %2449 }
 0x558   : > { %2546 = vst.msk [vmem:[#allocation4] sm:$0xff] %vm2545_vm14, %v2450_v2  ;;  %2857 = vrot.lane.b32.xlu0 %v11252_v40, %s6900_s22 }
 0x559   : > { %2739 = vst.msk [vmem:[#allocation4] sm:$0xff] %vm2738_vm15, %v2643_v11 }
 0x55a   : > { %v3536_v48 = vpop.permute.xlu0 %3535  ;;  %v3754_v34 = vld [vmem:[#allocation4 + $0x2a8] sm:$0xff] }
 0x55b   : > { %2670 = vrot.lane.b32.xlu2 %v2592_v7, %s6898_s19  ;;  %3602 = vst.msk [vmem:[#allocation4 + $0x2c0] sm:$0xff] %vm2931_vm0, %v3536_v48  ;;  %4110 = vmatmul.f32.gmra.mxu2 %v3754_v34  ;;  %v9245_v7 = vpop.f32.mrf.mxu3  ;;  %v2596_v48 = vld [vmem:[#allocation3 + $0xda] sm:$0xff] }
 0x55c   : > { %v2404_v34 = vld [vmem:[#allocation3 + $0xe1] sm:$0xff] }
 0x55d   : > { %2479 = vrot.lane.b32.xlu1 %v2400_v20, %s6899_s21  ;;  %v2649_v24 = vpop.permute.xlu2 %2648  ;;  %v11256_v20 = vld [vmem:[#allocation46_spill] sm:$0xff] }
 0x55e   : > { %v9210_v5 = vpop.f32.mrf.mxu2 }
 0x55f   : > { %v2452_v21 = vpop.permute.xlu1 %2451 }
 0x560   : > { %2547 = vst.msk [vmem:[#allocation4 + $0x18] sm:$0xff] %vm2545_vm14, %v2452_v21  ;;  %2859 = vrot.lane.b32.xlu0 %v11253_v1, %s6900_s22 }
 0x561   : > { %2740 = vst.msk [vmem:[#allocation4 + $0x18] sm:$0xff] %vm2738_vm15, %v2645_v30 }
 0x562   : > { %v3538_v25 = vpop.permute.xlu0 %3537  ;;  %v3757_v12 = vld [vmem:[#allocation4 + $0x2c0] sm:$0xff] }
 0x563   : > { %2672 = vrot.lane.b32.xlu2 %v2593_v3, %s6898_s19  ;;  %3603 = vst.msk [vmem:[#allocation4 + $0x2d8] sm:$0xff] %vm2931_vm0, %v3538_v25  ;;  %4113 = vmatmul.f32.gmra.mxu2 %v3757_v12  ;;  %v9257_v25 = vpop.f32.mrf.mxu3  ;;  %v11257_v12 = vld [vmem:[#allocation49_spill] sm:$0xff] }
 0x565   : > { %2481 = vrot.lane.b32.xlu1 %v2401_v60, %s6899_s21  ;;  %v2651_v17 = vpop.permute.xlu2 %2650 }
 0x566   : > { %v9223_v63 = vpop.f32.mrf.mxu2 }
 0x567   : > { %v2454_v11 = vpop.permute.xlu1 %2453 }
 0x568   : > { %2548 = vst.msk [vmem:[#allocation4 + $0x30] sm:$0xff] %vm2545_vm14, %v2454_v11  ;;  %2861 = vrot.lane.b32.xlu0 %v11254_v32, %s6900_s22  ;;  %v2405_v11 = vld [vmem:[#allocation3 + $0xf1] sm:$0xff] }
 0x569   : > { %2741 = vst.msk [vmem:[#allocation4 + $0x30] sm:$0xff] %vm2738_vm15, %v2647_v36 }
 0x56a   : > { %v3540_v28 = vpop.permute.xlu0 %3539  ;;  %v3760_v30 = vld [vmem:[#allocation4 + $0x2d8] sm:$0xff] }
 0x56b   : > { %2674 = vrot.lane.b32.xlu2 %v2594_v54, %s6898_s19  ;;  %3604 = vst.msk [vmem:[#allocation4 + $0x2f0] sm:$0xff] %vm2931_vm0, %v3540_v28  ;;  %4116 = vmatmul.f32.gmra.mxu2 %v3760_v30 }
 0x56d   : > { %2483 = vrot.lane.b32.xlu1 %v2402_v10, %s6899_s21  ;;  %v2653_v53 = vpop.permute.xlu2 %2652  ;;  %v3674_v10 = vld [vmem:[#allocation4 + $0x28] sm:$0xff] }
 0x56e   : > { %v9234_v45 = vpop.f32.mrf.mxu2 }
 0x56f   : > { %v2456_v51 = vpop.permute.xlu1 %2455 }
 0x570   : > { %2549 = vst.msk [vmem:[#allocation4 + $0x48] sm:$0xff] %vm2545_vm14, %v2456_v51  ;;  %2863 = vrot.lane.b32.xlu0 %v11255_v15, %s6900_s22  ;;  %v11258_v51 = vld [vmem:[#allocation50_spill] sm:$0xff] }
 0x571   : > { %2742 = vst.msk [vmem:[#allocation4 + $0x48] sm:$0xff] %vm2738_vm15, %v2649_v24  ;;  %v2598_v15 = vld [vmem:[#allocation3 + $0xf2] sm:$0xff] }
 0x572   : > { %v2836_v36 = vpop.permute.xlu0 %2835  ;;  %v3763_v2 = vld [vmem:[#allocation4 + $0x2f0] sm:$0xff] }
 0x573   : > { %2676 = vrot.lane.b32.xlu2 %v2595_v37, %s6898_s19  ;;  %2932 = vst.msk [vmem:[#allocation4] sm:$0xff] %vm2931_vm0, %v2836_v36  ;;  %4119 = vmatmul.f32.gmra.mxu2 %v3763_v2  ;;  %v2406_v37 = vld [vmem:[#allocation3 + $0xf9] sm:$0xff] }
 0x575   : > { %2485 = vrot.lane.b32.xlu1 %v2403_v23, %s6899_s21  ;;  %v2655_v6 = vpop.permute.xlu2 %2654  ;;  %v9272_v23 = vpop.f32.mrf.mxu3 }
 0x576   : > { %v9243_v40 = vpop.f32.mrf.mxu2 }
 0x577   : > { %v2458_v62 = vpop.permute.xlu1 %2457 }
 0x578   : > { %2550 = vst.msk [vmem:[#allocation4 + $0x60] sm:$0xff] %vm2545_vm14, %v2458_v62  ;;  %2865 = vrot.lane.b32.xlu0 %v11256_v20, %s6900_s22  ;;  %v3677_v62 = vld [vmem:[#allocation4 + $0x40] sm:$0xff] }
 0x579   : > { %2743 = vst.msk [vmem:[#allocation4 + $0x60] sm:$0xff] %vm2738_vm15, %v2651_v17  ;;  %v2597_v17 = vld [vmem:[#allocation3 + $0xe2] sm:$0xff] }
 0x57a   : > { %v2838_v24 = vpop.permute.xlu0 %2837  ;;  %v3669_v21 = vld [vmem:[#allocation4] sm:$0xff] }
 0x57b   : > { %2678 = vrot.lane.b32.xlu2 %v2596_v48, %s6898_s19  ;;  %2933 = vst.msk [vmem:[#allocation4 + $0x18] sm:$0xff] %vm2931_vm0, %v2838_v24  ;;  %3913 = vmatmul.f32.vlgmr.msra.gmra.mxu1 %v3669_v21  ;;  %v2599_v24 = vld [vmem:[#allocation3 + $0xfa] sm:$0xff]  ;;  %v2407_v21 = vld [vmem:[#allocation3 + $0x109] sm:$0xff] }
 0x57c   : > { %6666 = vmatmul.msk.f32.vlgmr.msrb.gmra.mxu2 %vm2232_vm12, %v3671_v27 }
 0x57d   : > { %2487 = vrot.lane.b32.xlu1 %v2404_v34, %s6899_s21  ;;  %v2657_v1 = vpop.permute.xlu2 %2656  ;;  %v11259_v34 = vld [vmem:[#allocation52_spill] sm:$0xff]  ;;  %v9284_v27 = vpop.f32.mrf.mxu3 }
 0x57e   : > { %v9255_v60 = vpop.f32.mrf.mxu2 }
 0x57f   : > { %v2460_v3 = vpop.permute.xlu1 %2459 }
 0x580   : > { %2551 = vst.msk [vmem:[#allocation4 + $0x78] sm:$0xff] %vm2545_vm14, %v2460_v3  ;;  %2867 = vrot.lane.b32.xlu0 %v11257_v12, %s6900_s22 }
 0x581   : > { %2744 = vst.msk [vmem:[#allocation4 + $0x78] sm:$0xff] %vm2738_vm15, %v2653_v53 }
 0x582   : > { %v2840_v32 = vpop.permute.xlu0 %2839  ;;  %v3672_v54 = vld [vmem:[#allocation4 + $0x18] sm:$0xff] }
 0x583   : > { %2680 = vrot.lane.b32.xlu2 %v2597_v17, %s6898_s19  ;;  %2934 = vst.msk [vmem:[#allocation4 + $0x30] sm:$0xff] %vm2931_vm0, %v2840_v32  ;;  %3916 = vmatmul.f32.gmra.mxu1 %v3672_v54  ;;  %v3680_v17 = vld [vmem:[#allocation4 + $0x58] sm:$0xff]  ;;  %v11260_v54 = vld [vmem:[#allocation55_spill] sm:$0xff] }
 0x584   : > { %6667 = vmatmul.msk.f32.gmra.mxu2 %vm2232_vm12, %v3674_v10  ;;  %v2600_v10 = vld [vmem:[#allocation3 + $0x10a] sm:$0xff] }
 0x585   : > { %2489 = vrot.lane.b32.xlu1 %v2405_v11, %s6899_s21  ;;  %v2659_v28 = vpop.permute.xlu2 %2658 }
 0x586   : > { %v9267_v53 = vpop.f32.mrf.mxu2 }
 0x587   : > { %v2462_v30 = vpop.permute.xlu1 %2461 }
 0x588   : > { %2552 = vst.msk [vmem:[#allocation4 + $0x90] sm:$0xff] %vm2545_vm14, %v2462_v30  ;;  %2869 = vrot.lane.b32.xlu0 %v11258_v51, %s6900_s22 }
 0x589   : > { %2745 = vst.msk [vmem:[#allocation4 + $0x90] sm:$0xff] %vm2738_vm15, %v2655_v6 }
 0x58a   : > { %v2842_v36 = vpop.permute.xlu0 %2841  ;;  %v3675_v2 = vld [vmem:[#allocation4 + $0x30] sm:$0xff] }
 0x58b   : > { %2682 = vrot.lane.b32.xlu2 %v2598_v15, %s6898_s19  ;;  %2935 = vst.msk [vmem:[#allocation4 + $0x48] sm:$0xff] %vm2931_vm0, %v2842_v36  ;;  %3919 = vmatmul.f32.gmra.mxu1 %v3675_v2  ;;  %v3683_v15 = vld [vmem:[#allocation4 + $0x70] sm:$0xff]  ;;  %v9298_v36 = vpop.f32.mrf.mxu3 }
 0x58c   : > { %6668 = vmatmul.msk.f32.gmra.mxu2 %vm2232_vm12, %v3677_v62  ;;  %v11261_v62 = vld [vmem:[#allocation56_spill] sm:$0xff] }
 0x58d   : > { %2491 = vrot.lane.b32.xlu1 %v2406_v37, %s6899_s21  ;;  %v2661_v20 = vpop.permute.xlu2 %2660 }
 0x58e   : > { %v9279_v48 = vpop.f32.mrf.mxu2 }
 0x58f   : > { %v2464_v6 = vpop.permute.xlu1 %2463 }
 0x590   : > { %2553 = vst.msk [vmem:[#allocation4 + $0xa8] sm:$0xff] %vm2545_vm14, %v2464_v6  ;;  %2871 = vrot.lane.b32.xlu0 %v11259_v34, %s6900_s22 }
 0x591   : > { %2746 = vst.msk [vmem:[#allocation4 + $0xa8] sm:$0xff] %vm2738_vm15, %v2657_v1 }
 0x592   : > { %v2844_v3 = vpop.permute.xlu0 %2843  ;;  %v3678_v12 = vld [vmem:[#allocation4 + $0x48] sm:$0xff] }
 0x593   : > { %2684 = vrot.lane.b32.xlu2 %v2599_v24, %s6898_s19  ;;  %2936 = vst.msk [vmem:[#allocation4 + $0x60] sm:$0xff] %vm2931_vm0, %v2844_v3  ;;  %3922 = vmatmul.f32.gmra.mxu1 %v3678_v12  ;;  %v3686_v24 = vld [vmem:[#allocation4 + $0x88] sm:$0xff]  ;;  %v9308_v3 = vpop.f32.mrf.mxu3 }
 0x594   : > { %6669 = vmatmul.msk.f32.gmra.mxu2 %vm2232_vm12, %v3680_v17  ;;  %11262 = vst [vmem:[#allocation64_spill] sm:$0xff] %v9308_v3  ;;  %v2792_v17 = vld [vmem:[#allocation3 + $0x110] sm:$0xff] }
 0x595   : > { %2493 = vrot.lane.b32.xlu1 %v2407_v21, %s6899_s21  ;;  %v2663_v11 = vpop.permute.xlu2 %2662 }
 0x596   : > { %v9291_v32 = vpop.f32.mrf.mxu2 }
 0x597   : > { %v2466_v1 = vpop.permute.xlu1 %2465 }
 0x598   : > { %2554 = vst.msk [vmem:[#allocation4 + $0xc0] sm:$0xff] %vm2545_vm14, %v2466_v1  ;;  %2873 = vrot.lane.b32.xlu0 %v11260_v54, %s6900_s22 }
 0x599   : > { %2747 = vst.msk [vmem:[#allocation4 + $0xc0] sm:$0xff] %vm2738_vm15, %v2659_v28 }
 0x59a   : > { %v2846_v30 = vpop.permute.xlu0 %2845  ;;  %v3681_v51 = vld [vmem:[#allocation4 + $0x60] sm:$0xff] }
 0x59b   : > { %2686 = vrot.lane.b32.xlu2 %v2600_v10, %s6898_s19  ;;  %2937 = vst.msk [vmem:[#allocation4 + $0x78] sm:$0xff] %vm2931_vm0, %v2846_v30  ;;  %3925 = vmatmul.f32.gmra.mxu1 %v3681_v51  ;;  %v4209_v51 = vpop.f32.mrf.mxu3 }
 0x59c   : > { %6670 = vmatmul.msk.f32.gmra.mxu2 %vm2232_vm12, %v3683_v15 }
 0x59d   : > { %v2665_v37 = vpop.permute.xlu2 %2664 }
 0x59e   : > { %v9302_v2 = vpop.f32.mrf.mxu2 }
 0x59f   : > { %v2468_v28 = vpop.permute.xlu1 %2467 }
 0x5a0   : > { %2555 = vst.msk [vmem:[#allocation4 + $0xd8] sm:$0xff] %vm2545_vm14, %v2468_v28  ;;  %2875 = vrot.lane.b32.xlu0 %v11261_v62, %s6900_s22 }
 0x5a1   : > { %2748 = vst.msk [vmem:[#allocation4 + $0xd8] sm:$0xff] %vm2738_vm15, %v2661_v20 }
 0x5a2   : > { %v2848_v6 = vpop.permute.xlu0 %2847  ;;  %v3684_v34 = vld [vmem:[#allocation4 + $0x78] sm:$0xff] }
 0x5a3   : > { %2938 = vst.msk [vmem:[#allocation4 + $0x90] sm:$0xff] %vm2931_vm0, %v2848_v6  ;;  %3928 = vmatmul.f32.gmra.mxu1 %v3684_v34 }
 0x5a4   : > { %6671 = vmatmul.msk.f32.gmra.mxu2 %vm2232_vm12, %v3686_v24  ;;  %v4212_v24 = vpop.f32.mrf.mxu3 }
 0x5a5   : > { %v2667_v21 = vpop.permute.xlu2 %2666 }
 0x5a6   : > { %v9312_v20 = vpop.f32.mrf.mxu2 }
 0x5a7   : > { %v2470_v12 = vpop.permute.xlu1 %2469 }
 0x5a8   : > { %2556 = vst.msk [vmem:[#allocation4 + $0xf0] sm:$0xff] %vm2545_vm14, %v2470_v12  ;;  %2877 = vrot.lane.b32.xlu0 %v2792_v17, %s6900_s22 }
 0x5a9   : > { %2749 = vst.msk [vmem:[#allocation4 + $0xf0] sm:$0xff] %vm2738_vm15, %v2663_v11  ;;  %v2793_v11 = vld [vmem:[#allocation3 + $0x120] sm:$0xff] }
 0x5aa   : > { %v2850_v1 = vpop.permute.xlu0 %2849  ;;  %v3687_v54 = vld [vmem:[#allocation4 + $0x90] sm:$0xff] }
 0x5ab   : > { %2939 = vst.msk [vmem:[#allocation4 + $0xa8] sm:$0xff] %vm2931_vm0, %v2850_v1  ;;  %3931 = vmatmul.f32.gmra.mxu1 %v3687_v54  ;;  %v9325_v1 = vstv %s4236_s23 }
 0x5ad   : > { %v2669_v10 = vpop.permute.xlu2 %2668 }
 0x5ae   : > { %v9318_v15 = vpop.f32.mrf.mxu2 }
 0x5af   : > { %v2472_v30 = vpop.permute.xlu1 %2471  ;;  %11263 = vst [vmem:[#allocation66_spill] sm:$0xff] %v9318_v15 }
 0x5b0   : > { %2557 = vst.msk [vmem:[#allocation4 + $0x108] sm:$0xff] %vm2545_vm14, %v2472_v30  ;;  %2879 = vrot.lane.b32.xlu0 %v2793_v11, %s6900_s22 }
 0x5b1   : > { %2750 = vst.msk [vmem:[#allocation4 + $0x108] sm:$0xff] %vm2738_vm15, %v2665_v37 }
 0x5b2   : > { %v2852_v28 = vpop.permute.xlu0 %2851  ;;  %v3690_v62 = vld [vmem:[#allocation4 + $0xa8] sm:$0xff] }
 0x5b3   : > { %2940 = vst.msk [vmem:[#allocation4 + $0xc0] sm:$0xff] %vm2931_vm0, %v2852_v28  ;;  %3934 = vmatmul.f32.gmra.mxu1 %v3690_v62 }
 0x5b5   : > { %v2671_v34 = vpop.permute.xlu2 %2670 }
 0x5b6   : > { %v4096_v12 = vpop.f32.mrf.mxu2 }
 0x5b7   : > { %v2474_v6 = vpop.permute.xlu1 %2473  ;;  %v4097_v37 = vadd.f32 %v4096_v12, %v8986_v50  ;;  %v4215_v12 = vpop.f32.mrf.mxu3 }
 0x5b8   : > { %2558 = vst.msk [vmem:[#allocation4 + $0x120] sm:$0xff] %vm2545_vm14, %v2474_v6 }
 0x5b9   : > { %2751 = vst.msk [vmem:[#allocation4 + $0x120] sm:$0xff] %vm2738_vm15, %v2667_v21  ;;  %v4210_v17 = vadd.f32 %v4209_v51, %v4097_v37 }
 0x5ba   : > { %v2854_v54 = vpop.permute.xlu0 %2853  ;;  %v3693_v30 = vld [vmem:[#allocation4 + $0xc0] sm:$0xff] }
 0x5bb   : > { %v4292_v11 = vmin.f32 %v4210_v17, 0.0  ;;  %2941 = vst.msk [vmem:[#allocation4 + $0xd8] sm:$0xff] %vm2931_vm0, %v2854_v54  ;;  %3937 = vmatmul.f32.gmra.mxu1 %v3693_v30  ;;  %v4260_v62 = vmax.f32 %v4210_v17, 0.0 }
 0x5bd   : > { %v4325_v3 = vmul.f32 %v9325_v1, %v4292_v11  ;;  %v2673_v50 = vpop.permute.xlu2 %2672 }
 0x5be   : > { %v4099_v21 = vpop.f32.mrf.mxu2 }
 0x5bf   : > { %v2476_v28 = vpop.permute.xlu1 %2475  ;;  %v4357_v6 = vadd.f32 %v4325_v3, %v4260_v62  ;;  %v4100_v51 = vadd.f32 %v4099_v21, %v8997_v47  ;;  %v4218_v62 = vpop.f32.mrf.mxu3 }
 0x5c0   : > { %2559 = vst.msk [vmem:[#allocation4 + $0x138] sm:$0xff] %vm2545_vm14, %v2476_v28 }
 0x5c1   : > { %2752 = vst.msk [vmem:[#allocation4 + $0x138] sm:$0xff] %vm2738_vm15, %v2669_v10  ;;  %v4213_v37 = vadd.f32 %v4212_v24, %v4100_v51 }
 0x5c2   : > { %4389 = vst.msk [vmem:[#allocation3 + $0x129] sm:$0xff] %vm2232_vm12, %v4357_v6  ;;  %v2856_v15 = vpop.permute.xlu0 %2855  ;;  %v3696_v54 = vld [vmem:[#allocation4 + $0xd8] sm:$0xff] }
 0x5c3   : > { %v4293_v30 = vmin.f32 %v4213_v37, 0.0  ;;  %2942 = vst.msk [vmem:[#allocation4 + $0xf0] sm:$0xff] %vm2931_vm0, %v2856_v15  ;;  %3940 = vmatmul.f32.gmra.mxu1 %v3696_v54  ;;  %v4261_v11 = vmax.f32 %v4213_v37, 0.0 }
 0x5c5   : > { %v4326_v28 = vmul.f32 %v9325_v1, %v4293_v30  ;;  %v2675_v24 = vpop.permute.xlu2 %2674 }
 0x5c6   : > { %v4102_v3 = vpop.f32.mrf.mxu2 }
 0x5c7   : > { %v2478_v17 = vpop.permute.xlu1 %2477  ;;  %v4358_v47 = vadd.f32 %v4326_v28, %v4261_v11  ;;  %v4103_v10 = vadd.f32 %v4102_v3, %v9008_v29  ;;  %v4221_v11 = vpop.f32.mrf.mxu3 }
 0x5c8   : > { %2560 = vst.msk [vmem:[#allocation4 + $0x150] sm:$0xff] %vm2545_vm14, %v2478_v17 }
 0x5c9   : > { %2753 = vst.msk [vmem:[#allocation4 + $0x150] sm:$0xff] %vm2738_vm15, %v2671_v34  ;;  %v4216_v21 = vadd.f32 %v4215_v12, %v4103_v10 }
 0x5ca   : > { %4390 = vst.msk [vmem:[#allocation3 + $0x139] sm:$0xff] %vm2232_vm12, %v4358_v47  ;;  %v2858_v6 = vpop.permute.xlu0 %2857  ;;  %v3699_v15 = vld [vmem:[#allocation4 + $0xf0] sm:$0xff] }
 0x5cb   : > { %v4294_v51 = vmin.f32 %v4216_v21, 0.0  ;;  %2943 = vst.msk [vmem:[#allocation4 + $0x108] sm:$0xff] %vm2931_vm0, %v2858_v6  ;;  %3943 = vmatmul.f32.gmra.mxu1 %v3699_v15  ;;  %v4262_v54 = vmax.f32 %v4216_v21, 0.0 }
 0x5cd   : > { %v4327_v30 = vmul.f32 %v9325_v1, %v4294_v51  ;;  %v2677_v47 = vpop.permute.xlu2 %2676 }
 0x5ce   : > { %v4105_v29 = vpop.f32.mrf.mxu2 }
 0x5cf   : > { %v2480_v37 = vpop.permute.xlu1 %2479  ;;  %v4359_v34 = vadd.f32 %v4327_v30, %v4262_v54  ;;  %v4106_v17 = vadd.f32 %v4105_v29, %v9020_v49 }
 0x5d0   : > { %2561 = vst.msk [vmem:[#allocation4 + $0x168] sm:$0xff] %vm2545_vm14, %v2480_v37  ;;  %v4224_v37 = vpop.f32.mrf.mxu3 }
 0x5d1   : > { %2754 = vst.msk [vmem:[#allocation4 + $0x168] sm:$0xff] %vm2738_vm15, %v2673_v50  ;;  %v4219_v12 = vadd.f32 %v4218_v62, %v4106_v17 }
 0x5d2   : > { %4391 = vst.msk [vmem:[#allocation3 + $0x141] sm:$0xff] %vm2232_vm12, %v4359_v34  ;;  %v2860_v28 = vpop.permute.xlu0 %2859  ;;  %v3702_v3 = vld [vmem:[#allocation4 + $0x108] sm:$0xff] }
 0x5d3   : > { %v4295_v10 = vmin.f32 %v4219_v12, 0.0  ;;  %2944 = vst.msk [vmem:[#allocation4 + $0x120] sm:$0xff] %vm2931_vm0, %v2860_v28  ;;  %3946 = vmatmul.f32.gmra.mxu1 %v3702_v3  ;;  %v4263_v6 = vmax.f32 %v4219_v12, 0.0 }
 0x5d5   : > { %v4328_v15 = vmul.f32 %v9325_v1, %v4295_v10  ;;  %v2679_v17 = vpop.permute.xlu2 %2678 }
 0x5d6   : > { %v4108_v49 = vpop.f32.mrf.mxu2 }
 0x5d7   : > { %v2482_v21 = vpop.permute.xlu1 %2481  ;;  %v4360_v50 = vadd.f32 %v4328_v15, %v4263_v6  ;;  %v4109_v62 = vadd.f32 %v4108_v49, %v9031_v33 }
 0x5d8   : > { %2562 = vst.msk [vmem:[#allocation4 + $0x180] sm:$0xff] %vm2545_vm14, %v2482_v21  ;;  %v4227_v15 = vpop.f32.mrf.mxu3 }
 0x5d9   : > { %2755 = vst.msk [vmem:[#allocation4 + $0x180] sm:$0xff] %vm2738_vm15, %v2675_v24  ;;  %v4222_v51 = vadd.f32 %v4221_v11, %v4109_v62 }
 0x5da   : > { %4392 = vst.msk [vmem:[#allocation3 + $0x151] sm:$0xff] %vm2232_vm12, %v4360_v50  ;;  %v2862_v54 = vpop.permute.xlu0 %2861  ;;  %v3705_v30 = vld [vmem:[#allocation4 + $0x120] sm:$0xff] }
 0x5db   : > { %v4296_v29 = vmin.f32 %v4222_v51, 0.0  ;;  %2945 = vst.msk [vmem:[#allocation4 + $0x138] sm:$0xff] %vm2931_vm0, %v2862_v54  ;;  %3949 = vmatmul.f32.gmra.mxu1 %v3705_v30  ;;  %v4264_v12 = vmax.f32 %v4222_v51, 0.0 }
 0x5dd   : > { %v4329_v28 = vmul.f32 %v9325_v1, %v4296_v29 }
 0x5de   : > { %v4111_v33 = vpop.f32.mrf.mxu2 }
 0x5df   : > { %v2484_v34 = vpop.permute.xlu1 %2483  ;;  %v4361_v24 = vadd.f32 %v4329_v28, %v4264_v12  ;;  %v4112_v11 = vadd.f32 %v4111_v33, %v9041_v8  ;;  %v2681_v8 = vpop.permute.xlu2 %2680 }
 0x5e0   : > { %2563 = vst.msk [vmem:[#allocation4 + $0x198] sm:$0xff] %vm2545_vm14, %v2484_v34  ;;  %v4230_v28 = vpop.f32.mrf.mxu3 }
 0x5e1   : > { %2756 = vst.msk [vmem:[#allocation4 + $0x198] sm:$0xff] %vm2738_vm15, %v2677_v47  ;;  %v4225_v3 = vadd.f32 %v4224_v37, %v4112_v11 }
 0x5e2   : > { %4393 = vst.msk [vmem:[#allocation3 + $0x159] sm:$0xff] %vm2232_vm12, %v4361_v24  ;;  %v2864_v10 = vpop.permute.xlu0 %2863  ;;  %v3708_v21 = vld [vmem:[#allocation4 + $0x138] sm:$0xff] }
 0x5e3   : > { %v4297_v6 = vmin.f32 %v4225_v3, 0.0  ;;  %2946 = vst.msk [vmem:[#allocation4 + $0x150] sm:$0xff] %vm2931_vm0, %v2864_v10  ;;  %3952 = vmatmul.f32.gmra.mxu1 %v3708_v21  ;;  %v4265_v50 = vmax.f32 %v4225_v3, 0.0 }
 0x5e5   : > { %v4330_v62 = vmul.f32 %v9325_v1, %v4297_v6 }
 0x5e6   : > { %v4114_v47 = vpop.f32.mrf.mxu2 }
 0x5e7   : > { %v2486_v49 = vpop.permute.xlu1 %2485  ;;  %v4362_v51 = vadd.f32 %v4330_v62, %v4265_v50  ;;  %v4115_v37 = vadd.f32 %v4114_v47, %v9050_v38  ;;  %v2683_v3 = vpop.permute.xlu2 %2682  ;;  %v9374_v62 = vld [vmem:[#allocation3 + $0x129] sm:$0xff] }
 0x5e8   : > { %2564 = vst.msk [vmem:[#allocation4 + $0x1b0] sm:$0xff] %vm2545_vm14, %v2486_v49  ;;  %v9370_v49 = vld [vmem:[#allocation3 + $0x12a] sm:$0xff] }
 0x5e9   : > { %2757 = vst.msk [vmem:[#allocation4 + $0x1b0] sm:$0xff] %vm2738_vm15, %v2679_v17  ;;  %v4228_v54 = vadd.f32 %v4227_v15, %v4115_v37 }
 0x5ea   : > { %4394 = vst.msk [vmem:[#allocation3 + $0x169] sm:$0xff] %vm2232_vm12, %v4362_v51  ;;  %v2866_v30 = vpop.permute.xlu0 %2865  ;;  %v3711_v29 = vld [vmem:[#allocation4 + $0x150] sm:$0xff]  ;;  %v4233_v51 = vpop.f32.mrf.mxu3 }
 0x5eb   : > { %v4298_v34 = vmin.f32 %v4228_v54, 0.0  ;;  %2947 = vst.msk [vmem:[#allocation4 + $0x168] sm:$0xff] %vm2931_vm0, %v2866_v30  ;;  %3955 = vmatmul.f32.gmra.mxu1 %v3711_v29  ;;  %v4266_v33 = vmax.f32 %v4228_v54, 0.0 }
 0x5ec   : > { %5731 = vst.msk [vmem:[#allocation4 + $0x208] sm:$0xff] %vm2232_vm12, %v9370_v49 }
 0x5ed   : > { %v4331_v24 = vmul.f32 %v9325_v1, %v4298_v34  ;;  %5093 = vst.msk [vmem:[#allocation4 + $0x230] sm:$0xff] %vm2232_vm12, %v9374_v62 }
 0x5ee   : > { %v4117_v17 = vpop.f32.mrf.mxu2 }
 0x5ef   : > { %v2488_v12 = vpop.permute.xlu1 %2487  ;;  %v4363_v38 = vadd.f32 %v4331_v24, %v4266_v33  ;;  %v4118_v11 = vadd.f32 %v4117_v17, %v9059_v44  ;;  %v9384_v24 = vld [vmem:[#allocation3 + $0x139] sm:$0xff] }
 0x5f0   : > { %2565 = vst.msk [vmem:[#allocation4 + $0x1c8] sm:$0xff] %vm2545_vm14, %v2488_v12 }
 0x5f1   : > { %2758 = vst.msk [vmem:[#allocation4 + $0x1c8] sm:$0xff] %vm2738_vm15, %v2681_v8  ;;  %v4231_v10 = vadd.f32 %v4230_v28, %v4118_v11  ;;  %v2685_v28 = vpop.permute.xlu2 %2684 }
 0x5f2   : > { %4395 = vst.msk [vmem:[#allocation3 + $0x171] sm:$0xff] %vm2232_vm12, %v4363_v38  ;;  %v2868_v21 = vpop.permute.xlu0 %2867  ;;  %v3714_v6 = vld [vmem:[#allocation4 + $0x168] sm:$0xff] }
 0x5f3   : > { %v4299_v15 = vmin.f32 %v4231_v10, 0.0  ;;  %2948 = vst.msk [vmem:[#allocation4 + $0x180] sm:$0xff] %vm2931_vm0, %v2868_v21  ;;  %3958 = vmatmul.f32.gmra.mxu1 %v3714_v6  ;;  %v4267_v47 = vmax.f32 %v4231_v10, 0.0  ;;  %v9386_v38 = vld [vmem:[#allocation3 + $0x138] sm:$0xff] }
 0x5f4   : > { %5094 = vst.msk [vmem:[#allocation4 + $0x248] sm:$0xff] %vm2232_vm12, %v9384_v24 }
 0x5f5   : > { %v4332_v44 = vmul.f32 %v9325_v1, %v4299_v15  ;;  %4456 = vst.msk [vmem:[#allocation4 + $0x270] sm:$0xff] %vm2232_vm12, %v9386_v38 }
 0x5f6   : > { %v4120_v8 = vpop.f32.mrf.mxu2 }
 0x5f7   : > { %v2490_v50 = vpop.permute.xlu1 %2489  ;;  %v4364_v37 = vadd.f32 %v4332_v44, %v4267_v47  ;;  %v4121_v54 = vadd.f32 %v4120_v8, %v9069_v16 }
 0x5f8   : > { %2566 = vst.msk [vmem:[#allocation4 + $0x1e0] sm:$0xff] %vm2545_vm14, %v2490_v50  ;;  %v3914_v30 = vpop.f32.mrf.mxu1 }
 0x5f9   : > { %2759 = vst.msk [vmem:[#allocation4 + $0x1e0] sm:$0xff] %vm2738_vm15, %v2683_v3  ;;  %v4234_v29 = vadd.f32 %v4233_v51, %v4121_v54  ;;  %v4028_v16 = vadd.f32 %v9078_v14, %v3914_v30  ;;  %v9399_v51 = vld [vmem:[#allocation3 + $0x13a] sm:$0xff]  ;;  %v2687_v54 = vpop.permute.xlu2 %2686 }
 0x5fa   : > { %4396 = vst.msk [vmem:[#allocation3 + $0x181] sm:$0xff] %vm2232_vm12, %v4364_v37  ;;  %v2870_v34 = vpop.permute.xlu0 %2869  ;;  %v3717_v12 = vld [vmem:[#allocation4 + $0x180] sm:$0xff] }
 0x5fb   : > { %v4300_v33 = vmin.f32 %v4234_v29, 0.0  ;;  %2949 = vst.msk [vmem:[#allocation4 + $0x198] sm:$0xff] %vm2931_vm0, %v2870_v34  ;;  %3961 = vmatmul.f32.gmra.mxu1 %v3717_v12  ;;  %v4268_v11 = vmax.f32 %v4234_v29, 0.0  ;;  %v9405_v34 = vld [vmem:[#allocation3 + $0x142] sm:$0xff] }
 0x5fc   : > { %5732 = vst.msk [vmem:[#allocation4 + $0x220] sm:$0xff] %vm2232_vm12, %v9399_v51 }
 0x5fd   : > { %v4333_v3 = vmul.f32 %v9325_v1, %v4300_v33  ;;  %5733 = vst.msk [vmem:[#allocation4 + $0x238] sm:$0xff] %vm2232_vm12, %v9405_v34 }
 0x5ff   : > { %v2492_v17 = vpop.permute.xlu1 %2491  ;;  %v4140_v10 = vpop.f32.mrf.mxu2  ;;  %v4365_v21 = vadd.f32 %v4333_v3, %v4268_v11 }
 0x600   : > { %2567 = vst.msk [vmem:[#allocation4 + $0x1f8] sm:$0xff] %vm2545_vm14, %v2492_v17  ;;  %v4141_v6 = vadd.f32 %v4140_v10, %v4028_v16  ;;  %v3917_v15 = vpop.f32.mrf.mxu1  ;;  %v9411_v17 = vld [vmem:[#allocation3 + $0x140] sm:$0xff] }
 0x601   : > { %2760 = vst.msk [vmem:[#allocation4 + $0x1f8] sm:$0xff] %vm2738_vm15, %v2685_v28  ;;  %v4031_v29 = vadd.f32 %v9087_v57, %v3917_v15  ;;  %v9408_v28 = vld [vmem:[#allocation3 + $0x141] sm:$0xff]  ;;  %v9423_v15 = vld [vmem:[#allocation3 + $0x150] sm:$0xff] }
 0x602   : > { %4397 = vst.msk [vmem:[#allocation3 + $0x189] sm:$0xff] %vm2232_vm12, %v4365_v21  ;;  %v4269_v50 = vmin.f32 %v4141_v6, 0.0  ;;  %v2872_v47 = vpop.permute.xlu0 %2871  ;;  %v3720_v44 = vld [vmem:[#allocation4 + $0x198] sm:$0xff]  ;;  %v4237_v14 = vmax.f32 %v4141_v6, 0.0  ;;  %v9421_v6 = vld [vmem:[#allocation3 + $0x151] sm:$0xff] }
 0x603   : > { %2950 = vst.msk [vmem:[#allocation4 + $0x1b0] sm:$0xff] %vm2931_vm0, %v2872_v47  ;;  %3964 = vmatmul.f32.gmra.mxu1 %v3720_v44 }
 0x604   : > { %v4302_v8 = vmul.f32 %v9325_v1, %v4269_v50  ;;  %5095 = vst.msk [vmem:[#allocation4 + $0x260] sm:$0xff] %vm2232_vm12, %v9408_v28 }
 0x605   : > { %4457 = vst.msk [vmem:[#allocation4 + $0x288] sm:$0xff] %vm2232_vm12, %v9411_v17 }
 0x606   : > { %v4334_v30 = vadd.f32 %v4302_v8, %v4237_v14  ;;  %5096 = vst.msk [vmem:[#allocation4 + $0x278] sm:$0xff] %vm2232_vm12, %v9421_v6 }
 0x607   : > { %v2494_v37 = vpop.permute.xlu1 %2493  ;;  %v4143_v12 = vpop.f32.mrf.mxu2  ;;  %4458 = vst.msk [vmem:[#allocation4 + $0x2a0] sm:$0xff] %vm2232_vm12, %v9423_v15 }
 0x608   : > { %2568 = vst.msk [vmem:[#allocation4 + $0x210] sm:$0xff] %vm2545_vm14, %v2494_v37  ;;  %v4144_v33 = vadd.f32 %v4143_v12, %v4031_v29  ;;  %v3920_v16 = vpop.f32.mrf.mxu1 }
 0x609   : > { %2761 = vst.msk [vmem:[#allocation4 + $0x210] sm:$0xff] %vm2738_vm15, %v2687_v54  ;;  %v4034_v47 = vadd.f32 %v9096_v58, %v3920_v16  ;;  %v5873_v58 = vld [vmem:[%s11096_s4 + $0x118] sm:$0xff]  ;;  %v5872_v16 = vld [vmem:[%s11096_s4 + $0x110] sm:$0xff] }
 0x60a   : > { %4366 = vst.msk [vmem:[#allocation3 + $0x19] sm:$0xff] %vm2232_vm12, %v4334_v30  ;;  %v4270_v11 = vmin.f32 %v4144_v33, 0.0  ;;  %v2874_v57 = vpop.permute.xlu0 %2873  ;;  %v3723_v3 = vld [vmem:[#allocation4 + $0x1b0] sm:$0xff]  ;;  %v4238_v10 = vmax.f32 %v4144_v33, 0.0  ;;  %6208 = vmatpush.msrb.mxu1 %v5873_v58  ;;  %v5870_v58 = vld [vmem:[%s11096_s4 + $0x100] sm:$0xff] }
 0x60b   : > { %2951 = vst.msk [vmem:[#allocation4 + $0x1c8] sm:$0xff] %vm2931_vm0, %v2874_v57  ;;  %3967 = vmatmul.f32.gmra.mxu1 %v3723_v3  ;;  %v9445_v57 = vld [vmem:[#allocation3 + $0x15a] sm:$0xff] }
 0x60c   : > { %v4303_v21 = vmul.f32 %v9325_v1, %v4270_v11  ;;  %v9443_v11 = vld [vmem:[#allocation3 + $0x152] sm:$0xff]  ;;  %11265 = vst [vmem:[#allocation68_spill] sm:$0xff] %v9445_v57  ;;  %6209 = vmatpush.msrb.mxu1 %v5872_v16 }
 0x60d   : > { %11264 = vst [vmem:[#allocation67_spill] sm:$0xff] %v9443_v11 }
 0x60e   : > { %v4335_v50 = vadd.f32 %v4303_v21, %v4238_v10  ;;  %5734 = vst.msk [vmem:[#allocation4 + $0x250] sm:$0xff] %vm2232_vm12, %v9443_v11  ;;  %v9450_v21 = vld [vmem:[#allocation3 + $0x159] sm:$0xff] }
 0x60f   : > { %v4146_v44 = vpop.f32.mrf.mxu2  ;;  %11266 = vst [vmem:[#allocation15_spill] sm:$0xff] %v9450_v21 }
 0x610   : > { %4367 = vst.msk [vmem:[#allocation3 + $0x21] sm:$0xff] %vm2232_vm12, %v4335_v50  ;;  %v4147_v14 = vadd.f32 %v4146_v44, %v4034_v47  ;;  %v3923_v37 = vpop.f32.mrf.mxu1  ;;  %v9456_v44 = vld [vmem:[#allocation3 + $0x158] sm:$0xff] }
 0x611   : > { %v9431_v8 = vld [vmem:[#allocation3 + $0x18] sm:$0xff]  ;;  %v4037_v10 = vadd.f32 %v9107_v56, %v3923_v37  ;;  %5735 = vst.msk [vmem:[#allocation4 + $0x268] sm:$0xff] %vm2232_vm12, %v9445_v57  ;;  %v9484_v57 = vld [vmem:[#allocation3 + $0x168] sm:$0xff] }
 0x612   : > { %4432 = vst.msk [vmem:[#allocation4 + $0x30] sm:$0xff] %vm2232_vm12, %v9431_v8  ;;  %v4271_v54 = vmin.f32 %v4147_v14, 0.0  ;;  %v2876_v30 = vpop.permute.xlu0 %2875  ;;  %v3726_v29 = vld [vmem:[#allocation4 + $0x1c8] sm:$0xff]  ;;  %v4239_v12 = vmax.f32 %v4147_v14, 0.0 }
 0x613   : > { %2952 = vst.msk [vmem:[#allocation4 + $0x1e0] sm:$0xff] %vm2931_vm0, %v2876_v30  ;;  %3970 = vmatmul.f32.gmra.mxu1 %v3726_v29 }
 0x614   : > { %v4304_v33 = vmul.f32 %v9325_v1, %v4271_v54  ;;  %11267 = vst [vmem:[#allocation17_spill] sm:$0xff] %v9456_v44 }
 0x615   : > { %5097 = vst.msk [vmem:[#allocation4 + $0x290] sm:$0xff] %vm2232_vm12, %v9450_v21  ;;  %v4463_v21 = vld [vmem:[#allocation3 + $0x9] sm:$0xff] }
 0x616   : > { %v4336_v3 = vadd.f32 %v4304_v33, %v4239_v12  ;;  %4459 = vst.msk [vmem:[#allocation4 + $0x2b8] sm:$0xff] %vm2232_vm12, %v9456_v44  ;;  %v5871_v33 = vld [vmem:[%s11096_s4 + $0x108] sm:$0xff] }
 0x617   : > { %v4149_v50 = vpop.f32.mrf.mxu2  ;;  %v9452_v47 = vld [vmem:[#allocation3 + $0x1a] sm:$0xff]  ;;  %6210 = vmatpush.msrb.mxu1 %v5871_v33  ;;  %11269 = vst [vmem:[#allocation20_spill] sm:$0xff] %v9484_v57 }
 0x618   : > { %4368 = vst.msk [vmem:[#allocation3 + $0x31] sm:$0xff] %vm2232_vm12, %v4336_v3  ;;  %v4150_v14 = vadd.f32 %v4149_v50, %v4037_v10  ;;  %5166 = vrot.lane.b32.xlu1 %v9452_v47, %s6899_s21  ;;  %v3926_v56 = vpop.f32.mrf.mxu1  ;;  %v9473_v16 = vld [vmem:[#allocation3 + $0x20] sm:$0xff]  ;;  %v9475_v3 = vld [vmem:[#allocation3 + $0x169] sm:$0xff] }
 0x619   : > { %11268 = vst [vmem:[#allocation19_spill] sm:$0xff] %v9475_v3  ;;  %v4040_v50 = vadd.f32 %v9118_v46, %v3926_v56  ;;  %6211 = vmatpush.msrb.mxu1 %v5870_v58 }
 0x61a   : > { %v4272_v37 = vmin.f32 %v4150_v14, 0.0  ;;  %v2878_v54 = vpop.permute.xlu0 %2877  ;;  %v3729_v30 = vld [vmem:[#allocation4 + $0x1e0] sm:$0xff]  ;;  %v4240_v29 = vmax.f32 %v4150_v14, 0.0  ;;  %v4462_v14 = vld [vmem:[#allocation3 + $0x1] sm:$0xff]  ;;  %4433 = vst.msk [vmem:[#allocation4 + $0x48] sm:$0xff] %vm2232_vm12, %v9473_v16 }
 0x61b   : > { %2953 = vst.msk [vmem:[#allocation4 + $0x1f8] sm:$0xff] %vm2931_vm0, %v2878_v54  ;;  %3973 = vmatmul.f32.gmra.mxu1 %v3729_v30 }
 0x61c   : > { %v4305_v12 = vmul.f32 %v9325_v1, %v4272_v37  ;;  %5098 = vst.msk [vmem:[#allocation4 + $0x2a8] sm:$0xff] %vm2232_vm12, %v9475_v3  ;;  %v4654_v3 = vld [vmem:[#allocation3 + $0x2] sm:$0xff] }
 0x61d   : > { %4460 = vst.msk [vmem:[#allocation4 + $0x2d0] sm:$0xff] %vm2232_vm12, %v9484_v57 }
 0x61e   : > { %v4337_v10 = vadd.f32 %v4305_v12, %v4240_v29 }
 0x61f   : > { %v4152_v37 = vpop.f32.mrf.mxu2  ;;  %v9480_v54 = vld [vmem:[#allocation3 + $0x31] sm:$0xff] }
 0x620   : > { %v9482_v30 = vld [vmem:[#allocation3 + $0x30] sm:$0xff]  ;;  %4369 = vst.msk [vmem:[#allocation3 + $0x39] sm:$0xff] %vm2232_vm12, %v4337_v10  ;;  %v4153_v29 = vadd.f32 %v4152_v37, %v4040_v50  ;;  %5550 = vrot.lane.b32.xlu0 %v9480_v54, %s6900_s22  ;;  %4526 = vrot.lane.b32.xlu1 %v4462_v14, %s6899_s21  ;;  %v3929_v46 = vpop.f32.mrf.mxu1  ;;  %v9500_v50 = vld [vmem:[#allocation3 + $0x19] sm:$0xff] }
 0x621   : > { %5358 = vrot.lane.b32.xlu2 %v9482_v30, %s6898_s19  ;;  %5072 = vst.msk [vmem:[#allocation4 + $0x38] sm:$0xff] %vm2232_vm12, %v9480_v54  ;;  %v5704_v37 = vld [vmem:[#allocation3 + $0x16a] sm:$0xff]  ;;  %v5705_v14 = vld [vmem:[#allocation3 + $0x172] sm:$0xff]  ;;  %v4043_v44 = vadd.f32 %v9129_v41, %v3929_v46 }
 0x622   : > { %v4273_v56 = vmin.f32 %v4153_v29, 0.0  ;;  %v2880_v12 = vpop.permute.xlu0 %2879  ;;  %v3732_v33 = vld [vmem:[#allocation4 + $0x1f8] sm:$0xff]  ;;  %v4241_v58 = vmax.f32 %v4153_v29, 0.0  ;;  %5070 = vst.msk [vmem:[#allocation4 + $0x8] sm:$0xff] %vm2232_vm12, %v9500_v50 }
 0x623   : > { %2954 = vst.msk [vmem:[#allocation4 + $0x210] sm:$0xff] %vm2931_vm0, %v2880_v12  ;;  %3976 = vmatmul.f32.gmra.mxu1 %v3732_v33  ;;  %v9511_v12 = vld [vmem:[#allocation3 + $0x22] sm:$0xff] }
 0x624   : > { %v4306_v10 = vmul.f32 %v9325_v1, %v4273_v56  ;;  %5736 = vst.msk [vmem:[#allocation4 + $0x280] sm:$0xff] %vm2232_vm12, %v5704_v37 }
 0x625   : > { %5737 = vst.msk [vmem:[#allocation4 + $0x298] sm:$0xff] %vm2232_vm12, %v5705_v14  ;;  %v9534_v14 = vld [vmem:[#allocation3 + $0x181] sm:$0xff] }
 0x626   : > { %v4338_v11 = vadd.f32 %v4306_v10, %v4241_v58  ;;  %11272 = vst [vmem:[#allocation23_spill] sm:$0xff] %v9534_v14 }
 0x627   : > { %v4155_v57 = vpop.f32.mrf.mxu2  ;;  %v9506_v29 = vld [vmem:[#allocation3 + $0x32] sm:$0xff]  ;;  %v9517_v41 = vld [vmem:[#allocation3 + $0x3a] sm:$0xff]  ;;  %5100 = vst.msk [vmem:[#allocation4 + $0x2d8] sm:$0xff] %vm2232_vm12, %v9534_v14 }
 0x628   : > { %4370 = vst.msk [vmem:[#allocation3 + $0x49] sm:$0xff] %vm2232_vm12, %v4338_v11  ;;  %v4156_v56 = vadd.f32 %v4155_v57, %v4043_v44  ;;  %4910 = vrot.lane.b32.xlu0 %v9431_v8, %s6900_s22  ;;  %v9515_v33 = vld [vmem:[#allocation3 + $0x39] sm:$0xff]  ;;  %5168 = vrot.lane.b32.xlu1 %v9511_v12, %s6899_s21  ;;  %v3932_v46 = vpop.f32.mrf.mxu1  ;;  %v9523_v11 = vld [vmem:[#allocation3 + $0x171] sm:$0xff] }
 0x629   : > { %4718 = vrot.lane.b32.xlu2 %v4654_v3, %s6898_s19  ;;  %5710 = vst.msk [vmem:[#allocation4 + $0x10] sm:$0xff] %vm2232_vm12, %v9506_v29  ;;  %v4046_v44 = vadd.f32 %v9138_v18, %v3932_v46  ;;  %v9530_v3 = vld [vmem:[#allocation3 + $0x170] sm:$0xff] }
 0x62a   : > { %11270 = vst [vmem:[#allocation21_spill] sm:$0xff] %v9523_v11  ;;  %v4274_v57 = vmin.f32 %v4156_v56, 0.0  ;;  %v3735_v8 = vld [vmem:[#allocation4 + $0x210] sm:$0xff]  ;;  %v4242_v58 = vmax.f32 %v4156_v56, 0.0  ;;  %v9542_v56 = vld [vmem:[#allocation3 + $0x38] sm:$0xff] }
 0x62b   : > { %5711 = vst.msk [vmem:[#allocation4 + $0x28] sm:$0xff] %vm2232_vm12, %v9517_v41  ;;  %v4159_v37 = vadd.f32 %v9103_v61, %v4046_v44  ;;  %3979 = vmatmul.f32.gmra.mxu1 %v3735_v8 }
 0x62c   : > { %5073 = vst.msk [vmem:[#allocation4 + $0x50] sm:$0xff] %vm2232_vm12, %v9515_v33  ;;  %v4307_v10 = vmul.f32 %v9325_v1, %v4274_v57 }
 0x62d   : > { %11271 = vst [vmem:[#allocation22_spill] sm:$0xff] %v9530_v3  ;;  %v4275_v46 = vmin.f32 %v4159_v37, 0.0  ;;  %v4243_v61 = vmax.f32 %v4159_v37, 0.0 }
 0x62e   : > { %5099 = vst.msk [vmem:[#allocation4 + $0x2c0] sm:$0xff] %vm2232_vm12, %v9523_v11  ;;  %v4339_v18 = vadd.f32 %v4307_v10, %v4242_v58  ;;  %v4655_v11 = vld [vmem:[#allocation3 + $0xa] sm:$0xff] }
 0x62f   : > { %4461 = vst.msk [vmem:[#allocation4 + $0x2e8] sm:$0xff] %vm2232_vm12, %v9530_v3  ;;  %v9544_v57 = vld [vmem:[#allocation3 + $0x49] sm:$0xff]  ;;  %v4308_v44 = vmul.f32 %v9325_v1, %v4275_v46 }
 0x630   : > { %4371 = vst.msk [vmem:[#allocation3 + $0x51] sm:$0xff] %vm2232_vm12, %v4339_v18  ;;  %5552 = vrot.lane.b32.xlu0 %v9515_v33, %s6900_s22  ;;  %4528 = vrot.lane.b32.xlu1 %v4463_v21, %s6899_s21  ;;  %v3935_v8 = vpop.f32.mrf.mxu1  ;;  %v5744_v14 = vld [vmem:[#allocation4 + $0x10] sm:$0xff]  ;;  %v5707_v3 = vld [vmem:[#allocation3 + $0x18a] sm:$0xff] }
 0x631   : > { %5360 = vrot.lane.b32.xlu2 %v9542_v56, %s6898_s19  ;;  %5074 = vst.msk [vmem:[#allocation4 + $0x68] sm:$0xff] %vm2232_vm12, %v9544_v57  ;;  %v4340_v58 = vadd.f32 %v4308_v44, %v4243_v61  ;;  %v4049_v10 = vadd.f32 %v9150_v26, %v3935_v8  ;;  %v9559_v18 = vld [vmem:[#allocation3 + $0x21] sm:$0xff]  ;;  %v9577_v8 = vld [vmem:[#allocation3 + $0x189] sm:$0xff] }
 0x632   : > { %v5706_v46 = vld [vmem:[#allocation3 + $0x182] sm:$0xff]  ;;  %5071 = vst.msk [vmem:[#allocation4 + $0x20] sm:$0xff] %vm2232_vm12, %v9559_v18 }
 0x633   : > { %4372 = vst.msk [vmem:[#allocation3 + $0x61] sm:$0xff] %vm2232_vm12, %v4340_v58  ;;  %v4162_v37 = vadd.f32 %v9115_v19, %v4049_v10  ;;  %6698 = vmatmul.msk.f32.vlgmr.msrb.gmra.mxu1 %vm2232_vm12, %v5744_v14 }
 0x634   : > { %5738 = vst.msk [vmem:[#allocation4 + $0x2b0] sm:$0xff] %vm2232_vm12, %v5706_v46  ;;  %v9591_v46 = vld [vmem:[#allocation3 + $0x48] sm:$0xff] }
 0x635   : > { %v4276_v21 = vmin.f32 %v4162_v37, 0.0  ;;  %5739 = vst.msk [vmem:[#allocation4 + $0x2c8] sm:$0xff] %vm2232_vm12, %v5707_v3  ;;  %v4244_v19 = vmax.f32 %v4162_v37, 0.0 }
 0x636   : > { %5101 = vst.msk [vmem:[#allocation4 + $0x2f0] sm:$0xff] %vm2232_vm12, %v9577_v8 }
 0x637   : > { %v9564_v61 = vld [vmem:[#allocation3 + $0x4a] sm:$0xff]  ;;  %v9566_v26 = vld [vmem:[#allocation3 + $0x52] sm:$0xff]  ;;  %v4309_v14 = vmul.f32 %v9325_v1, %v4276_v21 }
 0x638   : > { %v9568_v44 = vld [vmem:[#allocation3 + $0x51] sm:$0xff]  ;;  %4912 = vrot.lane.b32.xlu0 %v9473_v16, %s6900_s22  ;;  %5712 = vst.msk [vmem:[#allocation4 + $0x40] sm:$0xff] %vm2232_vm12, %v9564_v61  ;;  %5170 = vrot.lane.b32.xlu1 %v9506_v29, %s6899_s21  ;;  %v3938_v58 = vpop.f32.mrf.mxu1 }
 0x639   : > { %4720 = vrot.lane.b32.xlu2 %v4655_v11, %s6898_s19  ;;  %5713 = vst.msk [vmem:[#allocation4 + $0x58] sm:$0xff] %vm2232_vm12, %v9566_v26  ;;  %v4341_v3 = vadd.f32 %v4309_v14, %v4244_v19  ;;  %v4052_v10 = vadd.f32 %v9162_v55, %v3938_v58  ;;  %v5747_v11 = vld [vmem:[#allocation4 + $0x28] sm:$0xff] }
 0x63a   : > { %5075 = vst.msk [vmem:[#allocation4 + $0x80] sm:$0xff] %vm2232_vm12, %v9568_v44 }
 0x63b   : > { %4373 = vst.msk [vmem:[#allocation3 + $0x69] sm:$0xff] %vm2232_vm12, %v4341_v3  ;;  %v4165_v16 = vadd.f32 %v9126_v31, %v4052_v10  ;;  %6699 = vmatmul.msk.f32.gmra.mxu1 %vm2232_vm12, %v5747_v11 }
 0x63d   : > { %v4277_v37 = vmin.f32 %v4165_v16, 0.0  ;;  %v4245_v21 = vmax.f32 %v4165_v16, 0.0  ;;  %v9608_v16 = vld [vmem:[#allocation3 + $0x61] sm:$0xff] }
 0x63e   : > { %5076 = vst.msk [vmem:[#allocation4 + $0x98] sm:$0xff] %vm2232_vm12, %v9608_v16 }
 0x63f   : > { %v4310_v19 = vmul.f32 %v9325_v1, %v4277_v37  ;;  %v5750_v58 = vld [vmem:[#allocation4 + $0x40] sm:$0xff] }
 0x640   : > { %5554 = vrot.lane.b32.xlu0 %v9544_v57, %s6900_s22  ;;  %4530 = vrot.lane.b32.xlu1 %v9500_v50, %s6899_s21  ;;  %v3941_v55 = vpop.f32.mrf.mxu1 }
 0x641   : > { %5362 = vrot.lane.b32.xlu2 %v9591_v46, %s6898_s19  ;;  %v4342_v14 = vadd.f32 %v4310_v19, %v4245_v21  ;;  %v4055_v31 = vadd.f32 %v9173_v9, %v3941_v55  ;;  %v4402_v55 = vld [vmem:[#allocation3 + $0x30] sm:$0xff] }
 0x642   : > { %v9601_v3 = vld [vmem:[#allocation3 + $0x62] sm:$0xff]  ;;  %v9606_v11 = vld [vmem:[#allocation3 + $0x6a] sm:$0xff]  ;;  %4434 = vst.msk [vmem:[#allocation4 + $0x60] sm:$0xff] %vm2232_vm12, %v4402_v55 }
 0x643   : > { %4374 = vst.msk [vmem:[#allocation3 + $0x79] sm:$0xff] %vm2232_vm12, %v4342_v14  ;;  %v4168_v10 = vadd.f32 %v9140_v0, %v4055_v31  ;;  %6700 = vmatmul.msk.f32.gmra.mxu1 %vm2232_vm12, %v5750_v58  ;;  %v5753_v14 = vld [vmem:[#allocation4 + $0x58] sm:$0xff]  ;;  %v9628_v58 = vld [vmem:[#allocation3 + $0x50] sm:$0xff] }
 0x644   : > { %5714 = vst.msk [vmem:[#allocation4 + $0x70] sm:$0xff] %vm2232_vm12, %v9601_v3  ;;  %v9646_v55 = vld [vmem:[#allocation3 + $0x69] sm:$0xff] }
 0x645   : > { %v4278_v50 = vmin.f32 %v4168_v10, 0.0  ;;  %5715 = vst.msk [vmem:[#allocation4 + $0x88] sm:$0xff] %vm2232_vm12, %v9606_v11  ;;  %v4246_v9 = vmax.f32 %v4168_v10, 0.0 }
 0x646   : > { %5077 = vst.msk [vmem:[#allocation4 + $0xb0] sm:$0xff] %vm2232_vm12, %v9646_v55 }
 0x647   : > { %v4311_v37 = vmul.f32 %v9325_v1, %v4278_v50 }
 0x648   : > { %4914 = vrot.lane.b32.xlu0 %v9482_v30, %s6900_s22  ;;  %5172 = vrot.lane.b32.xlu1 %v9517_v41, %s6899_s21  ;;  %v3944_v0 = vpop.f32.mrf.mxu1 }
 0x649   : > { %4722 = vrot.lane.b32.xlu2 %v9452_v47, %s6898_s19  ;;  %v4343_v21 = vadd.f32 %v4311_v37, %v4246_v9  ;;  %v4058_v19 = vadd.f32 %v9184_v39, %v3944_v0  ;;  %v4403_v9 = vld [vmem:[#allocation3 + $0x38] sm:$0xff] }
 0x64a   : > { %4435 = vst.msk [vmem:[#allocation4 + $0x78] sm:$0xff] %vm2232_vm12, %v4403_v9 }
 0x64b   : > { %4375 = vst.msk [vmem:[#allocation3 + $0x81] sm:$0xff] %vm2232_vm12, %v4343_v21  ;;  %v4171_v31 = vadd.f32 %v9152_v22, %v4058_v19  ;;  %6701 = vmatmul.msk.f32.gmra.mxu1 %vm2232_vm12, %v5753_v14  ;;  %v5756_v37 = vld [vmem:[#allocation4 + $0x70] sm:$0xff] }
 0x64d   : > { %v4279_v30 = vmin.f32 %v4171_v31, 0.0  ;;  %v4247_v47 = vmax.f32 %v4171_v31, 0.0 }
 0x64f   : > { %v4312_v10 = vmul.f32 %v9325_v1, %v4279_v30 }
 0x650   : > { %5556 = vrot.lane.b32.xlu0 %v9568_v44, %s6900_s22  ;;  %4532 = vrot.lane.b32.xlu1 %v9559_v18, %s6899_s21  ;;  %v3947_v39 = vpop.f32.mrf.mxu1 }
 0x651   : > { %5364 = vrot.lane.b32.xlu2 %v9628_v58, %s6898_s19  ;;  %v4344_v50 = vadd.f32 %v4312_v10, %v4247_v47  ;;  %v4061_v22 = vadd.f32 %v9196_v52, %v3947_v39  ;;  %v4404_v47 = vld [vmem:[#allocation3 + $0x48] sm:$0xff]  ;;  %v5759_v10 = vld [vmem:[#allocation4 + $0x88] sm:$0xff] }
 0x652   : > { %v9638_v0 = vld [vmem:[#allocation3 + $0x7a] sm:$0xff]  ;;  %v9644_v19 = vld [vmem:[#allocation3 + $0x82] sm:$0xff]  ;;  %4436 = vst.msk [vmem:[#allocation4 + $0x90] sm:$0xff] %vm2232_vm12, %v4404_v47 }
 0x653   : > { %4376 = vst.msk [vmem:[#allocation3 + $0x91] sm:$0xff] %vm2232_vm12, %v4344_v50  ;;  %v4174_v21 = vadd.f32 %v9167_v59, %v4061_v22  ;;  %6702 = vmatmul.msk.f32.gmra.mxu1 %vm2232_vm12, %v5756_v37  ;;  %v9666_v50 = vld [vmem:[#allocation3 + $0x60] sm:$0xff]  ;;  %v4405_v37 = vld [vmem:[#allocation3 + $0x50] sm:$0xff] }
 0x654   : > { %5716 = vst.msk [vmem:[#allocation4 + $0xa0] sm:$0xff] %vm2232_vm12, %v9638_v0 }
 0x655   : > { %v4280_v52 = vmin.f32 %v4174_v21, 0.0  ;;  %5717 = vst.msk [vmem:[#allocation4 + $0xb8] sm:$0xff] %vm2232_vm12, %v9644_v19  ;;  %v4248_v18 = vmax.f32 %v4174_v21, 0.0 }
 0x656   : > { %4437 = vst.msk [vmem:[#allocation4 + $0xa8] sm:$0xff] %vm2232_vm12, %v4405_v37  ;;  %v9728_v37 = vld [vmem:[#allocation3 + $0x68] sm:$0xff] }
 0x657   : > { %v4313_v14 = vmul.f32 %v9325_v1, %v4280_v52 }
 0x658   : > { %4916 = vrot.lane.b32.xlu0 %v9542_v56, %s6900_s22  ;;  %5174 = vrot.lane.b32.xlu1 %v9564_v61, %s6899_s21  ;;  %v3950_v59 = vpop.f32.mrf.mxu1 }
 0x659   : > { %4724 = vrot.lane.b32.xlu2 %v9511_v12, %s6898_s19  ;;  %v4345_v31 = vadd.f32 %v4313_v14, %v4248_v18  ;;  %v4064_v30 = vadd.f32 %v9210_v5, %v3950_v59  ;;  %v9692_v59 = vld [vmem:[#allocation3 + $0x79] sm:$0xff] }
 0x65a   : > { %5078 = vst.msk [vmem:[#allocation4 + $0xc8] sm:$0xff] %vm2232_vm12, %v9692_v59 }
 0x65b   : > { %4377 = vst.msk [vmem:[#allocation3 + $0x99] sm:$0xff] %vm2232_vm12, %v4345_v31  ;;  %v4177_v39 = vadd.f32 %v9178_v13, %v4064_v30  ;;  %6703 = vmatmul.msk.f32.gmra.mxu1 %vm2232_vm12, %v5759_v10  ;;  %v5762_v21 = vld [vmem:[#allocation4 + $0xa0] sm:$0xff]  ;;  %v4406_v30 = vld [vmem:[#allocation3 + $0x60] sm:$0xff] }
 0x65c   : > { %4438 = vst.msk [vmem:[#allocation4 + $0xc0] sm:$0xff] %vm2232_vm12, %v4406_v30 }
 0x65d   : > { %v4281_v56 = vmin.f32 %v4177_v39, 0.0  ;;  %v4249_v12 = vmax.f32 %v4177_v39, 0.0 }
 0x65f   : > { %v4314_v22 = vmul.f32 %v9325_v1, %v4281_v56 }
 0x660   : > { %5558 = vrot.lane.b32.xlu0 %v9608_v16, %s6900_s22  ;;  %4534 = vrot.lane.b32.xlu1 %v9480_v54, %s6899_s21  ;;  %v3953_v5 = vpop.f32.mrf.mxu1  ;;  %v5869_v54 = vld [vmem:[%s11096_s4 + $0xf8] sm:$0xff] }
 0x661   : > { %5366 = vrot.lane.b32.xlu2 %v9666_v50, %s6898_s19  ;;  %v4346_v9 = vadd.f32 %v4314_v22, %v4249_v12  ;;  %v4067_v13 = vadd.f32 %v9223_v63, %v3953_v5  ;;  %v5868_v63 = vld [vmem:[%s11096_s4 + $0xf0] sm:$0xff]  ;;  %6083 = vmatpush.msrb.mxu3 %v5869_v54  ;;  %v5765_v22 = vld [vmem:[#allocation4 + $0xb8] sm:$0xff] }
 0x662   : > { %v9676_v52 = vld [vmem:[#allocation3 + $0x92] sm:$0xff]  ;;  %v9685_v14 = vld [vmem:[#allocation3 + $0x9a] sm:$0xff] }
 0x663   : > { %4378 = vst.msk [vmem:[#allocation3 + $0xa9] sm:$0xff] %vm2232_vm12, %v4346_v9  ;;  %v4180_v18 = vadd.f32 %v9192_v43, %v4067_v13  ;;  %6704 = vmatmul.msk.f32.gmra.mxu1 %vm2232_vm12, %v5762_v21  ;;  %v5867_v43 = vld [vmem:[%s11096_s4 + $0xe8] sm:$0xff]  ;;  %6084 = vmatpush.msrb.mxu3 %v5868_v63  ;;  %v5864_v13 = vld [vmem:[%s11096_s4 + $0xd0] sm:$0xff] }
 0x664   : > { %5718 = vst.msk [vmem:[#allocation4 + $0xd0] sm:$0xff] %vm2232_vm12, %v9676_v52  ;;  %v5851_v21 = vld [vmem:[%s11096_s4 + $0x68] sm:$0xff] }
 0x665   : > { %v4282_v31 = vmin.f32 %v4180_v18, 0.0  ;;  %5719 = vst.msk [vmem:[#allocation4 + $0xe8] sm:$0xff] %vm2232_vm12, %v9685_v14  ;;  %v4250_v47 = vmax.f32 %v4180_v18, 0.0  ;;  %6085 = vmatpush.msrb.mxu3 %v5867_v43  ;;  %v4407_v18 = vld [vmem:[#allocation3 + $0x68] sm:$0xff] }
 0x666   : > { %4439 = vst.msk [vmem:[#allocation4 + $0xd8] sm:$0xff] %vm2232_vm12, %v4407_v18 }
 0x667   : > { %v4315_v10 = vmul.f32 %v9325_v1, %v4282_v31  ;;  %v5863_v31 = vld [vmem:[%s11096_s4 + $0xc8] sm:$0xff] }
 0x668   : > { %4918 = vrot.lane.b32.xlu0 %v9591_v46, %s6900_s22  ;;  %5176 = vrot.lane.b32.xlu1 %v9566_v26, %s6899_s21  ;;  %v3956_v39 = vpop.f32.mrf.mxu1  ;;  %v5853_v46 = vld [vmem:[%s11096_s4 + $0x78] sm:$0xff] }
 0x669   : > { %4726 = vrot.lane.b32.xlu2 %v9506_v29, %s6898_s19  ;;  %v4347_v56 = vadd.f32 %v4315_v10, %v4250_v47  ;;  %v4070_v12 = vadd.f32 %v9234_v45, %v3956_v39  ;;  %v5866_v29 = vld [vmem:[%s11096_s4 + $0xe0] sm:$0xff]  ;;  %5970 = vmatpush.msrb.mxu0 %v5853_v46  ;;  %v5865_v45 = vld [vmem:[%s11096_s4 + $0xd8] sm:$0xff]  ;;  %v5860_v46 = vld [vmem:[%s11096_s4 + $0xb0] sm:$0xff] }
 0x66a   : > { %6086 = vmatpush.msrb.mxu3 %v5866_v29  ;;  %v5848_v29 = vld [vmem:[%s11096_s4 + $0x50] sm:$0xff] }
 0x66b   : > { %4379 = vst.msk [vmem:[#allocation3 + $0xb1] sm:$0xff] %vm2232_vm12, %v4347_v56  ;;  %v4183_v5 = vadd.f32 %v9206_v4, %v4070_v12  ;;  %6705 = vmatmul.msk.f32.gmra.mxu1 %vm2232_vm12, %v5765_v22  ;;  %v5852_v4 = vld [vmem:[%s11096_s4 + $0x70] sm:$0xff]  ;;  %v5862_v12 = vld [vmem:[%s11096_s4 + $0xc0] sm:$0xff] }
 0x66c   : > { %6087 = vmatpush.msrb.mxu3 %v5865_v45  ;;  %5971 = vmatpush.msrb.mxu0 %v5852_v4  ;;  %v5768_v10 = vld [vmem:[#allocation4 + $0xd0] sm:$0xff]  ;;  %v4408_v4 = vld [vmem:[#allocation3 + $0x78] sm:$0xff] }
 0x66d   : > { %v4283_v9 = vmin.f32 %v4183_v5, 0.0  ;;  %v4251_v54 = vmax.f32 %v4183_v5, 0.0  ;;  %v9774_v45 = vld [vmem:[#allocation3 + $0x81] sm:$0xff]  ;;  %4440 = vst.msk [vmem:[#allocation4 + $0xf0] sm:$0xff] %vm2232_vm12, %v4408_v4  ;;  %v5843_v4 = vld [vmem:[%s11096_s4 + $0x28] sm:$0xff] }
 0x66e   : > { %6088 = vmatpush.msrb.mxu3 %v5864_v13  ;;  %5972 = vmatpush.msrb.mxu0 %v5851_v21  ;;  %v5847_v21 = vld [vmem:[%s11096_s4 + $0x48] sm:$0xff]  ;;  %5079 = vst.msk [vmem:[#allocation4 + $0xe0] sm:$0xff] %vm2232_vm12, %v9774_v45 }
 0x66f   : > { %v4316_v63 = vmul.f32 %v9325_v1, %v4283_v9 }
 0x670   : > { %5560 = vrot.lane.b32.xlu0 %v9646_v55, %s6900_s22  ;;  %4536 = vrot.lane.b32.xlu1 %v9515_v33, %s6899_s21  ;;  %v3959_v43 = vpop.f32.mrf.mxu1  ;;  %v5850_v33 = vld [vmem:[%s11096_s4 + $0x60] sm:$0xff] }
 0x671   : > { %5368 = vrot.lane.b32.xlu2 %v9728_v37, %s6898_s19  ;;  %v4348_v30 = vadd.f32 %v4316_v63, %v4251_v54  ;;  %v4073_v47 = vadd.f32 %v9243_v40, %v3959_v43  ;;  %6089 = vmatpush.msrb.mxu3 %v5863_v31  ;;  %v5849_v40 = vld [vmem:[%s11096_s4 + $0x58] sm:$0xff]  ;;  %v5859_v54 = vld [vmem:[%s11096_s4 + $0xa8] sm:$0xff] }
 0x672   : > { %v9745_v39 = vld [vmem:[#allocation3 + $0xaa] sm:$0xff]  ;;  %5973 = vmatpush.msrb.mxu0 %v5850_v33  ;;  %v9764_v22 = vld [vmem:[#allocation3 + $0xb2] sm:$0xff] }
 0x673   : > { %4380 = vst.msk [vmem:[#allocation3 + $0xc1] sm:$0xff] %vm2232_vm12, %v4348_v30  ;;  %v4186_v56 = vadd.f32 %v9220_v42, %v4073_v47  ;;  %6706 = vmatmul.msk.f32.gmra.mxu1 %vm2232_vm12, %v5768_v10  ;;  %6090 = vmatpush.msrb.mxu3 %v5862_v12  ;;  %v5861_v42 = vld [vmem:[%s11096_s4 + $0xb8] sm:$0xff]  ;;  %v5771_v31 = vld [vmem:[#allocation4 + $0xe8] sm:$0xff]  ;;  %v5846_v30 = vld [vmem:[%s11096_s4 + $0x40] sm:$0xff] }
 0x674   : > { %5720 = vst.msk [vmem:[#allocation4 + $0x100] sm:$0xff] %vm2232_vm12, %v9745_v39  ;;  %5974 = vmatpush.msrb.mxu0 %v5849_v40  ;;  %v4398_v47 = vld [vmem:[#allocation3] sm:$0xff]  ;;  %v5845_v10 = vld [vmem:[%s11096_s4 + $0x38] sm:$0xff]  ;;  %v9811_v33 = vld [vmem:[#allocation3 + $0x78] sm:$0xff] }
 0x675   : > { %v4284_v5 = vmin.f32 %v4186_v56, 0.0  ;;  %5721 = vst.msk [vmem:[#allocation4 + $0x118] sm:$0xff] %vm2232_vm12, %v9764_v22  ;;  %6091 = vmatpush.msrb.mxu3 %v5861_v42  ;;  %v4252_v9 = vmax.f32 %v4186_v56, 0.0  ;;  %v5844_v12 = vld [vmem:[%s11096_s4 + $0x30] sm:$0xff] }
 0x676   : > { %5975 = vmatpush.msrb.mxu0 %v5848_v29  ;;  %4430 = vst.msk [vmem:[#allocation4] sm:$0xff] %vm2232_vm12, %v4398_v47  ;;  %v4409_v40 = vld [vmem:[#allocation3 + $0x80] sm:$0xff] }
 0x677   : > { %v4317_v13 = vmul.f32 %v9325_v1, %v4284_v5  ;;  %6092 = vmatpush.msrb.mxu3 %v5860_v46  ;;  %v5856_v29 = vld [vmem:[%s11096_s4 + $0x90] sm:$0xff]  ;;  %4441 = vst.msk [vmem:[#allocation4 + $0x108] sm:$0xff] %vm2232_vm12, %v4409_v40 }
 0x678   : > { %4920 = vrot.lane.b32.xlu0 %v9628_v58, %s6900_s22  ;;  %5178 = vrot.lane.b32.xlu1 %v9601_v3, %s6899_s21  ;;  %v3962_v18 = vpop.f32.mrf.mxu1 }
 0x679   : > { %4728 = vrot.lane.b32.xlu2 %v9517_v41, %s6898_s19  ;;  %v4349_v58 = vadd.f32 %v4317_v13, %v4252_v9  ;;  %v4076_v41 = vadd.f32 %v9255_v60, %v3962_v18  ;;  %5976 = vmatpush.msrb.mxu0 %v5847_v21  ;;  %v5858_v60 = vld [vmem:[%s11096_s4 + $0xa0] sm:$0xff]  ;;  %v5855_v18 = vld [vmem:[%s11096_s4 + $0x88] sm:$0xff] }
 0x67a   : > { %6093 = vmatpush.msrb.mxu3 %v5859_v54 }
 0x67b   : > { %v9793_v63 = vpop.permute.xlu2 %5358  ;;  %4381 = vst.msk [vmem:[#allocation3 + $0xc9] sm:$0xff] %vm2232_vm12, %v4349_v58  ;;  %v4189_v43 = vadd.f32 %v9231_v35, %v4076_v41  ;;  %6707 = vmatmul.msk.f32.gmra.mxu1 %vm2232_vm12, %v5771_v31  ;;  %5977 = vmatpush.msrb.mxu0 %v5846_v30  ;;  %v5857_v35 = vld [vmem:[%s11096_s4 + $0x98] sm:$0xff]  ;;  %v5774_v54 = vld [vmem:[#allocation4 + $0x100] sm:$0xff] }
 0x67c   : > { %6094 = vmatpush.msrb.mxu3 %v5858_v60  ;;  %v5854_v41 = vld [vmem:[%s11096_s4 + $0x80] sm:$0xff] }
 0x67d   : > { %v4285_v56 = vmin.f32 %v4189_v43, 0.0  ;;  %5978 = vmatpush.msrb.mxu0 %v5845_v10  ;;  %v4253_v42 = vmax.f32 %v4189_v43, 0.0  ;;  %v9856_v30 = vld [vmem:[#allocation3 + $0x91] sm:$0xff] }
 0x67e   : > { %6095 = vmatpush.msrb.mxu3 %v5857_v35  ;;  %v9858_v60 = vld [vmem:[#allocation3 + $0x90] sm:$0xff]  ;;  %5080 = vst.msk [vmem:[#allocation4 + $0xf8] sm:$0xff] %vm2232_vm12, %v9856_v30 }
 0x67f   : > { %v4318_v5 = vmul.f32 %v9325_v1, %v4285_v56  ;;  %5979 = vmatpush.msrb.mxu0 %v5844_v12  ;;  %v5840_v56 = vld [vmem:[%s11096_s4 + $0x10] sm:$0xff]  ;;  %4442 = vst.msk [vmem:[#allocation4 + $0x120] sm:$0xff] %vm2232_vm12, %v9858_v60 }
 0x680   : > { %5562 = vrot.lane.b32.xlu0 %v9692_v59, %s6900_s22  ;;  %4538 = vrot.lane.b32.xlu1 %v9544_v57, %s6899_s21  ;;  %v3965_v46 = vpop.f32.mrf.mxu1 }
 0x681   : > { %5370 = vrot.lane.b32.xlu2 %v9811_v33, %s6898_s19  ;;  %v4350_v9 = vadd.f32 %v4318_v5, %v4253_v42  ;;  %v4079_v13 = vadd.f32 %v9267_v53, %v3965_v46  ;;  %6096 = vmatpush.msrb.mxu3 %v5856_v29  ;;  %v5842_v53 = vld [vmem:[%s11096_s4 + $0x20] sm:$0xff]  ;;  %v5777_v5 = vld [vmem:[#allocation4 + $0x118] sm:$0xff] }
 0x682   : > { %v9836_v58 = vld [vmem:[#allocation3 + $0xc2] sm:$0xff]  ;;  %5980 = vmatpush.msrb.mxu0 %v5843_v4  ;;  %v9849_v31 = vld [vmem:[#allocation3 + $0xca] sm:$0xff] }
 0x683   : > { %v9831_v21 = vpop.permute.xlu2 %4718  ;;  %4382 = vst.msk [vmem:[#allocation3 + $0xd9] sm:$0xff] %vm2232_vm12, %v4350_v9  ;;  %v4192_v57 = vadd.f32 %v9245_v7, %v4079_v13  ;;  %6708 = vmatmul.msk.f32.gmra.mxu1 %vm2232_vm12, %v5774_v54  ;;  %6097 = vmatpush.msrb.mxu3 %v5855_v18  ;;  %v5841_v7 = vld [vmem:[%s11096_s4 + $0x18] sm:$0xff]  ;;  %v9890_v9 = vld [vmem:[#allocation3 + $0x99] sm:$0xff] }
 0x684   : > { %5722 = vst.msk [vmem:[#allocation4 + $0x130] sm:$0xff] %vm2232_vm12, %v9836_v58  ;;  %5981 = vmatpush.msrb.mxu0 %v5842_v53  ;;  %v4399_v46 = vld [vmem:[#allocation3 + $0x8] sm:$0xff]  ;;  %v9892_v13 = vld [vmem:[#allocation3 + $0x98] sm:$0xff]  ;;  %v9894_v18 = vld [vmem:[#allocation3 + $0x80] sm:$0xff] }
 0x685   : > { %v4286_v43 = vmin.f32 %v4192_v57, 0.0  ;;  %5723 = vst.msk [vmem:[#allocation4 + $0x148] sm:$0xff] %vm2232_vm12, %v9849_v31  ;;  %6098 = vmatpush.msrb.mxu3 %v5854_v41  ;;  %v4254_v47 = vmax.f32 %v4192_v57, 0.0 }
 0x686   : > { %5982 = vmatpush.msrb.mxu0 %v5841_v7  ;;  %4431 = vst.msk [vmem:[#allocation4 + $0x18] sm:$0xff] %vm2232_vm12, %v4399_v46 }
 0x687   : > { %v4319_v10 = vmul.f32 %v9325_v1, %v4286_v43  ;;  %5081 = vst.msk [vmem:[#allocation4 + $0x110] sm:$0xff] %vm2232_vm12, %v9890_v9 }
 0x688   : > { %4922 = vrot.lane.b32.xlu0 %v9666_v50, %s6900_s22  ;;  %5180 = vrot.lane.b32.xlu1 %v9606_v11, %s6899_s21  ;;  %v3968_v35 = vpop.f32.mrf.mxu1  ;;  %4443 = vst.msk [vmem:[#allocation4 + $0x138] sm:$0xff] %vm2232_vm12, %v9892_v13 }
 0x689   : > { %4730 = vrot.lane.b32.xlu2 %v9564_v61, %s6898_s19  ;;  %v4351_v12 = vadd.f32 %v4319_v10, %v4254_v47  ;;  %v4082_v40 = vadd.f32 %v9279_v48, %v3968_v35  ;;  %v5839_v61 = vld [vmem:[%s11096_s4 + $0x8] sm:$0xff]  ;;  %5983 = vmatpush.msrb.mxu0 %v5840_v56  ;;  %v5838_v48 = vld [vmem:[%s11096_s4] sm:$0xff] }
 0x68a   : > { %v5167_v50 = vpop.permute.xlu1 %5166  ;;  %v9921_v35 = vld [vmem:[#allocation3 + $0xa9] sm:$0xff] }
 0x68b   : > { %v9875_v42 = vpop.permute.xlu2 %5360  ;;  %5262 = vst.msk [vmem:[#allocation4 + $0x8] sm:$0xff] %vm2545_vm14, %v5167_v50  ;;  %v4195_v29 = vadd.f32 %v9257_v25, %v4082_v40  ;;  %6709 = vmatmul.msk.f32.gmra.mxu1 %vm2232_vm12, %v5777_v5  ;;  %5984 = vmatpush.msrb.mxu0 %v5839_v61  ;;  %v5780_v47 = vld [vmem:[#allocation4 + $0x130] sm:$0xff] }
 0x68c   : > { %4383 = vst.msk [vmem:[#allocation3 + $0xe1] sm:$0xff] %vm2232_vm12, %v4351_v12  ;;  %v9925_v12 = vld [vmem:[#allocation3 + $0xa8] sm:$0xff] }
 0x68d   : > { %5454 = vst.msk [vmem:[#allocation4 + $0x8] sm:$0xff] %vm2738_vm15, %v9793_v63  ;;  %v4287_v4 = vmin.f32 %v4195_v29, 0.0  ;;  %5985 = vmatpush.msrb.mxu0 %v5838_v48  ;;  %v4255_v25 = vmax.f32 %v4195_v29, 0.0  ;;  %v5783_v48 = vld [vmem:[#allocation4 + $0x148] sm:$0xff] }
 0x68e   : > { %5082 = vst.msk [vmem:[#allocation4 + $0x128] sm:$0xff] %vm2232_vm12, %v9921_v35 }
 0x68f   : > { %v4320_v54 = vmul.f32 %v9325_v1, %v4287_v4  ;;  %4444 = vst.msk [vmem:[#allocation4 + $0x150] sm:$0xff] %vm2232_vm12, %v9925_v12  ;;  %v9950_v4 = vld [vmem:[#allocation3 + $0xb1] sm:$0xff] }
 0x690   : > { %5564 = vrot.lane.b32.xlu0 %v9774_v45, %s6900_s22  ;;  %4540 = vrot.lane.b32.xlu1 %v9568_v44, %s6899_s21  ;;  %v3971_v63 = vpop.f32.mrf.mxu1  ;;  %5083 = vst.msk [vmem:[#allocation4 + $0x140] sm:$0xff] %vm2232_vm12, %v9950_v4 }
 0x691   : > { %5372 = vrot.lane.b32.xlu2 %v9894_v18, %s6898_s19  ;;  %v4352_v57 = vadd.f32 %v4320_v54, %v4255_v25  ;;  %v4085_v53 = vadd.f32 %v9291_v32, %v3971_v63  ;;  %v9952_v25 = vld [vmem:[#allocation3 + $0xb0] sm:$0xff] }
 0x692   : > { %v5551_v41 = vpop.permute.xlu0 %5550  ;;  %v4527_v7 = vpop.permute.xlu1 %4526  ;;  %4445 = vst.msk [vmem:[#allocation4 + $0x168] sm:$0xff] %vm2232_vm12, %v9952_v25 }
 0x693   : > { %v9908_v43 = vpop.permute.xlu2 %4720  ;;  %5646 = vst.msk [vmem:[#allocation4 + $0x8] sm:$0xff] %vm2931_vm0, %v5551_v41  ;;  %v4198_v10 = vadd.f32 %v9272_v23, %v4085_v53  ;;  %6710 = vmatmul.msk.f32.gmra.mxu1 %vm2232_vm12, %v5780_v47  ;;  %v9914_v56 = vld [vmem:[#allocation3 + $0xda] sm:$0xff]  ;;  %v9917_v44 = vld [vmem:[#allocation3 + $0xe2] sm:$0xff] }
 0x694   : > { %4384 = vst.msk [vmem:[#allocation3 + $0xf1] sm:$0xff] %vm2232_vm12, %v4352_v57 }
 0x695   : > { %4622 = vst.msk [vmem:[#allocation4] sm:$0xff] %vm2545_vm14, %v4527_v7  ;;  %v4288_v32 = vmin.f32 %v4198_v10, 0.0  ;;  %v4256_v23 = vmax.f32 %v4198_v10, 0.0 }
 0x696   : > { %4814 = vst.msk [vmem:[#allocation4] sm:$0xff] %vm2738_vm15, %v9831_v21 }
 0x697   : > { %5724 = vst.msk [vmem:[#allocation4 + $0x160] sm:$0xff] %vm2232_vm12, %v9914_v56  ;;  %v4321_v40 = vmul.f32 %v9325_v1, %v4288_v32 }
 0x698   : > { %4924 = vrot.lane.b32.xlu0 %v9728_v37, %s6900_s22  ;;  %5725 = vst.msk [vmem:[#allocation4 + $0x178] sm:$0xff] %vm2232_vm12, %v9917_v44  ;;  %5182 = vrot.lane.b32.xlu1 %v9638_v0, %s6899_s21  ;;  %v3974_v21 = vpop.f32.mrf.mxu1 }
 0x699   : > { %4732 = vrot.lane.b32.xlu2 %v9566_v26, %s6898_s19  ;;  %v4353_v50 = vadd.f32 %v4321_v40, %v4256_v23  ;;  %v4088_v61 = vadd.f32 %v9302_v2, %v3974_v21  ;;  %v9979_v40 = vld [vmem:[#allocation3 + $0xc1] sm:$0xff] }
 0x69a   : > { %v4911_v29 = vpop.permute.xlu0 %4910  ;;  %v5743_v37 = vld [vmem:[#allocation4 + $0x8] sm:$0xff]  ;;  %v5169_v26 = vpop.permute.xlu1 %5168  ;;  %v9983_v21 = vld [vmem:[#allocation3 + $0xc0] sm:$0xff]  ;;  %5084 = vst.msk [vmem:[#allocation4 + $0x158] sm:$0xff] %vm2232_vm12, %v9979_v40 }
 0x69b   : > { %v9939_v5 = vpop.permute.xlu2 %5362  ;;  %5006 = vst.msk [vmem:[#allocation4] sm:$0xff] %vm2931_vm0, %v4911_v29  ;;  %6099 = vmatmul.f32.vlgmr.msrb.gmra.mxu3 %v5743_v37  ;;  %v4201_v46 = vadd.f32 %v9284_v27, %v4088_v61  ;;  %6711 = vmatmul.msk.f32.gmra.mxu1 %vm2232_vm12, %v5783_v48  ;;  %v11273_v29 = vld [vmem:[#allocation66_spill] sm:$0xff] }
 0x69c   : > { %4385 = vst.msk [vmem:[#allocation3 + $0xf9] sm:$0xff] %vm2232_vm12, %v4353_v50 }
 0x69d   : > { %5263 = vst.msk [vmem:[#allocation4 + $0x20] sm:$0xff] %vm2545_vm14, %v5169_v26  ;;  %v4289_v2 = vmin.f32 %v4201_v46, 0.0  ;;  %v4257_v54 = vmax.f32 %v4201_v46, 0.0 }
 0x69e   : > { %5455 = vst.msk [vmem:[#allocation4 + $0x20] sm:$0xff] %vm2738_vm15, %v9875_v42  ;;  %v5786_v10 = vld [vmem:[#allocation4 + $0x160] sm:$0xff] }
 0x69f   : > { %v4322_v63 = vmul.f32 %v9325_v1, %v4289_v2  ;;  %4446 = vst.msk [vmem:[#allocation4 + $0x180] sm:$0xff] %vm2232_vm12, %v9983_v21  ;;  %v11274_v2 = vld [vmem:[#allocation64_spill] sm:$0xff] }
 0x6a0   : > { %5566 = vrot.lane.b32.xlu0 %v9856_v30, %s6900_s22  ;;  %4542 = vrot.lane.b32.xlu1 %v9608_v16, %s6899_s21  ;;  %v3977_v27 = vpop.f32.mrf.mxu1 }
 0x6a1   : > { %5374 = vrot.lane.b32.xlu2 %v9858_v60, %s6898_s19  ;;  %v4354_v42 = vadd.f32 %v4322_v63, %v4257_v54  ;;  %v4091_v57 = vadd.f32 %v9312_v20, %v3977_v27  ;;  %v10006_v27 = vld [vmem:[#allocation3 + $0xc9] sm:$0xff] }
 0x6a2   : > { %v5553_v53 = vpop.permute.xlu0 %5552  ;;  %v5742_v7 = vld [vmem:[#allocation4] sm:$0xff]  ;;  %v4529_v47 = vpop.permute.xlu1 %4528  ;;  %5085 = vst.msk [vmem:[#allocation4 + $0x170] sm:$0xff] %vm2232_vm12, %v10006_v27 }
 0x6a3   : > { %v9966_v41 = vpop.permute.xlu2 %4722  ;;  %5647 = vst.msk [vmem:[#allocation4 + $0x20] sm:$0xff] %vm2931_vm0, %v5553_v53  ;;  %5986 = vmatmul.f32.vlgmr.msrb.gmra.mxu0 %v5742_v7  ;;  %v4204_v32 = vadd.f32 %v9298_v36, %v4091_v57  ;;  %6712 = vmatmul.msk.f32.gmra.mxu1 %vm2232_vm12, %v5786_v10  ;;  %v9972_v16 = vld [vmem:[#allocation3 + $0xf2] sm:$0xff]  ;;  %v9975_v20 = vld [vmem:[#allocation3 + $0xfa] sm:$0xff] }
 0x6a4   : > { %4386 = vst.msk [vmem:[#allocation3 + $0x109] sm:$0xff] %vm2232_vm12, %v4354_v42  ;;  %v10008_v42 = vld [vmem:[#allocation3 + $0xc8] sm:$0xff] }
 0x6a5   : > { %4623 = vst.msk [vmem:[#allocation4 + $0x18] sm:$0xff] %vm2545_vm14, %v4529_v47  ;;  %v4290_v23 = vmin.f32 %v4204_v32, 0.0  ;;  %v4258_v36 = vmax.f32 %v4204_v32, 0.0 }
 0x6a6   : > { %4815 = vst.msk [vmem:[#allocation4 + $0x18] sm:$0xff] %vm2738_vm15, %v9908_v43 }
 0x6a7   : > { %5726 = vst.msk [vmem:[#allocation4 + $0x190] sm:$0xff] %vm2232_vm12, %v9972_v16  ;;  %v4323_v50 = vmul.f32 %v9325_v1, %v4290_v23 }
 0x6a8   : > { %4926 = vrot.lane.b32.xlu0 %v9811_v33, %s6900_s22  ;;  %5727 = vst.msk [vmem:[#allocation4 + $0x1a8] sm:$0xff] %vm2232_vm12, %v9975_v20  ;;  %5184 = vrot.lane.b32.xlu1 %v9644_v19, %s6899_s21  ;;  %v3980_v43 = vpop.f32.mrf.mxu1  ;;  %v5789_v33 = vld [vmem:[#allocation4 + $0x178] sm:$0xff] }
 0x6a9   : > { %4734 = vrot.lane.b32.xlu2 %v9601_v3, %s6898_s19  ;;  %v4355_v61 = vadd.f32 %v4323_v50, %v4258_v36  ;;  %v4094_v37 = vadd.f32 %v11273_v29, %v3980_v43  ;;  %4447 = vst.msk [vmem:[#allocation4 + $0x198] sm:$0xff] %vm2232_vm12, %v10008_v42  ;;  %v10035_v50 = vld [vmem:[#allocation3 + $0xd8] sm:$0xff] }
 0x6aa   : > { %v4913_v26 = vpop.permute.xlu0 %4912  ;;  %v5746_v46 = vld [vmem:[#allocation4 + $0x20] sm:$0xff]  ;;  %v5171_v3 = vpop.permute.xlu1 %5170  ;;  %4448 = vst.msk [vmem:[#allocation4 + $0x1b0] sm:$0xff] %vm2232_vm12, %v10035_v50 }
 0x6ab   : > { %v5365_v48 = vpop.permute.xlu2 %5364  ;;  %5007 = vst.msk [vmem:[#allocation4 + $0x18] sm:$0xff] %vm2931_vm0, %v4913_v26  ;;  %6102 = vmatmul.f32.gmra.mxu3 %v5746_v46  ;;  %v4207_v54 = vadd.f32 %v11274_v2, %v4094_v37  ;;  %6713 = vmatmul.msk.f32.gmra.mxu1 %vm2232_vm12, %v5789_v33  ;;  %v10057_v37 = vld [vmem:[#allocation3 + $0xe1] sm:$0xff] }
 0x6ac   : > { %4387 = vst.msk [vmem:[#allocation3 + $0x111] sm:$0xff] %vm2232_vm12, %v4355_v61  ;;  %v10059_v26 = vld [vmem:[#allocation3 + $0xe0] sm:$0xff] }
 0x6ad   : > { %5264 = vst.msk [vmem:[#allocation4 + $0x38] sm:$0xff] %vm2545_vm14, %v5171_v3  ;;  %v4291_v63 = vmin.f32 %v4207_v54, 0.0  ;;  %v4259_v57 = vmax.f32 %v4207_v54, 0.0  ;;  %v10075_v54 = vld [vmem:[#allocation3 + $0xf1] sm:$0xff] }
 0x6ae   : > { %5456 = vst.msk [vmem:[#allocation4 + $0x38] sm:$0xff] %vm2738_vm15, %v9939_v5 }
 0x6af   : > { %v4324_v53 = vmul.f32 %v9325_v1, %v4291_v63  ;;  %v5792_v1 = vld [vmem:[#allocation4 + $0x190] sm:$0xff]  ;;  %5087 = vst.msk [vmem:[#allocation4 + $0x1a0] sm:$0xff] %vm2232_vm12, %v10057_v37  ;;  %v10077_v63 = vld [vmem:[#allocation3 + $0xf0] sm:$0xff] }
 0x6b0   : > { %5568 = vrot.lane.b32.xlu0 %v9890_v9, %s6900_s22  ;;  %4544 = vrot.lane.b32.xlu1 %v9646_v55, %s6899_s21  ;;  %v10031_v55 = vld [vmem:[#allocation3 + $0xd9] sm:$0xff]  ;;  %4449 = vst.msk [vmem:[#allocation4 + $0x1c8] sm:$0xff] %vm2232_vm12, %v10059_v26 }
 0x6b1   : > { %5376 = vrot.lane.b32.xlu2 %v9892_v13, %s6898_s19  ;;  %v4356_v5 = vadd.f32 %v4324_v53, %v4259_v57  ;;  %5086 = vst.msk [vmem:[#allocation4 + $0x188] sm:$0xff] %vm2232_vm12, %v10031_v55 }
 0x6b2   : > { %v5555_v7 = vpop.permute.xlu0 %5554  ;;  %v5745_v10 = vld [vmem:[#allocation4 + $0x18] sm:$0xff]  ;;  %v4531_v32 = vpop.permute.xlu1 %4530  ;;  %5088 = vst.msk [vmem:[#allocation4 + $0x1b8] sm:$0xff] %vm2232_vm12, %v10075_v54 }
 0x6b3   : > { %v4725_v47 = vpop.permute.xlu2 %4724  ;;  %5648 = vst.msk [vmem:[#allocation4 + $0x38] sm:$0xff] %vm2931_vm0, %v5555_v7  ;;  %5989 = vmatmul.f32.gmra.mxu0 %v5745_v10  ;;  %6714 = vmatmul.msk.f32.gmra.mxu1 %vm2232_vm12, %v5792_v1  ;;  %v10024_v23 = vld [vmem:[#allocation3 + $0x10a] sm:$0xff]  ;;  %v10027_v36 = vld [vmem:[#allocation3 + $0x112] sm:$0xff] }
 0x6b4   : > { %4388 = vst.msk [vmem:[#allocation3 + $0x121] sm:$0xff] %vm2232_vm12, %v4356_v5 }
 0x6b5   : > { %4624 = vst.msk [vmem:[#allocation4 + $0x30] sm:$0xff] %vm2545_vm14, %v4531_v32 }
 0x6b6   : > { %4816 = vst.msk [vmem:[#allocation4 + $0x30] sm:$0xff] %vm2738_vm15, %v9966_v41 }
 0x6b7   : > { %5728 = vst.msk [vmem:[#allocation4 + $0x1c0] sm:$0xff] %vm2232_vm12, %v10024_v23 }
 0x6b8   : > { %4928 = vrot.lane.b32.xlu0 %v9894_v18, %s6900_s22  ;;  %5729 = vst.msk [vmem:[#allocation4 + $0x1d8] sm:$0xff] %vm2232_vm12, %v10027_v36  ;;  %5186 = vrot.lane.b32.xlu1 %v9676_v52, %s6899_s21 }
 0x6b9   : > { %4736 = vrot.lane.b32.xlu2 %v9606_v11, %s6898_s19  ;;  %v5795_v11 = vld [vmem:[#allocation4 + $0x1a8] sm:$0xff]  ;;  %4450 = vst.msk [vmem:[#allocation4 + $0x1e0] sm:$0xff] %vm2232_vm12, %v10077_v63 }
 0x6ba   : > { %v4915_v41 = vpop.permute.xlu0 %4914  ;;  %v5749_v61 = vld [vmem:[#allocation4 + $0x38] sm:$0xff]  ;;  %v5173_v18 = vpop.permute.xlu1 %5172 }
 0x6bb   : > { %v5367_v43 = vpop.permute.xlu2 %5366  ;;  %5008 = vst.msk [vmem:[#allocation4 + $0x30] sm:$0xff] %vm2931_vm0, %v4915_v41  ;;  %6105 = vmatmul.f32.gmra.mxu3 %v5749_v61  ;;  %v10050_v29 = vld [vmem:[#allocation3 + $0x122] sm:$0xff]  ;;  %6715 = vmatmul.msk.f32.gmra.mxu1 %vm2232_vm12, %v5795_v11 }
 0x6bc   : > { %5265 = vst.msk [vmem:[#allocation4 + $0x50] sm:$0xff] %vm2545_vm14, %v5173_v18  ;;  %v10113_v61 = vld [vmem:[#allocation3 + $0x108] sm:$0xff] }
 0x6bd   : > { %5457 = vst.msk [vmem:[#allocation4 + $0x50] sm:$0xff] %vm2738_vm15, %v5365_v48 }
 0x6be   : > { %5730 = vst.msk [vmem:[#allocation4 + $0x1f0] sm:$0xff] %vm2232_vm12, %v10050_v29  ;;  %v5798_v2 = vld [vmem:[#allocation4 + $0x1c0] sm:$0xff] }
 0x6bf   : > { %v5801_v7 = vld [vmem:[#allocation4 + $0x1d8] sm:$0xff]  ;;  %4452 = vst.msk [vmem:[#allocation4 + $0x210] sm:$0xff] %vm2232_vm12, %v10113_v61 }
 0x6c0   : > { %5570 = vrot.lane.b32.xlu0 %v9921_v35, %s6900_s22  ;;  %4546 = vrot.lane.b32.xlu1 %v9692_v59, %s6899_s21 }
 0x6c1   : > { %5378 = vrot.lane.b32.xlu2 %v9925_v12, %s6898_s19 }
 0x6c2   : > { %v5557_v48 = vpop.permute.xlu0 %5556  ;;  %v5748_v3 = vld [vmem:[#allocation4 + $0x30] sm:$0xff]  ;;  %v4533_v33 = vpop.permute.xlu1 %4532 }
 0x6c3   : > { %v4727_v46 = vpop.permute.xlu2 %4726  ;;  %5649 = vst.msk [vmem:[#allocation4 + $0x50] sm:$0xff] %vm2931_vm0, %v5557_v48  ;;  %5992 = vmatmul.f32.gmra.mxu0 %v5748_v3  ;;  %6716 = vmatmul.msk.f32.gmra.mxu1 %vm2232_vm12, %v5798_v2 }
 0x6c4   : > { %4625 = vst.msk [vmem:[#allocation4 + $0x48] sm:$0xff] %vm2545_vm14, %v4533_v33 }
 0x6c5   : > { %4817 = vst.msk [vmem:[#allocation4 + $0x48] sm:$0xff] %vm2738_vm15, %v4725_v47  ;;  %v5804_v41 = vld [vmem:[#allocation4 + $0x1f0] sm:$0xff] }
 0x6c8   : > { %4930 = vrot.lane.b32.xlu0 %v9858_v60, %s6900_s22  ;;  %5188 = vrot.lane.b32.xlu1 %v9685_v14, %s6899_s21  ;;  %v10095_v60 = vld [vmem:[#allocation3 + $0xf8] sm:$0xff] }
 0x6c9   : > { %4738 = vrot.lane.b32.xlu2 %v9638_v0, %s6898_s19  ;;  %v10093_v0 = vld [vmem:[#allocation3 + $0xf9] sm:$0xff]  ;;  %4451 = vst.msk [vmem:[#allocation4 + $0x1f8] sm:$0xff] %vm2232_vm12, %v10095_v60 }
 0x6ca   : > { %v4917_v59 = vpop.permute.xlu0 %4916  ;;  %v5752_v53 = vld [vmem:[#allocation4 + $0x50] sm:$0xff]  ;;  %v5175_v5 = vpop.permute.xlu1 %5174  ;;  %5089 = vst.msk [vmem:[#allocation4 + $0x1d0] sm:$0xff] %vm2232_vm12, %v10093_v0 }
 0x6cb   : > { %v5369_v57 = vpop.permute.xlu2 %5368  ;;  %5009 = vst.msk [vmem:[#allocation4 + $0x48] sm:$0xff] %vm2931_vm0, %v4917_v59  ;;  %6108 = vmatmul.f32.gmra.mxu3 %v5752_v53  ;;  %6717 = vmatmul.msk.f32.gmra.mxu1 %vm2232_vm12, %v5801_v7  ;;  %v10147_v53 = vld [vmem:[#allocation3 + $0x121] sm:$0xff] }
 0x6cc   : > { %5266 = vst.msk [vmem:[#allocation4 + $0x68] sm:$0xff] %vm2545_vm14, %v5175_v5  ;;  %v10149_v5 = vld [vmem:[#allocation3 + $0x120] sm:$0xff]  ;;  %v10151_v7 = vld [vmem:[#allocation3 + $0x128] sm:$0xff] }
 0x6cd   : > { %5458 = vst.msk [vmem:[#allocation4 + $0x68] sm:$0xff] %vm2738_vm15, %v5367_v43  ;;  %v10111_v43 = vld [vmem:[#allocation3 + $0x109] sm:$0xff] }
 0x6ce   : > { %5090 = vst.msk [vmem:[#allocation4 + $0x1e8] sm:$0xff] %vm2232_vm12, %v10111_v43 }
 0x6cf   : > { %5092 = vst.msk [vmem:[#allocation4 + $0x218] sm:$0xff] %vm2232_vm12, %v10147_v53 }
 0x6d0   : > { %5572 = vrot.lane.b32.xlu0 %v9950_v4, %s6900_s22  ;;  %4548 = vrot.lane.b32.xlu1 %v9774_v45, %s6899_s21  ;;  %4454 = vst.msk [vmem:[#allocation4 + $0x240] sm:$0xff] %vm2232_vm12, %v10149_v5 }
 0x6d1   : > { %5380 = vrot.lane.b32.xlu2 %v9952_v25, %s6898_s19  ;;  %4455 = vst.msk [vmem:[#allocation4 + $0x258] sm:$0xff] %vm2232_vm12, %v10151_v7 }
 0x6d2   : > { %v5559_v47 = vpop.permute.xlu0 %5558  ;;  %v5751_v32 = vld [vmem:[#allocation4 + $0x48] sm:$0xff]  ;;  %v4535_v1 = vpop.permute.xlu1 %4534 }
 0x6d3   : > { %v4729_v10 = vpop.permute.xlu2 %4728  ;;  %5650 = vst.msk [vmem:[#allocation4 + $0x68] sm:$0xff] %vm2931_vm0, %v5559_v47  ;;  %5995 = vmatmul.f32.gmra.mxu0 %v5751_v32  ;;  %6718 = vmatmul.msk.f32.gmra.mxu1 %vm2232_vm12, %v5804_v41 }
 0x6d4   : > { %4626 = vst.msk [vmem:[#allocation4 + $0x60] sm:$0xff] %vm2545_vm14, %v4535_v1  ;;  %v5813_v1 = vld [vmem:[#allocation4 + $0x238] sm:$0xff] }
 0x6d5   : > { %4818 = vst.msk [vmem:[#allocation4 + $0x60] sm:$0xff] %vm2738_vm15, %v4727_v46  ;;  %v5807_v46 = vld [vmem:[#allocation4 + $0x208] sm:$0xff] }
 0x6d8   : > { %4932 = vrot.lane.b32.xlu0 %v9892_v13, %s6900_s22  ;;  %5190 = vrot.lane.b32.xlu1 %v9745_v39, %s6899_s21  ;;  %v10131_v13 = vld [vmem:[#allocation3 + $0x110] sm:$0xff] }
 0x6d9   : > { %4740 = vrot.lane.b32.xlu2 %v9644_v19, %s6898_s19  ;;  %v10129_v19 = vld [vmem:[#allocation3 + $0x111] sm:$0xff]  ;;  %4453 = vst.msk [vmem:[#allocation4 + $0x228] sm:$0xff] %vm2232_vm12, %v10131_v13 }
 0x6da   : > { %v4919_v45 = vpop.permute.xlu0 %4918  ;;  %v5755_v11 = vld [vmem:[#allocation4 + $0x68] sm:$0xff]  ;;  %v5177_v48 = vpop.permute.xlu1 %5176  ;;  %5091 = vst.msk [vmem:[#allocation4 + $0x200] sm:$0xff] %vm2232_vm12, %v10129_v19 }
 0x6db   : > { %v5371_v18 = vpop.permute.xlu2 %5370  ;;  %5010 = vst.msk [vmem:[#allocation4 + $0x60] sm:$0xff] %vm2931_vm0, %v4919_v45  ;;  %6111 = vmatmul.f32.gmra.mxu3 %v5755_v11  ;;  %6719 = vmatmul.msk.f32.gmra.mxu1 %vm2232_vm12, %v5807_v46  ;;  %v5816_v46 = vld [vmem:[#allocation4 + $0x250] sm:$0xff] }
 0x6dc   : > { %5267 = vst.msk [vmem:[#allocation4 + $0x80] sm:$0xff] %vm2545_vm14, %v5177_v48 }
 0x6dd   : > { %5459 = vst.msk [vmem:[#allocation4 + $0x80] sm:$0xff] %vm2738_vm15, %v5369_v57  ;;  %v5810_v57 = vld [vmem:[#allocation4 + $0x220] sm:$0xff] }
 0x6e0   : > { %5574 = vrot.lane.b32.xlu0 %v9979_v40, %s6900_s22  ;;  %4550 = vrot.lane.b32.xlu1 %v9856_v30, %s6899_s21  ;;  %v10161_v30 = vpop.f32.mrf.mxu1 }
 0x6e1   : > { %5382 = vrot.lane.b32.xlu2 %v9983_v21, %s6898_s19 }
 0x6e2   : > { %v5561_v3 = vpop.permute.xlu0 %5560  ;;  %v5754_v2 = vld [vmem:[#allocation4 + $0x60] sm:$0xff]  ;;  %v4537_v59 = vpop.permute.xlu1 %4536 }
 0x6e3   : > { %v4731_v33 = vpop.permute.xlu2 %4730  ;;  %5651 = vst.msk [vmem:[#allocation4 + $0x80] sm:$0xff] %vm2931_vm0, %v5561_v3  ;;  %5998 = vmatmul.f32.gmra.mxu0 %v5754_v2  ;;  %6720 = vmatmul.msk.f32.gmra.mxu1 %vm2232_vm12, %v5810_v57 }
 0x6e4   : > { %4627 = vst.msk [vmem:[#allocation4 + $0x78] sm:$0xff] %vm2545_vm14, %v4537_v59  ;;  %v5819_v59 = vld [vmem:[#allocation4 + $0x268] sm:$0xff] }
 0x6e5   : > { %4819 = vst.msk [vmem:[#allocation4 + $0x78] sm:$0xff] %vm2738_vm15, %v4729_v10 }
 0x6e8   : > { %4934 = vrot.lane.b32.xlu0 %v9925_v12, %s6900_s22  ;;  %5192 = vrot.lane.b32.xlu1 %v9764_v22, %s6899_s21  ;;  %v10177_v11 = vpop.f32.mrf.mxu1 }
 0x6e9   : > { %4742 = vrot.lane.b32.xlu2 %v9676_v52, %s6898_s19 }
 0x6ea   : > { %v4921_v47 = vpop.permute.xlu0 %4920  ;;  %v5758_v32 = vld [vmem:[#allocation4 + $0x80] sm:$0xff]  ;;  %v5179_v12 = vpop.permute.xlu1 %5178 }
 0x6eb   : > { %v5373_v10 = vpop.permute.xlu2 %5372  ;;  %5011 = vst.msk [vmem:[#allocation4 + $0x78] sm:$0xff] %vm2931_vm0, %v4921_v47  ;;  %6114 = vmatmul.f32.gmra.mxu3 %v5758_v32  ;;  %6721 = vmatmul.msk.f32.gmra.mxu1 %vm2232_vm12, %v5813_v1  ;;  %v5822_v32 = vld [vmem:[#allocation4 + $0x280] sm:$0xff] }
 0x6ec   : > { %5268 = vst.msk [vmem:[#allocation4 + $0x98] sm:$0xff] %vm2545_vm14, %v5179_v12 }
 0x6ed   : > { %5460 = vst.msk [vmem:[#allocation4 + $0x98] sm:$0xff] %vm2738_vm15, %v5371_v18 }
 0x6f0   : > { %5576 = vrot.lane.b32.xlu0 %v10006_v27, %s6900_s22  ;;  %4552 = vrot.lane.b32.xlu1 %v9890_v9, %s6899_s21 }
 0x6f1   : > { %5384 = vrot.lane.b32.xlu2 %v10008_v42, %s6898_s19 }
 0x6f2   : > { %v5563_v52 = vpop.permute.xlu0 %5562  ;;  %v5757_v45 = vld [vmem:[#allocation4 + $0x78] sm:$0xff]  ;;  %v4539_v48 = vpop.permute.xlu1 %4538 }
 0x6f3   : > { %v4733_v41 = vpop.permute.xlu2 %4732  ;;  %5652 = vst.msk [vmem:[#allocation4 + $0x98] sm:$0xff] %vm2931_vm0, %v5563_v52  ;;  %6001 = vmatmul.f32.gmra.mxu0 %v5757_v45  ;;  %6722 = vmatmul.msk.f32.gmra.mxu1 %vm2232_vm12, %v5816_v46  ;;  %v5825_v45 = vld [vmem:[#allocation4 + $0x298] sm:$0xff] }
 0x6f4   : > { %4628 = vst.msk [vmem:[#allocation4 + $0x90] sm:$0xff] %vm2545_vm14, %v4539_v48 }
 0x6f5   : > { %4820 = vst.msk [vmem:[#allocation4 + $0x90] sm:$0xff] %vm2738_vm15, %v4731_v33  ;;  %v10192_v33 = vpop.f32.mrf.mxu1 }
 0x6f8   : > { %4936 = vrot.lane.b32.xlu0 %v9952_v25, %s6900_s22  ;;  %5194 = vrot.lane.b32.xlu1 %v9836_v58, %s6899_s21 }
 0x6f9   : > { %4744 = vrot.lane.b32.xlu2 %v9685_v14, %s6898_s19 }
 0x6fa   : > { %v4923_v9 = vpop.permute.xlu0 %4922  ;;  %v5761_v3 = vld [vmem:[#allocation4 + $0x98] sm:$0xff]  ;;  %v5181_v2 = vpop.permute.xlu1 %5180 }
 0x6fb   : > { %v5375_v18 = vpop.permute.xlu2 %5374  ;;  %5012 = vst.msk [vmem:[#allocation4 + $0x90] sm:$0xff] %vm2931_vm0, %v4923_v9  ;;  %6117 = vmatmul.f32.gmra.mxu3 %v5761_v3  ;;  %6723 = vmatmul.msk.f32.gmra.mxu1 %vm2232_vm12, %v5819_v59  ;;  %v5828_v9 = vld [vmem:[#allocation4 + $0x2b0] sm:$0xff]  ;;  %v5831_v59 = vld [vmem:[#allocation4 + $0x2c8] sm:$0xff] }
 0x6fc   : > { %5269 = vst.msk [vmem:[#allocation4 + $0xb0] sm:$0xff] %vm2545_vm14, %v5181_v2 }
 0x6fd   : > { %5461 = vst.msk [vmem:[#allocation4 + $0xb0] sm:$0xff] %vm2738_vm15, %v5373_v10  ;;  %v10205_v10 = vpop.f32.mrf.mxu1 }
 0x700   : > { %5578 = vrot.lane.b32.xlu0 %v10031_v55, %s6900_s22  ;;  %4554 = vrot.lane.b32.xlu1 %v9921_v35, %s6899_s21 }
 0x701   : > { %5386 = vrot.lane.b32.xlu2 %v10035_v50, %s6898_s19 }
 0x702   : > { %v5565_v14 = vpop.permute.xlu0 %5564  ;;  %v5760_v57 = vld [vmem:[#allocation4 + $0x90] sm:$0xff]  ;;  %v4541_v47 = vpop.permute.xlu1 %4540 }
 0x703   : > { %v4735_v25 = vpop.permute.xlu2 %4734  ;;  %5653 = vst.msk [vmem:[#allocation4 + $0xb0] sm:$0xff] %vm2931_vm0, %v5565_v14  ;;  %6004 = vmatmul.f32.gmra.mxu0 %v5760_v57  ;;  %6724 = vmatmul.msk.f32.gmra.mxu1 %vm2232_vm12, %v5822_v32 }
 0x704   : > { %4629 = vst.msk [vmem:[#allocation4 + $0xa8] sm:$0xff] %vm2545_vm14, %v4541_v47 }
 0x705   : > { %4821 = vst.msk [vmem:[#allocation4 + $0xa8] sm:$0xff] %vm2738_vm15, %v4733_v41 }
 0x708   : > { %4938 = vrot.lane.b32.xlu0 %v9983_v21, %s6900_s22  ;;  %5196 = vrot.lane.b32.xlu1 %v9849_v31, %s6899_s21 }
 0x709   : > { %4746 = vrot.lane.b32.xlu2 %v9745_v39, %s6898_s19  ;;  %v10221_v39 = vpop.f32.mrf.mxu1 }
 0x70a   : > { %v4925_v35 = vpop.permute.xlu0 %4924  ;;  %v5764_v1 = vld [vmem:[#allocation4 + $0xb0] sm:$0xff]  ;;  %v5183_v52 = vpop.permute.xlu1 %5182 }
 0x70b   : > { %v5377_v12 = vpop.permute.xlu2 %5376  ;;  %5013 = vst.msk [vmem:[#allocation4 + $0xa8] sm:$0xff] %vm2931_vm0, %v4925_v35  ;;  %6120 = vmatmul.f32.gmra.mxu3 %v5764_v1  ;;  %6725 = vmatmul.msk.f32.gmra.mxu1 %vm2232_vm12, %v5825_v45 }
 0x70c   : > { %5270 = vst.msk [vmem:[#allocation4 + $0xc8] sm:$0xff] %vm2545_vm14, %v5183_v52 }
 0x70d   : > { %5462 = vst.msk [vmem:[#allocation4 + $0xc8] sm:$0xff] %vm2738_vm15, %v5375_v18 }
 0x710   : > { %5580 = vrot.lane.b32.xlu0 %v10057_v37, %s6900_s22  ;;  %4556 = vrot.lane.b32.xlu1 %v9950_v4, %s6899_s21 }
 0x711   : > { %5388 = vrot.lane.b32.xlu2 %v10059_v26, %s6898_s19  ;;  %v10236_v14 = vpop.f32.mrf.mxu1 }
 0x712   : > { %v5567_v21 = vpop.permute.xlu0 %5566  ;;  %v5763_v48 = vld [vmem:[#allocation4 + $0xa8] sm:$0xff]  ;;  %v4543_v46 = vpop.permute.xlu1 %4542 }
 0x713   : > { %v4737_v41 = vpop.permute.xlu2 %4736  ;;  %5654 = vst.msk [vmem:[#allocation4 + $0xc8] sm:$0xff] %vm2931_vm0, %v5567_v21  ;;  %6007 = vmatmul.f32.gmra.mxu0 %v5763_v48  ;;  %6726 = vmatmul.msk.f32.gmra.mxu1 %vm2232_vm12, %v5828_v9 }
 0x714   : > { %4630 = vst.msk [vmem:[#allocation4 + $0xc0] sm:$0xff] %vm2545_vm14, %v4543_v46 }
 0x715   : > { %4822 = vst.msk [vmem:[#allocation4 + $0xc0] sm:$0xff] %vm2738_vm15, %v4735_v25 }
 0x718   : > { %4940 = vrot.lane.b32.xlu0 %v10008_v42, %s6900_s22  ;;  %5198 = vrot.lane.b32.xlu1 %v9914_v56, %s6899_s21 }
 0x719   : > { %4748 = vrot.lane.b32.xlu2 %v9764_v22, %s6898_s19 }
 0x71a   : > { %v4927_v4 = vpop.permute.xlu0 %4926  ;;  %v5767_v3 = vld [vmem:[#allocation4 + $0xc8] sm:$0xff]  ;;  %v5185_v2 = vpop.permute.xlu1 %5184 }
 0x71b   : > { %v5379_v18 = vpop.permute.xlu2 %5378  ;;  %5014 = vst.msk [vmem:[#allocation4 + $0xc0] sm:$0xff] %vm2931_vm0, %v4927_v4  ;;  %6123 = vmatmul.f32.gmra.mxu3 %v5767_v3  ;;  %6727 = vmatmul.msk.f32.gmra.mxu1 %vm2232_vm12, %v5831_v59 }
 0x71c   : > { %5271 = vst.msk [vmem:[#allocation4 + $0xe0] sm:$0xff] %vm2545_vm14, %v5185_v2 }
 0x71d   : > { %5463 = vst.msk [vmem:[#allocation4 + $0xe0] sm:$0xff] %vm2738_vm15, %v5377_v12 }
 0x720   : > { %5582 = vrot.lane.b32.xlu0 %v10075_v54, %s6900_s22  ;;  %4558 = vrot.lane.b32.xlu1 %v9979_v40, %s6899_s21 }
 0x721   : > { %5390 = vrot.lane.b32.xlu2 %v10077_v63, %s6898_s19 }
 0x722   : > { %v5569_v22 = vpop.permute.xlu0 %5568  ;;  %v5766_v25 = vld [vmem:[#allocation4 + $0xc0] sm:$0xff]  ;;  %v4545_v57 = vpop.permute.xlu1 %4544 }
 0x723   : > { %v4739_v42 = vpop.permute.xlu2 %4738  ;;  %5655 = vst.msk [vmem:[#allocation4 + $0xe0] sm:$0xff] %vm2931_vm0, %v5569_v22  ;;  %6010 = vmatmul.f32.gmra.mxu0 %v5766_v25 }
 0x724   : > { %4631 = vst.msk [vmem:[#allocation4 + $0xd8] sm:$0xff] %vm2545_vm14, %v4545_v57 }
 0x725   : > { %4823 = vst.msk [vmem:[#allocation4 + $0xd8] sm:$0xff] %vm2738_vm15, %v4737_v41 }
 0x728   : > { %4942 = vrot.lane.b32.xlu0 %v10035_v50, %s6900_s22  ;;  %5200 = vrot.lane.b32.xlu1 %v9917_v44, %s6899_s21 }
 0x729   : > { %4750 = vrot.lane.b32.xlu2 %v9836_v58, %s6898_s19 }
 0x72a   : > { %v4929_v40 = vpop.permute.xlu0 %4928  ;;  %v5770_v32 = vld [vmem:[#allocation4 + $0xe0] sm:$0xff]  ;;  %v5187_v35 = vpop.permute.xlu1 %5186 }
 0x72b   : > { %v5381_v47 = vpop.permute.xlu2 %5380  ;;  %5015 = vst.msk [vmem:[#allocation4 + $0xd8] sm:$0xff] %vm2931_vm0, %v4929_v40  ;;  %6126 = vmatmul.f32.gmra.mxu3 %v5770_v32 }
 0x72c   : > { %5272 = vst.msk [vmem:[#allocation4 + $0xf8] sm:$0xff] %vm2545_vm14, %v5187_v35 }
 0x72d   : > { %5464 = vst.msk [vmem:[#allocation4 + $0xf8] sm:$0xff] %vm2738_vm15, %v5379_v18 }
 0x730   : > { %5584 = vrot.lane.b32.xlu0 %v10093_v0, %s6900_s22  ;;  %4560 = vrot.lane.b32.xlu1 %v10006_v27, %s6899_s21 }
 0x731   : > { %5392 = vrot.lane.b32.xlu2 %v10095_v60, %s6898_s19 }
 0x732   : > { %v5571_v58 = vpop.permute.xlu0 %5570  ;;  %v5769_v12 = vld [vmem:[#allocation4 + $0xd8] sm:$0xff]  ;;  %v4547_v1 = vpop.permute.xlu1 %4546 }
 0x733   : > { %v4741_v50 = vpop.permute.xlu2 %4740  ;;  %5656 = vst.msk [vmem:[#allocation4 + $0xf8] sm:$0xff] %vm2931_vm0, %v5571_v58  ;;  %6013 = vmatmul.f32.gmra.mxu0 %v5769_v12 }
 0x734   : > { %4632 = vst.msk [vmem:[#allocation4 + $0xf0] sm:$0xff] %vm2545_vm14, %v4547_v1 }
 0x735   : > { %4824 = vst.msk [vmem:[#allocation4 + $0xf0] sm:$0xff] %vm2738_vm15, %v4739_v42  ;;  %v10313_v42 = vpop.f32.mrf.mxu3 }
 0x738   : > { %4944 = vrot.lane.b32.xlu0 %v10059_v26, %s6900_s22  ;;  %5202 = vrot.lane.b32.xlu1 %v9972_v16, %s6899_s21 }
 0x739   : > { %4752 = vrot.lane.b32.xlu2 %v9849_v31, %s6898_s19 }
 0x73a   : > { %v4931_v27 = vpop.permute.xlu0 %4930  ;;  %v5773_v45 = vld [vmem:[#allocation4 + $0xf8] sm:$0xff]  ;;  %v5189_v21 = vpop.permute.xlu1 %5188 }
 0x73b   : > { %v5383_v52 = vpop.permute.xlu2 %5382  ;;  %5016 = vst.msk [vmem:[#allocation4 + $0xf0] sm:$0xff] %vm2931_vm0, %v4931_v27  ;;  %6129 = vmatmul.f32.gmra.mxu3 %v5773_v45 }
 0x73c   : > { %5273 = vst.msk [vmem:[#allocation4 + $0x110] sm:$0xff] %vm2545_vm14, %v5189_v21 }
 0x73d   : > { %5465 = vst.msk [vmem:[#allocation4 + $0x110] sm:$0xff] %vm2738_vm15, %v5381_v47  ;;  %v10326_v47 = vpop.f32.mrf.mxu3 }
 0x740   : > { %5586 = vrot.lane.b32.xlu0 %v10111_v43, %s6900_s22  ;;  %4562 = vrot.lane.b32.xlu1 %v10031_v55, %s6899_s21 }
 0x741   : > { %5394 = vrot.lane.b32.xlu2 %v10113_v61, %s6898_s19 }
 0x742   : > { %v5573_v31 = vpop.permute.xlu0 %5572  ;;  %v5772_v41 = vld [vmem:[#allocation4 + $0xf0] sm:$0xff]  ;;  %v4549_v48 = vpop.permute.xlu1 %4548 }
 0x743   : > { %v4743_v26 = vpop.permute.xlu2 %4742  ;;  %5657 = vst.msk [vmem:[#allocation4 + $0x110] sm:$0xff] %vm2931_vm0, %v5573_v31  ;;  %6016 = vmatmul.f32.gmra.mxu0 %v5772_v41 }
 0x744   : > { %4633 = vst.msk [vmem:[#allocation4 + $0x108] sm:$0xff] %vm2545_vm14, %v4549_v48 }
 0x745   : > { %4825 = vst.msk [vmem:[#allocation4 + $0x108] sm:$0xff] %vm2738_vm15, %v4741_v50  ;;  %v10339_v12 = vpop.f32.mrf.mxu3 }
 0x748   : > { %4946 = vrot.lane.b32.xlu0 %v10077_v63, %s6900_s22  ;;  %5204 = vrot.lane.b32.xlu1 %v9975_v20, %s6899_s21 }
 0x749   : > { %4754 = vrot.lane.b32.xlu2 %v9914_v56, %s6898_s19 }
 0x74a   : > { %v4933_v55 = vpop.permute.xlu0 %4932  ;;  %v5776_v9 = vld [vmem:[#allocation4 + $0x110] sm:$0xff]  ;;  %v5191_v4 = vpop.permute.xlu1 %5190 }
 0x74b   : > { %v5385_v46 = vpop.permute.xlu2 %5384  ;;  %5017 = vst.msk [vmem:[#allocation4 + $0x108] sm:$0xff] %vm2931_vm0, %v4933_v55  ;;  %6132 = vmatmul.f32.gmra.mxu3 %v5776_v9 }
 0x74c   : > { %5274 = vst.msk [vmem:[#allocation4 + $0x128] sm:$0xff] %vm2545_vm14, %v5191_v4 }
 0x74d   : > { %5466 = vst.msk [vmem:[#allocation4 + $0x128] sm:$0xff] %vm2738_vm15, %v5383_v52 }
 0x74e   : > { %v10352_v52 = vpop.f32.mrf.mxu3 }
 0x750   : > { %5588 = vrot.lane.b32.xlu0 %v10129_v19, %s6900_s22  ;;  %4564 = vrot.lane.b32.xlu1 %v10057_v37, %s6899_s21 }
 0x751   : > { %5396 = vrot.lane.b32.xlu2 %v10131_v13, %s6898_s19 }
 0x752   : > { %v5575_v56 = vpop.permute.xlu0 %5574  ;;  %v5775_v18 = vld [vmem:[#allocation4 + $0x108] sm:$0xff]  ;;  %v4551_v3 = vpop.permute.xlu1 %4550 }
 0x753   : > { %v4745_v63 = vpop.permute.xlu2 %4744  ;;  %5658 = vst.msk [vmem:[#allocation4 + $0x128] sm:$0xff] %vm2931_vm0, %v5575_v56  ;;  %6019 = vmatmul.f32.gmra.mxu0 %v5775_v18 }
 0x754   : > { %4634 = vst.msk [vmem:[#allocation4 + $0x120] sm:$0xff] %vm2545_vm14, %v4551_v3 }
 0x755   : > { %4826 = vst.msk [vmem:[#allocation4 + $0x120] sm:$0xff] %vm2738_vm15, %v4743_v26 }
 0x758   : > { %4948 = vrot.lane.b32.xlu0 %v10095_v60, %s6900_s22  ;;  %5206 = vrot.lane.b32.xlu1 %v10024_v23, %s6899_s21  ;;  %v10315_v60 = vpop.f32.mrf.mxu0 }
 0x759   : > { %4756 = vrot.lane.b32.xlu2 %v9917_v44, %s6898_s19 }
 0x75a   : > { %v4935_v37 = vpop.permute.xlu0 %4934  ;;  %v5779_v59 = vld [vmem:[#allocation4 + $0x128] sm:$0xff]  ;;  %v5193_v22 = vpop.permute.xlu1 %5192 }
 0x75b   : > { %v5387_v2 = vpop.permute.xlu2 %5386  ;;  %5018 = vst.msk [vmem:[#allocation4 + $0x120] sm:$0xff] %vm2931_vm0, %v4935_v37  ;;  %6135 = vmatmul.f32.gmra.mxu3 %v5779_v59 }
 0x75c   : > { %5275 = vst.msk [vmem:[#allocation4 + $0x140] sm:$0xff] %vm2545_vm14, %v5193_v22 }
 0x75d   : > { %5467 = vst.msk [vmem:[#allocation4 + $0x140] sm:$0xff] %vm2738_vm15, %v5385_v46 }
 0x75e   : > { %v10365_v41 = vpop.f32.mrf.mxu3 }
 0x760   : > { %5590 = vrot.lane.b32.xlu0 %v10147_v53, %s6900_s22  ;;  %4566 = vrot.lane.b32.xlu1 %v10075_v54, %s6899_s21  ;;  %v10328_v32 = vpop.f32.mrf.mxu0 }
 0x761   : > { %5398 = vrot.lane.b32.xlu2 %v10149_v5, %s6898_s19 }
 0x762   : > { %v5577_v44 = vpop.permute.xlu0 %5576  ;;  %v5778_v57 = vld [vmem:[#allocation4 + $0x120] sm:$0xff]  ;;  %v4553_v40 = vpop.permute.xlu1 %4552 }
 0x763   : > { %v4747_v25 = vpop.permute.xlu2 %4746  ;;  %5659 = vst.msk [vmem:[#allocation4 + $0x140] sm:$0xff] %vm2931_vm0, %v5577_v44  ;;  %6022 = vmatmul.f32.gmra.mxu0 %v5778_v57 }
 0x764   : > { %4635 = vst.msk [vmem:[#allocation4 + $0x138] sm:$0xff] %vm2545_vm14, %v4553_v40 }
 0x765   : > { %4827 = vst.msk [vmem:[#allocation4 + $0x138] sm:$0xff] %vm2738_vm15, %v4745_v63 }
 0x768   : > { %4950 = vrot.lane.b32.xlu0 %v10113_v61, %s6900_s22  ;;  %5208 = vrot.lane.b32.xlu1 %v10027_v36, %s6899_s21  ;;  %v10341_v61 = vpop.f32.mrf.mxu0 }
 0x769   : > { %4758 = vrot.lane.b32.xlu2 %v9972_v16, %s6898_s19 }
 0x76a   : > { %v4937_v54 = vpop.permute.xlu0 %4936  ;;  %v5782_v58 = vld [vmem:[#allocation4 + $0x140] sm:$0xff]  ;;  %v5195_v50 = vpop.permute.xlu1 %5194 }
 0x76b   : > { %v5389_v35 = vpop.permute.xlu2 %5388  ;;  %5019 = vst.msk [vmem:[#allocation4 + $0x138] sm:$0xff] %vm2931_vm0, %v4937_v54  ;;  %6138 = vmatmul.f32.gmra.mxu3 %v5782_v58 }
 0x76c   : > { %5276 = vst.msk [vmem:[#allocation4 + $0x158] sm:$0xff] %vm2545_vm14, %v5195_v50 }
 0x76d   : > { %5468 = vst.msk [vmem:[#allocation4 + $0x158] sm:$0xff] %vm2738_vm15, %v5387_v2  ;;  %v4677_v2 = vld [vmem:[#allocation3 + $0x112] sm:$0xff] }
 0x76e   : > { %v10378_v46 = vpop.f32.mrf.mxu3 }
 0x770   : > { %5592 = vrot.lane.b32.xlu0 %v9374_v62, %s6900_s22  ;;  %4568 = vrot.lane.b32.xlu1 %v10093_v0, %s6899_s21  ;;  %v10354_v45 = vpop.f32.mrf.mxu0 }
 0x771   : > { %5400 = vrot.lane.b32.xlu2 %v10151_v7, %s6898_s19 }
 0x772   : > { %v5579_v16 = vpop.permute.xlu0 %5578  ;;  %v5781_v1 = vld [vmem:[#allocation4 + $0x138] sm:$0xff]  ;;  %v4555_v27 = vpop.permute.xlu1 %4554 }
 0x773   : > { %v4749_v36 = vpop.permute.xlu2 %4748  ;;  %5660 = vst.msk [vmem:[#allocation4 + $0x158] sm:$0xff] %vm2931_vm0, %v5579_v16  ;;  %6025 = vmatmul.f32.gmra.mxu0 %v5781_v1  ;;  %v4678_v16 = vld [vmem:[#allocation3 + $0x122] sm:$0xff] }
 0x774   : > { %4636 = vst.msk [vmem:[#allocation4 + $0x150] sm:$0xff] %vm2545_vm14, %v4555_v27 }
 0x775   : > { %4828 = vst.msk [vmem:[#allocation4 + $0x150] sm:$0xff] %vm2738_vm15, %v4747_v25 }
 0x778   : > { %4952 = vrot.lane.b32.xlu0 %v10131_v13, %s6900_s22  ;;  %5210 = vrot.lane.b32.xlu1 %v10050_v29, %s6899_s21  ;;  %v10367_v13 = vpop.f32.mrf.mxu0 }
 0x779   : > { %4760 = vrot.lane.b32.xlu2 %v9975_v20, %s6898_s19 }
 0x77a   : > { %v4939_v0 = vpop.permute.xlu0 %4938  ;;  %v5785_v31 = vld [vmem:[#allocation4 + $0x158] sm:$0xff]  ;;  %v5197_v26 = vpop.permute.xlu1 %5196 }
 0x77b   : > { %v5391_v21 = vpop.permute.xlu2 %5390  ;;  %5020 = vst.msk [vmem:[#allocation4 + $0x150] sm:$0xff] %vm2931_vm0, %v4939_v0  ;;  %6141 = vmatmul.f32.gmra.mxu3 %v5785_v31 }
 0x77c   : > { %5277 = vst.msk [vmem:[#allocation4 + $0x170] sm:$0xff] %vm2545_vm14, %v5197_v26 }
 0x77d   : > { %5469 = vst.msk [vmem:[#allocation4 + $0x170] sm:$0xff] %vm2738_vm15, %v5389_v35 }
 0x77e   : > { %v10391_v18 = vpop.f32.mrf.mxu3 }
 0x780   : > { %5594 = vrot.lane.b32.xlu0 %v9384_v24, %s6900_s22  ;;  %4570 = vrot.lane.b32.xlu1 %v10111_v43, %s6899_s21  ;;  %v10380_v9 = vpop.f32.mrf.mxu0 }
 0x781   : > { %5402 = vrot.lane.b32.xlu2 %v9386_v38, %s6898_s19 }
 0x782   : > { %v5581_v20 = vpop.permute.xlu0 %5580  ;;  %v5784_v48 = vld [vmem:[#allocation4 + $0x150] sm:$0xff]  ;;  %v4557_v55 = vpop.permute.xlu1 %4556 }
 0x783   : > { %v4751_v29 = vpop.permute.xlu2 %4750  ;;  %5661 = vst.msk [vmem:[#allocation4 + $0x170] sm:$0xff] %vm2931_vm0, %v5581_v20  ;;  %6028 = vmatmul.f32.gmra.mxu0 %v5784_v48 }
 0x784   : > { %4637 = vst.msk [vmem:[#allocation4 + $0x168] sm:$0xff] %vm2545_vm14, %v4557_v55  ;;  %v4679_v55 = vld [vmem:[#allocation3 + $0x12a] sm:$0xff] }
 0x785   : > { %4829 = vst.msk [vmem:[#allocation4 + $0x168] sm:$0xff] %vm2738_vm15, %v4749_v36 }
 0x788   : > { %4954 = vrot.lane.b32.xlu0 %v10149_v5, %s6900_s22  ;;  %5212 = vrot.lane.b32.xlu1 %v9370_v49, %s6899_s21  ;;  %v10393_v5 = vpop.f32.mrf.mxu0 }
 0x789   : > { %4762 = vrot.lane.b32.xlu2 %v10024_v23, %s6898_s19 }
 0x78a   : > { %v4941_v43 = vpop.permute.xlu0 %4940  ;;  %v5788_v56 = vld [vmem:[#allocation4 + $0x170] sm:$0xff]  ;;  %v5199_v63 = vpop.permute.xlu1 %5198 }
 0x78b   : > { %v5393_v4 = vpop.permute.xlu2 %5392  ;;  %5021 = vst.msk [vmem:[#allocation4 + $0x168] sm:$0xff] %vm2931_vm0, %v4941_v43  ;;  %6144 = vmatmul.f32.gmra.mxu3 %v5788_v56 }
 0x78c   : > { %5278 = vst.msk [vmem:[#allocation4 + $0x188] sm:$0xff] %vm2545_vm14, %v5199_v63 }
 0x78d   : > { %5470 = vst.msk [vmem:[#allocation4 + $0x188] sm:$0xff] %vm2738_vm15, %v5391_v21  ;;  %v11275_v21 = vld [vmem:[#allocation15_spill] sm:$0xff] }
 0x78e   : > { %v10404_v59 = vpop.f32.mrf.mxu3 }
 0x790   : > { %5596 = vrot.lane.b32.xlu0 %v9408_v28, %s6900_s22  ;;  %4572 = vrot.lane.b32.xlu1 %v10129_v19, %s6899_s21  ;;  %v10406_v22 = vpop.f32.mrf.mxu0 }
 0x791   : > { %5404 = vrot.lane.b32.xlu2 %v9411_v17, %s6898_s19 }
 0x792   : > { %v5583_v49 = vpop.permute.xlu0 %5582  ;;  %v5787_v3 = vld [vmem:[#allocation4 + $0x168] sm:$0xff]  ;;  %v4559_v37 = vpop.permute.xlu1 %4558 }
 0x793   : > { %v4753_v23 = vpop.permute.xlu2 %4752  ;;  %5662 = vst.msk [vmem:[#allocation4 + $0x188] sm:$0xff] %vm2931_vm0, %v5583_v49  ;;  %6031 = vmatmul.f32.gmra.mxu0 %v5787_v3 }
 0x794   : > { %4638 = vst.msk [vmem:[#allocation4 + $0x180] sm:$0xff] %vm2545_vm14, %v4559_v37 }
 0x795   : > { %4830 = vst.msk [vmem:[#allocation4 + $0x180] sm:$0xff] %vm2738_vm15, %v4751_v29 }
 0x798   : > { %4956 = vrot.lane.b32.xlu0 %v10151_v7, %s6900_s22  ;;  %5214 = vrot.lane.b32.xlu1 %v9399_v51, %s6899_s21 }
 0x799   : > { %4764 = vrot.lane.b32.xlu2 %v4677_v2, %s6898_s19 }
 0x79a   : > { %v4943_v19 = vpop.permute.xlu0 %4942  ;;  %v5791_v25 = vld [vmem:[#allocation4 + $0x188] sm:$0xff]  ;;  %v5201_v57 = vpop.permute.xlu1 %5200 }
 0x79b   : > { %v5395_v44 = vpop.permute.xlu2 %5394  ;;  %5022 = vst.msk [vmem:[#allocation4 + $0x180] sm:$0xff] %vm2931_vm0, %v4943_v19  ;;  %6147 = vmatmul.f32.gmra.mxu3 %v5791_v25 }
 0x79c   : > { %5279 = vst.msk [vmem:[#allocation4 + $0x1a0] sm:$0xff] %vm2545_vm14, %v5201_v57  ;;  %v4680_v57 = vld [vmem:[#allocation3 + $0x13a] sm:$0xff] }
 0x79d   : > { %5471 = vst.msk [vmem:[#allocation4 + $0x1a0] sm:$0xff] %vm2738_vm15, %v5393_v4 }
 0x79e   : > { %v6124_v40 = vpop.f32.mrf.mxu3 }
 0x7a0   : > { %5598 = vrot.lane.b32.xlu0 %v9421_v6, %s6900_s22  ;;  %v6011_v7 = vpop.f32.mrf.mxu0  ;;  %4574 = vrot.lane.b32.xlu1 %v10147_v53, %s6899_s21 }
 0x7a1   : > { %5406 = vrot.lane.b32.xlu2 %v9423_v15, %s6898_s19  ;;  %v10422_v51 = vadd.f32 %v6124_v40, %v6011_v7 }
 0x7a2   : > { %v5585_v54 = vpop.permute.xlu0 %5584  ;;  %v5790_v58 = vld [vmem:[#allocation4 + $0x180] sm:$0xff]  ;;  %v4561_v50 = vpop.permute.xlu1 %4560 }
 0x7a3   : > { %v4755_v35 = vpop.permute.xlu2 %4754  ;;  %5663 = vst.msk [vmem:[#allocation4 + $0x1a0] sm:$0xff] %vm2931_vm0, %v5585_v54  ;;  %6034 = vmatmul.f32.gmra.mxu0 %v5790_v58 }
 0x7a4   : > { %4639 = vst.msk [vmem:[#allocation4 + $0x198] sm:$0xff] %vm2545_vm14, %v4561_v50  ;;  %v11281_v50 = vld [vmem:[#allocation21_spill] sm:$0xff] }
 0x7a5   : > { %4831 = vst.msk [vmem:[#allocation4 + $0x198] sm:$0xff] %vm2738_vm15, %v4753_v23  ;;  %v11278_v23 = vld [vmem:[#allocation19_spill] sm:$0xff] }
 0x7a8   : > { %4958 = vrot.lane.b32.xlu0 %v9386_v38, %s6900_s22  ;;  %5216 = vrot.lane.b32.xlu1 %v9405_v34, %s6899_s21  ;;  %v11276_v38 = vld [vmem:[#allocation17_spill] sm:$0xff] }
 0x7a9   : > { %4766 = vrot.lane.b32.xlu2 %v4678_v16, %s6898_s19 }
 0x7aa   : > { %v4945_v53 = vpop.permute.xlu0 %4944  ;;  %v5794_v1 = vld [vmem:[#allocation4 + $0x1a0] sm:$0xff]  ;;  %v5203_v27 = vpop.permute.xlu1 %5202 }
 0x7ab   : > { %v5397_v36 = vpop.permute.xlu2 %5396  ;;  %5023 = vst.msk [vmem:[#allocation4 + $0x198] sm:$0xff] %vm2931_vm0, %v4945_v53  ;;  %6150 = vmatmul.f32.gmra.mxu3 %v5794_v1 }
 0x7ac   : > { %5280 = vst.msk [vmem:[#allocation4 + $0x1b8] sm:$0xff] %vm2545_vm14, %v5203_v27 }
 0x7ad   : > { %5472 = vst.msk [vmem:[#allocation4 + $0x1b8] sm:$0xff] %vm2738_vm15, %v5395_v44 }
 0x7ae   : > { %v6127_v0 = vpop.f32.mrf.mxu3 }
 0x7b0   : > { %5600 = vrot.lane.b32.xlu0 %v11275_v21, %s6900_s22  ;;  %v6014_v31 = vpop.f32.mrf.mxu0  ;;  %4576 = vrot.lane.b32.xlu1 %v9374_v62, %s6899_s21  ;;  %v11277_v62 = vld [vmem:[#allocation67_spill] sm:$0xff] }
 0x7b1   : > { %5408 = vrot.lane.b32.xlu2 %v11276_v38, %s6898_s19  ;;  %v10441_v34 = vadd.f32 %v6127_v0, %v6014_v31  ;;  %v10483_v31 = vpop.f32.mrf.mxu1 }
 0x7b2   : > { %v5587_v26 = vpop.permute.xlu0 %5586  ;;  %v5793_v29 = vld [vmem:[#allocation4 + $0x198] sm:$0xff]  ;;  %v4563_v48 = vpop.permute.xlu1 %4562 }
 0x7b3   : > { %v4757_v20 = vpop.permute.xlu2 %4756  ;;  %5664 = vst.msk [vmem:[#allocation4 + $0x1b8] sm:$0xff] %vm2931_vm0, %v5587_v26  ;;  %6037 = vmatmul.f32.gmra.mxu0 %v5793_v29  ;;  %v4681_v26 = vld [vmem:[#allocation3 + $0x142] sm:$0xff] }
 0x7b4   : > { %4640 = vst.msk [vmem:[#allocation4 + $0x1b0] sm:$0xff] %vm2545_vm14, %v4563_v48 }
 0x7b5   : > { %4832 = vst.msk [vmem:[#allocation4 + $0x1b0] sm:$0xff] %vm2738_vm15, %v4755_v35 }
 0x7b8   : > { %4960 = vrot.lane.b32.xlu0 %v9411_v17, %s6900_s22  ;;  %5218 = vrot.lane.b32.xlu1 %v11277_v62, %s6899_s21  ;;  %v11279_v17 = vld [vmem:[#allocation20_spill] sm:$0xff] }
 0x7b9   : > { %4768 = vrot.lane.b32.xlu2 %v4679_v55, %s6898_s19  ;;  %v10496_v62 = vpop.f32.mrf.mxu1 }
 0x7ba   : > { %v4947_v43 = vpop.permute.xlu0 %4946  ;;  %v5797_v56 = vld [vmem:[#allocation4 + $0x1b8] sm:$0xff]  ;;  %v5205_v63 = vpop.permute.xlu1 %5204 }
 0x7bb   : > { %v5399_v4 = vpop.permute.xlu2 %5398  ;;  %5024 = vst.msk [vmem:[#allocation4 + $0x1b0] sm:$0xff] %vm2931_vm0, %v4947_v43  ;;  %6153 = vmatmul.f32.gmra.mxu3 %v5797_v56 }
 0x7bc   : > { %5281 = vst.msk [vmem:[#allocation4 + $0x1d0] sm:$0xff] %vm2545_vm14, %v5205_v63 }
 0x7bd   : > { %5473 = vst.msk [vmem:[#allocation4 + $0x1d0] sm:$0xff] %vm2738_vm15, %v5397_v36 }
 0x7be   : > { %v6130_v49 = vpop.f32.mrf.mxu3 }
 0x7c0   : > { %5602 = vrot.lane.b32.xlu0 %v11278_v23, %s6900_s22  ;;  %v6017_v3 = vpop.f32.mrf.mxu0  ;;  %4578 = vrot.lane.b32.xlu1 %v9384_v24, %s6899_s21  ;;  %v11280_v24 = vld [vmem:[#allocation68_spill] sm:$0xff] }
 0x7c1   : > { %5410 = vrot.lane.b32.xlu2 %v11279_v17, %s6898_s19  ;;  %v10460_v37 = vadd.f32 %v6130_v49, %v6017_v3 }
 0x7c2   : > { %v5589_v2 = vpop.permute.xlu0 %5588  ;;  %v5796_v44 = vld [vmem:[#allocation4 + $0x1b0] sm:$0xff]  ;;  %v4565_v25 = vpop.permute.xlu1 %4564 }
 0x7c3   : > { %v4759_v19 = vpop.permute.xlu2 %4758  ;;  %5665 = vst.msk [vmem:[#allocation4 + $0x1d0] sm:$0xff] %vm2931_vm0, %v5589_v2  ;;  %6040 = vmatmul.f32.gmra.mxu0 %v5796_v44  ;;  %v4682_v44 = vld [vmem:[#allocation3 + $0x152] sm:$0xff] }
 0x7c4   : > { %4641 = vst.msk [vmem:[#allocation4 + $0x1c8] sm:$0xff] %vm2545_vm14, %v4565_v25  ;;  %v10516_v25 = vpop.f32.mrf.mxu1 }
 0x7c5   : > { %4833 = vst.msk [vmem:[#allocation4 + $0x1c8] sm:$0xff] %vm2738_vm15, %v4757_v20 }
 0x7c8   : > { %4962 = vrot.lane.b32.xlu0 %v9423_v15, %s6900_s22  ;;  %5220 = vrot.lane.b32.xlu1 %v11280_v24, %s6899_s21  ;;  %v11282_v15 = vld [vmem:[#allocation22_spill] sm:$0xff] }
 0x7c9   : > { %4770 = vrot.lane.b32.xlu2 %v4680_v57, %s6898_s19 }
 0x7ca   : > { %v4949_v40 = vpop.permute.xlu0 %4948  ;;  %v5800_v54 = vld [vmem:[#allocation4 + $0x1d0] sm:$0xff]  ;;  %v5207_v35 = vpop.permute.xlu1 %5206 }
 0x7cb   : > { %v5401_v7 = vpop.permute.xlu2 %5400  ;;  %5025 = vst.msk [vmem:[#allocation4 + $0x1c8] sm:$0xff] %vm2931_vm0, %v4949_v40  ;;  %6156 = vmatmul.f32.gmra.mxu3 %v5800_v54 }
 0x7cc   : > { %5282 = vst.msk [vmem:[#allocation4 + $0x1e8] sm:$0xff] %vm2545_vm14, %v5207_v35 }
 0x7cd   : > { %5474 = vst.msk [vmem:[#allocation4 + $0x1e8] sm:$0xff] %vm2738_vm15, %v5399_v4  ;;  %v11283_v4 = vld [vmem:[#allocation23_spill] sm:$0xff] }
 0x7ce   : > { %v6133_v58 = vpop.f32.mrf.mxu3 }
 0x7d0   : > { %5604 = vrot.lane.b32.xlu0 %v11281_v50, %s6900_s22  ;;  %v6020_v16 = vpop.f32.mrf.mxu0  ;;  %4580 = vrot.lane.b32.xlu1 %v9408_v28, %s6899_s21  ;;  %v10489_v28 = vld [vmem:[#allocation3 + $0x16a] sm:$0xff] }
 0x7d1   : > { %5412 = vrot.lane.b32.xlu2 %v11282_v15, %s6898_s19  ;;  %v10479_v53 = vadd.f32 %v6133_v58, %v6020_v16 }
 0x7d2   : > { %v5591_v36 = vpop.permute.xlu0 %5590  ;;  %v5799_v27 = vld [vmem:[#allocation4 + $0x1c8] sm:$0xff]  ;;  %v4567_v0 = vpop.permute.xlu1 %4566 }
 0x7d3   : > { %v4761_v1 = vpop.permute.xlu2 %4760  ;;  %5666 = vst.msk [vmem:[#allocation4 + $0x1e8] sm:$0xff] %vm2931_vm0, %v5591_v36  ;;  %6043 = vmatmul.f32.gmra.mxu0 %v5799_v27  ;;  %v10533_v27 = vpop.f32.mrf.mxu1 }
 0x7d4   : > { %4642 = vst.msk [vmem:[#allocation4 + $0x1e0] sm:$0xff] %vm2545_vm14, %v4567_v0 }
 0x7d5   : > { %4834 = vst.msk [vmem:[#allocation4 + $0x1e0] sm:$0xff] %vm2738_vm15, %v4759_v19 }
 0x7d8   : > { %4964 = vrot.lane.b32.xlu0 %v11276_v38, %s6900_s22  ;;  %5222 = vrot.lane.b32.xlu1 %v10489_v28, %s6899_s21  ;;  %v10498_v38 = vld [vmem:[#allocation3 + $0x180] sm:$0xff] }
 0x7d9   : > { %4772 = vrot.lane.b32.xlu2 %v4681_v26, %s6898_s19 }
 0x7da   : > { %v4951_v20 = vpop.permute.xlu0 %4950  ;;  %v5803_v48 = vld [vmem:[#allocation4 + $0x1e8] sm:$0xff]  ;;  %v5209_v55 = vpop.permute.xlu1 %5208 }
 0x7db   : > { %v5403_v29 = vpop.permute.xlu2 %5402  ;;  %5026 = vst.msk [vmem:[#allocation4 + $0x1e0] sm:$0xff] %vm2931_vm0, %v4951_v20  ;;  %6159 = vmatmul.f32.gmra.mxu3 %v5803_v48 }
 0x7dc   : > { %5283 = vst.msk [vmem:[#allocation4 + $0x200] sm:$0xff] %vm2545_vm14, %v5209_v55  ;;  %v10544_v55 = vpop.f32.mrf.mxu1 }
 0x7dd   : > { %5475 = vst.msk [vmem:[#allocation4 + $0x200] sm:$0xff] %vm2738_vm15, %v5401_v7 }
 0x7de   : > { %v6136_v43 = vpop.f32.mrf.mxu3 }
 0x7e0   : > { %5606 = vrot.lane.b32.xlu0 %v11283_v4, %s6900_s22  ;;  %v6023_v56 = vpop.f32.mrf.mxu0  ;;  %4582 = vrot.lane.b32.xlu1 %v9421_v6, %s6899_s21  ;;  %v10514_v6 = vld [vmem:[#allocation3 + $0x172] sm:$0xff] }
 0x7e1   : > { %5414 = vrot.lane.b32.xlu2 %v10498_v38, %s6898_s19  ;;  %v10506_v63 = vadd.f32 %v6136_v43, %v6023_v56  ;;  %v5516_v43 = vld [vmem:[#allocation3 + $0x199] sm:$0xff] }
 0x7e2   : > { %v5593_v49 = vpop.permute.xlu0 %5592  ;;  %v5802_v2 = vld [vmem:[#allocation4 + $0x1e0] sm:$0xff]  ;;  %v4569_v19 = vpop.permute.xlu1 %4568 }
 0x7e3   : > { %v4763_v3 = vpop.permute.xlu2 %4762  ;;  %5667 = vst.msk [vmem:[#allocation4 + $0x200] sm:$0xff] %vm2931_vm0, %v5593_v49  ;;  %6046 = vmatmul.f32.gmra.mxu0 %v5802_v2 }
 0x7e4   : > { %4643 = vst.msk [vmem:[#allocation4 + $0x1f8] sm:$0xff] %vm2545_vm14, %v4569_v19 }
 0x7e5   : > { %4835 = vst.msk [vmem:[#allocation4 + $0x1f8] sm:$0xff] %vm2738_vm15, %v4761_v1 }
 0x7e8   : > { %4966 = vrot.lane.b32.xlu0 %v11279_v17, %s6900_s22  ;;  %5224 = vrot.lane.b32.xlu1 %v10514_v6, %s6899_s21  ;;  %v10523_v17 = vld [vmem:[#allocation3 + $0x188] sm:$0xff] }
 0x7e9   : > { %4774 = vrot.lane.b32.xlu2 %v4682_v44, %s6898_s19 }
 0x7ea   : > { %v4953_v57 = vpop.permute.xlu0 %4952  ;;  %v5806_v40 = vld [vmem:[#allocation4 + $0x200] sm:$0xff]  ;;  %v5211_v7 = vpop.permute.xlu1 %5210 }
 0x7eb   : > { %v5405_v24 = vpop.permute.xlu2 %5404  ;;  %5027 = vst.msk [vmem:[#allocation4 + $0x1f8] sm:$0xff] %vm2931_vm0, %v4953_v57  ;;  %6162 = vmatmul.f32.gmra.mxu3 %v5806_v40  ;;  %v10556_v57 = vpop.f32.mrf.mxu1 }
 0x7ec   : > { %5284 = vst.msk [vmem:[#allocation4 + $0x218] sm:$0xff] %vm2545_vm14, %v5211_v7 }
 0x7ed   : > { %5476 = vst.msk [vmem:[#allocation4 + $0x218] sm:$0xff] %vm2738_vm15, %v5403_v29 }
 0x7ee   : > { %v6139_v54 = vpop.f32.mrf.mxu3 }
 0x7f0   : > { %5608 = vrot.lane.b32.xlu0 %v9577_v8, %s6900_s22  ;;  %v6026_v35 = vpop.f32.mrf.mxu0  ;;  %4584 = vrot.lane.b32.xlu1 %v11275_v21, %s6899_s21  ;;  %v4683_v8 = vld [vmem:[#allocation3 + $0x15a] sm:$0xff]  ;;  %v5132_v21 = vld [vmem:[#allocation3 + $0x182] sm:$0xff] }
 0x7f1   : > { %5416 = vrot.lane.b32.xlu2 %v10523_v17, %s6898_s19  ;;  %v10531_v58 = vadd.f32 %v6139_v54, %v6026_v35  ;;  %v5517_v35 = vld [vmem:[#allocation3 + $0x1a1] sm:$0xff] }
 0x7f2   : > { %v5595_v16 = vpop.permute.xlu0 %5594  ;;  %v5805_v1 = vld [vmem:[#allocation4 + $0x1f8] sm:$0xff]  ;;  %v4571_v0 = vpop.permute.xlu1 %4570 }
 0x7f3   : > { %v4765_v36 = vpop.permute.xlu2 %4764  ;;  %5668 = vst.msk [vmem:[#allocation4 + $0x218] sm:$0xff] %vm2931_vm0, %v5595_v16  ;;  %6049 = vmatmul.f32.gmra.mxu0 %v5805_v1  ;;  %v5325_v16 = vld [vmem:[#allocation3 + $0x1a0] sm:$0xff] }
 0x7f4   : > { %4644 = vst.msk [vmem:[#allocation4 + $0x210] sm:$0xff] %vm2545_vm14, %v4571_v0 }
 0x7f5   : > { %4836 = vst.msk [vmem:[#allocation4 + $0x210] sm:$0xff] %vm2738_vm15, %v4763_v3 }
 0x7f8   : > { %4968 = vrot.lane.b32.xlu0 %v11282_v15, %s6900_s22  ;;  %5226 = vrot.lane.b32.xlu1 %v5132_v21, %s6899_s21  ;;  %v5324_v15 = vld [vmem:[#allocation3 + $0x198] sm:$0xff] }
 0x7f9   : > { %4776 = vrot.lane.b32.xlu2 %v4683_v8, %s6898_s19 }
 0x7fa   : > { %v4955_v26 = vpop.permute.xlu0 %4954  ;;  %v5809_v29 = vld [vmem:[#allocation4 + $0x218] sm:$0xff]  ;;  %v5213_v48 = vpop.permute.xlu1 %5212 }
 0x7fb   : > { %v5407_v20 = vpop.permute.xlu2 %5406  ;;  %5028 = vst.msk [vmem:[#allocation4 + $0x210] sm:$0xff] %vm2931_vm0, %v4955_v26  ;;  %6165 = vmatmul.f32.gmra.mxu3 %v5809_v29 }
 0x7fc   : > { %5285 = vst.msk [vmem:[#allocation4 + $0x230] sm:$0xff] %vm2545_vm14, %v5213_v48 }
 0x7fd   : > { %5477 = vst.msk [vmem:[#allocation4 + $0x230] sm:$0xff] %vm2738_vm15, %v5405_v24 }
 0x7fe   : > { %v6142_v4 = vpop.f32.mrf.mxu3 }
 0x800   : > { %5610 = vrot.lane.b32.xlu0 %v5516_v43, %s6900_s22  ;;  %v6029_v56 = vpop.f32.mrf.mxu0  ;;  %4586 = vrot.lane.b32.xlu1 %v11278_v23, %s6899_s21  ;;  %v5133_v23 = vld [vmem:[#allocation3 + $0x18a] sm:$0xff] }
 0x801   : > { %5418 = vrot.lane.b32.xlu2 %v5324_v15, %s6898_s19  ;;  %v10551_v49 = vadd.f32 %v6142_v4, %v6029_v56 }
 0x802   : > { %v5597_v3 = vpop.permute.xlu0 %5596  ;;  %v5808_v19 = vld [vmem:[#allocation4 + $0x210] sm:$0xff]  ;;  %v4573_v44 = vpop.permute.xlu1 %4572 }
 0x803   : > { %v4767_v2 = vpop.permute.xlu2 %4766  ;;  %5669 = vst.msk [vmem:[#allocation4 + $0x230] sm:$0xff] %vm2931_vm0, %v5597_v3  ;;  %6052 = vmatmul.f32.gmra.mxu0 %v5808_v19 }
 0x804   : > { %4645 = vst.msk [vmem:[#allocation4 + $0x228] sm:$0xff] %vm2545_vm14, %v4573_v44 }
 0x805   : > { %4837 = vst.msk [vmem:[#allocation4 + $0x228] sm:$0xff] %vm2738_vm15, %v4765_v36  ;;  %v10568_v36 = vpop.f32.mrf.mxu1 }
 0x808   : > { %4970 = vrot.lane.b32.xlu0 %v10498_v38, %s6900_s22  ;;  %5228 = vrot.lane.b32.xlu1 %v5133_v23, %s6899_s21 }
 0x809   : > { %4778 = vrot.lane.b32.xlu2 %v10489_v28, %s6898_s19 }
 0x80a   : > { %v4957_v24 = vpop.permute.xlu0 %4956  ;;  %v5812_v7 = vld [vmem:[#allocation4 + $0x230] sm:$0xff]  ;;  %v5215_v54 = vpop.permute.xlu1 %5214 }
 0x80b   : > { %v5409_v40 = vpop.permute.xlu2 %5408  ;;  %5029 = vst.msk [vmem:[#allocation4 + $0x228] sm:$0xff] %vm2931_vm0, %v4957_v24  ;;  %6168 = vmatmul.f32.gmra.mxu3 %v5812_v7 }
 0x80c   : > { %5286 = vst.msk [vmem:[#allocation4 + $0x248] sm:$0xff] %vm2545_vm14, %v5215_v54 }
 0x80d   : > { %5478 = vst.msk [vmem:[#allocation4 + $0x248] sm:$0xff] %vm2738_vm15, %v5407_v20  ;;  %v10581_v48 = vpop.f32.mrf.mxu1 }
 0x80e   : > { %v6145_v38 = vpop.f32.mrf.mxu3 }
 0x810   : > { %5612 = vrot.lane.b32.xlu0 %v5517_v35, %s6900_s22  ;;  %v6032_v28 = vpop.f32.mrf.mxu0  ;;  %4588 = vrot.lane.b32.xlu1 %v11281_v50, %s6899_s21  ;;  %s6561_s21 = sshll.u32 %s10919_s18, 4  ;;  %s6562_s21 = int_to_ptr.vmem [resolvable:$true] %s6561_s21 }
 0x811   : > { %5420 = vrot.lane.b32.xlu2 %v5325_v16, %s6898_s19  ;;  %v10572_v1 = vadd.f32 %v6145_v38, %v6032_v28 }
 0x812   : > { %v5599_v0 = vpop.permute.xlu0 %5598  ;;  %v5811_v21 = vld [vmem:[#allocation4 + $0x228] sm:$0xff]  ;;  %v4575_v26 = vpop.permute.xlu1 %4574 }
 0x813   : > { %v4769_v8 = vpop.permute.xlu2 %4768  ;;  %5670 = vst.msk [vmem:[#allocation4 + $0x248] sm:$0xff] %vm2931_vm0, %v5599_v0  ;;  %6055 = vmatmul.f32.gmra.mxu0 %v5811_v21 }
 0x814   : > { %4646 = vst.msk [vmem:[#allocation4 + $0x240] sm:$0xff] %vm2545_vm14, %v4575_v26 }
 0x815   : > { %4838 = vst.msk [vmem:[#allocation4 + $0x240] sm:$0xff] %vm2738_vm15, %v4767_v2  ;;  %v10590_v19 = vpop.f32.mrf.mxu1 }
 0x818   : > { %4972 = vrot.lane.b32.xlu0 %v10523_v17, %s6900_s22 }
 0x819   : > { %4780 = vrot.lane.b32.xlu2 %v10514_v6, %s6898_s19  ;;  %s6560_s19 = scalar_lea.hbm %s11099_s7, %s6739_s20 }
 0x81a   : > { %v4959_v50 = vpop.permute.xlu0 %4958  ;;  %v5815_v29 = vld [vmem:[#allocation4 + $0x248] sm:$0xff]  ;;  %v5217_v43 = vpop.permute.xlu1 %5216  ;;  %s6563_s22 = sshll.u32 %s6560_s19, 4  ;;  %s6564_s22 = int_to_ptr.hbm [resolvable:$true] %s6563_s22 }
 0x81b   : > { %v5411_v20 = vpop.permute.xlu2 %5410  ;;  %5030 = vst.msk [vmem:[#allocation4 + $0x240] sm:$0xff] %vm2931_vm0, %v4959_v50  ;;  %6171 = vmatmul.f32.gmra.mxu3 %v5815_v29  ;;  %s6839_s25 = sshra.s32 %s6564_s22, 4  ;;  %s6840_s25 = int_to_ptr.hbm [resolvable:$true] %s6839_s25 }
 0x81c   : > { %5287 = vst.msk [vmem:[#allocation4 + $0x260] sm:$0xff] %vm2545_vm14, %v5217_v43  ;;  %s6841_s30 = scalar_lea.hbm %s6840_s25, 256  ;;  %p6846_p0 = scmp.lt.s32.totalorder %s6840_s25, %s11099_s7 }
 0x81d   : > { %5479 = vst.msk [vmem:[#allocation4 + $0x260] sm:$0xff] %vm2738_vm15, %v5409_v40  ;;  %v10596_v7 = vpop.f32.mrf.mxu1  ;;  %p6842_p11 = scmp.ne.s32.totalorder %s6840_s25, %s6841_s30  ;;  %p6847_p1 = scmp.lt.s32.totalorder %s6845_s14, %s6841_s30 }
 0x81e   : > { %v6148_v15 = vpop.f32.mrf.mxu3 }
 0x81f   : > { %p6843_p12 = pnand %p6842_p11, %p6984_p5  ;;  %p6848_p2 = por %p6847_p1, %p6846_p0 }
 0x820   : > { %v6035_v4 = vpop.f32.mrf.mxu0 }
 0x821   : > { %v10586_v56 = vadd.f32 %v6148_v15, %v6035_v4  ;;  %p6844_p13 = pneg %p6843_p12 }
 0x822   : > { %v5601_v17 = vpop.permute.xlu0 %5600  ;;  %v5814_v6 = vld [vmem:[#allocation4 + $0x240] sm:$0xff]  ;;  %v4577_v2 = vpop.permute.xlu1 %4576 }
 0x823   : > { %v4771_v3 = vpop.permute.xlu2 %4770  ;;  %5671 = vst.msk [vmem:[#allocation4 + $0x260] sm:$0xff] %vm2931_vm0, %v5601_v17  ;;  %6058 = vmatmul.f32.gmra.mxu0 %v5814_v6  ;;  %p6849_p3 = pnand %p6848_p2, %p6844_p13 }
 0x824   : > { %4647 = vst.msk [vmem:[#allocation4 + $0x258] sm:$0xff] %vm2545_vm14, %v4577_v2 }
 0x825   : > { %4839 = vst.msk [vmem:[#allocation4 + $0x258] sm:$0xff] %vm2738_vm15, %v4769_v8  ;;  %v10603_v21 = vpop.f32.mrf.mxu1 }
 0x82a   : > { %v4961_v44 = vpop.permute.xlu0 %4960  ;;  %v5818_v24 = vld [vmem:[#allocation4 + $0x260] sm:$0xff]  ;;  %v5219_v40 = vpop.permute.xlu1 %5218 }
 0x82b   : > { %v5413_v23 = vpop.permute.xlu2 %5412  ;;  %5031 = vst.msk [vmem:[#allocation4 + $0x258] sm:$0xff] %vm2931_vm0, %v4961_v44  ;;  %6174 = vmatmul.f32.gmra.mxu3 %v5818_v24 }
 0x82c   : > { %5288 = vst.msk [vmem:[#allocation4 + $0x278] sm:$0xff] %vm2545_vm14, %v5219_v40 }
 0x82d   : > { %5480 = vst.msk [vmem:[#allocation4 + $0x278] sm:$0xff] %vm2738_vm15, %v5411_v20  ;;  %v10611_v2 = vpop.f32.mrf.mxu1 }
 0x82e   : > { %v6151_v54 = vpop.f32.mrf.mxu3 }
 0x830   : > { %v6038_v35 = vpop.f32.mrf.mxu0 }
 0x831   : > { %v10598_v16 = vadd.f32 %v6151_v54, %v6038_v35 }
 0x832   : > { %v5603_v38 = vpop.permute.xlu0 %5602  ;;  %v5817_v28 = vld [vmem:[#allocation4 + $0x258] sm:$0xff]  ;;  %v4579_v0 = vpop.permute.xlu1 %4578 }
 0x833   : > { %5672 = vst.msk [vmem:[#allocation4 + $0x278] sm:$0xff] %vm2931_vm0, %v5603_v38  ;;  %6061 = vmatmul.f32.gmra.mxu0 %v5817_v28  ;;  %v4773_v8 = vpop.permute.xlu2 %4772 }
 0x834   : > { %4648 = vst.msk [vmem:[#allocation4 + $0x270] sm:$0xff] %vm2545_vm14, %v4579_v0 }
 0x835   : > { %4840 = vst.msk [vmem:[#allocation4 + $0x270] sm:$0xff] %vm2738_vm15, %v4771_v3  ;;  %v10618_v54 = vpop.f32.mrf.mxu1 }
 0x83a   : > { %v4963_v26 = vpop.permute.xlu0 %4962  ;;  %v5821_v50 = vld [vmem:[#allocation4 + $0x278] sm:$0xff]  ;;  %v5221_v20 = vpop.permute.xlu1 %5220 }
 0x83b   : > { %5032 = vst.msk [vmem:[#allocation4 + $0x270] sm:$0xff] %vm2931_vm0, %v4963_v26  ;;  %6177 = vmatmul.f32.gmra.mxu3 %v5821_v50  ;;  %v5415_v29 = vpop.permute.xlu2 %5414 }
 0x83c   : > { %5289 = vst.msk [vmem:[#allocation4 + $0x290] sm:$0xff] %vm2545_vm14, %v5221_v20 }
 0x83d   : > { %5481 = vst.msk [vmem:[#allocation4 + $0x290] sm:$0xff] %vm2738_vm15, %v5413_v23  ;;  %v10625_v20 = vpop.f32.mrf.mxu1 }
 0x83e   : > { %v6154_v43 = vpop.f32.mrf.mxu3 }
 0x840   : > { %v6041_v15 = vpop.f32.mrf.mxu0 }
 0x841   : > { %v10608_v4 = vadd.f32 %v6154_v43, %v6041_v15 }
 0x842   : > { %v5605_v17 = vpop.permute.xlu0 %5604  ;;  %v5820_v6 = vld [vmem:[#allocation4 + $0x270] sm:$0xff]  ;;  %v4581_v3 = vpop.permute.xlu1 %4580 }
 0x843   : > { %5673 = vst.msk [vmem:[#allocation4 + $0x290] sm:$0xff] %vm2931_vm0, %v5605_v17  ;;  %6064 = vmatmul.f32.gmra.mxu0 %v5820_v6  ;;  %v4775_v44 = vpop.permute.xlu2 %4774 }
 0x844   : > { %4649 = vst.msk [vmem:[#allocation4 + $0x288] sm:$0xff] %vm2545_vm14, %v4581_v3 }
 0x845   : > { %4841 = vst.msk [vmem:[#allocation4 + $0x288] sm:$0xff] %vm2738_vm15, %v4773_v8 }
 0x84a   : > { %v4965_v24 = vpop.permute.xlu0 %4964  ;;  %v5824_v23 = vld [vmem:[#allocation4 + $0x290] sm:$0xff]  ;;  %v5223_v40 = vpop.permute.xlu1 %5222 }
 0x84b   : > { %5033 = vst.msk [vmem:[#allocation4 + $0x288] sm:$0xff] %vm2931_vm0, %v4965_v24  ;;  %6180 = vmatmul.f32.gmra.mxu3 %v5824_v23  ;;  %v5417_v0 = vpop.permute.xlu2 %5416  ;;  %v6273_v23 = vpop.f32.mrf.mxu1 }
 0x84c   : > { %5290 = vst.msk [vmem:[#allocation4 + $0x2a8] sm:$0xff] %vm2545_vm14, %v5223_v40 }
 0x84d   : > { %5482 = vst.msk [vmem:[#allocation4 + $0x2a8] sm:$0xff] %vm2738_vm15, %v5415_v29 }
 0x84e   : > { %v6157_v35 = vpop.f32.mrf.mxu3 }
 0x850   : > { %v6044_v38 = vpop.f32.mrf.mxu0 }
 0x851   : > { %v10620_v28 = vadd.f32 %v6157_v35, %v6044_v38 }
 0x852   : > { %v5607_v26 = vpop.permute.xlu0 %5606  ;;  %v5823_v8 = vld [vmem:[#allocation4 + $0x288] sm:$0xff]  ;;  %v4583_v50 = vpop.permute.xlu1 %4582 }
 0x853   : > { %5674 = vst.msk [vmem:[#allocation4 + $0x2a8] sm:$0xff] %vm2931_vm0, %v5607_v26  ;;  %6067 = vmatmul.f32.gmra.mxu0 %v5823_v8  ;;  %v4777_v17 = vpop.permute.xlu2 %4776  ;;  %v5834_v8 = vld [vmem:[#allocation4 + $0x2e0] sm:$0xff] }
 0x854   : > { %4650 = vst.msk [vmem:[#allocation4 + $0x2a0] sm:$0xff] %vm2545_vm14, %v4583_v50  ;;  %6728 = vmatmul.msk.f32.gmra.mxu1 %vm2232_vm12, %v5834_v8 }
 0x855   : > { %4842 = vst.msk [vmem:[#allocation4 + $0x2a0] sm:$0xff] %vm2738_vm15, %v4775_v44 }
 0x85a   : > { %v4967_v29 = vpop.permute.xlu0 %4966  ;;  %v5827_v43 = vld [vmem:[#allocation4 + $0x2a8] sm:$0xff]  ;;  %v5225_v15 = vpop.permute.xlu1 %5224 }
 0x85b   : > { %5034 = vst.msk [vmem:[#allocation4 + $0x2a0] sm:$0xff] %vm2931_vm0, %v4967_v29  ;;  %6183 = vmatmul.f32.gmra.mxu3 %v5827_v43  ;;  %v5419_v26 = vpop.permute.xlu2 %5418 }
 0x85c   : > { %5291 = vst.msk [vmem:[#allocation4 + $0x2c0] sm:$0xff] %vm2545_vm14, %v5225_v15 }
 0x85d   : > { %5483 = vst.msk [vmem:[#allocation4 + $0x2c0] sm:$0xff] %vm2738_vm15, %v5417_v0 }
 0x85e   : > { %v6160_v6 = vpop.f32.mrf.mxu3 }
 0x860   : > { %v6047_v3 = vpop.f32.mrf.mxu0 }
 0x861   : > { %v6161_v24 = vadd.f32 %v6160_v6, %v6047_v3  ;;  %v5837_v3 = vld [vmem:[#allocation4 + $0x2f8] sm:$0xff] }
 0x862   : > { %v5609_v40 = vpop.permute.xlu0 %5608  ;;  %v5826_v35 = vld [vmem:[#allocation4 + $0x2a0] sm:$0xff]  ;;  %v4585_v38 = vpop.permute.xlu1 %4584  ;;  %6729 = vmatmul.msk.f32.gmra.mxu1 %vm2232_vm12, %v5837_v3 }
 0x863   : > { %v10630_v44 = vadd.f32 %v6273_v23, %v6161_v24  ;;  %5675 = vst.msk [vmem:[#allocation4 + $0x2c0] sm:$0xff] %vm2931_vm0, %v5609_v40  ;;  %6070 = vmatmul.f32.gmra.mxu0 %v5826_v35  ;;  %v4779_v43 = vpop.permute.xlu2 %4778 }
 0x864   : > { %4651 = vst.msk [vmem:[#allocation4 + $0x2b8] sm:$0xff] %vm2545_vm14, %v4585_v38 }
 0x865   : > { %4843 = vst.msk [vmem:[#allocation4 + $0x2b8] sm:$0xff] %vm2738_vm15, %v4777_v17 }
 0x86a   : > { %v4969_v0 = vpop.permute.xlu0 %4968  ;;  %v5830_v50 = vld [vmem:[#allocation4 + $0x2c0] sm:$0xff]  ;;  %v5227_v29 = vpop.permute.xlu1 %5226 }
 0x86b   : > { %5035 = vst.msk [vmem:[#allocation4 + $0x2b8] sm:$0xff] %vm2931_vm0, %v4969_v0  ;;  %6186 = vmatmul.f32.gmra.mxu3 %v5830_v50  ;;  %v5421_v24 = vpop.permute.xlu2 %5420 }
 0x86c   : > { %5292 = vst.msk [vmem:[#allocation4 + $0x2d8] sm:$0xff] %vm2545_vm14, %v5227_v29 }
 0x86d   : > { %5484 = vst.msk [vmem:[#allocation4 + $0x2d8] sm:$0xff] %vm2738_vm15, %v5419_v26 }
 0x86e   : > { %v10656_v3 = vpop.f32.mrf.mxu3 }
 0x872   : > { %v5611_v15 = vpop.permute.xlu0 %5610  ;;  %v5829_v6 = vld [vmem:[#allocation4 + $0x2b8] sm:$0xff]  ;;  %v4587_v17 = vpop.permute.xlu1 %4586 }
 0x873   : > { %5676 = vst.msk [vmem:[#allocation4 + $0x2d8] sm:$0xff] %vm2931_vm0, %v5611_v15  ;;  %6073 = vmatmul.f32.gmra.mxu0 %v5829_v6  ;;  %v4781_v0 = vpop.permute.xlu2 %4780  ;;  %v10650_v15 = vpop.f32.mrf.mxu1 }
 0x874   : > { %4652 = vst.msk [vmem:[#allocation4 + $0x2d0] sm:$0xff] %vm2545_vm14, %v4587_v17  ;;  %v10654_v17 = vpop.f32.mrf.mxu0 }
 0x875   : > { %4844 = vst.msk [vmem:[#allocation4 + $0x2d0] sm:$0xff] %vm2738_vm15, %v4779_v43 }
 0x87a   : > { %v4971_v23 = vpop.permute.xlu0 %4970  ;;  %v5833_v40 = vld [vmem:[#allocation4 + $0x2d8] sm:$0xff]  ;;  %v5229_v35 = vpop.permute.xlu1 %5228 }
 0x87b   : > { %5036 = vst.msk [vmem:[#allocation4 + $0x2d0] sm:$0xff] %vm2931_vm0, %v4971_v23  ;;  %6189 = vmatmul.f32.gmra.mxu3 %v5833_v40  ;;  %v10652_v6 = vpop.f32.mrf.mxu1 }
 0x87c   : > { %5293 = vst.msk [vmem:[#allocation4 + $0x2f0] sm:$0xff] %vm2545_vm14, %v5229_v35 }
 0x87d   : > { %5485 = vst.msk [vmem:[#allocation4 + $0x2f0] sm:$0xff] %vm2738_vm15, %v5421_v24 }
 0x87e   : > { %v10662_v40 = vpop.f32.mrf.mxu3 }
 0x880   : > { %v10660_v23 = vpop.f32.mrf.mxu0 }
 0x882   : > { %v5613_v38 = vpop.permute.xlu0 %5612  ;;  %v5832_v26 = vld [vmem:[#allocation4 + $0x2d0] sm:$0xff]  ;;  %v4589_v8 = vpop.permute.xlu1 %4588 }
 0x883   : > { %5677 = vst.msk [vmem:[#allocation4 + $0x2f0] sm:$0xff] %vm2931_vm0, %v5613_v38  ;;  %6076 = vmatmul.f32.gmra.mxu0 %v5832_v26  ;;  %v10658_v24 = vpop.f32.mrf.mxu1  ;;  %v6104_v26 = vadd.f32 %v10326_v47, %v10328_v32  ;;  %v6113_v47 = vadd.f32 %v10365_v41, %v10367_v13 }
 0x884   : > { %4653 = vst.msk [vmem:[#allocation4 + $0x2e8] sm:$0xff] %vm2545_vm14, %v4589_v8 }
 0x885   : > { %4845 = vst.msk [vmem:[#allocation4 + $0x2e8] sm:$0xff] %vm2738_vm15, %v4781_v0  ;;  %v6101_v0 = vadd.f32 %v10313_v42, %v10315_v60  ;;  %v6382_v42 = vld [vmem:[%s11097_s5 + $0x18] sm:$0xff] }
 0x886   : > { %11284 = vst [vmem:[#allocation25_spill] sm:$0xff] %v10658_v24  ;;  %6398 = vmatpush.msra.mxu2 %v6382_v42 }
 0x88a   : > { %v4973_v50 = vpop.permute.xlu0 %4972  ;;  %v5836_v29 = vld [vmem:[#allocation4 + $0x2f0] sm:$0xff] }
 0x88b   : > { %5037 = vst.msk [vmem:[#allocation4 + $0x2e8] sm:$0xff] %vm2931_vm0, %v4973_v50  ;;  %6192 = vmatmul.f32.gmra.mxu3 %v5836_v29  ;;  %v10664_v35 = vpop.f32.mrf.mxu1  ;;  %v6107_v50 = vadd.f32 %v10339_v12, %v10341_v61  ;;  %v10677_v29 = vadd.f32 %v10177_v11, %v6104_v26 }
 0x88c   : > { %11285 = vst [vmem:[#allocation27_spill] sm:$0xff] %v10664_v35  ;;  %v10682_v35 = vadd.f32 %v10161_v30, %v6101_v0  ;;  %v6116_v30 = vadd.f32 %v10378_v46, %v10380_v9  ;;  %v6122_v9 = vadd.f32 %v10404_v59, %v10406_v22 }
 0x88d   : > { %v10685_v24 = vadd.f32 %v10192_v33, %v6107_v50  ;;  %v6310_v11 = vsel %vm2232_vm12, %v10677_v29, 0.0 }
 0x88e   : > { %v10670_v8 = vpop.f32.mrf.mxu3  ;;  %v6309_v61 = vsel %vm2232_vm12, %v10682_v35, 0.0  ;;  %v10717_v46 = vadd.f32 %v10236_v14, %v6116_v30 }
 0x88f   : > { %v6311_v41 = vadd.f32 %v6310_v11, %v6309_v61 }
 0x890   : > { %v10666_v38 = vpop.f32.mrf.mxu0 }
 0x892   : > { %v5835_v43 = vld [vmem:[#allocation4 + $0x2e8] sm:$0xff] }
 0x893   : > { %6079 = vmatmul.f32.gmra.mxu0 %v5835_v43  ;;  %v6110_v43 = vadd.f32 %v10352_v52, %v10354_v45  ;;  %v10701_v33 = vpop.f32.mrf.mxu1  ;;  %v6312_v52 = vsel %vm2232_vm12, %v10685_v24, 0.0  ;;  %v10710_v45 = vadd.f32 %v10221_v39, %v6113_v47 }
 0x894   : > { %v6313_v26 = vadd.f32 %v6312_v52, %v6311_v41  ;;  %v10753_v52 = vadd.f32 %v10544_v55, %v10460_v37  ;;  %v10768_v55 = vadd.f32 %v10568_v36, %v10506_v63 }
 0x895   : > { %v10697_v32 = vadd.f32 %v10205_v10, %v6110_v43  ;;  %v6119_v10 = vadd.f32 %v10391_v18, %v10393_v5  ;;  %v6316_v0 = vsel %vm2232_vm12, %v10710_v45, 0.0  ;;  %v6318_v18 = vsel %vm2232_vm12, %v10717_v46, 0.0 }
 0x896   : > { %v10731_v5 = vadd.f32 %v10496_v62, %v6122_v9  ;;  %v10747_v62 = vadd.f32 %v10533_v27, %v10441_v34  ;;  %v10762_v34 = vadd.f32 %v10556_v57, %v10479_v53  ;;  %v6328_v37 = vsel %vm2232_vm12, %v10753_v52, 0.0 }
 0x897   : > { %v6314_v13 = vsel %vm2232_vm12, %v10697_v32, 0.0  ;;  %v10724_v39 = vadd.f32 %v10483_v31, %v6119_v10  ;;  %v10741_v31 = vadd.f32 %v10516_v25, %v10422_v51  ;;  %v6381_v51 = vld [vmem:[%s11097_s5 + $0x10] sm:$0xff]  ;;  %v10776_v53 = vadd.f32 %v10581_v48, %v10531_v58 }
 0x898   : > { %v6315_v50 = vadd.f32 %v6314_v13, %v6313_v26  ;;  %v6322_v11 = vsel %vm2232_vm12, %v10731_v5, 0.0  ;;  %v6326_v25 = vsel %vm2232_vm12, %v10747_v62, 0.0  ;;  %6399 = vmatpush.msra.mxu2 %v6381_v51  ;;  %v10791_v58 = vadd.f32 %v10596_v7, %v10572_v1 }
 0x899   : > { %v6320_v59 = vsel %vm2232_vm12, %v10724_v39, 0.0  ;;  %v6324_v61 = vsel %vm2232_vm12, %v10741_v31, 0.0  ;;  %v10809_v51 = vadd.f32 %v10618_v54, %v10608_v4  ;;  %v6167_v4 = vadd.f32 %v10662_v40, %v10660_v23 }
 0x89a   : > { %v6317_v14 = vadd.f32 %v6316_v0, %v6315_v50  ;;  %v6330_v0 = vsel %vm2232_vm12, %v10762_v34, 0.0  ;;  %v6332_v50 = vsel %vm2232_vm12, %v10768_v55, 0.0 }
 0x89b   : > { %v10737_v22 = vpop.f32.mrf.mxu1 }
 0x89c   : > { %v6319_v42 = vadd.f32 %v6318_v18, %v6317_v14  ;;  %v10782_v18 = vadd.f32 %v10590_v19, %v10551_v49  ;;  %v6380_v14 = vld [vmem:[%s11097_s5 + $0x8] sm:$0xff]  ;;  %v10797_v19 = vadd.f32 %v10603_v21, %v10586_v56 }
 0x89d   : > { %6400 = vmatpush.msra.mxu2 %v6380_v14  ;;  %v11286_v14 = vld [vmem:[#allocation25_spill] sm:$0xff] }
 0x89e   : > { %v10703_v12 = vpop.f32.mrf.mxu3  ;;  %v6321_v30 = vadd.f32 %v6320_v59, %v6319_v42  ;;  %v6334_v59 = vsel %vm2232_vm12, %v10776_v53, 0.0  ;;  %v6336_v49 = vsel %vm2232_vm12, %v10782_v18, 0.0 }
 0x8a0   : > { %v10692_v60 = vpop.f32.mrf.mxu0  ;;  %v6323_v10 = vadd.f32 %v6322_v11, %v6321_v30  ;;  %v6338_v30 = vsel %vm2232_vm12, %v10791_v58, 0.0 }
 0x8a1   : > { %v6173_v23 = vadd.f32 %v10703_v12, %v10692_v60 }
 0x8a2   : > { %v6325_v27 = vadd.f32 %v6324_v61, %v6323_v10  ;;  %v10803_v61 = vadd.f32 %v10611_v2, %v10598_v16  ;;  %v6340_v10 = vsel %vm2232_vm12, %v10797_v19, 0.0  ;;  %v6164_v16 = vadd.f32 %v10656_v3, %v10654_v17 }
 0x8a3   : > { %v10770_v26 = vpop.f32.mrf.mxu1  ;;  %v6348_v17 = vsel %vm2232_vm12, %v10630_v44, 0.0  ;;  %v10833_v3 = vadd.f32 %v10652_v6, %v6167_v4 }
 0x8a4   : > { %v6327_v9 = vadd.f32 %v6326_v25, %v6325_v27  ;;  %v6342_v21 = vsel %vm2232_vm12, %v10803_v61, 0.0  ;;  %v10815_v27 = vadd.f32 %v10625_v20, %v10620_v28  ;;  %v6170_v28 = vadd.f32 %v10670_v8, %v10666_v38 }
 0x8a5   : > { %v6352_v6 = vsel %vm2232_vm12, %v10833_v3, 0.0 }
 0x8a6   : > { %v6329_v57 = vadd.f32 %v6328_v37, %v6327_v9  ;;  %v6344_v9 = vsel %vm2232_vm12, %v10809_v51, 0.0 }
 0x8a8   : > { %v6331_v63 = vadd.f32 %v6330_v0, %v6329_v57  ;;  %v6346_v0 = vsel %vm2232_vm12, %v10815_v27, 0.0  ;;  %v10826_v57 = vadd.f32 %v10650_v15, %v6164_v16 }
 0x8aa   : > { %v6333_v48 = vadd.f32 %v6332_v50, %v6331_v63  ;;  %v6350_v15 = vsel %vm2232_vm12, %v10826_v57, 0.0 }
 0x8ab   : > { %v6297_v7 = vpop.f32.mrf.mxu1 }
 0x8ac   : > { %v6335_v11 = vadd.f32 %v6334_v59, %v6333_v48  ;;  %v10840_v59 = vadd.f32 %v11286_v14, %v6170_v28 }
 0x8ae   : > { %v10733_v47 = vpop.f32.mrf.mxu3  ;;  %v6337_v1 = vadd.f32 %v6336_v49, %v6335_v11  ;;  %v11287_v49 = vld [vmem:[#allocation27_spill] sm:$0xff] }
 0x8af   : > { %v10847_v11 = vadd.f32 %v11287_v49, %v6173_v23 }
 0x8b0   : > { %v10726_v43 = vpop.f32.mrf.mxu0  ;;  %v6339_v25 = vadd.f32 %v6338_v30, %v6337_v1  ;;  %v6354_v30 = vsel %vm2232_vm12, %v10840_v59, 0.0 }
 0x8b1   : > { %v6176_v38 = vadd.f32 %v10733_v47, %v10726_v43  ;;  %v6379_v43 = vld [vmem:[%s11097_s5] sm:$0xff]  ;;  %v6356_v47 = vsel %vm2232_vm12, %v10847_v11, 0.0 }
 0x8b2   : > { %v6341_v2 = vadd.f32 %v6340_v10, %v6339_v25  ;;  %6401 = vmatpush.msra.mxu2 %v6379_v43 }
 0x8b3   : > { %v6300_v63 = vpop.f32.mrf.mxu1  ;;  %v10852_v1 = vadd.f32 %v10701_v33, %v6176_v38  ;;  %v6407_v33 = vld [vmem:[%s11098_s6] sm:$0xff] }
 0x8b4   : > { %v6343_v54 = vadd.f32 %v6342_v21, %v6341_v2  ;;  %6427 = vmatpush.msrb.mxu2 %v6407_v33 }
 0x8b6   : > { %v6345_v20 = vadd.f32 %v6344_v9, %v6343_v54 }
 0x8b8   : > { %v6347_v40 = vadd.f32 %v6346_v0, %v6345_v20 }
 0x8ba   : > { %v6349_v8 = vadd.f32 %v6348_v17, %v6347_v40 }
 0x8bc   : > { %v6351_v12 = vadd.f32 %v6350_v15, %v6349_v8 }
 0x8be   : > { %v6178_v13 = vpop.f32.mrf.mxu3  ;;  %v6353_v25 = vadd.f32 %v6352_v6, %v6351_v12 }
 0x8c0   : > { %v6065_v41 = vpop.f32.mrf.mxu0 }
 0x8c1   : > { %v6179_v60 = vadd.f32 %v6178_v13, %v6065_v41  ;;  %v6355_v13 = vadd.f32 %v6354_v30, %v6353_v25 }
 0x8c3   : > { %v10860_v21 = vadd.f32 %v10737_v22, %v6179_v60  ;;  %v6357_v4 = vadd.f32 %v6356_v47, %v6355_v13 }
 0x8ce   : > { %v6181_v42 = vpop.f32.mrf.mxu3 }
 0x8d0   : > { %v6068_v36 = vpop.f32.mrf.mxu0 }
 0x8d1   : > { %v6182_v10 = vadd.f32 %v6181_v42, %v6068_v36  ;;  %v6358_v36 = vsel %vm2232_vm12, %v10852_v1, 0.0  ;;  %v6303_v9 = vpop.f32.mrf.mxu1 }
 0x8d2   : > { %v6359_v0 = vadd.f32 %v6358_v36, %v6357_v4 }
 0x8d3   : > { %v10868_v42 = vadd.f32 %v10770_v26, %v6182_v10 }
 0x8d5   : > { %v6362_v28 = vsel %vm2232_vm12, %v10868_v42, 0.0 }
 0x8de   : > { %v6184_v37 = vpop.f32.mrf.mxu3 }
 0x8df   : > { %v6306_v15 = vpop.f32.mrf.mxu1 }
 0x8e0   : > { %v6071_v56 = vpop.f32.mrf.mxu0 }
 0x8e1   : > { %v6185_v41 = vadd.f32 %v6184_v37, %v6071_v56  ;;  %v6360_v56 = vsel %vm2232_vm12, %v10860_v21, 0.0 }
 0x8e2   : > { %v6361_v17 = vadd.f32 %v6360_v56, %v6359_v0 }
 0x8e3   : > { %v10872_v37 = vadd.f32 %v6297_v7, %v6185_v41 }
 0x8e4   : > { %v6363_v40 = vadd.f32 %v6362_v28, %v6361_v17 }
 0x8e5   : > { %v6364_v26 = vsel %vm2232_vm12, %v10872_v37, 0.0 }
 0x8e6   : > { %v6365_v7 = vadd.f32 %v6364_v26, %v6363_v40 }
 0x8ee   : > { %v6187_v48 = vpop.f32.mrf.mxu3 }
 0x8f0   : > { %v6074_v50 = vpop.f32.mrf.mxu0 }
 0x8f1   : > { %v6188_v2 = vadd.f32 %v6187_v48, %v6074_v50 }
 0x8f3   : > { %v10876_v20 = vadd.f32 %v6300_v63, %v6188_v2 }
 0x8f5   : > { %v6366_v50 = vsel %vm2232_vm12, %v10876_v20, 0.0 }
 0x8f6   : > { %v6367_v63 = vadd.f32 %v6366_v50, %v6365_v7 }
 0x8fe   : > { %v6190_v22 = vpop.f32.mrf.mxu3 }
 0x900   : > { %v6077_v16 = vpop.f32.mrf.mxu0 }
 0x901   : > { %v6191_v54 = vadd.f32 %v6190_v22, %v6077_v16 }
 0x903   : > { %v10880_v23 = vadd.f32 %v6303_v9, %v6191_v54 }
 0x905   : > { %v6368_v8 = vsel %vm2232_vm12, %v10880_v23, 0.0 }
 0x906   : > { %v6369_v49 = vadd.f32 %v6368_v8, %v6367_v63 }
 0x90e   : > { %v6193_v14 = vpop.f32.mrf.mxu3 }
 0x910   : > { %v6080_v38 = vpop.f32.mrf.mxu0 }
 0x911   : > { %v6194_v48 = vadd.f32 %v6193_v14, %v6080_v38 }
 0x913   : > { %v10886_v6 = vadd.f32 %v6306_v15, %v6194_v48 }
 0x915   : > { %v6370_v60 = vsel %vm2232_vm12, %v10886_v6, 0.0 }
 0x916   : > { %v6371_v12 = vadd.f32 %v6370_v60, %v6369_v49 }
 0x918   : > { %v6372_v30 = vrot.slane %v6371_v12, 4 }
 0x91a   : > { %v6373_v10 = vadd.f32 %v6372_v30, %v6371_v12  ;;  %v11288_v12 = vld [vmem:[#allocation10_spill] sm:$0xff]  ;;  %v11289_v30 = vld [vmem:[#allocation11_spill] sm:$0xff] }
 0x91c   : > { %v6374_v25 = vrot.slane %v6373_v10, 2 }
 0x91e   : > { %v6375_v43 = vadd.f32 %v6374_v25, %v6373_v10 }
 0x920   : > { %v6376_v47 = vrot.slane %v6375_v43, 1 }
 0x922   : > { %v6377_v41 = vadd.f32 %v6376_v47, %v6375_v43  ;;  %v11291_v43 = vld [vmem:[#allocation13_spill] sm:$0xff]  ;;  %v11292_v47 = vld [vmem:[#allocation14_spill] sm:$0xff] }
 0x924   : > { %v6378_v13 = vmul.f32 0.00390625, %v6377_v41 }
 0x926   : > { %6730 = vmatmul.msk.f32.vlgmr.msra.gmra.mxu2 %vm2232_vm12, %v6378_v13  ;;  %v11294_v13 = vld [vmem:[#allocation18_spill] sm:$0xff] }
 0x9a9   : > { %v6403_v16 = vpop.f32.mrf.mxu2 }
 0x9aa   : > { %v6406_v33 = vmax.f32 %v6403_v16, 0.0 }
 0x9ac   : > { %6731 = vmatmul.msk.f32.vlgmr.msrb.gmra.mxu2 %vm6408_vm1, %v6406_v33 }
 0xa2f   : > { %v6429_v36 = vpop.f32.mrf.mxu2 }
 0xa30   : > { %v6732_v2 = vmul.f32 -1.442695, %v6429_v36  ;;  %v11295_v36 = vld [vmem:[#allocation24_spill] sm:$0xff] }
 0xa32   : > { %6817 = vpow2.f32 %v6732_v2 }
 0xa38   : > { %v6818_v9 = vpop.eup %6817 }
 0xa39   : > { %v6435_v4 = vadd.f32 1.0, %v6818_v9  ;;  %v11296_v9 = vld [vmem:[#allocation26_spill] sm:$0xff] }
 0xa3b   : > { %6819 = vrcp.f32 %v6435_v4  ;;  %v6447_v0 = vand.u32 2147483648, %v6435_v4  ;;  %v6445_v17 = vand.u32 2147483647, %v6435_v4  ;;  %vm6441_vm3 = vweird.f32 %v6435_v4 }
 0xa3d   : > { %v6448_v40 = vor.u32 1.1754944e-38, %v6447_v0  ;;  %vm6446_vm5 = vcmp.eq.f32.partialorder %v6445_v17, 8.507059e+37 }
 0xa41   : > { %v6820_v22 = vpop.eup %6819 }
 0xa42   : > { %v6437_v56 = vmul.f32 %v6820_v22, %v6435_v4  ;;  %vm6442_vm2 = vweird.f32 %v6820_v22 }
 0xa43   : > { %vm6443_vm4 = vmor %vm6441_vm3, %vm6442_vm2 }
 0xa44   : > { %v6438_v54 = vsub.f32 1.0, %v6437_v56 }
 0xa46   : > { %v6439_v28 = vmul.f32 %v6820_v22, %v6438_v54  ;;  %v11298_v54 = vld [vmem:[#allocation31_spill] sm:$0xff] }
 0xa48   : > { %v6440_v26 = vadd.f32 %v6820_v22, %v6439_v28  ;;  %v11299_v28 = vld [vmem:[#allocation33_spill] sm:$0xff] }
 0xa4a   : > { %v6444_v50 = vsel %vm6443_vm4, %v6820_v22, %v6440_v26  ;;  %v11297_v22 = vld [vmem:[#allocation28_spill] sm:$0xff] }
 0xa4b   : > { %v6449_v15 = vsel %vm6446_vm5, %v6448_v40, %v6444_v50  ;;  %v11300_v26 = vld [vmem:[#allocation36_spill] sm:$0xff]  ;;  %v11301_v50 = vld [vmem:[#allocation37_spill] sm:$0xff] }
 0xa4c   : > { %v10891_v7 = vperm.slane %v6449_v15, 0 }
 0xa4e   : > { %v6452_v14 = vmul.f32 %v10891_v7, %v10682_v35  ;;  %v6453_v38 = vmul.f32 %v10891_v7, %v10677_v29  ;;  %v6454_v8 = vmul.f32 %v10891_v7, %v10685_v24  ;;  %v6455_v48 = vmul.f32 %v10891_v7, %v10697_v32  ;;  %v11290_v29 = vld [vmem:[#allocation12_spill] sm:$0xff] }
 0xa4f   : > { %v6456_v63 = vmul.f32 %v10891_v7, %v10710_v45  ;;  %v6457_v49 = vmul.f32 %v10891_v7, %v10717_v46  ;;  %v6458_v60 = vmul.f32 %v10891_v7, %v10724_v39  ;;  %v6459_v24 = vmul.f32 %v10891_v7, %v10731_v5  ;;  %v11293_v39 = vld [vmem:[#allocation16_spill] sm:$0xff] }
 0xa50   : > { %v6484_v35 = vadd.f32 %v6452_v14, %v11288_v12  ;;  %v6485_v10 = vadd.f32 %v6453_v38, %v11289_v30  ;;  %v6486_v25 = vadd.f32 %v6454_v8, %v11290_v29  ;;  %v6487_v32 = vadd.f32 %v6455_v48, %v11291_v43  ;;  %v11302_v14 = vld [vmem:[#allocation39_spill] sm:$0xff]  ;;  %v11303_v8 = vld [vmem:[#allocation40_spill] sm:$0xff] }
 0xa51   : > { %v6460_v45 = vmul.f32 %v10891_v7, %v10741_v31  ;;  %v6488_v41 = vadd.f32 %v6456_v63, %v11292_v47  ;;  %v6461_v46 = vmul.f32 %v10891_v7, %v10747_v62  ;;  %v6489_v5 = vadd.f32 %v6457_v49, %v11293_v39  ;;  %v11304_v63 = vld [vmem:[#allocation41_spill] sm:$0xff]  ;;  %v11309_v43 = vld [vmem:[#allocation51_spill] sm:$0xff] }
 0xa52   : > { %6516 = vst.msk [vmem:[%s10919_s18] sm:$0xff] %vm2232_vm12, %v6484_v35  ;;  %v6462_v31 = vmul.f32 %v10891_v7, %v10753_v52  ;;  %v6490_v16 = vadd.f32 %v6458_v60, %v11294_v13  ;;  %v6463_v33 = vmul.f32 %v10891_v7, %v10762_v34  ;;  %v6491_v2 = vadd.f32 %v6459_v24, %v11295_v36  ;;  %v11305_v60 = vld [vmem:[#allocation42_spill] sm:$0xff]  ;;  %v11306_v35 = vld [vmem:[#allocation45_spill] sm:$0xff] }
 0xa53   : > { %6517 = vst.msk [vmem:[%s10919_s18 + $0x8] sm:$0xff] %vm2232_vm12, %v6485_v10  ;;  %v6464_v62 = vmul.f32 %v10891_v7, %v10768_v55  ;;  %v6492_v4 = vadd.f32 %v6460_v45, %v11296_v9  ;;  %v6465_v52 = vmul.f32 %v10891_v7, %v10776_v53  ;;  %v6493_v56 = vadd.f32 %v6461_v46, %v11297_v22  ;;  %v11307_v10 = vld [vmem:[#allocation47_spill] sm:$0xff]  ;;  %v11310_v45 = vld [vmem:[#allocation53_spill] sm:$0xff] }
 0xa54   : > { %6518 = vst.msk [vmem:[%s10919_s18 + $0x10] sm:$0xff] %vm2232_vm12, %v6486_v25  ;;  %v6466_v34 = vmul.f32 %v10891_v7, %v10782_v18  ;;  %v6494_v0 = vadd.f32 %v6462_v31, %v11298_v54  ;;  %v6467_v55 = vmul.f32 %v10891_v7, %v10791_v58  ;;  %v6495_v17 = vadd.f32 %v6463_v33, %v11299_v28  ;;  %v11308_v25 = vld [vmem:[#allocation48_spill] sm:$0xff]  ;;  %v11312_v39 = vld [vmem:[#allocation57_spill] sm:$0xff] }
 0xa55   : > { %6519 = vst.msk [vmem:[%s10919_s18 + $0x18] sm:$0xff] %vm2232_vm12, %v6487_v32  ;;  %v6468_v53 = vmul.f32 %v10891_v7, %v10797_v19  ;;  %v6496_v40 = vadd.f32 %v6464_v62, %v11300_v26  ;;  %v6469_v18 = vmul.f32 %v10891_v7, %v10803_v61  ;;  %v6497_v15 = vadd.f32 %v6465_v52, %v11301_v50  ;;  %v11315_v33 = vld [vmem:[#allocation60_spill] sm:$0xff]  ;;  %v11317_v62 = vld [vmem:[#allocation62_spill] sm:$0xff] }
 0xa56   : > { %6520 = vst.msk [vmem:[%s10919_s18 + $0x20] sm:$0xff] %vm2232_vm12, %v6488_v41  ;;  %v6470_v58 = vmul.f32 %v10891_v7, %v10809_v51  ;;  %v6498_v38 = vadd.f32 %v6466_v34, %v11302_v14  ;;  %v6471_v19 = vmul.f32 %v10891_v7, %v10815_v27  ;;  %v6499_v48 = vadd.f32 %v6467_v55, %v11303_v8  ;;  %v11311_v41 = vld [vmem:[#allocation54_spill] sm:$0xff] }
 0xa57   : > { %6521 = vst.msk [vmem:[%s10919_s18 + $0x28] sm:$0xff] %vm2232_vm12, %v6489_v5  ;;  %v6472_v61 = vmul.f32 %v10891_v7, %v10630_v44  ;;  %v6500_v49 = vadd.f32 %v6468_v53, %v11304_v63  ;;  %v6473_v51 = vmul.f32 %v10891_v7, %v10826_v57  ;;  %v6501_v12 = vadd.f32 %v6469_v18, %v11305_v60 }
 0xa58   : > { %6522 = vst.msk [vmem:[%s10919_s18 + $0x30] sm:$0xff] %vm2232_vm12, %v6490_v16  ;;  %v6474_v27 = vmul.f32 %v10891_v7, %v10833_v3  ;;  %v6502_v30 = vadd.f32 %v6470_v58, %v11306_v35  ;;  %v6475_v44 = vmul.f32 %v10891_v7, %v10840_v59  ;;  %v6503_v29 = vadd.f32 %v6471_v19, %v11307_v10  ;;  %v11314_v16 = vld [vmem:[#allocation59_spill] sm:$0xff] }
 0xa59   : > { %6523 = vst.msk [vmem:[%s10919_s18 + $0x38] sm:$0xff] %vm2232_vm12, %v6491_v2  ;;  %v6476_v57 = vmul.f32 %v10891_v7, %v10847_v11  ;;  %v6504_v24 = vadd.f32 %v6472_v61, %v11308_v25  ;;  %v6477_v3 = vmul.f32 %v10891_v7, %v10852_v1  ;;  %v6505_v32 = vadd.f32 %v6473_v51, %v11309_v43 }
 0xa5a   : > { %6524 = vst.msk [vmem:[%s10919_s18 + $0x40] sm:$0xff] %vm2232_vm12, %v6492_v4  ;;  %v6478_v59 = vmul.f32 %v10891_v7, %v10860_v21  ;;  %v6506_v47 = vadd.f32 %v6474_v27, %v11310_v45  ;;  %v6479_v11 = vmul.f32 %v10891_v7, %v10868_v42  ;;  %v6507_v46 = vadd.f32 %v6475_v44, %v11311_v41  ;;  %v11313_v42 = vld [vmem:[#allocation58_spill] sm:$0xff]  ;;  %v11318_v4 = vld [vmem:[#allocation63_spill] sm:$0xff] }
 0xa5b   : > { %6525 = vst.msk [vmem:[%s10919_s18 + $0x48] sm:$0xff] %vm2232_vm12, %v6493_v56  ;;  %v6480_v1 = vmul.f32 %v10891_v7, %v10872_v37  ;;  %v6508_v21 = vadd.f32 %v6476_v57, %v11312_v39  ;;  %v6481_v5 = vmul.f32 %v10891_v7, %v10876_v20  ;;  %v6509_v31 = vadd.f32 %v6477_v3, %v11313_v42 }
 0xa5c   : > { %6526 = vst.msk [vmem:[%s10919_s18 + $0x50] sm:$0xff] %vm2232_vm12, %v6494_v0  ;;  %v6482_v13 = vmul.f32 %v10891_v7, %v10880_v23  ;;  %v6510_v37 = vadd.f32 %v6478_v59, %v11314_v16  ;;  %v6483_v20 = vmul.f32 %v10891_v7, %v10886_v6  ;;  %v6511_v36 = vadd.f32 %v6479_v11, %v11315_v33  ;;  %v11316_v23 = vld [vmem:[#allocation61_spill] sm:$0xff] }
 0xa5d   : > { %6527 = vst.msk [vmem:[%s10919_s18 + $0x58] sm:$0xff] %vm2232_vm12, %v6495_v17  ;;  %v6512_v2 = vadd.f32 %v6480_v1, %v11316_v23  ;;  %v6513_v9 = vadd.f32 %v6481_v5, %v11317_v62  ;;  %v11319_v7 = vld [vmem:[#allocation65_spill] sm:$0xff] }
 0xa5e   : > { %6528 = vst.msk [vmem:[%s10919_s18 + $0x60] sm:$0xff] %vm2232_vm12, %v6496_v40  ;;  %v6514_v6 = vadd.f32 %v6482_v13, %v11318_v4  ;;  %v6515_v52 = vadd.f32 %v6483_v20, %v11319_v7 }
 0xa5f   : > { %6529 = vst.msk [vmem:[%s10919_s18 + $0x68] sm:$0xff] %vm2232_vm12, %v6497_v15 }
 0xa60   : > { %6530 = vst.msk [vmem:[%s10919_s18 + $0x70] sm:$0xff] %vm2232_vm12, %v6498_v38 }
 0xa61   : > { %6531 = vst.msk [vmem:[%s10919_s18 + $0x78] sm:$0xff] %vm2232_vm12, %v6499_v48 }
 0xa62   : > { %6532 = vst.msk [vmem:[%s10919_s18 + $0x80] sm:$0xff] %vm2232_vm12, %v6500_v49 }
 0xa63   : > { %6533 = vst.msk [vmem:[%s10919_s18 + $0x88] sm:$0xff] %vm2232_vm12, %v6501_v12 }
 0xa64   : > { %6534 = vst.msk [vmem:[%s10919_s18 + $0x90] sm:$0xff] %vm2232_vm12, %v6502_v30 }
 0xa65   : > { %6535 = vst.msk [vmem:[%s10919_s18 + $0x98] sm:$0xff] %vm2232_vm12, %v6503_v29 }
 0xa66   : > { %6536 = vst.msk [vmem:[%s10919_s18 + $0xa0] sm:$0xff] %vm2232_vm12, %v6504_v24 }
 0xa67   : > { %6537 = vst.msk [vmem:[%s10919_s18 + $0xa8] sm:$0xff] %vm2232_vm12, %v6505_v32 }
 0xa68   : > { %6538 = vst.msk [vmem:[%s10919_s18 + $0xb0] sm:$0xff] %vm2232_vm12, %v6506_v47 }
 0xa69   : > { %6539 = vst.msk [vmem:[%s10919_s18 + $0xb8] sm:$0xff] %vm2232_vm12, %v6507_v46 }
 0xa6a   : > { %6540 = vst.msk [vmem:[%s10919_s18 + $0xc0] sm:$0xff] %vm2232_vm12, %v6508_v21 }
 0xa6b   : > { %6541 = vst.msk [vmem:[%s10919_s18 + $0xc8] sm:$0xff] %vm2232_vm12, %v6509_v31 }
 0xa6c   : > { %6542 = vst.msk [vmem:[%s10919_s18 + $0xd0] sm:$0xff] %vm2232_vm12, %v6510_v37 }
 0xa6d   : > { %6543 = vst.msk [vmem:[%s10919_s18 + $0xd8] sm:$0xff] %vm2232_vm12, %v6511_v36 }
 0xa6e   : > { %6544 = vst.msk [vmem:[%s10919_s18 + $0xe0] sm:$0xff] %vm2232_vm12, %v6512_v2 }
 0xa6f   : > { %6545 = vst.msk [vmem:[%s10919_s18 + $0xe8] sm:$0xff] %vm2232_vm12, %v6513_v9 }
 0xa70   : > { %6546 = vst.msk [vmem:[%s10919_s18 + $0xf0] sm:$0xff] %vm2232_vm12, %v6514_v6 }
 0xa71   : > { %6547 = vst.msk [vmem:[%s10919_s18 + $0xf8] sm:$0xff] %vm2232_vm12, %v6515_v52 }
 0xa72   : > { %6852 = shalt.err (!%p6849_p3)
}
 0xa73   : > { %s6901_s16 = smov 128   ;;  %s6902_s18 = smov 8  }
 0xa74   : > { %6764 = dma.vmem_to_hbm [thread:$0]  (%p6984_p5), %s6562_s21, 4096, %s6564_s22, %s6549_s24, %s6901_s16, %s6901_s16, %s6902_s18  }
 0xa75 PF: > { %p6770_p4 = scmp.ge.s32.totalorder %s6887_s29, 2  ;;  %s6578_s20 = sand.u32 1, %s6875_s26  }
 0xa76   : > { %s6579_s0 = scalar_lea.sflag [#allocation8], %s6578_s20 }
 0xa77   : > { %p6767_p7 = pnand %p6770_p4, %p6988_p6 }
 0xa79   : > { %p6768_p8 = pneg %p6767_p7 }
 0xa7b   : > { %6870 = dma.done.wait (%p6768_p8), %s6579_s0, 4096  }
 0xa7c   : > { %6872 = vsyncadd (%p6768_p8), %s6579_s0, 4294963200  ;;  %p18_p9 = scmp.ge.s32.totalorder %s6971_s8, 4   ;;  %s11320_s26 = smov %s6879_s27 }
 0xa7d   : > { %s11321_s27 = smov %s6883_s28  ;;  %s11322_s28 = smov %s6982_s11 }
 0xa7e   : > { %s11323_s29 = smov %s6971_s8  ;;  %20 = sbr.rel (!%p18_p9) target bundleno = 5 (0x5), region = 83 }
 0xa83   :  { %6585 = vsyncpa [#allocation8], 1 }
 0xa84   :  { %6587 = vsyncpa [#allocation8 + $0x1], 1 }

</bundles_post_ra>
